<compile_context>
chip_gen: v7x
topology: tpu7x:2x2x1
jax: 0.10.0
libtpu: 0.0.40
codegen_flags: <defaults>
</compile_context>

<pallas_src>
import collections
import functools

import jax
import jax.numpy as jnp
from jax.experimental import pallas as pl
from jax.experimental.pallas import tpu as pltpu


_LANE = 128  # every layer's per-tap Cout is padded to a full lane group

LayerCfg = collections.namedtuple("LayerCfg", "K s p Ho Wo cout cp")


# ----------------------------------------------------------------------------
# In-kernel helpers
# ----------------------------------------------------------------------------
def _tap_shifts(K, s, p):
    """Per-tap (phase residue r, phase-row shift d) along one spatial axis."""
    out = []
    for k in range(K):
        r = (k - p) % s
        d = (k - p - r) // s
        out.append((r, d))
    return out


def _pad_hw(x, pb, pa):
    """Zero-pad a (B, H, W, C) value spatially (concat-based; lowers cleanly)."""
    if pb == 0 and pa == 0:
        return x
    B, H, W, C = x.shape
    parts = []
    if pb:
        parts.append(jnp.zeros((B, pb, W, C), x.dtype))
    parts.append(x)
    if pa:
        parts.append(jnp.zeros((B, pa, W, C), x.dtype))
    x = jnp.concatenate(parts, axis=1) if len(parts) > 1 else x
    Hp = x.shape[1]
    parts = []
    if pb:
        parts.append(jnp.zeros((B, Hp, pb, C), x.dtype))
    parts.append(x)
    if pa:
        parts.append(jnp.zeros((B, Hp, pa, C), x.dtype))
    return jnp.concatenate(parts, axis=2) if len(parts) > 1 else x


def _deconv_fused(x, w_ref, b_ref, cfg):
    """PyTorch ConvTranspose2d on an NHWC value with ONE fused wide-N matmul.

    x     : (Bt, H, W, Cin) f32 value
    w_ref : (Cin, K*K*cp) bf16 ref, tap-major along N, tap Cout padded to cp
    b_ref : (1, cp) f32 ref
    out   : (Bt, Ho, Wo, cp) f32 value (padded channels are exactly zero)

    Subpixel decomposition: tap (kh, kw) sends x[ih, iw] @ w[kh, kw] to output
    (s*ih - p + kh, s*iw - p + kw).  The input is zero-padded by <=1 row/col so
    each tap's shifted contribution to its phase image is a static window of
    the single fused matmul result; phases are interleaved with concat+reshape
    and bias is added once at the end.
    """
    K, s, p, Ho, Wo, cout, cp = cfg
    Bt, H, W, Cin = x.shape
    rd = _tap_shifts(K, s, p)
    pb = max(0, max(d for _, d in rd))   # shifts here are only in {-1, 0, +1}
    pa = max(0, -min(d for _, d in rd))

    xb = _pad_hw(x.astype(jnp.bfloat16), pb, pa)
    Hp, Wp = H + pb + pa, W + pb + pa

    # One wide matmul per layer: all K*K taps for all (padded) pixels.
    z = jnp.dot(xb.reshape(Bt * Hp * Wp, Cin), w_ref[...],
                preferred_element_type=jnp.float32)
    z = z.reshape(Bt, Hp, Wp, K * K * cp)

    # Shift-accumulate each tap into its (rh, rw) phase image via static
    # window slices (the spatial pad supplies the zero fill).
    phases = [[None for _ in range(s)] for _ in range(s)]
    for kh in range(K):
        rh, dh = rd[kh]
        hs = pb - dh
        for kw in range(K):
            rw, dw = rd[kw]
            ws = pb - dw
            t = kh * K + kw
            zt = z[:, hs:hs + H, ws:ws + W, t * cp:(t + 1) * cp]
            phases[rh][rw] = zt if phases[rh][rw] is None else phases[rh][rw] + zt
    for rh in range(s):
        for rw in range(s):
            if phases[rh][rw] is None:           # never triggers for these configs
                phases[rh][rw] = jnp.zeros((Bt, H, W, cp), jnp.float32)

    if s == 1:
        full = phases[0][0]
    else:
        # Interleave column phases on the lane axis then fold into W, then the
        # row phases along W folded into H (row-major reshape == interleave).
        rows = [jnp.concatenate(phases[rh], axis=-1).reshape(Bt, H, W * s, cp)
                for rh in range(s)]
        full = jnp.concatenate(rows, axis=2).reshape(Bt, H * s, W * s, cp)

    # Bias added exactly once, after the crop (padded lanes have zero bias).
    return full[:, :Ho, :Wo, :] + b_ref[...].reshape(1, 1, 1, cp)


def _decoder_kernel(l1_ref, l2_ref, l3_ref, l4_ref,
                    w4_ref, b4_ref, w3_ref, b3_ref,
                    w2_ref, b2_ref, w1_ref, b1_ref,
                    o_ref, *, cfgs):
    c4, c3, c2, c1 = cfgs
    d4 = _deconv_fused(l4_ref[...], w4_ref, b4_ref, c4)
    x3 = jnp.concatenate([d4[..., :c4.cout], l3_ref[...]], axis=-1)
    d3 = _deconv_fused(x3, w3_ref, b3_ref, c3)
    x2 = jnp.concatenate([d3[..., :c3.cout], l2_ref[...]], axis=-1)
    d2 = _deconv_fused(x2, w2_ref, b2_ref, c2)
    x1 = jnp.concatenate([d2[..., :c2.cout], l1_ref[...]], axis=-1)
    d1 = _deconv_fused(x1, w1_ref, b1_ref, c1)     # (bt, Ho, Wo, 128) lane-dense
    o_ref[...] = d1


# ----------------------------------------------------------------------------
# Host-side glue
# ----------------------------------------------------------------------------
def _prep_weight_fused(w, cp):
    """(Cin, Cout, K, K) torch layout -> (Cin, K*K*cp) bf16, tap-major N."""
    Cin, Cout, K, _ = w.shape
    wt = jnp.transpose(w, (0, 2, 3, 1))              # (Cin, K, K, Cout)
    if cp > Cout:
        wt = jnp.pad(wt, ((0, 0), (0, 0), (0, 0), (0, cp - Cout)))
    return wt.reshape(Cin, K * K * cp).astype(jnp.bfloat16)


def _prep_bias(b, cp):
    bb = b.astype(jnp.float32)
    if cp > bb.shape[0]:
        bb = jnp.pad(bb, (0, cp - bb.shape[0]))
    return bb.reshape(1, cp)


def prepare_decoder_params(params):
    """One-time weight prep, hoisted out of the per-forward jit."""
    w4, b4 = params["deconv4"]
    w3, b3 = params["deconv3"]
    w2, b2 = params["deconv2"]
    w1, b1 = params["deconv1"]
    return {
        "w4": _prep_weight_fused(w4, _LANE), "b4": _prep_bias(b4, _LANE),
        "w3": _prep_weight_fused(w3, _LANE), "b3": _prep_bias(b3, _LANE),
        "w2": _prep_weight_fused(w2, _LANE), "b2": _prep_bias(b2, _LANE),
        "w1": _prep_weight_fused(w1, _LANE), "b1": _prep_bias(b1, _LANE),
    }


def _deconv_out_hw(h, w, K, s, p, op):
    return (h - 1) * s - 2 * p + K + op, (w - 1) * s - 2 * p + K + op


@functools.partial(jax.jit, static_argnames=("b_tile",))
def cnn_decoder_forward(prepared, l1, l2, l3, l4, *, b_tile=4):
    B, _, H4, W4 = l4.shape
    Ho4, Wo4 = _deconv_out_hw(H4, W4, 2, 2, 0, 0)     # deconvLayer4
    Ho3, Wo3 = _deconv_out_hw(Ho4, Wo4, 2, 2, 1, 1)   # deconvLayer3
    Ho2, Wo2 = _deconv_out_hw(Ho3, Wo3, 3, 2, 1, 1)   # deconvLayer2
    Ho1, Wo1 = _deconv_out_hw(Ho2, Wo2, 3, 1, 1, 0)   # deconvLayer1
    assert l3.shape[2:] == (Ho4, Wo4)
    assert l2.shape[2:] == (Ho3, Wo3)
    assert l1.shape[2:] == (Ho2, Wo2)

    cfgs = (LayerCfg(2, 2, 0, Ho4, Wo4, 128, _LANE),
            LayerCfg(2, 2, 1, Ho3, Wo3, 64, _LANE),
            LayerCfg(3, 2, 1, Ho2, Wo2, 32, _LANE),
            LayerCfg(3, 1, 1, Ho1, Wo1, 3, _LANE))

    # Batch-block the grid (M per matmul = bt*H*W) while keeping >=2 grid
    # steps whenever B >= 2 so ("parallel",) can use both v7x TensorCores.
    bt = max(1, min(b_tile, pl.cdiv(B, 2))) if B >= 2 else 1
    n_steps = pl.cdiv(B, bt)
    Bp = n_steps * bt

    nhwc = lambda t: jnp.transpose(t, (0, 2, 3, 1))   # channels -> lane axis
    acts = [nhwc(l1), nhwc(l2), nhwc(l3), nhwc(l4)]
    if Bp > B:
        acts = [jnp.pad(a, ((0, Bp - B), (0, 0), (0, 0), (0, 0))) for a in acts]

    args = (acts[0], acts[1], acts[2], acts[3],
            prepared["w4"], prepared["b4"], prepared["w3"], prepared["b3"],
            prepared["w2"], prepared["b2"], prepared["w1"], prepared["b1"])

    def act_spec(a):     # one B_TILE slab per grid step
        return pl.BlockSpec((bt,) + tuple(a.shape[1:]), lambda b: (b, 0, 0, 0))

    def const_spec(a):   # grid-invariant weights / biases: no re-fetch
        return pl.BlockSpec(tuple(a.shape), lambda b: (0, 0))

    in_specs = [act_spec(a) for a in args[:4]] + [const_spec(a) for a in args[4:]]

    out = pl.pallas_call(
        functools.partial(_decoder_kernel, cfgs=cfgs),
        grid=(n_steps,),
        in_specs=in_specs,
        out_specs=pl.BlockSpec((bt, Ho1, Wo1, _LANE), lambda b: (b, 0, 0, 0)),
        out_shape=jax.ShapeDtypeStruct((Bp, Ho1, Wo1, _LANE), jnp.float32),
        compiler_params=pltpu.CompilerParams(
            dimension_semantics=("parallel",),
            vmem_limit_bytes=48 * 1024 * 1024),
    )(*args)

    # Lane-dense padded output -> (B, 3, Ho, Wo) NCHW, once.
    return jnp.transpose(out[:B, :, :, :3], (0, 3, 1, 2))


# ----------------------------------------------------------------------------
# Pure-JAX reference (torch ConvTranspose2d semantics) for a tolerance check
# ----------------------------------------------------------------------------
def _conv_transpose_ref(x, w, b, s, p, op):
    K = w.shape[-1]
    w_flip = jnp.transpose(jnp.flip(w, axis=(2, 3)), (1, 0, 2, 3))  # (Cout,Cin,K,K)
    pad = (K - 1 - p, K - 1 - p + op)
    y = jax.lax.conv_general_dilated(
        x.astype(jnp.bfloat16), w_flip.astype(jnp.bfloat16),
        window_strides=(1, 1), padding=(pad, pad), lhs_dilation=(s, s),
        dimension_numbers=("NCHW", "OIHW", "NCHW"),
        preferred_element_type=jnp.float32)
    return y + b.reshape(1, -1, 1, 1).astype(jnp.float32)


def decoder_reference(params, l1, l2, l3, l4):
    w4, b4 = params["deconv4"]
    w3, b3 = params["deconv3"]
    w2, b2 = params["deconv2"]
    w1, b1 = params["deconv1"]
    d4 = _conv_transpose_ref(l4, w4, b4, 2, 0, 0)
    d3 = _conv_transpose_ref(jnp.concatenate([d4, l3], axis=1), w3, b3, 2, 1, 1)
    d2 = _conv_transpose_ref(jnp.concatenate([d3, l2], axis=1), w2, b2, 2, 1, 1)
    d1 = _conv_transpose_ref(jnp.concatenate([d2, l1], axis=1), w1, b1, 1, 1, 0)
    return d1


# ----------------------------------------------------------------------------
# Parameters + demo
# ----------------------------------------------------------------------------
def init_params(key):
    def make(k, cin, cout, ksz):
        kw_, kb_ = jax.random.split(k)
        bound = 1.0 / jnp.sqrt(cin * ksz * ksz)
        w = jax.random.uniform(kw_, (cin, cout, ksz, ksz), jnp.float32,
                               -bound, bound)
        b = jax.random.uniform(kb_, (cout,), jnp.float32, -bound, bound)
        return w, b

    k4, k3, k2, k1 = jax.random.split(key, 4)
    return {
        "deconv4": make(k4, 256, 128, 2),  # k=2, s=2, p=0
        "deconv3": make(k3, 256, 64, 2),   # k=2, s=2, p=1, op=1
        "deconv2": make(k2, 128, 32, 3),   # k=3, s=2, p=1, op=1
        "deconv1": make(k1, 64, 3, 3),     # k=3, s=1, p=1
    }


if __name__ == "__main__":
    key = jax.random.PRNGKey(0)
    kp, k1, k2, k3, k4 = jax.random.split(key, 5)
    params = init_params(kp)
    prepared = prepare_decoder_params(params)    # one-time weight prep (hoisted)

    B = 4
    # MSCRED-style pyramid (shrunk): 14 -> 7 -> 4 -> 2 so the concats line up.
    conv_lstm_layer1 = jax.random.normal(k1, (B, 32, 14, 14), jnp.float32)
    conv_lstm_layer2 = jax.random.normal(k2, (B, 64, 7, 7), jnp.float32)
    conv_lstm_layer3 = jax.random.normal(k3, (B, 128, 4, 4), jnp.float32)
    conv_lstm_layer4 = jax.random.normal(k4, (B, 256, 2, 2), jnp.float32)

    out = cnn_decoder_forward(prepared, conv_lstm_layer1, conv_lstm_layer2,
                              conv_lstm_layer3, conv_lstm_layer4)
    out = jax.block_until_ready(out)
    assert out.shape == (B, 3, 14, 14), out.shape
    assert out.dtype == jnp.float32

    ref = decoder_reference(params, conv_lstm_layer1, conv_lstm_layer2,
                            conv_lstm_layer3, conv_lstm_layer4)
    ref = jax.block_until_ready(ref)
    err = float(jnp.max(jnp.abs(out - ref)))
    assert err < 5e-2, f"max abs err vs bf16-matched reference: {err}"

    print("KERNEL_OK")
</pallas_src>

<mosaic_0001>
module attributes {stable_mosaic.version = 11 : i64} {
  func.func @_decoder_kernel(%arg0: i32, %arg1: memref<2x14x14x32xf32, #tpu.memory_space<vmem>>, %arg2: memref<2x7x7x64xf32, #tpu.memory_space<vmem>>, %arg3: memref<2x4x4x128xf32, #tpu.memory_space<vmem>>, %arg4: memref<2x2x2x256xf32, #tpu.memory_space<vmem>>, %arg5: memref<256x512xbf16, #tpu.memory_space<vmem>>, %arg6: memref<1x128xf32, #tpu.memory_space<vmem>>, %arg7: memref<256x512xbf16, #tpu.memory_space<vmem>>, %arg8: memref<1x128xf32, #tpu.memory_space<vmem>>, %arg9: memref<128x1152xbf16, #tpu.memory_space<vmem>>, %arg10: memref<1x128xf32, #tpu.memory_space<vmem>>, %arg11: memref<64x1152xbf16, #tpu.memory_space<vmem>>, %arg12: memref<1x128xf32, #tpu.memory_space<vmem>>, %arg13: memref<2x14x14x128xf32, #tpu.memory_space<vmem>>) attributes {dimension_semantics = [#tpu.dimension_semantics<parallel>], iteration_bounds = array<i64: 2>, scalar_prefetch = 0 : i64, scratch_operands = 0 : i64, tpu.core_type = #tpu.core_type<tc>, window_params = [{transform_indices = @transform_0, window_bounds = array<i64: 2, 14, 14, 32>}, {transform_indices = @transform_1, window_bounds = array<i64: 2, 7, 7, 64>}, {transform_indices = @transform_2, window_bounds = array<i64: 2, 4, 4, 128>}, {transform_indices = @transform_3, window_bounds = array<i64: 2, 2, 2, 256>}, {pipeline_mode = #tpu.pipeline_mode<synchronous>, transform_indices = @transform_4, window_bounds = array<i64: 256, 512>}, {pipeline_mode = #tpu.pipeline_mode<synchronous>, transform_indices = @transform_5, window_bounds = array<i64: 1, 128>}, {pipeline_mode = #tpu.pipeline_mode<synchronous>, transform_indices = @transform_6, window_bounds = array<i64: 256, 512>}, {pipeline_mode = #tpu.pipeline_mode<synchronous>, transform_indices = @transform_7, window_bounds = array<i64: 1, 128>}, {pipeline_mode = #tpu.pipeline_mode<synchronous>, transform_indices = @transform_8, window_bounds = array<i64: 128, 1152>}, {pipeline_mode = #tpu.pipeline_mode<synchronous>, transform_indices = @transform_9, window_bounds = array<i64: 1, 128>}, {pipeline_mode = #tpu.pipeline_mode<synchronous>, transform_indices = @transform_10, window_bounds = array<i64: 64, 1152>}, {pipeline_mode = #tpu.pipeline_mode<synchronous>, transform_indices = @transform_11, window_bounds = array<i64: 1, 128>}, {transform_indices = @transform_12, window_bounds = array<i64: 2, 14, 14, 128>}]} {
    %c0 = arith.constant 0 : index
    %c0_0 = arith.constant 0 : index
    %c0_1 = arith.constant 0 : index
    %c0_2 = arith.constant 0 : index
    %0 = vector.load %arg4[%c0, %c0_0, %c0_1, %c0_2] : memref<2x2x2x256xf32, #tpu.memory_space<vmem>>, vector<2x2x2x256xf32>
    %1 = arith.truncf %0 : vector<2x2x2x256xf32> to vector<2x2x2x256xbf16>
    %2 = vector.shape_cast %1 : vector<2x2x2x256xbf16> to vector<8x256xbf16>
    %c0_3 = arith.constant 0 : index
    %c0_4 = arith.constant 0 : index
    %3 = vector.load %arg5[%c0_3, %c0_4] : memref<256x512xbf16, #tpu.memory_space<vmem>>, vector<256x512xbf16>
    %cst = arith.constant dense<0.000000e+00> : vector<8x512xf32>
    %4 = tpu.matmul %2, %3, %cst {dimension_numbers = #tpu.dot_dimension_numbers<[1], [0], [0], [1], [0, 0, 1, 1], [], []>} : vector<8x256xbf16>, vector<256x512xbf16>, vector<8x512xf32> -> vector<8x512xf32>
    %5 = vector.shape_cast %4 : vector<8x512xf32> to vector<2x2x2x512xf32>
    %6 = vector.extract_strided_slice %5 {offsets = [0, 0, 0, 0], sizes = [2, 2, 2, 128], strides = [1, 1, 1, 1]} : vector<2x2x2x512xf32> to vector<2x2x2x128xf32>
    %7 = vector.extract_strided_slice %5 {offsets = [0, 0, 0, 128], sizes = [2, 2, 2, 128], strides = [1, 1, 1, 1]} : vector<2x2x2x512xf32> to vector<2x2x2x128xf32>
    %8 = vector.extract_strided_slice %5 {offsets = [0, 0, 0, 256], sizes = [2, 2, 2, 128], strides = [1, 1, 1, 1]} : vector<2x2x2x512xf32> to vector<2x2x2x128xf32>
    %9 = vector.extract_strided_slice %5 {offsets = [0, 0, 0, 384], sizes = [2, 2, 2, 128], strides = [1, 1, 1, 1]} : vector<2x2x2x512xf32> to vector<2x2x2x128xf32>
    %10 = tpu.concatenate %6, %7 in 3 : vector<2x2x2x128xf32>, vector<2x2x2x128xf32> -> vector<2x2x2x256xf32>
    %11 = vector.shape_cast %10 : vector<2x2x2x256xf32> to vector<2x2x4x128xf32>
    %12 = tpu.concatenate %8, %9 in 3 : vector<2x2x2x128xf32>, vector<2x2x2x128xf32> -> vector<2x2x2x256xf32>
    %13 = vector.shape_cast %12 : vector<2x2x2x256xf32> to vector<2x2x4x128xf32>
    %14 = tpu.concatenate %11, %13 in 2 : vector<2x2x4x128xf32>, vector<2x2x4x128xf32> -> vector<2x2x8x128xf32>
    %15 = vector.shape_cast %14 : vector<2x2x8x128xf32> to vector<2x4x4x128xf32>
    %c0_5 = arith.constant 0 : index
    %c0_6 = arith.constant 0 : index
    %16 = vector.load %arg6[%c0_5, %c0_6] : memref<1x128xf32, #tpu.memory_space<vmem>>, vector<1x128xf32>
    %17 = vector.shape_cast %16 : vector<1x128xf32> to vector<1x1x1x128xf32>
    %18 = vector.broadcast %17 : vector<1x1x1x128xf32> to vector<2x4x4x128xf32>
    %19 = arith.addf %15, %18 : vector<2x4x4x128xf32>
    %c0_7 = arith.constant 0 : index
    %c0_8 = arith.constant 0 : index
    %c0_9 = arith.constant 0 : index
    %c0_10 = arith.constant 0 : index
    %20 = vector.load %arg3[%c0_7, %c0_8, %c0_9, %c0_10] : memref<2x4x4x128xf32, #tpu.memory_space<vmem>>, vector<2x4x4x128xf32>
    %21 = tpu.concatenate %19, %20 in 3 : vector<2x4x4x128xf32>, vector<2x4x4x128xf32> -> vector<2x4x4x256xf32>
    %22 = arith.truncf %21 : vector<2x4x4x256xf32> to vector<2x4x4x256xbf16>
    %cst_11 = arith.constant 0.000000e+00 : bf16
    %23 = vector.broadcast %cst_11 : bf16 to vector<2x1x4x256xbf16>
    %24 = tpu.concatenate %22, %23 in 1 : vector<2x4x4x256xbf16>, vector<2x1x4x256xbf16> -> vector<2x5x4x256xbf16>
    %cst_12 = arith.constant 0.000000e+00 : bf16
    %25 = vector.broadcast %cst_12 : bf16 to vector<2x5x1x256xbf16>
    %26 = tpu.concatenate %24, %25 in 2 : vector<2x5x4x256xbf16>, vector<2x5x1x256xbf16> -> vector<2x5x5x256xbf16>
    %27 = vector.shape_cast %26 : vector<2x5x5x256xbf16> to vector<50x256xbf16>
    %c0_13 = arith.constant 0 : index
    %c0_14 = arith.constant 0 : index
    %28 = vector.load %arg7[%c0_13, %c0_14] : memref<256x512xbf16, #tpu.memory_space<vmem>>, vector<256x512xbf16>
    %cst_15 = arith.constant dense<0.000000e+00> : vector<50x512xf32>
    %29 = tpu.matmul %27, %28, %cst_15 {dimension_numbers = #tpu.dot_dimension_numbers<[1], [0], [0], [1], [0, 0, 1, 1], [], []>} : vector<50x256xbf16>, vector<256x512xbf16>, vector<50x512xf32> -> vector<50x512xf32>
    %30 = vector.shape_cast %29 : vector<50x512xf32> to vector<2x5x5x512xf32>
    %31 = vector.extract_strided_slice %30 {offsets = [0, 1, 1, 0], sizes = [2, 4, 4, 128], strides = [1, 1, 1, 1]} : vector<2x5x5x512xf32> to vector<2x4x4x128xf32>
    %32 = vector.extract_strided_slice %30 {offsets = [0, 1, 0, 128], sizes = [2, 4, 4, 128], strides = [1, 1, 1, 1]} : vector<2x5x5x512xf32> to vector<2x4x4x128xf32>
    %33 = vector.extract_strided_slice %30 {offsets = [0, 0, 1, 256], sizes = [2, 4, 4, 128], strides = [1, 1, 1, 1]} : vector<2x5x5x512xf32> to vector<2x4x4x128xf32>
    %34 = vector.extract_strided_slice %30 {offsets = [0, 0, 0, 384], sizes = [2, 4, 4, 128], strides = [1, 1, 1, 1]} : vector<2x5x5x512xf32> to vector<2x4x4x128xf32>
    %35 = tpu.concatenate %34, %33 in 3 : vector<2x4x4x128xf32>, vector<2x4x4x128xf32> -> vector<2x4x4x256xf32>
    %36 = vector.shape_cast %35 : vector<2x4x4x256xf32> to vector<2x4x8x128xf32>
    %37 = tpu.concatenate %32, %31 in 3 : vector<2x4x4x128xf32>, vector<2x4x4x128xf32> -> vector<2x4x4x256xf32>
    %38 = vector.shape_cast %37 : vector<2x4x4x256xf32> to vector<2x4x8x128xf32>
    %39 = tpu.concatenate %36, %38 in 2 : vector<2x4x8x128xf32>, vector<2x4x8x128xf32> -> vector<2x4x16x128xf32>
    %40 = vector.shape_cast %39 : vector<2x4x16x128xf32> to vector<2x8x8x128xf32>
    %41 = vector.extract_strided_slice %40 {offsets = [0, 0, 0, 0], sizes = [2, 7, 7, 128], strides = [1, 1, 1, 1]} : vector<2x8x8x128xf32> to vector<2x7x7x128xf32>
    %c0_16 = arith.constant 0 : index
    %c0_17 = arith.constant 0 : index
    %42 = vector.load %arg8[%c0_16, %c0_17] : memref<1x128xf32, #tpu.memory_space<vmem>>, vector<1x128xf32>
    %43 = vector.shape_cast %42 : vector<1x128xf32> to vector<1x1x1x128xf32>
    %44 = vector.broadcast %43 : vector<1x1x1x128xf32> to vector<2x7x7x128xf32>
    %45 = arith.addf %41, %44 : vector<2x7x7x128xf32>
    %46 = vector.extract_strided_slice %45 {offsets = [0, 0, 0, 0], sizes = [2, 7, 7, 64], strides = [1, 1, 1, 1]} : vector<2x7x7x128xf32> to vector<2x7x7x64xf32>
    %c0_18 = arith.constant 0 : index
    %c0_19 = arith.constant 0 : index
    %c0_20 = arith.constant 0 : index
    %c0_21 = arith.constant 0 : index
    %47 = vector.load %arg2[%c0_18, %c0_19, %c0_20, %c0_21] : memref<2x7x7x64xf32, #tpu.memory_space<vmem>>, vector<2x7x7x64xf32>
    %48 = tpu.concatenate %46, %47 in 3 : vector<2x7x7x64xf32>, vector<2x7x7x64xf32> -> vector<2x7x7x128xf32>
    %49 = arith.truncf %48 : vector<2x7x7x128xf32> to vector<2x7x7x128xbf16>
    %cst_22 = arith.constant 0.000000e+00 : bf16
    %50 = vector.broadcast %cst_22 : bf16 to vector<2x1x7x128xbf16>
    %51 = tpu.concatenate %49, %50 in 1 : vector<2x7x7x128xbf16>, vector<2x1x7x128xbf16> -> vector<2x8x7x128xbf16>
    %cst_23 = arith.constant 0.000000e+00 : bf16
    %52 = vector.broadcast %cst_23 : bf16 to vector<2x8x1x128xbf16>
    %53 = tpu.concatenate %51, %52 in 2 : vector<2x8x7x128xbf16>, vector<2x8x1x128xbf16> -> vector<2x8x8x128xbf16>
    %54 = vector.shape_cast %53 : vector<2x8x8x128xbf16> to vector<128x128xbf16>
    %c0_24 = arith.constant 0 : index
    %c0_25 = arith.constant 0 : index
    %55 = vector.load %arg9[%c0_24, %c0_25] : memref<128x1152xbf16, #tpu.memory_space<vmem>>, vector<128x1152xbf16>
    %cst_26 = arith.constant dense<0.000000e+00> : vector<128x1152xf32>
    %56 = tpu.matmul %54, %55, %cst_26 {dimension_numbers = #tpu.dot_dimension_numbers<[1], [0], [0], [1], [0, 0, 1, 1], [], []>} : vector<128x128xbf16>, vector<128x1152xbf16>, vector<128x1152xf32> -> vector<128x1152xf32>
    %57 = vector.shape_cast %56 : vector<128x1152xf32> to vector<2x8x8x1152xf32>
    %58 = vector.extract_strided_slice %57 {offsets = [0, 1, 1, 0], sizes = [2, 7, 7, 128], strides = [1, 1, 1, 1]} : vector<2x8x8x1152xf32> to vector<2x7x7x128xf32>
    %59 = vector.extract_strided_slice %57 {offsets = [0, 1, 0, 128], sizes = [2, 7, 7, 128], strides = [1, 1, 1, 1]} : vector<2x8x8x1152xf32> to vector<2x7x7x128xf32>
    %60 = vector.extract_strided_slice %57 {offsets = [0, 1, 0, 256], sizes = [2, 7, 7, 128], strides = [1, 1, 1, 1]} : vector<2x8x8x1152xf32> to vector<2x7x7x128xf32>
    %61 = arith.addf %58, %60 : vector<2x7x7x128xf32>
    %62 = vector.extract_strided_slice %57 {offsets = [0, 0, 1, 384], sizes = [2, 7, 7, 128], strides = [1, 1, 1, 1]} : vector<2x8x8x1152xf32> to vector<2x7x7x128xf32>
    %63 = vector.extract_strided_slice %57 {offsets = [0, 0, 0, 512], sizes = [2, 7, 7, 128], strides = [1, 1, 1, 1]} : vector<2x8x8x1152xf32> to vector<2x7x7x128xf32>
    %64 = vector.extract_strided_slice %57 {offsets = [0, 0, 0, 640], sizes = [2, 7, 7, 128], strides = [1, 1, 1, 1]} : vector<2x8x8x1152xf32> to vector<2x7x7x128xf32>
    %65 = arith.addf %62, %64 : vector<2x7x7x128xf32>
    %66 = vector.extract_strided_slice %57 {offsets = [0, 0, 1, 768], sizes = [2, 7, 7, 128], strides = [1, 1, 1, 1]} : vector<2x8x8x1152xf32> to vector<2x7x7x128xf32>
    %67 = arith.addf %61, %66 : vector<2x7x7x128xf32>
    %68 = vector.extract_strided_slice %57 {offsets = [0, 0, 0, 896], sizes = [2, 7, 7, 128], strides = [1, 1, 1, 1]} : vector<2x8x8x1152xf32> to vector<2x7x7x128xf32>
    %69 = arith.addf %59, %68 : vector<2x7x7x128xf32>
    %70 = vector.extract_strided_slice %57 {offsets = [0, 0, 0, 1024], sizes = [2, 7, 7, 128], strides = [1, 1, 1, 1]} : vector<2x8x8x1152xf32> to vector<2x7x7x128xf32>
    %71 = arith.addf %67, %70 : vector<2x7x7x128xf32>
    %72 = tpu.concatenate %63, %65 in 3 : vector<2x7x7x128xf32>, vector<2x7x7x128xf32> -> vector<2x7x7x256xf32>
    %73 = vector.shape_cast %72 : vector<2x7x7x256xf32> to vector<2x7x14x128xf32>
    %74 = tpu.concatenate %69, %71 in 3 : vector<2x7x7x128xf32>, vector<2x7x7x128xf32> -> vector<2x7x7x256xf32>
    %75 = vector.shape_cast %74 : vector<2x7x7x256xf32> to vector<2x7x14x128xf32>
    %76 = tpu.concatenate %73, %75 in 2 : vector<2x7x14x128xf32>, vector<2x7x14x128xf32> -> vector<2x7x28x128xf32>
    %77 = vector.shape_cast %76 : vector<2x7x28x128xf32> to vector<2x14x14x128xf32>
    %c0_27 = arith.constant 0 : index
    %c0_28 = arith.constant 0 : index
    %78 = vector.load %arg10[%c0_27, %c0_28] : memref<1x128xf32, #tpu.memory_space<vmem>>, vector<1x128xf32>
    %79 = vector.shape_cast %78 : vector<1x128xf32> to vector<1x1x1x128xf32>
    %80 = vector.broadcast %79 : vector<1x1x1x128xf32> to vector<2x14x14x128xf32>
    %81 = arith.addf %77, %80 : vector<2x14x14x128xf32>
    %82 = vector.extract_strided_slice %81 {offsets = [0, 0, 0, 0], sizes = [2, 14, 14, 32], strides = [1, 1, 1, 1]} : vector<2x14x14x128xf32> to vector<2x14x14x32xf32>
    %c0_29 = arith.constant 0 : index
    %c0_30 = arith.constant 0 : index
    %c0_31 = arith.constant 0 : index
    %c0_32 = arith.constant 0 : index
    %83 = vector.load %arg1[%c0_29, %c0_30, %c0_31, %c0_32] : memref<2x14x14x32xf32, #tpu.memory_space<vmem>>, vector<2x14x14x32xf32>
    %84 = tpu.concatenate %82, %83 in 3 : vector<2x14x14x32xf32>, vector<2x14x14x32xf32> -> vector<2x14x14x64xf32>
    %85 = arith.truncf %84 : vector<2x14x14x64xf32> to vector<2x14x14x64xbf16>
    %cst_33 = arith.constant 0.000000e+00 : bf16
    %86 = vector.broadcast %cst_33 : bf16 to vector<2x1x14x64xbf16>
    %cst_34 = arith.constant 0.000000e+00 : bf16
    %87 = vector.broadcast %cst_34 : bf16 to vector<2x1x14x64xbf16>
    %88 = tpu.concatenate %86, %85, %87 in 1 : vector<2x1x14x64xbf16>, vector<2x14x14x64xbf16>, vector<2x1x14x64xbf16> -> vector<2x16x14x64xbf16>
    %cst_35 = arith.constant 0.000000e+00 : bf16
    %89 = vector.broadcast %cst_35 : bf16 to vector<2x16x1x64xbf16>
    %cst_36 = arith.constant 0.000000e+00 : bf16
    %90 = vector.broadcast %cst_36 : bf16 to vector<2x16x1x64xbf16>
    %91 = tpu.concatenate %89, %88, %90 in 2 : vector<2x16x1x64xbf16>, vector<2x16x14x64xbf16>, vector<2x16x1x64xbf16> -> vector<2x16x16x64xbf16>
    %92 = vector.shape_cast %91 : vector<2x16x16x64xbf16> to vector<512x64xbf16>
    %c0_37 = arith.constant 0 : index
    %c0_38 = arith.constant 0 : index
    %93 = vector.load %arg11[%c0_37, %c0_38] : memref<64x1152xbf16, #tpu.memory_space<vmem>>, vector<64x1152xbf16>
    %cst_39 = arith.constant dense<0.000000e+00> : vector<512x1152xf32>
    %94 = tpu.matmul %92, %93, %cst_39 {dimension_numbers = #tpu.dot_dimension_numbers<[1], [0], [0], [1], [0, 0, 1, 1], [], []>} : vector<512x64xbf16>, vector<64x1152xbf16>, vector<512x1152xf32> -> vector<512x1152xf32>
    %95 = vector.shape_cast %94 : vector<512x1152xf32> to vector<2x16x16x1152xf32>
    %96 = vector.extract_strided_slice %95 {offsets = [0, 2, 2, 0], sizes = [2, 14, 14, 128], strides = [1, 1, 1, 1]} : vector<2x16x16x1152xf32> to vector<2x14x14x128xf32>
    %97 = vector.extract_strided_slice %95 {offsets = [0, 2, 1, 128], sizes = [2, 14, 14, 128], strides = [1, 1, 1, 1]} : vector<2x16x16x1152xf32> to vector<2x14x14x128xf32>
    %98 = arith.addf %96, %97 : vector<2x14x14x128xf32>
    %99 = vector.extract_strided_slice %95 {offsets = [0, 2, 0, 256], sizes = [2, 14, 14, 128], strides = [1, 1, 1, 1]} : vector<2x16x16x1152xf32> to vector<2x14x14x128xf32>
    %100 = arith.addf %98, %99 : vector<2x14x14x128xf32>
    %101 = vector.extract_strided_slice %95 {offsets = [0, 1, 2, 384], sizes = [2, 14, 14, 128], strides = [1, 1, 1, 1]} : vector<2x16x16x1152xf32> to vector<2x14x14x128xf32>
    %102 = arith.addf %100, %101 : vector<2x14x14x128xf32>
    %103 = vector.extract_strided_slice %95 {offsets = [0, 1, 1, 512], sizes = [2, 14, 14, 128], strides = [1, 1, 1, 1]} : vector<2x16x16x1152xf32> to vector<2x14x14x128xf32>
    %104 = arith.addf %102, %103 : vector<2x14x14x128xf32>
    %105 = vector.extract_strided_slice %95 {offsets = [0, 1, 0, 640], sizes = [2, 14, 14, 128], strides = [1, 1, 1, 1]} : vector<2x16x16x1152xf32> to vector<2x14x14x128xf32>
    %106 = arith.addf %104, %105 : vector<2x14x14x128xf32>
    %107 = vector.extract_strided_slice %95 {offsets = [0, 0, 2, 768], sizes = [2, 14, 14, 128], strides = [1, 1, 1, 1]} : vector<2x16x16x1152xf32> to vector<2x14x14x128xf32>
    %108 = arith.addf %106, %107 : vector<2x14x14x128xf32>
    %109 = vector.extract_strided_slice %95 {offsets = [0, 0, 1, 896], sizes = [2, 14, 14, 128], strides = [1, 1, 1, 1]} : vector<2x16x16x1152xf32> to vector<2x14x14x128xf32>
    %110 = arith.addf %108, %109 : vector<2x14x14x128xf32>
    %111 = vector.extract_strided_slice %95 {offsets = [0, 0, 0, 1024], sizes = [2, 14, 14, 128], strides = [1, 1, 1, 1]} : vector<2x16x16x1152xf32> to vector<2x14x14x128xf32>
    %112 = arith.addf %110, %111 : vector<2x14x14x128xf32>
    %c0_40 = arith.constant 0 : index
    %c0_41 = arith.constant 0 : index
    %113 = vector.load %arg12[%c0_40, %c0_41] : memref<1x128xf32, #tpu.memory_space<vmem>>, vector<1x128xf32>
    %114 = vector.shape_cast %113 : vector<1x128xf32> to vector<1x1x1x128xf32>
    %115 = vector.broadcast %114 : vector<1x1x1x128xf32> to vector<2x14x14x128xf32>
    %116 = arith.addf %112, %115 : vector<2x14x14x128xf32>
    %c0_42 = arith.constant 0 : index
    %c0_43 = arith.constant 0 : index
    %c0_44 = arith.constant 0 : index
    %c0_45 = arith.constant 0 : index
    %117 = vector.load %arg13[%c0_42, %c0_43, %c0_44, %c0_45] : memref<2x14x14x128xf32, #tpu.memory_space<vmem>>, vector<2x14x14x128xf32>
    tpu.vector_store %arg13[%c0_42, %c0_43, %c0_44, %c0_45], %116 {strides = array<i32>} : memref<2x14x14x128xf32, #tpu.memory_space<vmem>>, vector<2x14x14x128xf32>,
    return
  }
  func.func @transform_0(%arg0: i32) -> (i32, i32, i32, i32) {
    %c0_i32 = arith.constant 0 : i32
    %c0_i32_0 = arith.constant 0 : i32
    %c0_i32_1 = arith.constant 0 : i32
    %c0_i32_2 = arith.constant 0 : i32
    return %arg0, %c0_i32, %c0_i32_0, %c0_i32_1 : i32, i32, i32, i32
  }
  func.func @transform_1(%arg0: i32) -> (i32, i32, i32, i32) {
    %c0_i32 = arith.constant 0 : i32
    %c0_i32_0 = arith.constant 0 : i32
    %c0_i32_1 = arith.constant 0 : i32
    %c0_i32_2 = arith.constant 0 : i32
    return %arg0, %c0_i32, %c0_i32_0, %c0_i32_1 : i32, i32, i32, i32
  }
  func.func @transform_2(%arg0: i32) -> (i32, i32, i32, i32) {
    %c0_i32 = arith.constant 0 : i32
    %c0_i32_0 = arith.constant 0 : i32
    %c0_i32_1 = arith.constant 0 : i32
    %c0_i32_2 = arith.constant 0 : i32
    return %arg0, %c0_i32, %c0_i32_0, %c0_i32_1 : i32, i32, i32, i32
  }
  func.func @transform_3(%arg0: i32) -> (i32, i32, i32, i32) {
    %c0_i32 = arith.constant 0 : i32
    %c0_i32_0 = arith.constant 0 : i32
    %c0_i32_1 = arith.constant 0 : i32
    %c0_i32_2 = arith.constant 0 : i32
    return %arg0, %c0_i32, %c0_i32_0, %c0_i32_1 : i32, i32, i32, i32
  }
  func.func @transform_4(%arg0: i32) -> (i32, i32) {
    %c0_i32 = arith.constant 0 : i32
    %c0_i32_0 = arith.constant 0 : i32
    %c0_i32_1 = arith.constant 0 : i32
    return %c0_i32, %c0_i32_0 : i32, i32
  }
  func.func @transform_5(%arg0: i32) -> (i32, i32) {
    %c0_i32 = arith.constant 0 : i32
    %c0_i32_0 = arith.constant 0 : i32
    %c0_i32_1 = arith.constant 0 : i32
    return %c0_i32, %c0_i32_0 : i32, i32
  }
  func.func @transform_6(%arg0: i32) -> (i32, i32) {
    %c0_i32 = arith.constant 0 : i32
    %c0_i32_0 = arith.constant 0 : i32
    %c0_i32_1 = arith.constant 0 : i32
    return %c0_i32, %c0_i32_0 : i32, i32
  }
  func.func @transform_7(%arg0: i32) -> (i32, i32) {
    %c0_i32 = arith.constant 0 : i32
    %c0_i32_0 = arith.constant 0 : i32
    %c0_i32_1 = arith.constant 0 : i32
    return %c0_i32, %c0_i32_0 : i32, i32
  }
  func.func @transform_8(%arg0: i32) -> (i32, i32) {
    %c0_i32 = arith.constant 0 : i32
    %c0_i32_0 = arith.constant 0 : i32
    %c0_i32_1 = arith.constant 0 : i32
    return %c0_i32, %c0_i32_0 : i32, i32
  }
  func.func @transform_9(%arg0: i32) -> (i32, i32) {
    %c0_i32 = arith.constant 0 : i32
    %c0_i32_0 = arith.constant 0 : i32
    %c0_i32_1 = arith.constant 0 : i32
    return %c0_i32, %c0_i32_0 : i32, i32
  }
  func.func @transform_10(%arg0: i32) -> (i32, i32) {
    %c0_i32 = arith.constant 0 : i32
    %c0_i32_0 = arith.constant 0 : i32
    %c0_i32_1 = arith.constant 0 : i32
    return %c0_i32, %c0_i32_0 : i32, i32
  }
  func.func @transform_11(%arg0: i32) -> (i32, i32) {
    %c0_i32 = arith.constant 0 : i32
    %c0_i32_0 = arith.constant 0 : i32
    %c0_i32_1 = arith.constant 0 : i32
    return %c0_i32, %c0_i32_0 : i32, i32
  }
  func.func @transform_12(%arg0: i32) -> (i32, i32, i32, i32) {
    %c0_i32 = arith.constant 0 : i32
    %c0_i32_0 = arith.constant 0 : i32
    %c0_i32_1 = arith.constant 0 : i32
    %c0_i32_2 = arith.constant 0 : i32
    return %arg0, %c0_i32, %c0_i32_0, %c0_i32_1 : i32, i32, i32, i32
  }
}

</mosaic_0001>

<bundles_post_ra>
// kernel: cnn_decoder_forward.1
= control target key start
LH: loop header
LB: loop body
LE: loop exit
PB: predicated region body
PF: predicated region fallthrough
CT: control target
= control target key end

     0   :  { %s13564_s21 = smov 0   ;;  %s18292_s0 = inlined_call_operand.vmem [shape: f32[4,14,14,32], index: 0, kind: input, shape index: {}]   ;;  %s18293_s1 = inlined_call_operand.vmem [shape: f32[4,7,7,64], index: 1, kind: input, shape index: {}]   ;;  %s18294_s2 = inlined_call_operand.vmem [shape: f32[4,4,4,128], index: 2, kind: input, shape index: {}]   ;;  %s18295_s3 = inlined_call_operand.vmem [shape: f32[4,2,2,256], index: 3, kind: input, shape index: {}]   ;;  %s18296_s4 = inlined_call_operand.vmem [shape: bf16[256,512], index: 4, kind: input, shape index: {}]   ;;  %s18297_s5 = inlined_call_operand.vmem [shape: f32[1,128], index: 5, kind: input, shape index: {}]   ;;  %s18298_s6 = inlined_call_operand.vmem [shape: bf16[256,512], index: 6, kind: input, shape index: {}]   ;;  %s18299_s7 = inlined_call_operand.vmem [shape: f32[1,128], index: 7, kind: input, shape index: {}]   ;;  %s18300_s8 = inlined_call_operand.vmem [shape: bf16[128,1152], index: 8, kind: input, shape index: {}]   ;;  %s18301_s9 = inlined_call_operand.vmem [shape: f32[1,128], index: 9, kind: input, shape index: {}]   ;;  %s18302_s10 = inlined_call_operand.vmem [shape: bf16[64,1152], index: 10, kind: input, shape index: {}]   ;;  %s18303_s11 = inlined_call_operand.vmem [shape: f32[1,128], index: 11, kind: input, shape index: {}]   ;;  %s18304_s12 = inlined_call_operand.vmem [shape: f32[4,14,14,128], index: 12, kind: output, shape index: {}]  }
   0x1 LB: > { %s12303_s22 = sadd.s32 4294967295, %s13491_s21   ;;  %p12307_p0 = scmp.ge.s32.totalorder %s13491_s21, 1  ;;  %s13491_s21 = sphi %s13564_s21, %s22_s21  }
   0x2   : > { %p400_p1 = scmp.lt.s32.totalorder %s13491_s21, 3 }
   0x4   : > { %p401_p2 = pnand %p12307_p0, %p400_p1 }
   0x6   : > { %404 = sbr.rel (%p401_p2) target bundleno = 2021 (0x7e5), region = 68 }
   0xd   : > { %v13137_v0 = vld [vmem:[%s18296_s4 + $0x4] ss:$16 sps:$4 sm:$0xff]   ;;  %v13139_v1 = vld [vmem:[%s18296_s4 + $0xc] ss:$16 sps:$4 sm:$0xff]   ;;  %v13141_v2 = vld [vmem:[%s18296_s4] ss:$16 sps:$4 sm:$0xff]   ;;  %v566_v43 = vlaneseq }
   0xe   : > { %1040 = vmatprep.subr.bf16.mxu0 %v13137_v0  ;;  %v13142_v3 = vld [vmem:[%s18296_s4 + $0x8] ss:$16 sps:$4 sm:$0xff]   ;;  %1081 = vmatprep.subr.bf16.mxu1 %v13139_v1  ;;  %v13143_v4 = vld [vmem:[%s18296_s4 + $0x24] ss:$16 sps:$4 sm:$0xff]   ;;  %v13145_v5 = vld [vmem:[%s18296_s4 + $0x2c] ss:$16 sps:$4 sm:$0xff]  }
   0xf   : > { %1041 = vmatpush1.bf16.msra.mxu0 %v13141_v2  ;;  %1082 = vmatpush1.bf16.msra.mxu1 %v13142_v3  ;;  %v13147_v6 = vld [vmem:[%s18296_s4 + $0x20] ss:$16 sps:$4 sm:$0xff]   ;;  %v13148_v7 = vld [vmem:[%s18296_s4 + $0x28] ss:$16 sps:$4 sm:$0xff]   ;;  %v13149_v8 = vld [vmem:[%s18296_s4 + $0x44] ss:$16 sps:$4 sm:$0xff]  }
  0x10   : > { %1042 = vmatprep.subr.bf16.mxu0 %v13143_v4  ;;  %1083 = vmatprep.subr.bf16.mxu1 %v13145_v5  ;;  %v13151_v9 = vld [vmem:[%s18296_s4 + $0x4c] ss:$16 sps:$4 sm:$0xff]   ;;  %v13153_v10 = vld [vmem:[%s18296_s4 + $0x40] ss:$16 sps:$4 sm:$0xff]   ;;  %v13154_v11 = vld [vmem:[%s18296_s4 + $0x48] ss:$16 sps:$4 sm:$0xff]  }
  0x11   : > { %v13155_v12 = vld [vmem:[%s18296_s4 + $0x64] ss:$16 sps:$4 sm:$0xff]   ;;  %v13157_v13 = vld [vmem:[%s18296_s4 + $0x6c] ss:$16 sps:$4 sm:$0xff]   ;;  %v13159_v14 = vld [vmem:[%s18296_s4 + $0x60] ss:$16 sps:$4 sm:$0xff]  }
  0x12   : > { %v13160_v15 = vld [vmem:[%s18296_s4 + $0x68] ss:$16 sps:$4 sm:$0xff]   ;;  %v13161_v16 = vld [vmem:[%s18296_s4 + $0x84] ss:$16 sps:$4 sm:$0xff]   ;;  %v13163_v17 = vld [vmem:[%s18296_s4 + $0x8c] ss:$16 sps:$4 sm:$0xff]  }
  0x13   : > { %1043 = vmatpush1.bf16.msra.mxu0 %v13147_v6  ;;  %1084 = vmatpush1.bf16.msra.mxu1 %v13148_v7  ;;  %v13165_v18 = vld [vmem:[%s18296_s4 + $0x80] ss:$16 sps:$4 sm:$0xff]   ;;  %v13166_v19 = vld [vmem:[%s18296_s4 + $0x88] ss:$16 sps:$4 sm:$0xff]   ;;  %v13167_v20 = vld [vmem:[%s18296_s4 + $0xa4] ss:$16 sps:$4 sm:$0xff]  }
  0x14   : > { %1044 = vmatprep.subr.bf16.mxu0 %v13149_v8  ;;  %1085 = vmatprep.subr.bf16.mxu1 %v13151_v9  ;;  %v13169_v21 = vld [vmem:[%s18296_s4 + $0xac] ss:$16 sps:$4 sm:$0xff]   ;;  %v13171_v22 = vld [vmem:[%s18296_s4 + $0xa0] ss:$16 sps:$4 sm:$0xff]   ;;  %v13172_v23 = vld [vmem:[%s18296_s4 + $0xa8] ss:$16 sps:$4 sm:$0xff]  }
  0x15   : > { %v13173_v24 = vld [vmem:[%s18296_s4 + $0xc4] ss:$16 sps:$4 sm:$0xff]   ;;  %v13175_v25 = vld [vmem:[%s18296_s4 + $0xcc] ss:$16 sps:$4 sm:$0xff]   ;;  %v13177_v26 = vld [vmem:[%s18296_s4 + $0xc0] ss:$16 sps:$4 sm:$0xff]  }
  0x16   : > { %v13178_v27 = vld [vmem:[%s18296_s4 + $0xc8] ss:$16 sps:$4 sm:$0xff]   ;;  %v13179_v28 = vld [vmem:[%s18296_s4 + $0xe4] ss:$16 sps:$4 sm:$0xff]   ;;  %v13181_v29 = vld [vmem:[%s18296_s4 + $0xec] ss:$16 sps:$4 sm:$0xff]  }
  0x17   : > { %1045 = vmatpush1.bf16.msra.mxu0 %v13153_v10  ;;  %1086 = vmatpush1.bf16.msra.mxu1 %v13154_v11  ;;  %s12308_s17 = sshll.u32 %s12303_s22, 1  ;;  %v13183_v30 = vld [vmem:[%s18296_s4 + $0xe0] ss:$16 sps:$4 sm:$0xff]   ;;  %v13184_v31 = vld [vmem:[%s18296_s4 + $0xe8] ss:$16 sps:$4 sm:$0xff]   ;;  %v13715_v49 = vshrl.u32 %v566_v43, 7 }
  0x18   : > { %1046 = vmatprep.subr.bf16.mxu0 %v13155_v12  ;;  %1087 = vmatprep.subr.bf16.mxu1 %v13157_v13  ;;  %v13185_v32 = vld [vmem:[%s18296_s4 + $0x104] ss:$16 sps:$4 sm:$0xff]   ;;  %p463_p3 = scmp.lt.s32.totalorder %s12308_s17, 3  ;;  %v13187_v33 = vld [vmem:[%s18296_s4 + $0x10c] ss:$16 sps:$4 sm:$0xff]   ;;  %s13494_s13 = smov 64  }
  0x19   : > { %v13189_v34 = vld [vmem:[%s18296_s4 + $0x100] ss:$16 sps:$4 sm:$0xff]   ;;  %v13190_v35 = vld [vmem:[%s18296_s4 + $0x108] ss:$16 sps:$4 sm:$0xff]   ;;  %v13191_v36 = vld [vmem:[%s18296_s4 + $0x124] ss:$16 sps:$4 sm:$0xff]  }
  0x1a   : > { %s18882_s17 = smov (!%p463_p3, %s12308_s17), 3  ;;  %v13193_v37 = vld [vmem:[%s18296_s4 + $0x12c] ss:$16 sps:$4 sm:$0xff]   ;;  %v13195_v38 = vld [vmem:[%s18296_s4 + $0x120] ss:$16 sps:$4 sm:$0xff]   ;;  %vm1370_vm0 = vcmask 1041408  }
  0x1b   : > { %1047 = vmatpush1.bf16.msra.mxu0 %v13159_v14  ;;  %1088 = vmatpush1.bf16.msra.mxu1 %v13160_v15  ;;  %v13196_v39 = vld [vmem:[%s18296_s4 + $0x128] ss:$16 sps:$4 sm:$0xff]   ;;  %v13197_v40 = vld [vmem:[%s18296_s4 + $0x144] ss:$16 sps:$4 sm:$0xff]   ;;  %v13493_v41 = vmov 1966171168  }
  0x1c   : > { %1048 = vmatprep.subr.bf16.mxu0 %v13161_v16  ;;  %1089 = vmatprep.subr.bf16.mxu1 %v13163_v17  ;;  %v564_v42 = vunpack.c.l.s4 %v13493_v41  ;;  %v13199_v44 = vld [vmem:[%s18296_s4 + $0x14c] ss:$16 sps:$4 sm:$0xff]   ;;  %s12778_s22 = sshll.u32 %s18882_s17, 3  ;;  %v13201_v45 = vld [vmem:[%s18296_s4 + $0x140] ss:$16 sps:$4 sm:$0xff]   ;;  %s12777_s16 = sshll.u32 %s18882_s17, 4 }
  0x1d   : > { %v13202_v46 = vld [vmem:[%s18296_s4 + $0x148] ss:$16 sps:$4 sm:$0xff]   ;;  %v13203_v47 = vld [vmem:[%s18296_s4 + $0x164] ss:$16 sps:$4 sm:$0xff]   ;;  %s488_s19 = scalar_lea.vmem %s18295_s3, %s12778_s22  ;;  %v13205_v50 = vld [vmem:[%s18296_s4 + $0x16c] ss:$16 sps:$4 sm:$0xff]   ;;  %s13992_s20 = scalar_lea.vmem %s18294_s2, %s12777_s16 }
  0x1e   : > { %v565_v48 = vunpack.c.0.s8 %v564_v42  ;;  %v13207_v51 = vld [vmem:[%s18296_s4 + $0x160] ss:$16 sps:$4 sm:$0xff]   ;;  %v13208_v52 = vld [vmem:[%s18296_s4 + $0x168] ss:$16 sps:$4 sm:$0xff]   ;;  %v13209_v54 = vld [vmem:[%s18296_s4 + $0x184] ss:$16 sps:$4 sm:$0xff]  }
  0x1f   : > { %1049 = vmatpush1.bf16.msra.mxu0 %v13165_v18  ;;  %1090 = vmatpush1.bf16.msra.mxu1 %v13166_v19  ;;  %v12320_v53 = vld.sshfl [vmem:[%s488_s19] sm:$0x33 pattern:$0x76325410]  ;;  %v13211_v58 = vld [vmem:[%s18296_s4 + $0x18c] ss:$16 sps:$4 sm:$0xff]  }
  0x20   : > { %1050 = vmatprep.subr.bf16.mxu0 %v13167_v20  ;;  %1091 = vmatprep.subr.bf16.mxu1 %v13169_v21  ;;  %v12321_v55 = vld.sshfl [vmem:[%s488_s19 + $0x4] sm:$0x33 pattern:$0x76325410]  ;;  %v513_v56 = vcombine.high %v12320_v53, %v12320_v53  ;;  %v13730_v57 = vsub.s32 %v565_v48, %v13715_v49  ;;  %v13213_v2 = vld [vmem:[%s18296_s4 + $0x180] ss:$16 sps:$4 sm:$0xff]  }
  0x21   : > { %v12322_v59 = vld.sshfl [vmem:[%s488_s19 + $0x8] sm:$0x33 pattern:$0x76325410]  ;;  %v521_v60 = vcombine.high %v12321_v55, %v12321_v55  ;;  %v13215_v6 = vld [vmem:[%s18296_s4 + $0x1a4] ss:$16 sps:$4 sm:$0xff]  }
  0x22   : > { %v12323_v61 = vld.sshfl [vmem:[%s488_s19 + $0xc] sm:$0x33 pattern:$0x76325410]  ;;  %v529_v62 = vcombine.high %v12322_v59, %v12322_v59  ;;  %v12324_v63 = vpack.c.bf16 %v513_v56, %v12320_v53  ;;  %v13214_v3 = vld [vmem:[%s18296_s4 + $0x188] ss:$16 sps:$4 sm:$0xff]  }
  0x23   : > { %1051 = vmatpush1.bf16.msra.mxu0 %v13171_v22  ;;  %1092 = vmatpush1.bf16.msra.mxu1 %v13172_v23  ;;  %v537_v0 = vcombine.high %v12323_v61, %v12323_v61  ;;  %v12325_v1 = vpack.c.bf16 %v521_v60, %v12321_v55  ;;  %v13217_v7 = vld [vmem:[%s18296_s4 + $0x1ac] ss:$16 sps:$4 sm:$0xff]   ;;  %v13219_v14 = vld [vmem:[%s18296_s4 + $0x1a0] ss:$16 sps:$4 sm:$0xff]   ;;  %v13220_v15 = vld [vmem:[%s18296_s4 + $0x1a8] ss:$16 sps:$4 sm:$0xff]  }
  0x24   : > { %1052 = vmatprep.subr.bf16.mxu0 %v13173_v24  ;;  %1093 = vmatprep.subr.bf16.mxu1 %v13175_v25  ;;  %v569_v4 = vrot.slane %v12324_v63, %v13730_v57  ;;  %v12326_v5 = vpack.c.bf16 %v529_v62, %v12322_v59  ;;  %v13221_v17 = vld [vmem:[%s18296_s4 + $0x1c4] ss:$16 sps:$4 sm:$0xff]   ;;  %v13223_v18 = vld [vmem:[%s18296_s4 + $0x1cc] ss:$16 sps:$4 sm:$0xff]   ;;  %v13225_v21 = vld [vmem:[%s18296_s4 + $0x1c0] ss:$16 sps:$4 sm:$0xff]  }
  0x25   : > { %v584_v8 = vrot.slane %v12325_v1, %v13730_v57  ;;  %v12327_v9 = vpack.c.bf16 %v537_v0, %v12323_v61  ;;  %v13226_v22 = vld [vmem:[%s18296_s4 + $0x1c8] ss:$16 sps:$4 sm:$0xff]   ;;  %v13227_v23 = vld [vmem:[%s18296_s4 + $0x1e4] ss:$16 sps:$4 sm:$0xff]   ;;  %v13229_v24 = vld [vmem:[%s18296_s4 + $0x1ec] ss:$16 sps:$4 sm:$0xff]  }
  0x26   : > { %v576_v10 = vrot.slane %v569_v4, %v13730_v57  ;;  %v599_v11 = vrot.slane %v12326_v5, %v13730_v57  ;;  %v13242_v41 = vld [vmem:[%s18298_s6 + $0x28] ss:$16 sps:$4 sm:$0xff]   ;;  %v13247_v42 = vld [vmem:[%s18298_s6 + $0x44] ss:$16 sps:$4 sm:$0xff]   ;;  %v13250_v43 = vld [vmem:[%s18298_s6 + $0x4c] ss:$16 sps:$4 sm:$0xff]  }
  0x27   : > { %1053 = vmatpush1.bf16.msra.mxu0 %v13177_v26  ;;  %1094 = vmatpush1.bf16.msra.mxu1 %v13178_v27  ;;  %v591_v12 = vrot.slane %v584_v8, %v13730_v57  ;;  %v614_v13 = vrot.slane %v12327_v9, %v13730_v57  ;;  %v13251_v48 = vld [vmem:[%s18298_s6 + $0x60] ss:$16 sps:$4 sm:$0xff]   ;;  %v13265_v55 = vld [vmem:[%s18298_s6 + $0xa4] ss:$16 sps:$4 sm:$0xff]   ;;  %v13268_v56 = vld [vmem:[%s18298_s6 + $0xac] ss:$16 sps:$4 sm:$0xff]  }
  0x28   : > { %1054 = vmatprep.subr.bf16.mxu0 %v13179_v28  ;;  %1095 = vmatprep.subr.bf16.mxu1 %v13181_v29  ;;  %v606_v16 = vrot.slane %v599_v11, %v13730_v57  ;;  %v13231_v28 = vld [vmem:[%s18296_s4 + $0x1e0] ss:$16 sps:$4 sm:$0xff]   ;;  %v13232_v29 = vld [vmem:[%s18296_s4 + $0x1e8] ss:$16 sps:$4 sm:$0xff]   ;;  %v13271_v60 = vld [vmem:[%s18298_s6 + $0xc4] ss:$16 sps:$4 sm:$0xff]  }
  0x29   : > { %v621_v19 = vrot.slane %v614_v13, %v13730_v57  ;;  %v686_v20 = vcombine.low %v576_v10, %v591_v12  ;;  %v13257_v53 = vld [vmem:[%s18298_s6 + $0x80] ss:$16 sps:$4 sm:$0xff]   ;;  %v13266_v59 = vld [vmem:[%s18298_s6 + $0xa8] ss:$16 sps:$4 sm:$0xff]   ;;  %v13274_v61 = vld [vmem:[%s18298_s6 + $0xcc] ss:$16 sps:$4 sm:$0xff]  }
  0x2a   : > { %v13269_v62 = vld [vmem:[%s18298_s6 + $0xc0] ss:$16 sps:$4 sm:$0xff]   ;;  %v13272_v63 = vld [vmem:[%s18298_s6 + $0xc8] ss:$16 sps:$4 sm:$0xff]   ;;  %v13277_v0 = vld [vmem:[%s18298_s6 + $0xe4] ss:$16 sps:$4 sm:$0xff]  }
  0x2b   : > { %1055 = vmatpush1.bf16.msra.mxu0 %v13183_v30  ;;  %1096 = vmatpush1.bf16.msra.mxu1 %v13184_v31  ;;  %v687_v25 = vcombine.low %v606_v16, %v621_v19  ;;  %v694_v26 = vrot.slane %v686_v20, %v13730_v57  ;;  %v13280_v1 = vld [vmem:[%s18298_s6 + $0xec] ss:$16 sps:$4 sm:$0xff]   ;;  %v13283_v4 = vld [vmem:[%s18298_s6 + $0x104] ss:$16 sps:$4 sm:$0xff]   ;;  %v13287_v10 = vld [vmem:[%s18298_s6 + $0x120] ss:$16 sps:$4 sm:$0xff]  }
  0x2c   : > { %1056 = vmatprep.subr.bf16.mxu0 %v13185_v32  ;;  %1097 = vmatprep.subr.bf16.mxu1 %v13187_v33  ;;  %v13235_v32 = vld [vmem:[%s18298_s6 + $0x4] ss:$16 sps:$4 sm:$0xff]   ;;  %v13238_v33 = vld [vmem:[%s18298_s6 + $0xc] ss:$16 sps:$4 sm:$0xff]   ;;  %v13290_v11 = vld [vmem:[%s18298_s6 + $0x128] ss:$16 sps:$4 sm:$0xff]  }
  0x2d   : > { %v701_v27 = vrot.slane %v687_v25, %v13730_v57  ;;  %v13286_v5 = vld [vmem:[%s18298_s6 + $0x10c] ss:$16 sps:$4 sm:$0xff]   ;;  %v13289_v8 = vld [vmem:[%s18298_s6 + $0x124] ss:$16 sps:$4 sm:$0xff]   ;;  %v13302_v19 = vld [vmem:[%s18298_s6 + $0x168] ss:$16 sps:$4 sm:$0xff]  }
  0x2e   : > { %v13292_v9 = vld [vmem:[%s18298_s6 + $0x12c] ss:$16 sps:$4 sm:$0xff]   ;;  %v13295_v12 = vld [vmem:[%s18298_s6 + $0x144] ss:$16 sps:$4 sm:$0xff]   ;;  %s12952_s22 = smul.u32 56, %s18882_s17  ;;  %vm1314_vm1 = vcmask 1043456  }
  0x2f   : > { %1057 = vmatpush1.bf16.msra.mxu0 %v13189_v34  ;;  %1098 = vmatpush1.bf16.msra.mxu1 %v13190_v35  ;;  %v703_v30 = vcombine.high %v694_v26, %v701_v27  ;;  %v702_v31 = vcombine.low %v694_v26, %v701_v27  ;;  %v13233_v35 = vld [vmem:[%s18298_s6] ss:$16 sps:$4 sm:$0xff]   ;;  %v13298_v13 = vld [vmem:[%s18298_s6 + $0x14c] ss:$16 sps:$4 sm:$0xff]   ;;  %v13301_v16 = vld [vmem:[%s18298_s6 + $0x164] ss:$16 sps:$4 sm:$0xff]  }
  0x30   : > { %1058 = vmatprep.subr.bf16.mxu0 %v13191_v36  ;;  %1099 = vmatprep.subr.bf16.mxu1 %v13193_v37  ;;  %v13236_v36 = vld [vmem:[%s18298_s6 + $0x8] ss:$16 sps:$4 sm:$0xff]   ;;  %v13307_v20 = vld [vmem:[%s18298_s6 + $0x184] ss:$16 sps:$4 sm:$0xff]   ;;  %v13316_v25 = vld [vmem:[%s18298_s6 + $0x1ac] ss:$16 sps:$4 sm:$0xff]   ;;  %s474_s30 = scalar_lea.vmem %s18293_s1, %s12952_s22 }
  0x31   : > { %v717_v34 = vrot.slane %v703_v30, %v13730_v57  ;;  %v710_v37 = vrot.slane %v702_v31, %v13730_v57  ;;  %v13311_v26 = vld [vmem:[%s18298_s6 + $0x1a0] ss:$16 sps:$4 sm:$0xff]   ;;  %v13314_v27 = vld [vmem:[%s18298_s6 + $0x1a8] ss:$16 sps:$4 sm:$0xff]   ;;  %vm3492_vm2 = vsmask.f32 3328 }
  0x32   : > { %v13317_v30 = vld [vmem:[%s18298_s6 + $0x1c0] ss:$16 sps:$4 sm:$0xff]   ;;  %v13320_v31 = vld [vmem:[%s18298_s6 + $0x1c8] ss:$16 sps:$4 sm:$0xff]   ;;  %vm3462_vm3 = vcmask 523264   ;;  %vm14503_vm4 = vmand %vm1314_vm1, %vm3492_vm2  ;;  %s12951_s25 = smul.u32 224, %s18882_s17 }
  0x33   : > { %1059 = vmatpush1.bf16.msra.mxu0 %v13195_v38  ;;  %1100 = vmatpush1.bf16.msra.mxu1 %v13196_v39  ;;  %v13241_v38 = vld [vmem:[%s18298_s6 + $0x24] ss:$16 sps:$4 sm:$0xff]   ;;  %v13244_v39 = vld [vmem:[%s18298_s6 + $0x2c] ss:$16 sps:$4 sm:$0xff]   ;;  %s13498_s28 = smov 32   ;;  %vm8145_vm5 = vcmask 261120  }
  0x34   : > { %1060 = vmatprep.subr.bf16.mxu0 %v13197_v40  ;;  %1101 = vmatprep.subr.bf16.mxu1 %v13199_v44  ;;  %v13239_v40 = vld [vmem:[%s18298_s6 + $0x20] ss:$16 sps:$4 sm:$0xff]   ;;  %s14818_s22 = scalar_lea.vmem %s18292_s0, %s12951_s25  ;;  %vm8461_vm6 = vcmask 1040384   ;;  %vm8462_vm7 = vsmask.f32 256  ;;  %vm8493_vm9 = vcmask 1047552   ;;  %s18092_s15 = scalar_lea.vmem %s18304_s12, %s12951_s25 }
  0x35   : > { %1072 = vmatprep.mubr.bf16.mxu0 %v717_v34  ;;  %1113 = vmatprep.mubr.bf16.mxu1 %v717_v34  ;;  %v13245_v44 = vld [vmem:[%s18298_s6 + $0x40] ss:$16 sps:$4 sm:$0xff]   ;;  %vm15468_vm8 = vmand %vm8461_vm6, %vm8462_vm7  ;;  %vm8494_vm10 = vsmask.f32 7424  ;;  %vm5345_vm12 = vcmask 1045504  }
  0x36   : > { %v13323_v34 = vld [vmem:[%s18298_s6 + $0x1e0] ss:$16 sps:$4 sm:$0xff]   ;;  %vm15478_vm11 = vmand %vm8493_vm9, %vm8494_vm10 }
  0x37   : > { %1061 = vmatpush1.bf16.msra.mxu0 %v13201_v45  ;;  %1102 = vmatpush1.bf16.msra.mxu1 %v13202_v46  ;;  %v13248_v45 = vld [vmem:[%s18298_s6 + $0x48] ss:$16 sps:$4 sm:$0xff]   ;;  %v13253_v46 = vld [vmem:[%s18298_s6 + $0x64] ss:$16 sps:$4 sm:$0xff]  }
  0x38   : > { %1062 = vmatprep.subr.bf16.mxu0 %v13203_v47  ;;  %1103 = vmatprep.subr.bf16.mxu1 %v13205_v50  ;;  %v13256_v47 = vld [vmem:[%s18298_s6 + $0x6c] ss:$16 sps:$4 sm:$0xff]   ;;  %v13254_v50 = vld [vmem:[%s18298_s6 + $0x68] ss:$16 sps:$4 sm:$0xff]  }
  0x3b   : > { %1063 = vmatpush1.bf16.msra.mxu0 %v13207_v51  ;;  %1104 = vmatpush1.bf16.msra.mxu1 %v13208_v52  ;;  %v13259_v51 = vld [vmem:[%s18298_s6 + $0x84] ss:$16 sps:$4 sm:$0xff]   ;;  %v13262_v52 = vld [vmem:[%s18298_s6 + $0x8c] ss:$16 sps:$4 sm:$0xff]  }
  0x3c   : > { %1064 = vmatprep.subr.bf16.mxu0 %v13209_v54  ;;  %1105 = vmatprep.subr.bf16.mxu1 %v13211_v58  ;;  %v13260_v54 = vld [vmem:[%s18298_s6 + $0x88] ss:$16 sps:$4 sm:$0xff]   ;;  %v13263_v58 = vld [vmem:[%s18298_s6 + $0xa0] ss:$16 sps:$4 sm:$0xff]  }
  0x3f   : > { %1065 = vmatpush1.bf16.msra.mxu0 %v13213_v2  ;;  %1106 = vmatpush1.bf16.msra.mxu1 %v13214_v3  ;;  %v13275_v2 = vld [vmem:[%s18298_s6 + $0xe0] ss:$16 sps:$4 sm:$0xff]   ;;  %v13278_v3 = vld [vmem:[%s18298_s6 + $0xe8] ss:$16 sps:$4 sm:$0xff]  }
  0x40   : > { %1066 = vmatprep.subr.bf16.mxu0 %v13215_v6  ;;  %1107 = vmatprep.subr.bf16.mxu1 %v13217_v7  ;;  %v13281_v6 = vld [vmem:[%s18298_s6 + $0x100] ss:$16 sps:$4 sm:$0xff]   ;;  %v13284_v7 = vld [vmem:[%s18298_s6 + $0x108] ss:$16 sps:$4 sm:$0xff]  }
  0x43   : > { %1067 = vmatpush1.bf16.msra.mxu0 %v13219_v14  ;;  %1108 = vmatpush1.bf16.msra.mxu1 %v13220_v15  ;;  %v13293_v14 = vld [vmem:[%s18298_s6 + $0x140] ss:$16 sps:$4 sm:$0xff]   ;;  %v13296_v15 = vld [vmem:[%s18298_s6 + $0x148] ss:$16 sps:$4 sm:$0xff]  }
  0x44   : > { %1068 = vmatprep.subr.bf16.mxu0 %v13221_v17  ;;  %1109 = vmatprep.subr.bf16.mxu1 %v13223_v18  ;;  %v13304_v17 = vld [vmem:[%s18298_s6 + $0x16c] ss:$16 sps:$4 sm:$0xff]   ;;  %v13299_v18 = vld [vmem:[%s18298_s6 + $0x160] ss:$16 sps:$4 sm:$0xff]  }
  0x47   : > { %1069 = vmatpush1.bf16.msra.mxu0 %v13225_v21  ;;  %1110 = vmatpush1.bf16.msra.mxu1 %v13226_v22  ;;  %v13310_v21 = vld [vmem:[%s18298_s6 + $0x18c] ss:$16 sps:$4 sm:$0xff]   ;;  %v13305_v22 = vld [vmem:[%s18298_s6 + $0x180] ss:$16 sps:$4 sm:$0xff]  }
  0x48   : > { %1070 = vmatprep.subr.bf16.mxu0 %v13227_v23  ;;  %1111 = vmatprep.subr.bf16.mxu1 %v13229_v24  ;;  %v13308_v23 = vld [vmem:[%s18298_s6 + $0x188] ss:$16 sps:$4 sm:$0xff]   ;;  %v13313_v24 = vld [vmem:[%s18298_s6 + $0x1a4] ss:$16 sps:$4 sm:$0xff]  }
  0x4b   : > { %1071 = vmatpush1.bf16.msra.mxu0 %v13231_v28  ;;  %1112 = vmatpush1.bf16.msra.mxu1 %v13232_v29  ;;  %v13319_v28 = vld [vmem:[%s18298_s6 + $0x1c4] ss:$16 sps:$4 sm:$0xff]   ;;  %v13322_v29 = vld [vmem:[%s18298_s6 + $0x1cc] ss:$16 sps:$4 sm:$0xff]  }
  0x4c   : > { %2319 = vmatprep.subr.bf16.mxu0 %v13235_v32  ;;  %2388 = vmatprep.subr.bf16.mxu1 %v13238_v33  ;;  %v13325_v32 = vld [vmem:[%s18298_s6 + $0x1e4] ss:$16 sps:$4 sm:$0xff]   ;;  %v13328_v33 = vld [vmem:[%s18298_s6 + $0x1ec] ss:$16 sps:$4 sm:$0xff]  }
  0x4e   : > { %1073 = vmatmul.mubr.bf16.vlgmr.msra.gmra.mrb[0].mxu0 %v710_v37  ;;  %1114 = vmatmul.mubr.bf16.vlgmr.msra.gmra.mrb[0].mxu1 %v710_v37  ;;  %v3393_v37 = vld [vmem:[%s474_s30 + $0x8] sm:$0x7f] }
  0x4f   : > { %2320 = vmatpush1.bf16.msra.mxu0 %v13233_v35  ;;  %2389 = vmatpush1.bf16.msra.mxu1 %v13236_v36  ;;  %v13326_v35 = vld [vmem:[%s18298_s6 + $0x1e8] ss:$16 sps:$4 sm:$0xff]   ;;  %v3392_v36 = vld [vmem:[%s474_s30] sm:$0x7f] }
  0x50   : > { %2321 = vmatprep.subr.bf16.mxu0 %v13241_v38  ;;  %2390 = vmatprep.subr.bf16.mxu1 %v13244_v39  ;;  %v12967_v38 = vpack.i.bf16 %v3393_v37, %v3392_v36  ;;  %v3394_v39 = vld [vmem:[%s474_s30 + $0x10] sm:$0x7f] }
  0x52   : > { %12968 = vrot.lane.b32.xlu0 %v12967_v38, %s13494_s13 }
  0x53   : > { %2322 = vmatpush1.bf16.msra.mxu0 %v13239_v40  ;;  %2391 = vmatpush1.bf16.msra.mxu1 %v13242_v41  ;;  %v3395_v40 = vld [vmem:[%s474_s30 + $0x18] sm:$0x7f]  ;;  %v3396_v41 = vld [vmem:[%s474_s30 + $0x20] sm:$0x7f] }
  0x54   : > { %2323 = vmatprep.subr.bf16.mxu0 %v13247_v42  ;;  %2392 = vmatprep.subr.bf16.mxu1 %v13250_v43  ;;  %v3397_v42 = vld [vmem:[%s474_s30 + $0x28] sm:$0x7f]  ;;  %v12972_v43 = vpack.i.bf16 %v3395_v40, %v3394_v39 }
  0x56   : > { %12973 = vrot.lane.b32.xlu0 %v12972_v43, %s13494_s13 }
  0x57   : > { %2324 = vmatpush1.bf16.msra.mxu0 %v13245_v44  ;;  %2393 = vmatpush1.bf16.msra.mxu1 %v13248_v45  ;;  %v12977_v44 = vpack.i.bf16 %v3397_v42, %v3396_v41  ;;  %v3399_v45 = vld [vmem:[%s474_s30 + $0x38] sm:$0x7f] }
  0x58   : > { %2325 = vmatprep.subr.bf16.mxu0 %v13253_v46  ;;  %2394 = vmatprep.subr.bf16.mxu1 %v13256_v47  ;;  %v3400_v46 = vld [vmem:[%s474_s30 + $0x40] sm:$0x7f] }
  0x59   : > { %12978 = vrot.lane.b32.xlu1 %v12977_v44, %s13494_s13  ;;  %v13331_v47 = vld [vmem:[%s18300_s8 + $0x4] ss:$36 sps:$4 sm:$0xff]  }
  0x5b   : > { %2326 = vmatpush1.bf16.msra.mxu0 %v13251_v48  ;;  %2395 = vmatpush1.bf16.msra.mxu1 %v13254_v50  ;;  %v3398_v48 = vld [vmem:[%s474_s30 + $0x30] sm:$0x7f]  ;;  %v3401_v50 = vld [vmem:[%s474_s30 + $0x48] sm:$0x7f] }
  0x5c   : > { %2327 = vmatprep.subr.bf16.mxu0 %v13259_v51  ;;  %2396 = vmatprep.subr.bf16.mxu1 %v13262_v52  ;;  %v3402_v51 = vld [vmem:[%s474_s30 + $0x50] sm:$0x7f]  ;;  %v12982_v52 = vpack.i.bf16 %v3400_v46, %v3399_v45 }
  0x5d   : > { %3432 = vrot.lane.b32.xlu1 %v3398_v48, %s13494_s13 }
  0x5e   : > { %12983 = vrot.lane.b32.xlu0 %v12982_v52, %s13494_s13 }
  0x5f   : > { %2328 = vmatpush1.bf16.msra.mxu0 %v13257_v53  ;;  %2397 = vmatpush1.bf16.msra.mxu1 %v13260_v54  ;;  %v3403_v53 = vld [vmem:[%s474_s30 + $0x58] sm:$0x7f]  ;;  %v3404_v54 = vld [vmem:[%s474_s30 + $0x60] sm:$0x7f] }
  0x60   : > { %2329 = vmatprep.subr.bf16.mxu0 %v13265_v55  ;;  %2398 = vmatprep.subr.bf16.mxu1 %v13268_v56  ;;  %v12987_v55 = vpack.i.bf16 %v3402_v51, %v3401_v50  ;;  %v12992_v56 = vpack.i.bf16 %v3404_v54, %v3403_v53 }
  0x62   : > { %12988 = vrot.lane.b32.xlu1 %v12987_v55, %s13494_s13  ;;  %12993 = vrot.lane.b32.xlu0 %v12992_v56, %s13494_s13  ;;  %v1352_v55 = vld [vmem:[%s13992_s20 + $0x18] sm:$0xf] }
  0x63   : > { %2330 = vmatpush1.bf16.msra.mxu0 %v13263_v58  ;;  %2399 = vmatpush1.bf16.msra.mxu1 %v13266_v59  ;;  %v3405_v58 = vld [vmem:[%s474_s30 + $0x68] sm:$0x7f]  ;;  %v13495_v59 = vmov 1983009808  }
  0x64   : > { %2331 = vmatprep.subr.bf16.mxu0 %v13271_v60  ;;  %2400 = vmatprep.subr.bf16.mxu1 %v13274_v61  ;;  %v1131_v60 = vunpack.c.l.s4 %v13495_v59  ;;  %v13496_v61 = vmov 1935823168  }
  0x66   : > { %3446 = vrot.lane.b32.xlu1 %v3405_v58, %s13494_s13 }
  0x67   : > { %2332 = vmatpush1.bf16.msra.mxu0 %v13269_v62  ;;  %2401 = vmatpush1.bf16.msra.mxu1 %v13272_v63  ;;  %v1203_v62 = vunpack.c.l.s4 %v13496_v61  ;;  %v1132_v63 = vunpack.c.0.s8 %v1131_v60 }
  0x68   : > { %2333 = vmatprep.subr.bf16.mxu0 %v13277_v0  ;;  %2402 = vmatprep.subr.bf16.mxu1 %v13280_v1  ;;  %v1346_v0 = vld [vmem:[%s13992_s20] sm:$0xf] }
  0x69   : > { %v1204_v1 = vunpack.c.0.s8 %v1203_v62 }
  0x6b   : > { %2334 = vmatpush1.bf16.msra.mxu0 %v13275_v2  ;;  %2403 = vmatpush1.bf16.msra.mxu1 %v13278_v3  ;;  %v1347_v2 = vld [vmem:[%s13992_s20 + $0x4] sm:$0xf]  ;;  %v1348_v3 = vld [vmem:[%s13992_s20 + $0x8] sm:$0xf] }
  0x6c   : > { %2335 = vmatprep.subr.bf16.mxu0 %v13283_v4  ;;  %2404 = vmatprep.subr.bf16.mxu1 %v13286_v5  ;;  %v1349_v4 = vld [vmem:[%s13992_s20 + $0xc] sm:$0xf]  ;;  %v1355_v5 = vpack.c.bf16 %v1346_v0, %v1346_v0 }
  0x6f   : > { %2336 = vmatpush1.bf16.msra.mxu0 %v13281_v6  ;;  %2405 = vmatpush1.bf16.msra.mxu1 %v13284_v7  ;;  %v18305_v6 = vmov 0  }
  0x70   : > { %2337 = vmatprep.subr.bf16.mxu0 %v13289_v8  ;;  %2406 = vmatprep.subr.bf16.mxu1 %v13292_v9  ;;  %v1517_v7 = vcombine.low %v18305_v6, %v18305_v6  ;;  %v14001_v8 = vsub.s32 %v1132_v63, %v13715_v49 }
  0x73   : > { %2338 = vmatpush1.bf16.msra.mxu0 %v13287_v10  ;;  %2407 = vmatpush1.bf16.msra.mxu1 %v13290_v11  ;;  %v1350_v11 = vld [vmem:[%s13992_s20 + $0x10] sm:$0xf] }
  0x74   : > { %2339 = vmatprep.subr.bf16.mxu0 %v13295_v12  ;;  %2408 = vmatprep.subr.bf16.mxu1 %v13298_v13  ;;  %v14005_v12 = vld [vmem:[%s13992_s20 + $0x14] sm:$0xf] }
  0x77   : > { %2340 = vmatpush1.bf16.msra.mxu0 %v13293_v14  ;;  %2409 = vmatpush1.bf16.msra.mxu1 %v13296_v15  ;;  %v14008_v15 = vsub.s32 %v1204_v1, %v13715_v49  ;;  %v1524_v49 = vrot.slane %v1517_v7, %v13730_v57  ;;  %v1353_v1 = vld [vmem:[%s13992_s20 + $0x1c] sm:$0xf] }
  0x78   : > { %2341 = vmatprep.subr.bf16.mxu0 %v13301_v16  ;;  %2410 = vmatprep.subr.bf16.mxu1 %v13304_v17  ;;  %v1357_v16 = vpack.c.bf16 %v1347_v2, %v1347_v2  ;;  %v1359_v17 = vpack.c.bf16 %v1348_v3, %v1348_v3 }
  0x79   : > { %v1525_v37 = vcombine.high %v1524_v49, %v1524_v49 }
  0x7b   : > { %2342 = vmatpush1.bf16.msra.mxu0 %v13299_v18  ;;  %2411 = vmatpush1.bf16.msra.mxu1 %v13302_v19  ;;  %v1361_v18 = vpack.c.bf16 %v1349_v4, %v1349_v4 }
  0x7c   : > { %2343 = vmatprep.subr.bf16.mxu0 %v13307_v20  ;;  %2412 = vmatprep.subr.bf16.mxu1 %v13310_v21 }
  0x7d   : > { %v14027_v36 = vsel %vm1370_vm0, %v1361_v18, 0 }
  0x7f   : > { %2344 = vmatpush1.bf16.msra.mxu0 %v13305_v22  ;;  %2413 = vmatpush1.bf16.msra.mxu1 %v13308_v23 }
  0x80   : > { %2345 = vmatprep.subr.bf16.mxu0 %v13313_v24  ;;  %2414 = vmatprep.subr.bf16.mxu1 %v13316_v25 }
  0x83   : > { %2346 = vmatpush1.bf16.msra.mxu0 %v13311_v26  ;;  %2415 = vmatpush1.bf16.msra.mxu1 %v13314_v27  ;;  %v14011_v27 = vsel %vm1370_vm0, %v1355_v5, 0  ;;  %v1367_v5 = vpack.c.bf16 %v1352_v55, %v1352_v55 }
  0x84   : > { %2347 = vmatprep.subr.bf16.mxu0 %v13319_v28  ;;  %2416 = vmatprep.subr.bf16.mxu1 %v13322_v29  ;;  %v1363_v28 = vpack.c.bf16 %v1350_v11, %v1350_v11  ;;  %v1365_v29 = vpack.c.bf16 %v14005_v12, %v14005_v12 }
  0x86   : > { %v14040_v4 = vsel %vm1370_vm0, %v1363_v28, 0  ;;  %v14043_v12 = vsel %vm1370_vm0, %v1365_v29, 0 }
  0x87   : > { %2348 = vmatpush1.bf16.msra.mxu0 %v13317_v30  ;;  %2417 = vmatpush1.bf16.msra.mxu1 %v13320_v31 }
  0x88   : > { %2349 = vmatprep.subr.bf16.mxu0 %v13325_v32  ;;  %2418 = vmatprep.subr.bf16.mxu1 %v13328_v33 }
  0x8b   : > { %2350 = vmatpush1.bf16.msra.mxu0 %v13323_v34  ;;  %2419 = vmatpush1.bf16.msra.mxu1 %v13326_v35  ;;  %v14021_v34 = vsel %vm1370_vm0, %v1357_v16, 0  ;;  %v14024_v35 = vsel %vm1370_vm0, %v1359_v17, 0  ;;  %v1369_v16 = vpack.c.bf16 %v1353_v1, %v1353_v1 }
  0x8c   : > { %4002 = vmatprep.subr.bf16.mxu0 %v13331_v47 }
 0x121   : > { %v1074_v9 = vpop.f32.mrb[0].mxu0  ;;  %v1115_v10 = vpop.f32.mrb[0].mxu1 }
 0x122   : > { %v1076_v13 = vpop.f32.mrb[1].mxu0  ;;  %v1117_v14 = vpop.f32.mrb[1].mxu1 }
 0x123   : > { %v1126_v19 = vcombine.low %v1074_v9, %v1076_v13  ;;  %v1127_v20 = vcombine.high %v1074_v9, %v1076_v13  ;;  %v1128_v21 = vcombine.low %v1115_v10, %v1117_v14  ;;  %v1129_v22 = vcombine.high %v1115_v10, %v1117_v14  ;;  %v1078_v23 = vpop.f32.mrb[2].mxu0  ;;  %v1119_v24 = vpop.f32.mrb[2].mxu1 }
 0x124   : > { %v1079_v25 = vpop.f32.mrb[3].mxu0  ;;  %v1120_v26 = vpop.f32.mrb[3].mxu1  ;;  %v14046_v13 = vrot.slane %v1524_v49, %v13730_v57  ;;  %v14049_v14 = vrot.slane %v1525_v37, %v13730_v57  ;;  %v12400_v49 = vld [vmem:[%s18297_s5] ss:$0 sm:$0xff] }
 0x125   : > { %v1136_v30 = vrot.slane %v1126_v19, %v14001_v8  ;;  %v1143_v31 = vrot.slane %v1127_v20, %v14001_v8  ;;  %v1150_v32 = vrot.slane %v1128_v21, %v14001_v8  ;;  %v1157_v33 = vrot.slane %v1129_v22, %v14001_v8 }
 0x127   : > { %v1158_v38 = vcombine.low %v1136_v30, %v1150_v32  ;;  %v1159_v39 = vcombine.high %v1136_v30, %v1150_v32  ;;  %v1160_v40 = vcombine.low %v1143_v31, %v1157_v33  ;;  %v1161_v41 = vcombine.high %v1143_v31, %v1157_v33 }
 0x128   : > { %v12396_v42 = vcombine.low %v1150_v32, %v1150_v32  ;;  %v12397_v43 = vcombine.high %v1150_v32, %v1150_v32  ;;  %v12398_v44 = vcombine.low %v1157_v33, %v1157_v33  ;;  %v12399_v45 = vcombine.high %v1157_v33, %v1157_v33 }
 0x129   : > { %v1168_v46 = vrot.slane %v1158_v38, %v14001_v8  ;;  %v1176_v47 = vrot.slane %v1159_v39, %v14001_v8  ;;  %v1184_v48 = vrot.slane %v1160_v40, %v14001_v8  ;;  %v1192_v50 = vrot.slane %v1161_v41, %v14001_v8 }
 0x12a   : > { %v1237_v51 = vrot.slane %v12396_v42, %v14001_v8  ;;  %v1245_v52 = vrot.slane %v12397_v43, %v14001_v8  ;;  %v1253_v53 = vrot.slane %v12398_v44, %v14001_v8  ;;  %v1261_v54 = vrot.slane %v12399_v45, %v14001_v8 }
 0x12b   : > { %v1169_v56 = vcombine.high %v1168_v46, %v1168_v46  ;;  %v1185_v58 = vcombine.high %v1184_v48, %v1184_v48  ;;  %v12393_v59 = vcombine.high %v1136_v30, %v1176_v47  ;;  %v12395_v60 = vcombine.high %v1143_v31, %v1192_v50 }
 0x12c   : > { %v1262_v61 = vcombine.high %v1237_v51, %v1237_v51  ;;  %v1263_v62 = vcombine.high %v1245_v52, %v1245_v52  ;;  %v1264_v63 = vcombine.high %v1253_v53, %v1253_v53  ;;  %v1265_v0 = vcombine.high %v1261_v54, %v1261_v54 }
 0x12d   : > { %v12392_v2 = vcombine.low %v1136_v30, %v1169_v56  ;;  %v12394_v3 = vcombine.low %v1143_v31, %v1185_v58  ;;  %v1215_v22 = vrot.slane %v12393_v59, %v14008_v15  ;;  %v1229_v24 = vrot.slane %v12395_v60, %v14008_v15 }
 0x12e   : > { %v1266_v7 = vcombine.low %v1237_v51, %v1262_v61  ;;  %v1267_v9 = vcombine.low %v1245_v52, %v1263_v62  ;;  %v1268_v10 = vcombine.low %v1253_v53, %v1264_v63  ;;  %v1269_v11 = vcombine.low %v1261_v54, %v1265_v0 }
 0x12f   : > { %v1208_v21 = vrot.slane %v12392_v2, %v14008_v15  ;;  %v1222_v23 = vrot.slane %v12394_v3, %v14008_v15  ;;  %v14064_v30 = vcombine.high %v14046_v13, %v14046_v13  ;;  %v1838_v31 = vcombine.low %v14046_v13, %v14049_v14 }
 0x130   : > { %v1280_v17 = vrot.slane %v1266_v7, %v14008_v15  ;;  %v1287_v18 = vrot.slane %v1267_v9, %v14008_v15  ;;  %v1294_v19 = vrot.slane %v1268_v10, %v14008_v15  ;;  %v1301_v20 = vrot.slane %v1269_v11, %v14008_v15 }
 0x131   : > { %v14069_v32 = vsel %vm1370_vm0, %v1367_v5, 0  ;;  %v14072_v33 = vsel %vm1370_vm0, %v1369_v16, 0  ;;  %v14079_v56 = vrot.slane %v1838_v31, %v13730_v57 }
 0x132   : > { %v1306_v25 = vrot.slane %v1280_v17, 4  ;;  %v1307_v26 = vrot.slane %v1287_v18, 4  ;;  %v1308_v28 = vrot.slane %v1294_v19, 4  ;;  %v1309_v29 = vrot.slane %v1301_v20, 4 }
 0x133   : > { %v1658_v19 = vunpack.i.h.s16 %v14046_v13 }
 0x134   : > { %v1315_v37 = vsel %vm1314_vm1, %v1208_v21, %v1306_v25  ;;  %v1316_v38 = vsel %vm1314_vm1, %v1215_v22, %v1307_v26  ;;  %v1317_v39 = vsel %vm1314_vm1, %v1222_v23, %v1308_v28  ;;  %v1318_v40 = vsel %vm1314_vm1, %v1229_v24, %v1309_v29 }
 0x135   : > { %v1323_v41 = vcombine.high %v1315_v37, %v1315_v37  ;;  %v1324_v42 = vcombine.high %v1316_v38, %v1316_v38  ;;  %v1338_v43 = vadd.f32 %v12400_v49, %v1315_v37  ;;  %v1340_v44 = vadd.f32 %v12400_v49, %v1316_v38 }
 0x136   : > { %v1325_v45 = vcombine.high %v1317_v39, %v1317_v39  ;;  %v1342_v46 = vadd.f32 %v12400_v49, %v1317_v39  ;;  %v1326_v47 = vcombine.high %v1318_v40, %v1318_v40  ;;  %v1344_v48 = vadd.f32 %v12400_v49, %v1318_v40 }
 0x137   : > { %v1339_v50 = vadd.f32 %v12400_v49, %v1323_v41  ;;  %v1341_v51 = vadd.f32 %v12400_v49, %v1324_v42  ;;  %v1354_v52 = vpack.c.bf16 %v1338_v43, %v1338_v43  ;;  %v1358_v53 = vpack.c.bf16 %v1340_v44, %v1340_v44 }
 0x138   : > { %v1343_v54 = vadd.f32 %v12400_v49, %v1325_v45  ;;  %v1362_v55 = vpack.c.bf16 %v1342_v46, %v1342_v46  ;;  %v14081_v58 = vadd.f32 %v12400_v49, %v1326_v47  ;;  %v1366_v9 = vpack.c.bf16 %v1344_v48, %v1344_v48 }
 0x139   : > { %v1356_v59 = vpack.c.bf16 %v1339_v50, %v1339_v50  ;;  %v1360_v60 = vpack.c.bf16 %v1341_v51, %v1341_v51  ;;  %v1373_v61 = vsel %vm1370_vm0, %v1354_v52, 0  ;;  %v1381_v62 = vsel %vm1370_vm0, %v1358_v53, 0 }
 0x13a   : > { %v1421_v63 = vcombine.low %v1373_v61, %v14011_v27  ;;  %v1469_v0 = vcombine.low %v1381_v62, %v14024_v35  ;;  %v1364_v1 = vpack.c.bf16 %v1343_v54, %v1343_v54  ;;  %v1389_v2 = vsel %vm1370_vm0, %v1362_v55, 0 }
 0x13b   : > { %v1377_v3 = vsel %vm1370_vm0, %v1356_v59, 0  ;;  %v1385_v5 = vsel %vm1370_vm0, %v1360_v60, 0  ;;  %v1541_v7 = vcombine.low %v1389_v2, %v14040_v4  ;;  %v1368_v18 = vpack.c.bf16 %v14081_v58, %v14081_v58 }
 0x13c   : > { %v1428_v10 = vrot.slane %v1421_v63, %v13730_v57  ;;  %v1445_v11 = vcombine.low %v1377_v3, %v14021_v34  ;;  %v1476_v16 = vrot.slane %v1469_v0, %v13730_v57  ;;  %v1493_v27 = vcombine.low %v1385_v5, %v14027_v36 }
 0x13d   : > { %v1393_v35 = vsel %vm1370_vm0, %v1364_v1, 0  ;;  %v1548_v17 = vrot.slane %v1541_v7, %v13730_v57  ;;  %v14105_v24 = vsel %vm1370_vm0, %v1366_v9, 0 }
 0x13e   : > { %v1429_v20 = vcombine.high %v1428_v10, %v1428_v10  ;;  %v1436_v4 = vrot.slane %v1428_v10, %v13730_v57  ;;  %v1452_v21 = vrot.slane %v1445_v11, %v13730_v57  ;;  %v1477_v22 = vcombine.high %v1476_v16, %v1476_v16 }
 0x13f   : > { %v1484_v34 = vrot.slane %v1476_v16, %v13730_v57  ;;  %v1500_v23 = vrot.slane %v1493_v27, %v13730_v57  ;;  %v1549_v36 = vcombine.high %v1548_v17, %v1548_v17  ;;  %v1556_v38 = vrot.slane %v1548_v17, %v13730_v57 }
 0x140   : > { %v1443_v25 = vrot.slane %v1429_v20, %v13730_v57  ;;  %v1444_v26 = vcombine.high %v1436_v4, %v1436_v4  ;;  %v1453_v28 = vcombine.high %v1452_v21, %v1452_v21  ;;  %v1460_v29 = vrot.slane %v1452_v21, %v13730_v57 }
 0x141   : > { %v1492_v49 = vcombine.high %v1484_v34, %v1484_v34  ;;  %v1508_v31 = vrot.slane %v1500_v23, %v13730_v57  ;;  %v1501_v37 = vcombine.high %v1500_v23, %v1500_v23  ;;  %v1491_v40 = vrot.slane %v1477_v22, %v13730_v57 }
 0x142   : > { %v1467_v39 = vrot.slane %v1453_v28, %v13730_v57  ;;  %v1643_v41 = vunpack.i.h.s16 %v1460_v29  ;;  %v12401_v42 = vpack.i.b16 %v1460_v29, %v1444_v26  ;;  %v1468_v43 = vcombine.high %v1460_v29, %v1460_v29 }
 0x143   : > { %v12404_v44 = vpack.i.b16 %v1508_v31, %v1492_v49  ;;  %v1771_v45 = vcombine.low %v1436_v4, %v1443_v25  ;;  %v1515_v46 = vrot.slane %v1501_v37, %v13730_v57  ;;  %v1516_v50 = vcombine.high %v1508_v31, %v1508_v31 }
 0x144   : > { %v1645_v47 = vunpack.i.h.s16 %v1467_v39  ;;  %v12402_v48 = vpack.i.b16 %v1467_v39, %v1643_v41  ;;  %v1563_v51 = vrot.slane %v1549_v36, %v13730_v57  ;;  %v1564_v53 = vcombine.high %v1556_v38, %v1556_v38 }
 0x145   : > { %v1774_v52 = vcombine.low %v1491_v40, %v12404_v44  ;;  %v1565_v54 = vcombine.low %v1393_v35, %v14043_v12  ;;  %v1653_v55 = vunpack.i.h.s16 %v1508_v31  ;;  %v1655_v60 = vunpack.i.h.s16 %v1515_v46 }
 0x146   : > { %v12403_v58 = vpack.i.b16 %v1468_v43, %v1645_v47  ;;  %v1772_v59 = vcombine.low %v12401_v42, %v12402_v48  ;;  %v1663_v61 = vunpack.i.h.s16 %v1556_v38  ;;  %v1781_v62 = vrot.slane %v1771_v45, %v13730_v57 }
 0x147   : > { %v1802_v63 = vrot.slane %v1774_v52, %v13730_v57  ;;  %v1572_v0 = vrot.slane %v1565_v54, %v13730_v57  ;;  %v1665_v1 = vunpack.i.h.s16 %v1563_v51  ;;  %v12405_v5 = vpack.i.b16 %v1515_v46, %v1653_v55 }
 0x148   : > { %v1773_v2 = vcombine.low %v12403_v58, %v1484_v34  ;;  %v1788_v3 = vrot.slane %v1772_v59, %v13730_v57  ;;  %v12406_v7 = vpack.i.b16 %v1516_v50, %v1655_v60  ;;  %v12407_v12 = vpack.i.b16 %v1556_v38, %v14064_v30 }
 0x149   : > { %v1580_v9 = vrot.slane %v1572_v0, %v13730_v57  ;;  %v12408_v10 = vpack.i.b16 %v1563_v51, %v1663_v61  ;;  %v12409_v11 = vpack.i.b16 %v1564_v53, %v1665_v1  ;;  %v1401_v21 = vsel %vm1370_vm0, %v1368_v18, 0 }
 0x14a   : > { %v1795_v16 = vrot.slane %v1773_v2, %v13730_v57  ;;  %v1804_v27 = vcombine.high %v1781_v62, %v1788_v3  ;;  %v1803_v35 = vcombine.low %v1781_v62, %v1788_v3  ;;  %v1837_v17 = vcombine.low %v12405_v5, %v12406_v7 }
 0x14b   : > { %v1839_v20 = vcombine.low %v12407_v12, %v12408_v10  ;;  %v1840_v4 = vcombine.low %v12409_v11, %v1580_v9  ;;  %v1573_v22 = vcombine.high %v1572_v0, %v1572_v0  ;;  %v1588_v25 = vcombine.high %v1580_v9, %v1580_v9 }
 0x14c   : > { %v1806_v34 = vcombine.high %v1795_v16, %v1802_v63  ;;  %v1820_v23 = vrot.slane %v1804_v27, %v13730_v57  ;;  %v1805_v36 = vcombine.low %v1795_v16, %v1802_v63  ;;  %v1847_v26 = vrot.slane %v1837_v17, %v13730_v57 }
 0x14d   : > { %v1861_v28 = vrot.slane %v1839_v20, %v13730_v57  ;;  %v1868_v29 = vrot.slane %v1840_v4, %v13730_v57  ;;  %v1589_v49 = vcombine.low %v14105_v24, %v14069_v32  ;;  %v1813_v37 = vrot.slane %v1803_v35, %v13730_v57  ;;  %v13329_v24 = vld [vmem:[%s18300_s8] ss:$36 sps:$4 sm:$0xff]  }
 0x14e   : > { %v1834_v31 = vrot.slane %v1806_v34, %v13730_v57  ;;  %v1827_v18 = vrot.slane %v1805_v36, %v13730_v57  ;;  %v1613_v38 = vcombine.low %v1401_v21, %v14072_v33  ;;  %v1870_v39 = vcombine.high %v1847_v26, %v14079_v56 }
 0x14f   : > { %v1872_v40 = vcombine.high %v1861_v28, %v1868_v29  ;;  %v1869_v41 = vcombine.low %v1847_v26, %v14079_v56  ;;  %v1871_v42 = vcombine.low %v1861_v28, %v1868_v29  ;;  %v1596_v45 = vrot.slane %v1589_v49, %v13730_v57  ;;  %v13334_v26 = vld [vmem:[%s18300_s8 + $0xc] ss:$36 sps:$4 sm:$0xff]  }
 0x150   : > { %v1836_v43 = vcombine.low %v1820_v23, %v1834_v31  ;;  %v1835_v44 = vcombine.low %v1813_v37, %v1827_v18  ;;  %v1620_v32 = vrot.slane %v1613_v38, %v13730_v57  ;;  %v1886_v46 = vrot.slane %v1870_v39, %v13730_v57  ;;  %4111 = vmatprep.subr.bf16.mxu1 %v13334_v26  ;;  %v13335_v28 = vld [vmem:[%s18300_s8 + $0x48] ss:$36 sps:$4 sm:$0xff]   ;;  %v13338_v49 = vld [vmem:[%s18300_s8 + $0x50] ss:$36 sps:$4 sm:$0xff]   ;;  %v13346_v18 = vld [vmem:[%s18300_s8 + $0x9c] ss:$36 sps:$4 sm:$0xff]  }
 0x151   : > { %v1900_v33 = vrot.slane %v1872_v40, %v13730_v57  ;;  %v1879_v47 = vrot.slane %v1869_v41, %v13730_v57  ;;  %v1893_v48 = vrot.slane %v1871_v42, %v13730_v57  ;;  %v1597_v56 = vcombine.high %v1596_v45, %v1596_v45  ;;  %v13337_v29 = vld [vmem:[%s18300_s8 + $0x4c] ss:$36 sps:$4 sm:$0xff]   ;;  %v13340_v31 = vld [vmem:[%s18300_s8 + $0x54] ss:$36 sps:$4 sm:$0xff]   ;;  %v13349_v40 = vld [vmem:[%s18300_s8 + $0xdc] ss:$36 sps:$4 sm:$0xff]  }
 0x152   : > { %2351 = vmatprep.mubr.bf16.mxu0 %v1836_v43  ;;  %2420 = vmatprep.mubr.bf16.mxu1 %v1836_v43  ;;  %v1604_v50 = vrot.slane %v1596_v45, %v13730_v57  ;;  %v1621_v51 = vcombine.high %v1620_v32, %v1620_v32  ;;  %v1628_v54 = vrot.slane %v1620_v32, %v13730_v57  ;;  %v13343_v37 = vld [vmem:[%s18300_s8 + $0x94] ss:$36 sps:$4 sm:$0xff]   ;;  %v13352_v41 = vld [vmem:[%s18300_s8 + $0xe4] ss:$36 sps:$4 sm:$0xff]  }
 0x153   : > { %2352 = vmatmul.mubr.bf16.vlgmr.msra.gmra.mrb[4].mxu0 %v1835_v44  ;;  %2421 = vmatmul.mubr.bf16.vlgmr.msra.gmra.mrb[4].mxu1 %v1835_v44  ;;  %v1902_v52 = vcombine.low %v1886_v46, %v1900_v33  ;;  %v1901_v53 = vcombine.low %v1879_v47, %v1893_v48  ;;  %v1611_v55 = vrot.slane %v1597_v56, %v13730_v57  ;;  %v13341_v38 = vld [vmem:[%s18300_s8 + $0x90] ss:$36 sps:$4 sm:$0xff]   ;;  %v13344_v39 = vld [vmem:[%s18300_s8 + $0x98] ss:$36 sps:$4 sm:$0xff]   ;;  %v13350_v43 = vld [vmem:[%s18300_s8 + $0xe0] ss:$36 sps:$4 sm:$0xff]   ;;  %v1660_v46 = vunpack.i.h.s16 %v14049_v14 }
 0x154   : > { %v1635_v58 = vrot.slane %v1621_v51, %v13730_v57  ;;  %v1673_v59 = vunpack.i.h.s16 %v1604_v50  ;;  %v12414_v60 = vpack.i.b16 %v14049_v14, %v1658_v19  ;;  %4003 = vmatpush1.bf16.msra.mxu0 %v13329_v24  ;;  %v1587_v61 = vrot.slane %v1573_v22, %v13730_v57  ;;  %v13347_v42 = vld [vmem:[%s18300_s8 + $0xd8] ss:$36 sps:$4 sm:$0xff]   ;;  %v13353_v44 = vld [vmem:[%s18300_s8 + $0x120] ss:$36 sps:$4 sm:$0xff]   ;;  %v13356_v32 = vld [vmem:[%s18300_s8 + $0x128] ss:$36 sps:$4 sm:$0xff]  }
 0x155   : > { %2361 = vmatprep.mubr.bf16.mxu0 %v1902_v52  ;;  %2430 = vmatprep.mubr.bf16.mxu1 %v1902_v52  ;;  %v1636_v62 = vcombine.high %v1628_v54, %v1628_v54  ;;  %v12410_v63 = vpack.i.b16 %v1604_v50, %v1588_v25  ;;  %v1612_v0 = vcombine.high %v1604_v50, %v1604_v50  ;;  %v1675_v1 = vunpack.i.h.s16 %v1611_v55  ;;  %v13332_v25 = vld [vmem:[%s18300_s8 + $0x8] ss:$36 sps:$4 sm:$0xff]   ;;  %v13364_v51 = vld [vmem:[%s18300_s8 + $0x174] ss:$36 sps:$4 sm:$0xff]  }
 0x156   : > { %v1905_v5 = vcombine.low %v1628_v54, %v1635_v58  ;;  %v12411_v7 = vpack.i.b16 %v1611_v55, %v1673_v59  ;;  %4112 = vmatpush1.bf16.msra.mxu1 %v13332_v25  ;;  %4004 = vmatprep.subr.bf16.mxu0 %v13337_v29  ;;  %v13355_v45 = vld [vmem:[%s18300_s8 + $0x124] ss:$36 sps:$4 sm:$0xff]   ;;  %v13358_v24 = vld [vmem:[%s18300_s8 + $0x12c] ss:$36 sps:$4 sm:$0xff]   ;;  %v12415_v47 = vpack.i.b16 %v14064_v30, %v1660_v46  ;;  %v13370_v55 = vld [vmem:[%s18300_s8 + $0x1bc] ss:$36 sps:$4 sm:$0xff]  }
 0x157   : > { %v12413_v2 = vpack.i.b16 %v14046_v13, %v1636_v62  ;;  %v1903_v3 = vcombine.low %v1587_v61, %v12410_v63  ;;  %v12412_v9 = vpack.i.b16 %v1612_v0, %v1675_v1  ;;  %4113 = vmatprep.subr.bf16.mxu1 %v13340_v31  ;;  %v13361_v33 = vld [vmem:[%s18300_s8 + $0x16c] ss:$36 sps:$4 sm:$0xff]   ;;  %v13368_v58 = vld [vmem:[%s18300_s8 + $0x1b8] ss:$36 sps:$4 sm:$0xff]   ;;  %v13374_v62 = vld [vmem:[%s18300_s8 + $0x200] ss:$36 sps:$4 sm:$0xff]   ;;  %v14268_v1 = vpop.permute.xlu0 %12968 }
 0x158   : > { %v1927_v19 = vrot.slane %v1905_v5, %v13730_v57  ;;  %4005 = vmatpush1.bf16.msra.mxu0 %v13335_v28  ;;  %v13359_v48 = vld [vmem:[%s18300_s8 + $0x168] ss:$36 sps:$4 sm:$0xff]   ;;  %v1975_v56 = vrot.slane %v12415_v47, %v13730_v57  ;;  %v13362_v52 = vld [vmem:[%s18300_s8 + $0x170] ss:$36 sps:$4 sm:$0xff]   ;;  %v13373_v59 = vld [vmem:[%s18300_s8 + $0x1fc] ss:$36 sps:$4 sm:$0xff]  }
 0x159   : > { %v1906_v12 = vcombine.low %v12413_v2, %v12414_v60  ;;  %v1904_v10 = vcombine.low %v12411_v7, %v12412_v9  ;;  %v1913_v11 = vrot.slane %v1903_v3, %v13730_v57  ;;  %4006 = vmatprep.subr.bf16.mxu0 %v13343_v37  ;;  %v13365_v54 = vld [vmem:[%s18300_s8 + $0x1b0] ss:$36 sps:$4 sm:$0xff]   ;;  %v13376_v60 = vld [vmem:[%s18300_s8 + $0x204] ss:$36 sps:$4 sm:$0xff]   ;;  %v13371_v61 = vld [vmem:[%s18300_s8 + $0x1f8] ss:$36 sps:$4 sm:$0xff]   ;;  %v14272_v3 = vpop.permute.xlu1 %12978 }
 0x15a   : > { %4114 = vmatpush1.bf16.msra.mxu1 %v13338_v49  ;;  %v1976_v50 = vcombine.high %v1975_v56, %v1975_v56  ;;  %v1983_v30 = vrot.slane %v1975_v56, %v13730_v57  ;;  %v13379_v63 = vld [vmem:[%s18300_s8 + $0x14] ss:$36 sps:$4 sm:$0xff]   ;;  %v14265_v0 = vld [vmem:[%s18300_s8 + $0x1c] ss:$36 sps:$4 sm:$0xff]  }
 0x15b   : > { %2362 = vmatmul.mubr.bf16.gmra.mrb[8].mxu0 %v1901_v53  ;;  %2431 = vmatmul.mubr.bf16.gmra.mrb[8].mxu1 %v1901_v53  ;;  %v1934_v16 = vrot.slane %v1906_v12, %v13730_v57  ;;  %v1920_v27 = vrot.slane %v1904_v10, %v13730_v57  ;;  %v13367_v53 = vld [vmem:[%s18300_s8 + $0x1b4] ss:$36 sps:$4 sm:$0xff]   ;;  %v14270_v2 = vpop.permute.xlu0 %12973  ;;  %v12971_v10 = vunpack.i.h.bf16 %v14268_v1 }
 0x15c   : > { %4115 = vmatprep.subr.bf16.mxu1 %v13346_v18  ;;  %4007 = vmatpush1.bf16.msra.mxu0 %v13341_v38  ;;  %v1990_v14 = vrot.slane %v1976_v50, %v13730_v57 }
 0x15d   : > { %v1938_v35 = vcombine.high %v1927_v19, %v1934_v16  ;;  %v1937_v17 = vcombine.low %v1927_v19, %v1934_v16  ;;  %v1936_v20 = vcombine.high %v1913_v11, %v1920_v27  ;;  %v1935_v13 = vcombine.low %v1913_v11, %v1920_v27  ;;  %4008 = vmatprep.subr.bf16.mxu0 %v13349_v40 }
 0x15e   : > { %4116 = vmatpush1.bf16.msra.mxu1 %v13344_v39 }
 0x15f   : > { %v1966_v4 = vrot.slane %v1938_v35, %v13730_v57  ;;  %v1959_v21 = vrot.slane %v1937_v17, %v13730_v57  ;;  %v1952_v22 = vrot.slane %v1936_v20, %v13730_v57  ;;  %v1945_v34 = vrot.slane %v1935_v13, %v13730_v57  ;;  %4117 = vmatprep.subr.bf16.mxu1 %v13352_v41 }
 0x160   : > { %4009 = vmatpush1.bf16.msra.mxu0 %v13347_v42 }
 0x161   : > { %v1968_v23 = vcombine.low %v1952_v22, %v1966_v4  ;;  %v1967_v36 = vcombine.low %v1945_v34, %v1959_v21  ;;  %4010 = vmatprep.subr.bf16.mxu0 %v13355_v45  ;;  %v12970_v4 = vunpack.i.l.bf16 %v14268_v1  ;;  %v12976_v21 = vunpack.i.h.bf16 %v14270_v2 }
 0x162   : > { %4118 = vmatpush1.bf16.msra.mxu1 %v13350_v43  ;;  %v12975_v22 = vunpack.i.l.bf16 %v14270_v2  ;;  %v12980_v34 = vunpack.i.l.bf16 %v14272_v3 }
 0x163   : > { %2371 = vmatprep.mubr.bf16.mxu0 %v1968_v23  ;;  %2440 = vmatprep.mubr.bf16.mxu1 %v1968_v23 }
 0x164   : > { %2372 = vmatmul.mubr.bf16.gmra.mrb[12].mxu0 %v1967_v36  ;;  %2441 = vmatmul.mubr.bf16.gmra.mrb[12].mxu1 %v1967_v36 }
 0x165   : > { %4011 = vmatpush1.bf16.msra.mxu0 %v13353_v44  ;;  %4119 = vmatprep.subr.bf16.mxu1 %v13358_v24  ;;  %v14287_v44 = vpop.permute.xlu0 %12983 }
 0x166   : > { %4120 = vmatpush1.bf16.msra.mxu1 %v13356_v32  ;;  %4012 = vmatprep.subr.bf16.mxu0 %v13361_v33 }
 0x167   : > { %2381 = vmatprep.mubr.bf16.mxu0 %v1990_v14  ;;  %4121 = vmatprep.subr.bf16.mxu1 %v13364_v51 }
 0x168   : > { %2450 = vmatprep.mubr.bf16.mxu1 %v1990_v14 }
 0x169   : > { %4013 = vmatpush1.bf16.msra.mxu0 %v13359_v48 }
 0x16a   : > { %4122 = vmatpush1.bf16.msra.mxu1 %v13362_v52  ;;  %4014 = vmatprep.subr.bf16.mxu0 %v13367_v53 }
 0x16b   : > { %4123 = vmatprep.subr.bf16.mxu1 %v13370_v55 }
 0x16c   : > { %2382 = vmatmul.mubr.bf16.gmra.mrb[16].mxu0 %v1983_v30  ;;  %2451 = vmatmul.mubr.bf16.gmra.mrb[16].mxu1 %v1983_v30 }
 0x16d   : > { %4034 = vmatprep.mubr.bf16.mxu0 %v18305_v6  ;;  %4143 = vmatprep.mubr.bf16.mxu1 %v18305_v6 }
 0x16e   : > { %4015 = vmatpush1.bf16.msra.mxu0 %v13365_v54  ;;  %4124 = vmatpush1.bf16.msra.mxu1 %v13368_v58 }
 0x16f   : > { %4016 = vmatprep.subr.bf16.mxu0 %v13373_v59  ;;  %4125 = vmatprep.subr.bf16.mxu1 %v13376_v60 }
 0x172   : > { %4017 = vmatpush1.bf16.msra.mxu0 %v13371_v61  ;;  %4126 = vmatpush1.bf16.msra.mxu1 %v13374_v62 }
 0x173   : > { %4220 = vmatprep.subr.bf16.mxu0 %v13379_v63  ;;  %12935 = vmatprep.subr.bf16.mxu1 %v14265_v0 }
 0x226   : > { %v2353_v5 = vpop.f32.mrb[4].mxu0  ;;  %v2422_v7 = vpop.f32.mrb[4].mxu1 }
 0x227   : > { %v2355_v9 = vpop.f32.mrb[5].mxu0  ;;  %v2424_v12 = vpop.f32.mrb[5].mxu1 }
 0x228   : > { %v2481_v11 = vcombine.low %v2353_v5, %v2355_v9  ;;  %v2482_v19 = vcombine.high %v2353_v5, %v2355_v9  ;;  %v2483_v16 = vcombine.low %v2422_v7, %v2424_v12  ;;  %v2484_v27 = vcombine.high %v2422_v7, %v2424_v12  ;;  %v2357_v35 = vpop.f32.mrb[6].mxu0  ;;  %v2426_v17 = vpop.f32.mrb[6].mxu1 }
 0x229   : > { %v2359_v20 = vpop.f32.mrb[7].mxu0  ;;  %v2428_v13 = vpop.f32.mrb[7].mxu1 }
 0x22a   : > { %v2491_v23 = vrot.slane %v2481_v11, %v13730_v57  ;;  %v2498_v36 = vrot.slane %v2482_v19, %v13730_v57  ;;  %v2505_v25 = vrot.slane %v2483_v16, %v13730_v57  ;;  %v2512_v26 = vrot.slane %v2484_v27, %v13730_v57 }
 0x22b   : > { %v2549_v28 = vcombine.low %v2357_v35, %v2359_v20  ;;  %v2550_v29 = vcombine.high %v2357_v35, %v2359_v20  ;;  %v2551_v49 = vcombine.low %v2426_v17, %v2428_v13  ;;  %v2552_v31 = vcombine.high %v2426_v17, %v2428_v13 }
 0x22c   : > { %v2513_v37 = vcombine.low %v2491_v23, %v2505_v25  ;;  %v2514_v18 = vcombine.high %v2491_v23, %v2505_v25  ;;  %v2515_v38 = vcombine.low %v2498_v36, %v2512_v26  ;;  %v2516_v39 = vcombine.high %v2498_v36, %v2512_v26 }
 0x22d   : > { %v2559_v40 = vrot.slane %v2549_v28, %v13730_v57  ;;  %v2566_v41 = vrot.slane %v2550_v29, %v13730_v57  ;;  %v2573_v42 = vrot.slane %v2551_v49, %v13730_v57  ;;  %v2580_v43 = vrot.slane %v2552_v31, %v13730_v57 }
 0x22e   : > { %v2523_v45 = vrot.slane %v2513_v37, %v13730_v57  ;;  %v2530_v32 = vrot.slane %v2515_v38, %v13730_v57  ;;  %v2537_v24 = vrot.slane %v2514_v18, %v13730_v57  ;;  %v2544_v46 = vrot.slane %v2516_v39, %v13730_v57  ;;  %v2363_v33 = vpop.f32.mrb[8].mxu0  ;;  %v2432_v47 = vpop.f32.mrb[8].mxu1 }
 0x22f   : > { %v2581_v48 = vcombine.low %v2559_v40, %v2573_v42  ;;  %v2582_v56 = vcombine.high %v2559_v40, %v2573_v42  ;;  %v2583_v50 = vcombine.low %v2566_v41, %v2580_v43  ;;  %v2584_v14 = vcombine.high %v2566_v41, %v2580_v43  ;;  %v2365_v51 = vpop.f32.mrb[9].mxu0  ;;  %v2434_v52 = vpop.f32.mrb[9].mxu1 }
 0x230   : > { %v2545_v30 = vcombine.high %v2523_v45, %v2523_v45  ;;  %v2546_v53 = vcombine.high %v2530_v32, %v2530_v32  ;;  %v2547_v54 = vcombine.high %v2537_v24, %v2537_v24  ;;  %v2548_v55 = vcombine.high %v2544_v46, %v2544_v46  ;;  %v2367_v58 = vpop.f32.mrb[10].mxu0  ;;  %v2436_v59 = vpop.f32.mrb[10].mxu1 }
 0x231   : > { %v2845_v60 = vcombine.low %v2523_v45, %v2537_v24  ;;  %v12480_v61 = vcombine.high %v2523_v45, %v2537_v24  ;;  %v12484_v62 = vcombine.high %v2530_v32, %v2544_v46  ;;  %v2591_v63 = vrot.slane %v2581_v48, %v13730_v57  ;;  %v2369_v5 = vpop.f32.mrb[11].mxu0  ;;  %v2438_v7 = vpop.f32.mrb[11].mxu1 }
 0x232   : > { %v14294_v9 = vcombine.low %v2544_v46, %v2546_v53  ;;  %v14296_v12 = vcombine.low %v2537_v24, %v2545_v30  ;;  %v14298_v11 = vcombine.low %v2547_v54, %v2530_v32  ;;  %v2598_v19 = vrot.slane %v2583_v50, %v13730_v57 }
 0x233   : > { %v14302_v16 = vrot.slane %v2845_v60, %v13730_v57  ;;  %v2605_v27 = vrot.slane %v2582_v56, %v13730_v57  ;;  %v12981_v35 = vunpack.i.h.bf16 %v14272_v3  ;;  %v14308_v20 = vrot.slane %v12480_v61, %v13730_v57 }
 0x234   : > { %v2878_v13 = vrot.slane %v14294_v9, %v13730_v57  ;;  %v14313_v23 = vrot.slane %v12484_v62, %v13730_v57  ;;  %v2612_v36 = vrot.slane %v2584_v14, %v13730_v57  ;;  %v2614_v25 = vcombine.high %v2598_v19, %v2598_v19 }
 0x235   : > { %v2615_v26 = vcombine.high %v2605_v27, %v2605_v27  ;;  %v14316_v28 = vcombine.low %v2548_v55, %v2591_v63  ;;  %v12481_v29 = vcombine.high %v2591_v63, %v2605_v27  ;;  %v3053_v49 = vrot.slane %v14296_v12, %v13730_v57 }
 0x236   : > { %v2896_v31 = vcombine.low %v2598_v19, %v2612_v36  ;;  %v3071_v37 = vcombine.low %v2591_v63, %v2605_v27  ;;  %v2617_v18 = vcombine.low %v2363_v33, %v2365_v51  ;;  %v3060_v38 = vrot.slane %v14298_v11, %v13730_v57 }
 0x237   : > { %v2616_v39 = vcombine.high %v2612_v36, %v2612_v36  ;;  %v14322_v40 = vcombine.low %v2615_v26, %v2598_v19  ;;  %v14324_v41 = vcombine.low %v2612_v36, %v2614_v25  ;;  %v2885_v42 = vrot.slane %v14316_v28, %v13730_v57  ;;  %v2373_v24 = vpop.f32.mrb[12].mxu0  ;;  %v2442_v46 = vpop.f32.mrb[12].mxu1 }
 0x238   : > { %v14329_v43 = vrot.slane %v12481_v29, %v13730_v57  ;;  %v2625_v45 = vrot.slane %v2617_v18, %v13730_v57  ;;  %v2618_v32 = vcombine.low %v2432_v47, %v2434_v52  ;;  %v14333_v33 = vrot.slane %v2896_v31, %v13730_v57  ;;  %v2375_v14 = vpop.f32.mrb[13].mxu0  ;;  %v2444_v51 = vpop.f32.mrb[13].mxu1 }
 0x239   : > { %v14336_v48 = vrot.slane %v3071_v37, %v13730_v57  ;;  %v2651_v56 = vcombine.low %v2367_v58, %v2369_v5  ;;  %v2652_v50 = vcombine.high %v2367_v58, %v2369_v5  ;;  %v2653_v53 = vcombine.low %v2436_v59, %v2438_v7  ;;  %v14339_v60 = vpop.f32.mrb[14].mxu0  ;;  %v14341_v47 = vpop.f32.mrb[14].mxu1 }
 0x23a   : > { %v2632_v30 = vrot.slane %v2618_v32, %v13730_v57  ;;  %v2654_v54 = vcombine.high %v2436_v59, %v2438_v7  ;;  %v2719_v55 = vcombine.low %v2373_v24, %v2375_v14  ;;  %v2720_v62 = vcombine.high %v2373_v24, %v2375_v14  ;;  %v14345_v19 = vpop.f32.mrb[15].mxu0  ;;  %v14347_v58 = vpop.f32.mrb[15].mxu1 }
 0x23b   : > { %v2661_v52 = vrot.slane %v2651_v56, %v13730_v57  ;;  %v2668_v61 = vrot.slane %v2652_v50, %v13730_v57  ;;  %v2721_v63 = vcombine.low %v2442_v46, %v2444_v51  ;;  %v2675_v36 = vrot.slane %v2653_v53, %v13730_v57 }
 0x23c   : > { %v2633_v5 = vcombine.low %v2625_v45, %v2632_v30  ;;  %v2634_v27 = vcombine.high %v2625_v45, %v2632_v30  ;;  %v2682_v59 = vrot.slane %v2654_v54, %v13730_v57  ;;  %v3103_v7 = vrot.slane %v14322_v40, %v13730_v57 }
 0x23d   : > { %v2729_v25 = vrot.slane %v2719_v55, %v13730_v57  ;;  %v2722_v26 = vcombine.high %v2442_v46, %v2444_v51  ;;  %v2743_v29 = vrot.slane %v2721_v63, %v13730_v57  ;;  %v2683_v18 = vcombine.low %v2661_v52, %v2675_v36 }
 0x23e   : > { %v2641_v31 = vrot.slane %v2633_v5, %v13730_v57  ;;  %v2648_v37 = vrot.slane %v2634_v27, %v13730_v57  ;;  %v2684_v32 = vcombine.high %v2661_v52, %v2675_v36  ;;  %v2685_v24 = vcombine.low %v2668_v61, %v2682_v59 }
 0x23f   : > { %v2686_v45 = vcombine.high %v2668_v61, %v2682_v59  ;;  %v2736_v56 = vrot.slane %v2720_v62, %v13730_v57  ;;  %v2751_v50 = vcombine.low %v2729_v25, %v2743_v29  ;;  %v2693_v55 = vrot.slane %v2683_v18, %v13730_v57 }
 0x240   : > { %v2649_v14 = vcombine.high %v2641_v31, %v2641_v31  ;;  %v2920_v30 = vcombine.low %v2616_v39, %v2641_v31  ;;  %v3120_v53 = vcombine.low %v2641_v31, %v2648_v37  ;;  %v12485_v54 = vcombine.high %v2641_v31, %v2648_v37 }
 0x241   : > { %v2700_v46 = vrot.slane %v2685_v24, %v13730_v57  ;;  %v2707_v51 = vrot.slane %v2684_v32, %v13730_v57  ;;  %v2714_v63 = vrot.slane %v2686_v45, %v13730_v57  ;;  %v2750_v62 = vrot.slane %v2722_v26, %v13730_v57 }
 0x242   : > { %v2921_v5 = vcombine.low %v2648_v37, %v2649_v14  ;;  %v14363_v52 = vrot.slane %v3120_v53, %v13730_v57  ;;  %v14366_v61 = vrot.slane %v12485_v54, %v13730_v57  ;;  %v2928_v39 = vrot.slane %v2920_v30, %v13730_v57 }
 0x243   : > { %v2715_v27 = vcombine.high %v2693_v55, %v2693_v55  ;;  %v2717_v36 = vcombine.high %v2707_v51, %v2707_v51  ;;  %v12482_v59 = vcombine.high %v2700_v46, %v2714_v63  ;;  %v12486_v32 = vcombine.high %v2693_v55, %v2707_v51 }
 0x244   : > { %v2935_v31 = vrot.slane %v2921_v5, %v13730_v57  ;;  %v3136_v18 = vcombine.low %v14363_v52, %v14366_v61  ;;  %v3146_v37 = vcombine.low %v2700_v46, %v2714_v63  ;;  %v3110_v24 = vrot.slane %v14324_v41, %v13730_v57 }
 0x245   : > { %v14375_v45 = vcombine.low %v2707_v51, %v2715_v27  ;;  %v14377_v14 = vcombine.low %v2717_v36, %v2700_v46  ;;  %v2752_v26 = vcombine.high %v2729_v25, %v2743_v29  ;;  %v14382_v30 = vrot.slane %v12486_v32, %v13730_v57 }
 0x246   : > { %v14379_v53 = vcombine.high %v2928_v39, %v2935_v31  ;;  %v14385_v54 = vrot.slane %v3146_v37, %v13730_v57  ;;  %v2753_v5 = vcombine.low %v2736_v56, %v2750_v62  ;;  %v2718_v17 = vcombine.high %v2714_v63, %v2714_v63 }
 0x247   : > { %v14388_v55 = vrot.slane %v12482_v59, %v13730_v57  ;;  %v2754_v6 = vcombine.high %v2736_v56, %v2750_v62  ;;  %v2761_v41 = vrot.slane %v2751_v50, %v13730_v57  ;;  %v2775_v29 = vrot.slane %v2752_v26, %v13730_v57 }
 0x248   : > { %v3161_v46 = vcombine.low %v14382_v30, %v14385_v54  ;;  %v2768_v25 = vrot.slane %v2753_v5, %v13730_v57  ;;  %v2787_v51 = vcombine.low %v14339_v60, %v14345_v19  ;;  %v2788_v56 = vcombine.high %v14339_v60, %v14345_v19  ;;  %v13380_v54 = vld [vmem:[%s18300_s8 + $0x58] ss:$36 sps:$4 sm:$0xff]  }
 0x249   : > { %v2782_v39 = vrot.slane %v2754_v6, %v13730_v57  ;;  %v2783_v27 = vcombine.high %v2761_v41, %v2761_v41  ;;  %v14398_v63 = vcombine.low %v2718_v17, %v2761_v41  ;;  %v2953_v50 = vrot.slane %v14375_v45, %v13730_v57  ;;  %v13382_v45 = vld [vmem:[%s18300_s8 + $0x5c] ss:$36 sps:$4 sm:$0xff]  }
 0x24a   : > { %v2784_v62 = vcombine.high %v2768_v25, %v2768_v25  ;;  %v2785_v36 = vcombine.high %v2775_v29, %v2775_v29  ;;  %v2971_v59 = vcombine.low %v2761_v41, %v2775_v29  ;;  %v2960_v31 = vrot.slane %v14377_v14, %v13730_v57 }
 0x24b   : > { %v14406_v32 = vcombine.low %v2775_v29, %v2783_v27  ;;  %v3195_v37 = vcombine.low %v2768_v25, %v2782_v39  ;;  %v12487_v26 = vcombine.high %v2768_v25, %v2782_v39  ;;  %v3178_v60 = vrot.slane %v14398_v63, %v13730_v57 }
 0x24c   : > { %v14408_v6 = vcombine.low %v2785_v36, %v2768_v25  ;;  %v14410_v17 = vcombine.low %v2782_v39, %v2784_v62  ;;  %v2797_v19 = vrot.slane %v2787_v51, %v13730_v57  ;;  %v14416_v5 = vrot.slane %v2971_v59, %v13730_v57 }
 0x24d   : > { %v3185_v41 = vrot.slane %v14406_v32, %v13730_v57  ;;  %v2804_v29 = vrot.slane %v2788_v56, %v13730_v57  ;;  %v2789_v27 = vcombine.low %v14341_v47, %v14347_v58  ;;  %v14424_v25 = vrot.slane %v3195_v37, %v13730_v57 }
 0x24e   : > { %v14427_v39 = vrot.slane %v12487_v26, %v13730_v57  ;;  %v2790_v51 = vcombine.high %v14341_v47, %v14347_v58  ;;  %v2861_v62 = vcombine.high %v14302_v16, %v14308_v20  ;;  %v2886_v56 = vcombine.high %v2878_v13, %v2885_v42 }
 0x24f   : > { %v2811_v36 = vrot.slane %v2789_v27, %v13730_v57  ;;  %v3061_v47 = vcombine.low %v3053_v49, %v3060_v38  ;;  %v3086_v16 = vcombine.low %v14313_v23, %v14336_v48  ;;  %v2911_v28 = vcombine.high %v14329_v43, %v14333_v33 }
 0x250   : > { %v2818_v20 = vrot.slane %v2790_v51, %v13730_v57  ;;  %v2868_v58 = vrot.slane %v2861_v62, %v13730_v57  ;;  %v3111_v9 = vcombine.low %v3103_v7, %v3110_v24  ;;  %v2893_v12 = vrot.slane %v2886_v56, %v13730_v57  ;;  %v14480_v62 = vld [vmem:[%s18299_s7] ss:$0 sm:$0xff] }
 0x251   : > { %v2819_v11 = vcombine.low %v2797_v19, %v2811_v36  ;;  %v2820_v13 = vcombine.high %v2797_v19, %v2811_v36  ;;  %v3068_v49 = vrot.slane %v3061_v47, %v13730_v57  ;;  %v3093_v23 = vrot.slane %v3086_v16, %v13730_v57 }
 0x252   : > { %v2821_v38 = vcombine.low %v2804_v29, %v2818_v20  ;;  %v2918_v42 = vrot.slane %v2911_v28, %v13730_v57  ;;  %v3118_v48 = vrot.slane %v3111_v9, %v13730_v57  ;;  %v3003_v43 = vrot.slane %v14408_v6, %v13730_v57 }
 0x253   : > { %v14463_v33 = vrot.slane %v2819_v11, %v13730_v57  ;;  %v14466_v40 = vrot.slane %v2820_v13, %v13730_v57  ;;  %v12488_v7 = vcombine.high %v2868_v58, %v3068_v49  ;;  %v3317_v59 = vcombine.low %v2893_v12, %v3093_v23 }
 0x254   : > { %v2835_v24 = vrot.slane %v2821_v38, %v13730_v57  ;;  %v12489_v37 = vcombine.high %v2893_v12, %v3093_v23  ;;  %v3318_v26 = vcombine.low %v2918_v42, %v3118_v48  ;;  %v3010_v20 = vrot.slane %v14410_v17, %v13730_v57 }
 0x255   : > { %v2843_v19 = vcombine.high %v14463_v33, %v14463_v33  ;;  %v2844_v29 = vcombine.high %v14466_v40, %v14466_v40  ;;  %v3020_v27 = vcombine.low %v14463_v33, %v14466_v40  ;;  %v12483_v51 = vcombine.high %v14463_v33, %v14466_v40 }
 0x256   : > { %v3267_v36 = vrot.slane %v12488_v7, %v14008_v15  ;;  %v3335_v56 = vrot.slane %v3317_v59, %v14008_v15  ;;  %v3274_v47 = vrot.slane %v12489_v37, %v14008_v15  ;;  %v3342_v16 = vrot.slane %v3318_v26, %v14008_v15  ;;  %v14522_v26 = vpop.permute.xlu1 %3432 }
 0x257   : > { %v3220_v58 = vcombine.low %v14466_v40, %v2843_v19  ;;  %v3221_v28 = vcombine.low %v2844_v29, %v2835_v24  ;;  %v2943_v9 = vrot.slane %v14379_v53, %v13730_v57  ;;  %v3143_v17 = vrot.slane %v3136_v18, %v13730_v57 }
 0x258   : > { %v3378_v11 = vadd.f32 %v14480_v62, %v3267_v36  ;;  %v3379_v13 = vadd.f32 %v14480_v62, %v3335_v56  ;;  %v3380_v12 = vadd.f32 %v14480_v62, %v3274_v47  ;;  %v3381_v49 = vadd.f32 %v14480_v62, %v3342_v16 }
 0x259   : > { %v3228_v38 = vrot.slane %v3220_v58, %v13730_v57  ;;  %v3235_v23 = vrot.slane %v3221_v28, %v13730_v57  ;;  %v12490_v33 = vcombine.high %v2918_v42, %v3118_v48  ;;  %v3319_v37 = vcombine.low %v2943_v9, %v3143_v17 }
 0x25a   : > { %v3464_v40 = vsel %vm3462_vm3, %v3379_v13, %v12971_v10  ;;  %v3463_v7 = vsel %vm3462_vm3, %v3378_v11, %v12970_v4  ;;  %v3466_v52 = vsel %vm3462_vm3, %v3381_v49, %v12976_v21  ;;  %v3465_v61 = vsel %vm3462_vm3, %v3380_v12, %v12975_v22  ;;  %v13377_v22 = vld [vmem:[%s18300_s8 + $0x10] ss:$36 sps:$4 sm:$0xff]  }
 0x25b   : > { %v14519_v18 = vcombine.low %v3228_v38, %v3235_v23  ;;  %v3478_v42 = vpack.c.bf16 %v3464_v40, %v3464_v40  ;;  %v3477_v48 = vpack.c.bf16 %v3463_v7, %v3463_v7  ;;  %v3480_v24 = vpack.c.bf16 %v3466_v52, %v3466_v52 }
 0x25c   : > { %v3479_v59 = vpack.c.bf16 %v3465_v61, %v3465_v61  ;;  %v3281_v10 = vrot.slane %v12490_v33, %v14008_v15  ;;  %v12491_v1 = vcombine.high %v2943_v9, %v3143_v17  ;;  %v2961_v19 = vcombine.high %v2953_v50, %v2960_v31  ;;  %v14570_v9 = vld [vmem:[%s18300_s8 + $0x18] ss:$36 sps:$4 sm:$0xff]  }
 0x25d   : > { %v3495_v4 = vsel %vm14503_vm4, %v3478_v42, 0  ;;  %v3494_v2 = vsel %vm14503_vm4, %v3477_v48, 0  ;;  %v3497_v21 = vsel %vm14503_vm4, %v3480_v24, 0  ;;  %v3349_v56 = vrot.slane %v3319_v37, %v14008_v15  ;;  %v12994_v42 = vpop.permute.xlu0 %12993  ;;  %v13383_v37 = vld [vmem:[%s18300_s8 + $0xa0] ss:$36 sps:$4 sm:$0xff]  }
 0x25e   : > { %v14539_v29 = vcombine.low %v3494_v2, %v3495_v4  ;;  %v3496_v36 = vsel %vm14503_vm4, %v3479_v59, 0  ;;  %v3382_v47 = vadd.f32 %v14480_v62, %v3281_v10  ;;  %v3028_v16 = vrot.slane %v3020_v27, %v13730_v57 }
 0x25f   : > { %v14546_v58 = vcombine.low %v3496_v36, %v3497_v21  ;;  %v2968_v28 = vrot.slane %v2961_v19, %v13730_v57  ;;  %v2986_v14 = vcombine.high %v14388_v55, %v14416_v5  ;;  %v3383_v50 = vadd.f32 %v14480_v62, %v3349_v56  ;;  %v14565_v5 = vpop.permute.xlu1 %12988  ;;  %v13388_v36 = vld [vmem:[%s18300_s8 + $0xec] ss:$36 sps:$4 sm:$0xff]  }
 0x260   : > { %v3467_v31 = vsel %vm3462_vm3, %v3382_v47, %v12980_v34  ;;  %4035 = vmatmul.mubr.bf16.vlgmr.msra.gmra.mrb[20].mxu0 %v14539_v29  ;;  %4144 = vmatmul.mubr.bf16.vlgmr.msra.gmra.mrb[20].mxu1 %v14539_v29  ;;  %v3168_v27 = vrot.slane %v3161_v46, %v13730_v57  ;;  %v12986_v55 = vunpack.i.h.bf16 %v14287_v44  ;;  %v3035_v34 = vrot.slane %v12483_v51, %v13730_v57  ;;  %v14586_v46 = vld [vmem:[%s18300_s8 + $0x64] ss:$36 sps:$4 sm:$0xff]  }
 0x261   : > { %v3481_v11 = vpack.c.bf16 %v3467_v31, %v3467_v31  ;;  %4221 = vmatpush1.bf16.msra.mxu0 %v13377_v22  ;;  %v3288_v13 = vrot.slane %v12491_v1, %v14008_v15  ;;  %v3186_v30 = vcombine.low %v3178_v60, %v3185_v41  ;;  %v3468_v51 = vsel %vm3462_vm3, %v3383_v50, %v12981_v35  ;;  %v13385_v41 = vld [vmem:[%s18300_s8 + $0xa4] ss:$36 sps:$4 sm:$0xff]  }
 0x262   : > { %v12492_v12 = vcombine.high %v2968_v28, %v3168_v27  ;;  %v3011_v32 = vcombine.high %v3003_v43, %v3010_v20  ;;  %v3211_v63 = vcombine.low %v14424_v25, %v14427_v39  ;;  %v18405_v60 = vmov 0   ;;  %4222 = vmatprep.subr.bf16.mxu0 %v13382_v45  ;;  %12943 = vmatpush1.bf16.msra.mxu1 %v14570_v9  ;;  %v14629_v1 = vld [vmem:[%s18300_s8 + $0x60] ss:$36 sps:$4 sm:$0xff]  }
 0x263   : > { %4042 = vmatprep.mubr.bf16.mxu0 %v18405_v60  ;;  %v3482_v49 = vpack.c.bf16 %v3468_v51, %v3468_v51  ;;  %v2993_v38 = vrot.slane %v2986_v14, %v13730_v57  ;;  %v3193_v3 = vrot.slane %v3186_v30, %v13730_v57  ;;  %v12991_v35 = vunpack.i.h.bf16 %v14565_v5  ;;  %4152 = vmatprep.mubr.bf16.mxu1 %v18405_v60 }
 0x264   : > { %v3498_v6 = vsel %vm14503_vm4, %v3481_v11, 0  ;;  %v3295_v25 = vrot.slane %v12492_v12, %v14008_v15  ;;  %v3018_v39 = vrot.slane %v3011_v32, %v13730_v57  ;;  %v3218_v43 = vrot.slane %v3211_v63, %v13730_v57  ;;  %12936 = vmatprep.subr.bf16.mxu1 %v14586_v46  ;;  %v13386_v11 = vld [vmem:[%s18300_s8 + $0xe8] ss:$36 sps:$4 sm:$0xff]  }
 0x265   : > { %v3499_v20 = vsel %vm14503_vm4, %v3482_v49, 0  ;;  %v3320_v23 = vcombine.low %v2993_v38, %v3193_v3  ;;  %v12493_v17 = vcombine.high %v2993_v38, %v3193_v3  ;;  %v3036_v33 = vcombine.high %v3028_v16, %v3035_v34  ;;  %4223 = vmatpush1.bf16.msra.mxu0 %v13380_v54  ;;  %v13391_v54 = vld [vmem:[%s18300_s8 + $0x134] ss:$36 sps:$4 sm:$0xff]  }
 0x266   : > { %v14613_v40 = vcombine.low %v3498_v6, %v3499_v20  ;;  %v3385_v7 = vadd.f32 %v14480_v62, %v3295_v25  ;;  %v3321_v52 = vcombine.low %v3018_v39, %v3218_v43  ;;  %v12990_v61 = vunpack.i.l.bf16 %v14565_v5  ;;  %4224 = vmatprep.subr.bf16.mxu0 %v13385_v41  ;;  %12944 = vmatpush1.bf16.msra.mxu1 %v14629_v1  ;;  %v14691_v38 = vld [vmem:[%s18300_s8 + $0xf4] ss:$36 sps:$4 sm:$0xff]  }
 0x267   : > { %v3384_v48 = vadd.f32 %v14480_v62, %v3288_v13  ;;  %v3356_v24 = vrot.slane %v3320_v23, %v14008_v15  ;;  %v3302_v59 = vrot.slane %v12493_v17, %v14008_v15  ;;  %v14621_v10 = vrot.slane %v3036_v33, %v13730_v57  ;;  %v14672_v13 = vld [vmem:[%s18300_s8 + $0xa8] ss:$36 sps:$4 sm:$0xff]   ;;  %v13400_v33 = vld [vmem:[%s18300_s8 + $0x17c] ss:$36 sps:$4 sm:$0xff]  }
 0x268   : > { %v18406_v4 = vunpack.i.l.bf16 %v14287_v44  ;;  %v3363_v21 = vrot.slane %v3321_v52, %v14008_v15  ;;  %v14637_v22 = vrot.slane %v14519_v18, %v13730_v57  ;;  %v12494_v19 = vcombine.high %v3018_v39, %v3218_v43  ;;  %4043 = vmatmul.mubr.bf16.gmra.mrb[24].mxu0 %v14546_v58  ;;  %4153 = vmatmul.mubr.bf16.gmra.mrb[24].mxu1 %v14546_v58  ;;  %v14650_v57 = vld [vmem:[%s18300_s8 + $0xac] ss:$36 sps:$4 sm:$0xff]  }
 0x269   : > { %v3386_v56 = vadd.f32 %v14480_v62, %v3356_v24  ;;  %v3387_v16 = vadd.f32 %v14480_v62, %v3302_v59  ;;  %v12995_v28 = vunpack.i.l.bf16 %v12994_v42  ;;  %4052 = vmatprep.mubr.bf16.mxu0 %v18405_v60  ;;  %4162 = vmatprep.mubr.bf16.mxu1 %v18405_v60  ;;  %v3469_v31 = vsel %vm3462_vm3, %v3384_v48, %v14522_v26  ;;  %v13389_v39 = vld [vmem:[%s18300_s8 + $0x130] ss:$36 sps:$4 sm:$0xff]   ;;  %v14736_v59 = vld [vmem:[%s18300_s8 + $0x138] ss:$36 sps:$4 sm:$0xff]  }
 0x26a   : > { %v3470_v2 = vsel %vm3462_vm3, %v3385_v7, %v18406_v4  ;;  %v3388_v18 = vadd.f32 %v14480_v62, %v3363_v21  ;;  %v3309_v14 = vrot.slane %v12494_v19, %v14008_v15  ;;  %v3322_v45 = vcombine.low %v14621_v10, %v14637_v22  ;;  %4225 = vmatpush1.bf16.msra.mxu0 %v13383_v37  ;;  %v14705_v43 = vld [vmem:[%s18300_s8 + $0xf0] ss:$36 sps:$4 sm:$0xff]   ;;  %v14717_v7 = vld [vmem:[%s18300_s8 + $0x13c] ss:$36 sps:$4 sm:$0xff]   ;;  %v13409_v4 = vld [vmem:[%s18300_s8 + $0x1c4] ss:$36 sps:$4 sm:$0xff]  }
 0x26b   : > { %v3484_v47 = vpack.c.bf16 %v3470_v2, %v3470_v2  ;;  %v12495_v50 = vcombine.high %v14621_v10, %v14637_v22  ;;  %v3471_v27 = vsel %vm3462_vm3, %v3386_v56, %v12986_v55  ;;  %v3472_v5 = vsel %vm3462_vm3, %v3387_v16, %v12990_v61  ;;  %4226 = vmatprep.subr.bf16.mxu0 %v13388_v36  ;;  %v13398_v61 = vld [vmem:[%s18300_s8 + $0x178] ss:$36 sps:$4 sm:$0xff]   ;;  %v14750_v21 = vld [vmem:[%s18300_s8 + $0x184] ss:$36 sps:$4 sm:$0xff]   ;;  %v13418_v56 = vld [vmem:[%s18300_s8 + $0x20c] ss:$36 sps:$4 sm:$0xff]  }
 0x26c   : > { %v12996_v34 = vunpack.i.h.bf16 %v12994_v42  ;;  %v3485_v26 = vpack.c.bf16 %v3471_v27, %v3471_v27  ;;  %v3473_v44 = vsel %vm3462_vm3, %v3388_v18, %v12991_v35  ;;  %v3486_v30 = vpack.c.bf16 %v3472_v5, %v3472_v5  ;;  %12937 = vmatprep.subr.bf16.mxu1 %v14650_v57  ;;  %v13407_v19 = vld [vmem:[%s18300_s8 + $0x1c0] ss:$36 sps:$4 sm:$0xff]   ;;  %v13416_v16 = vld [vmem:[%s18300_s8 + $0x208] ss:$36 sps:$4 sm:$0xff]   ;;  %v14787_v18 = vld [vmem:[%s18300_s8 + $0x214] ss:$36 sps:$4 sm:$0xff]   ;;  %v3447_v27 = vpop.permute.xlu1 %3446 }
 0x26d   : > { %v3370_v55 = vrot.slane %v3322_v45, %v14008_v15  ;;  %v3487_v51 = vpack.c.bf16 %v3473_v44, %v3473_v44  ;;  %v3389_v12 = vadd.f32 %v14480_v62, %v3309_v14  ;;  %v3501_v63 = vsel %vm14503_vm4, %v3484_v47, 0  ;;  %12945 = vmatpush1.bf16.msra.mxu1 %v14672_v13  ;;  %v14759_v36 = vld [vmem:[%s18300_s8 + $0x180] ss:$36 sps:$4 sm:$0xff]   ;;  %v14768_v47 = vld [vmem:[%s18300_s8 + $0x1cc] ss:$36 sps:$4 sm:$0xff]  }
 0x26e   : > { %v3502_v32 = vsel %vm14503_vm4, %v3485_v26, 0  ;;  %v3503_v41 = vsel %vm14503_vm4, %v3486_v30, 0  ;;  %v3483_v3 = vpack.c.bf16 %v3469_v31, %v3469_v31  ;;  %4227 = vmatpush1.bf16.msra.mxu0 %v13386_v11  ;;  %12938 = vmatprep.subr.bf16.mxu1 %v14691_v38  ;;  %v14793_v14 = vld [vmem:[%s18300_s8 + $0x210] ss:$36 sps:$4 sm:$0xff]   ;;  %v3316_v45 = vrot.slane %v12495_v50, %v14008_v15  ;;  %v6689_v10 = vld [vmem:[%s14818_s22] sm:$0xff] }
 0x26f   : > { %v3390_v49 = vadd.f32 %v14480_v62, %v3370_v55  ;;  %v14693_v35 = vcombine.low %v3501_v63, %v3502_v32  ;;  %v3504_v6 = vsel %vm14503_vm4, %v3487_v51, 0  ;;  %v3474_v25 = vsel %vm3462_vm3, %v3389_v12, %v12995_v28  ;;  %4228 = vmatprep.subr.bf16.mxu0 %v13391_v54  ;;  %v14781_v28 = vld [vmem:[%s18300_s8 + $0x1c8] ss:$36 sps:$4 sm:$0xff]   ;;  %v6693_v11 = vld [vmem:[%s14818_s22 + $0x20] sm:$0xff] }
 0x270   : > { %v14707_v20 = vcombine.low %v3503_v41, %v3504_v6  ;;  %v3488_v17 = vpack.c.bf16 %v3474_v25, %v3474_v25  ;;  %4053 = vmatmul.mubr.bf16.gmra.mrb[28].mxu0 %v14613_v40  ;;  %4163 = vmatmul.mubr.bf16.gmra.mrb[28].mxu1 %v14613_v40  ;;  %v3500_v42 = vsel %vm14503_vm4, %v3483_v3, 0  ;;  %v3391_v31 = vadd.f32 %v14480_v62, %v3316_v45  ;;  %v6690_v22 = vld [vmem:[%s14818_s22 + $0x8] sm:$0x3f]  ;;  %v6697_v44 = vld [vmem:[%s14818_s22 + $0x40] sm:$0xff]  ;;  %v2383_v41 = vpop.f32.mrb[16].mxu0 }
 0x271   : > { %v3475_v23 = vsel %vm3462_vm3, %v3390_v49, %v12996_v34  ;;  %4062 = vmatprep.mubr.bf16.mxu0 %v18405_v60  ;;  %4172 = vmatprep.mubr.bf16.mxu1 %v18405_v60  ;;  %v14745_v2 = vcombine.low %v3500_v42, %v18405_v60  ;;  %v12997_v50 = vpack.i.bf16 %v6690_v22, %v6689_v10  ;;  %v6694_v26 = vld [vmem:[%s14818_s22 + $0x28] sm:$0x3f]  ;;  %v6701_v54 = vld [vmem:[%s14818_s22 + $0x60] sm:$0xff]  ;;  %v2384_v3 = vpop.f32.mrb[17].mxu0  ;;  %v13427_v10 = vld [vmem:[%s18300_s8 + $0xb0] ss:$36 sps:$4 sm:$0xff]  }
 0x272   : > { %v3489_v52 = vpack.c.bf16 %v3475_v23, %v3475_v23  ;;  %v3505_v24 = vsel %vm14503_vm4, %v3488_v17, 0  ;;  %4229 = vmatpush1.bf16.msra.mxu0 %v13389_v39  ;;  %12946 = vmatpush1.bf16.msra.mxu1 %v14705_v43  ;;  %v13007_v53 = vpack.i.bf16 %v6694_v26, %v6693_v11  ;;  %v6698_v30 = vld [vmem:[%s14818_s22 + $0x48] sm:$0x3f]  ;;  %v6705_v12 = vld [vmem:[%s14818_s22 + $0x80] sm:$0xff]  ;;  %v2452_v23 = vpop.f32.mrb[16].mxu1  ;;  %v6691_v11 = vld [vmem:[%s14818_s22 + $0x10] sm:$0xff] }
 0x273   : > { %4230 = vmatprep.subr.bf16.mxu0 %v13400_v33  ;;  %12939 = vmatprep.subr.bf16.mxu1 %v14717_v7  ;;  %v13017_v55 = vpack.i.bf16 %v6698_v30, %v6697_v44  ;;  %v6702_v51 = vld [vmem:[%s14818_s22 + $0x68] sm:$0x3f]  ;;  %v6709_v49 = vld [vmem:[%s14818_s22 + $0xa0] sm:$0xff]  ;;  %v2453_v17 = vpop.f32.mrb[17].mxu1  ;;  %v13428_v22 = vld [vmem:[%s18300_s8 + $0xf8] ss:$36 sps:$4 sm:$0xff]  }
 0x274   : > { %v3506_v48 = vsel %vm14503_vm4, %v3489_v52, 0  ;;  %12998 = vrot.lane.b32.xlu0 %v12997_v50, %s13498_s28  ;;  %v13027_v32 = vpack.i.bf16 %v6702_v51, %v6701_v54  ;;  %v6706_v63 = vld [vmem:[%s14818_s22 + $0x88] sm:$0x3f]  ;;  %v6713_v25 = vld [vmem:[%s14818_s22 + $0xc0] sm:$0xff]  ;;  %v2454_v52 = vpop.f32.mrb[18].mxu1  ;;  %v6695_v44 = vld [vmem:[%s14818_s22 + $0x30] sm:$0xff] }
 0x275   : > { %v14738_v37 = vcombine.low %v3505_v24, %v3506_v48  ;;  %v6714_v39 = vld [vmem:[%s14818_s22 + $0xc8] sm:$0x3f]  ;;  %v6721_v42 = vld [vmem:[%s14818_s22 + $0x100] sm:$0xff]  ;;  %v6692_v26 = vld [vmem:[%s14818_s22 + $0x18] sm:$0x3f] }
 0x276   : > { %4231 = vmatpush1.bf16.msra.mxu0 %v13398_v61  ;;  %12947 = vmatpush1.bf16.msra.mxu1 %v14736_v59  ;;  %v13057_v33 = vpack.i.bf16 %v6714_v39, %v6713_v25  ;;  %v2455_v61 = vpop.f32.mrb[19].mxu1  ;;  %v13425_v24 = vld [vmem:[%s18300_s8 + $0x20] ss:$36 sps:$4 sm:$0xff]   ;;  %v6696_v30 = vld [vmem:[%s14818_s22 + $0x38] sm:$0x3f]  ;;  %v6711_v25 = vld [vmem:[%s14818_s22 + $0xb0] sm:$0xff] }
 0x277   : > { %4232 = vmatprep.subr.bf16.mxu0 %v13409_v4  ;;  %12940 = vmatprep.subr.bf16.mxu1 %v14750_v21  ;;  %v6726_v4 = vld [vmem:[%s14818_s22 + $0x128] sm:$0x3f]  ;;  %v13429_v50 = vld [vmem:[%s18300_s8 + $0x140] ss:$36 sps:$4 sm:$0xff]   ;;  %v13012_v54 = vpack.i.bf16 %v6696_v30, %v6695_v44  ;;  %v13432_v51 = vld [vmem:[%s18300_s8 + $0x218] ss:$36 sps:$4 sm:$0xff]  }
 0x278   : > { %4063 = vmatmul.mubr.bf16.gmra.mrb[32].mxu0 %v14745_v2  ;;  %4173 = vmatmul.mubr.bf16.gmra.mrb[32].mxu1 %v14745_v2  ;;  %v6704_v41 = vld [vmem:[%s14818_s22 + $0x78] sm:$0x3f]  ;;  %v6715_v23 = vld [vmem:[%s14818_s22 + $0xd0] sm:$0xff] }
 0x279   : > { %4072 = vmatprep.mubr.bf16.mxu0 %v18405_v60  ;;  %4181 = vmatprep.mubr.bf16.mxu1 %v18405_v60  ;;  %v6708_v3 = vld [vmem:[%s14818_s22 + $0x98] sm:$0x3f] }
 0x27a   : > { %4233 = vmatpush1.bf16.msra.mxu0 %v13407_v19  ;;  %12948 = vmatpush1.bf16.msra.mxu1 %v14759_v36  ;;  %v6712_v39 = vld [vmem:[%s14818_s22 + $0xb8] sm:$0x3f] }
 0x27b   : > { %4234 = vmatprep.subr.bf16.mxu0 %v13418_v56  ;;  %12941 = vmatprep.subr.bf16.mxu1 %v14768_v47  ;;  %v6720_v52 = vld [vmem:[%s14818_s22 + $0xf8] sm:$0x3f] }
 0x27c   : > { %13008 = vrot.lane.b32.xlu0 %v13007_v53, %s13498_s28  ;;  %v13002_v53 = vpack.i.bf16 %v6692_v26, %v6691_v11 }
 0x27e   : > { %4235 = vmatpush1.bf16.msra.mxu0 %v13416_v16  ;;  %12949 = vmatpush1.bf16.msra.mxu1 %v14781_v28  ;;  %v6734_v16 = vld [vmem:[%s14818_s22 + $0x168] sm:$0x3f] }
 0x27f   : > { %12942 = vmatprep.subr.bf16.mxu1 %v14787_v18  ;;  %4329 = vmatprep.subr.bf16.mxu0 %v14265_v0  ;;  %v3476_v0 = vsel %vm3462_vm3, %v3391_v31, %v3447_v27  ;;  %v6741_v31 = vld [vmem:[%s14818_s22 + $0x1a0] sm:$0xff]  ;;  %v6742_v27 = vld [vmem:[%s14818_s22 + $0x1a8] sm:$0x3f] }
 0x280   : > { %4073 = vmatmul.mubr.bf16.gmra.mrb[36].mxu0 %v14693_v35  ;;  %4182 = vmatmul.mubr.bf16.gmra.mrb[36].mxu1 %v14693_v35  ;;  %v3490_v62 = vpack.c.bf16 %v3476_v0, %v3476_v0  ;;  %v13127_v0 = vpack.i.bf16 %v6742_v27, %v6741_v31 }
 0x281   : > { %4080 = vmatprep.mubr.bf16.mxu0 %v18405_v60  ;;  %4190 = vmatprep.mubr.bf16.mxu1 %v18405_v60 }
 0x282   : > { %12950 = vmatpush1.bf16.msra.mxu1 %v14793_v14  ;;  %v3507_v5 = vsel %vm14503_vm4, %v3490_v62, 0  ;;  %13018 = vrot.lane.b32.xlu0 %v13017_v55, %s13498_s28  ;;  %v13426_v62 = vld [vmem:[%s18300_s8 + $0x68] ss:$36 sps:$4 sm:$0xff]   ;;  %v13431_v55 = vld [vmem:[%s18300_s8 + $0x1d0] ss:$36 sps:$4 sm:$0xff]  }
 0x283   : > { %v14830_v34 = vcombine.low %v3507_v5, %v18405_v60  ;;  %v13430_v5 = vld [vmem:[%s18300_s8 + $0x188] ss:$36 sps:$4 sm:$0xff]   ;;  %13003 = vrot.lane.b32.xlu1 %v13002_v53, %s13498_s28 }
 0x286   : > { %13028 = vrot.lane.b32.xlu0 %v13027_v32, %s13498_s28  ;;  %v6700_v32 = vld [vmem:[%s14818_s22 + $0x58] sm:$0x3f] }
 0x287   : > { %13013 = vrot.lane.b32.xlu1 %v13012_v54, %s13498_s28 }
 0x288   : > { %4081 = vmatmul.mubr.bf16.gmra.mrb[40].mxu0 %v14707_v20  ;;  %4191 = vmatmul.mubr.bf16.gmra.mrb[40].mxu1 %v14707_v20 }
 0x289   : > { %4090 = vmatprep.mubr.bf16.mxu0 %v18405_v60  ;;  %4200 = vmatprep.mubr.bf16.mxu1 %v18405_v60 }
 0x290   : > { %4091 = vmatmul.mubr.bf16.gmra.mrb[44].mxu0 %v14738_v37  ;;  %4201 = vmatmul.mubr.bf16.gmra.mrb[44].mxu1 %v14738_v37 }
 0x291   : > { %4100 = vmatprep.mubr.bf16.mxu0 %v18405_v60  ;;  %4210 = vmatprep.mubr.bf16.mxu1 %v18405_v60 }
 0x298   : > { %4101 = vmatmul.mubr.bf16.gmra.mrb[48].mxu0 %v14830_v34  ;;  %4211 = vmatmul.mubr.bf16.gmra.mrb[48].mxu1 %v14830_v34 }
 0x299   : > { %4252 = vmatprep.mubr.bf16.mxu0 %v18405_v60  ;;  %4419 = vmatprep.mubr.bf16.mxu1 %v18405_v60 }
 0x2a0   : > { %4253 = vmatmul.mubr.bf16.vlgmr.msra.gmra.mrb[52].mxu0 %v14539_v29  ;;  %4420 = vmatmul.mubr.bf16.vlgmr.msra.gmra.mrb[52].mxu1 %v14738_v37 }
 0x2a1   : > { %4330 = vmatpush1.bf16.msra.mxu0 %v14570_v9  ;;  %4262 = vmatprep.mubr.bf16.mxu0 %v18405_v60  ;;  %v13037_v9 = vpack.i.bf16 %v6706_v63, %v6705_v12  ;;  %v6699_v12 = vld [vmem:[%s14818_s22 + $0x50] sm:$0xff] }
 0x2a2   : > { %4331 = vmatprep.subr.bf16.mxu0 %v14586_v46  ;;  %4429 = vmatprep.mubr.bf16.mxu1 %v18405_v60  ;;  %v6710_v46 = vld [vmem:[%s14818_s22 + $0xa8] sm:$0x3f]  ;;  %v13022_v63 = vpack.i.bf16 %v6700_v32, %v6699_v12 }
 0x2a3   : > { %13038 = vrot.lane.b32.xlu0 %v13037_v9, %s13498_s28  ;;  %v13047_v6 = vpack.i.bf16 %v6710_v46, %v6709_v49  ;;  %v6703_v9 = vld [vmem:[%s14818_s22 + $0x70] sm:$0xff] }
 0x2a4   : > { %13023 = vrot.lane.b32.xlu1 %v13022_v63, %s13498_s28  ;;  %v13032_v49 = vpack.i.bf16 %v6704_v41, %v6703_v9  ;;  %v6707_v46 = vld [vmem:[%s14818_s22 + $0x90] sm:$0xff] }
 0x2a5   : > { %4332 = vmatpush1.bf16.msra.mxu0 %v14629_v1  ;;  %v2385_v1 = vpop.f32.mrb[18].mxu0 }
 0x2a6   : > { %4333 = vmatprep.subr.bf16.mxu0 %v14650_v57  ;;  %v2386_v57 = vpop.f32.mrb[19].mxu0  ;;  %v13052_v1 = vpack.i.bf16 %v6712_v39, %v6711_v25 }
 0x2a7   : > { %13048 = vrot.lane.b32.xlu0 %v13047_v6, %s13498_s28  ;;  %v13042_v6 = vpack.i.bf16 %v6708_v3, %v6707_v46  ;;  %v6716_v57 = vld [vmem:[%s14818_s22 + $0xd8] sm:$0x3f] }
 0x2a8   : > { %4263 = vmatmul.mubr.bf16.gmra.mrb[56].mxu0 %v14546_v58  ;;  %4430 = vmatmul.mubr.bf16.gmra.mrb[56].mxu1 %v14830_v34  ;;  %v13062_v17 = vpack.i.bf16 %v6716_v57, %v6715_v23 }
 0x2a9   : > { %4272 = vmatprep.mubr.bf16.mxu0 %v18405_v60  ;;  %4334 = vmatpush1.bf16.msra.mxu0 %v14672_v13  ;;  %v6717_v13 = vld [vmem:[%s14818_s22 + $0xe0] sm:$0xff] }
 0x2aa   : > { %8868 = vmatprep.mubr.bf16.mxu1 %v18405_v60  ;;  %4335 = vmatprep.subr.bf16.mxu0 %v14691_v38  ;;  %v6718_v38 = vld [vmem:[%s14818_s22 + $0xe8] sm:$0x3f] }
 0x2ab   : > { %13058 = vrot.lane.b32.xlu0 %v13057_v33, %s13498_s28  ;;  %13033 = vrot.lane.b32.xlu1 %v13032_v49, %s13498_s28  ;;  %v6719_v33 = vld [vmem:[%s14818_s22 + $0xf0] sm:$0xff] }
 0x2ac   : > { %v13072_v61 = vpack.i.bf16 %v6720_v52, %v6719_v33 }
 0x2ad   : > { %4336 = vmatpush1.bf16.msra.mxu0 %v14705_v43  ;;  %v13067_v43 = vpack.i.bf16 %v6718_v38, %v6717_v13  ;;  %v6723_v13 = vld [vmem:[%s14818_s22 + $0x110] sm:$0xff] }
 0x2ae   : > { %4337 = vmatprep.subr.bf16.mxu0 %v14717_v7  ;;  %v6722_v7 = vld [vmem:[%s14818_s22 + $0x108] sm:$0x3f] }
 0x2af   : > { %13068 = vrot.lane.b32.xlu0 %v13067_v43, %s13498_s28  ;;  %v13077_v48 = vpack.i.bf16 %v6722_v7, %v6721_v42  ;;  %13043 = vrot.lane.b32.xlu1 %v13042_v6, %s13498_s28  ;;  %v6727_v42 = vld [vmem:[%s14818_s22 + $0x130] sm:$0xff]  ;;  %v6728_v43 = vld [vmem:[%s14818_s22 + $0x138] sm:$0x3f] }
 0x2b0   : > { %4273 = vmatmul.mubr.bf16.gmra.mrb[60].mxu0 %v14613_v40  ;;  %v6731_v7 = vld [vmem:[%s14818_s22 + $0x150] sm:$0xff] }
 0x2b1   : > { %4282 = vmatprep.mubr.bf16.mxu0 %v18405_v60  ;;  %4338 = vmatpush1.bf16.msra.mxu0 %v14736_v59  ;;  %v6725_v59 = vld [vmem:[%s14818_s22 + $0x120] sm:$0xff] }
 0x2b2   : > { %4339 = vmatprep.subr.bf16.mxu0 %v14750_v21  ;;  %v6729_v21 = vld [vmem:[%s14818_s22 + $0x140] sm:$0xff]  ;;  %v13087_v19 = vpack.i.bf16 %v6726_v4, %v6725_v59  ;;  %v6739_v59 = vld [vmem:[%s14818_s22 + $0x190] sm:$0xff]  ;;  %v6740_v4 = vld [vmem:[%s14818_s22 + $0x198] sm:$0x3f] }
 0x2b3   : > { %13078 = vrot.lane.b32.xlu0 %v13077_v48, %s13498_s28  ;;  %13053 = vrot.lane.b32.xlu1 %v13052_v1, %s13498_s28 }
 0x2b5   : > { %4340 = vmatpush1.bf16.msra.mxu0 %v14759_v36  ;;  %v6730_v36 = vld [vmem:[%s14818_s22 + $0x148] sm:$0x3f] }
 0x2b6   : > { %4341 = vmatprep.subr.bf16.mxu0 %v14768_v47  ;;  %v13097_v56 = vpack.i.bf16 %v6730_v36, %v6729_v21  ;;  %v6733_v47 = vld [vmem:[%s14818_s22 + $0x160] sm:$0xff]  ;;  %v13122_v21 = vpack.i.bf16 %v6740_v4, %v6739_v59 }
 0x2b7   : > { %13088 = vrot.lane.b32.xlu0 %v13087_v19, %s13498_s28  ;;  %13063 = vrot.lane.b32.xlu1 %v13062_v17, %s13498_s28  ;;  %v6744_v19 = vld [vmem:[%s14818_s22 + $0x1b8] sm:$0x3f] }
 0x2b8   : > { %4283 = vmatmul.mubr.bf16.gmra.mrb[64].mxu0 %v14745_v2 }
 0x2b9   : > { %4290 = vmatprep.mubr.bf16.mxu0 %v18405_v60  ;;  %4342 = vmatpush1.bf16.msra.mxu0 %v14781_v28  ;;  %v6737_v28 = vld [vmem:[%s14818_s22 + $0x180] sm:$0xff] }
 0x2ba   : > { %4343 = vmatprep.subr.bf16.mxu0 %v14787_v18  ;;  %v13107_v18 = vpack.i.bf16 %v6734_v16, %v6733_v47 }
 0x2bb   : > { %13098 = vrot.lane.b32.xlu0 %v13097_v56, %s13498_s28  ;;  %13073 = vrot.lane.b32.xlu1 %v13072_v61, %s13498_s28 }
 0x2bd   : > { %4344 = vmatpush1.bf16.msra.mxu0 %v14793_v14  ;;  %v6738_v14 = vld [vmem:[%s14818_s22 + $0x188] sm:$0x3f] }
 0x2be   : > { %12831 = vmatprep.subr.bf16.mxu0 %v13425_v24  ;;  %v13117_v45 = vpack.i.bf16 %v6738_v14, %v6737_v28 }
 0x2bf   : > { %13108 = vrot.lane.b32.xlu0 %v13107_v18, %s13498_s28 }
 0x2c0   : > { %4291 = vmatmul.mubr.bf16.gmra.mrb[68].mxu0 %v14693_v35 }
 0x2c1   : > { %4300 = vmatprep.mubr.bf16.mxu0 %v18405_v60 }
 0x2c3   : > { %13118 = vrot.lane.b32.xlu0 %v13117_v45, %s13498_s28 }
 0x2c7   : > { %13128 = vrot.lane.b32.xlu0 %v13127_v0, %s13498_s28 }
 0x2c8   : > { %4301 = vmatmul.mubr.bf16.gmra.mrb[72].mxu0 %v14707_v20 }
 0x2c9   : > { %4310 = vmatprep.mubr.bf16.mxu0 %v18405_v60 }
 0x2d0   : > { %4311 = vmatmul.mubr.bf16.gmra.mrb[76].mxu0 %v14738_v37 }
 0x2d1   : > { %4320 = vmatprep.mubr.bf16.mxu0 %v18405_v60 }
 0x2d8   : > { %4321 = vmatmul.mubr.bf16.gmra.mrb[80].mxu0 %v14830_v34 }
 0x2d9   : > { %4361 = vmatprep.mubr.bf16.mxu0 %v18405_v60 }
 0x2e0   : > { %4362 = vmatmul.mubr.bf16.vlgmr.msra.gmra.mrb[84].mxu0 %v14539_v29 }
 0x2e1   : > { %12832 = vmatpush3.bf16.msra.mxu0 %v13425_v24  ;;  %4371 = vmatprep.mubr.bf16.mxu0 %v18405_v60 }
 0x2e2   : > { %12833 = vmatprep.subr.bf16.mxu0 %v13426_v62 }
 0x2e5   : > { %12834 = vmatpush3.bf16.msra.mxu0 %v13426_v62 }
 0x2e6   : > { %12835 = vmatprep.subr.bf16.mxu0 %v13427_v10 }
 0x2e8   : > { %4372 = vmatmul.mubr.bf16.gmra.mrb[88].mxu0 %v14546_v58 }
 0x2e9   : > { %12836 = vmatpush3.bf16.msra.mxu0 %v13427_v10  ;;  %4381 = vmatprep.mubr.bf16.mxu0 %v18405_v60 }
 0x2ea   : > { %12837 = vmatprep.subr.bf16.mxu0 %v13428_v22 }
 0x2ed   : > { %12838 = vmatpush3.bf16.msra.mxu0 %v13428_v22 }
 0x2ee   : > { %12839 = vmatprep.subr.bf16.mxu0 %v13429_v50 }
 0x2f0   : > { %4382 = vmatmul.mubr.bf16.gmra.mrb[92].mxu0 %v14613_v40 }
 0x2f1   : > { %4391 = vmatprep.mubr.bf16.mxu0 %v18405_v60  ;;  %12840 = vmatpush3.bf16.msra.mxu0 %v13429_v50 }
 0x2f2   : > { %12841 = vmatprep.subr.bf16.mxu0 %v13430_v5 }
 0x2f5   : > { %12842 = vmatpush3.bf16.msra.mxu0 %v13430_v5 }
 0x2f6   : > { %12843 = vmatprep.subr.bf16.mxu0 %v13431_v55 }
 0x2f8   : > { %4392 = vmatmul.mubr.bf16.gmra.mrb[96].mxu0 %v14745_v2 }
 0x2f9   : > { %4399 = vmatprep.mubr.bf16.mxu0 %v18405_v60  ;;  %12844 = vmatpush3.bf16.msra.mxu0 %v13431_v55 }
 0x2fa   : > { %12845 = vmatprep.subr.bf16.mxu0 %v13432_v51 }
 0x2fd   : > { %12846 = vmatpush3.bf16.msra.mxu0 %v13432_v51 }
 0x300   : > { %4400 = vmatmul.mubr.bf16.gmra.mrb[100].mxu0 %v14693_v35 }
 0x301   : > { %4409 = vmatprep.mubr.bf16.mxu0 %v18405_v60 }
 0x308   : > { %4410 = vmatmul.mubr.bf16.gmra.mrb[104].mxu0 %v14707_v20 }
 0x309   : > { %12847 = vmatprep.mubr.bf16.mxu0 %v14539_v29  ;;  %v6724_v29 = vld [vmem:[%s14818_s22 + $0x118] sm:$0x3f] }
 0x30a   : > { %v13082_v38 = vpack.i.bf16 %v6724_v29, %v6723_v13 }
 0x30c   : > { %13083 = vrot.lane.b32.xlu1 %v13082_v38, %s13498_s28 }
 0x310   : > { %12848 = vmatmul.mubr.bf16.vlgmr.msra.gmra.mrb[108].mxu0 %v14546_v58  ;;  %v13092_v58 = vpack.i.bf16 %v6728_v43, %v6727_v42 }
 0x311   : > { %12851 = vmatprep.mubr.bf16.mxu0 %v14613_v40  ;;  %v6732_v40 = vld [vmem:[%s14818_s22 + $0x158] sm:$0x3f] }
 0x312   : > { %13093 = vrot.lane.b32.xlu1 %v13092_v58, %s13498_s28  ;;  %v13102_v48 = vpack.i.bf16 %v6732_v40, %v6731_v7 }
 0x316   : > { %13103 = vrot.lane.b32.xlu1 %v13102_v48, %s13498_s28 }
 0x318   : > { %12852 = vmatmul.mubr.bf16.gmra.mrb[112].mxu0 %v14745_v2  ;;  %v6736_v2 = vld [vmem:[%s14818_s22 + $0x178] sm:$0x3f] }
 0x319   : > { %12855 = vmatprep.mubr.bf16.mxu0 %v14693_v35  ;;  %v6735_v35 = vld [vmem:[%s14818_s22 + $0x170] sm:$0xff] }
 0x31a   : > { %v13112_v24 = vpack.i.bf16 %v6736_v2, %v6735_v35 }
 0x31c   : > { %13113 = vrot.lane.b32.xlu1 %v13112_v24, %s13498_s28 }
 0x320   : > { %12856 = vmatmul.mubr.bf16.gmra.mrb[116].mxu0 %v14707_v20  ;;  %13123 = vrot.lane.b32.xlu1 %v13122_v21, %s13498_s28  ;;  %v6743_v20 = vld [vmem:[%s14818_s22 + $0x1b0] sm:$0xff] }
 0x321   : > { %12859 = vmatprep.mubr.bf16.mxu0 %v14738_v37  ;;  %v13132_v36 = vpack.i.bf16 %v6744_v19, %v6743_v20 }
 0x324   : > { %13133 = vrot.lane.b32.xlu1 %v13132_v36, %s13498_s28 }
 0x328   : > { %12860 = vmatmul.mubr.bf16.gmra.mrb[120].mxu0 %v14830_v34 }
 0x329   : > { %9205 = vmatprep.mubr.bf16.mxu0 %v18405_v60 }
 0x333   : > { %v4036_v37 = vpop.f32.mrb[20].mxu0  ;;  %v4145_v56 = vpop.f32.mrb[20].mxu1 }
 0x334   : > { %v4037_v47 = vpop.f32.mrb[21].mxu0  ;;  %v14996_v16 = vpop.f32.mrb[21].mxu1 }
 0x335   : > { %v4038_v28 = vpop.f32.mrb[22].mxu0  ;;  %v4148_v18 = vpop.f32.mrb[22].mxu1 }
 0x336   : > { %v4547_v34 = vrot.slane %v4148_v18, 7  ;;  %v14998_v14 = vpop.f32.mrb[23].mxu0  ;;  %v15000_v45 = vpop.f32.mrb[23].mxu1 }
 0x338   : > { %v15002_v31 = vadd.f32 %v4547_v34, %v4038_v28 }
 0x33b   : > { %v4044_v27 = vpop.f32.mrb[24].mxu0  ;;  %v4154_v0 = vpop.f32.mrb[24].mxu1 }
 0x33c   : > { %v15004_v62 = vpop.f32.mrb[25].mxu0  ;;  %v4548_v10 = vrot.slane %v4154_v0, 7  ;;  %v15006_v22 = vpop.f32.mrb[25].mxu1 }
 0x33d   : > { %v4048_v50 = vpop.f32.mrb[26].mxu0  ;;  %v4158_v5 = vpop.f32.mrb[26].mxu1 }
 0x33e   : > { %v15008_v11 = vpop.f32.mrb[27].mxu0  ;;  %v4549_v26 = vrot.slane %v4158_v5, 7  ;;  %v15010_v44 = vpop.f32.mrb[27].mxu1  ;;  %v15012_v53 = vadd.f32 %v4548_v10, %v4044_v27 }
 0x340   : > { %v15014_v30 = vadd.f32 %v4549_v26, %v4048_v50 }
 0x343   : > { %v4054_v55 = vpop.f32.mrb[28].mxu0  ;;  %v4164_v54 = vpop.f32.mrb[28].mxu1 }
 0x344   : > { %v15016_v51 = vpop.f32.mrb[29].mxu0  ;;  %v4550_v12 = vrot.slane %v4164_v54, 7  ;;  %v15018_v32 = vpop.f32.mrb[29].mxu1 }
 0x345   : > { %v4058_v63 = vpop.f32.mrb[30].mxu0  ;;  %v4168_v9 = vpop.f32.mrb[30].mxu1 }
 0x346   : > { %v15020_v41 = vpop.f32.mrb[31].mxu0  ;;  %v4551_v49 = vrot.slane %v4168_v9, 7  ;;  %v15022_v46 = vpop.f32.mrb[31].mxu1  ;;  %v15024_v3 = vadd.f32 %v4550_v12, %v4054_v55 }
 0x348   : > { %v15026_v6 = vadd.f32 %v4551_v49, %v4058_v63 }
 0x34b   : > { %v4064_v25 = vpop.f32.mrb[32].mxu0  ;;  %v4174_v39 = vpop.f32.mrb[32].mxu1 }
 0x34c   : > { %v15028_v1 = vpop.f32.mrb[33].mxu0  ;;  %v4552_v23 = vrot.slane %v4174_v39, 7  ;;  %v15030_v57 = vpop.f32.mrb[33].mxu1 }
 0x34d   : > { %v4068_v17 = vpop.f32.mrb[34].mxu0  ;;  %v4178_v33 = vpop.f32.mrb[34].mxu1 }
 0x34e   : > { %v15032_v52 = vpop.f32.mrb[35].mxu0  ;;  %v4553_v61 = vrot.slane %v4178_v33, 7  ;;  %v4180_v13 = vpop.f32.mrb[35].mxu1  ;;  %v15034_v29 = vadd.f32 %v4552_v23, %v4064_v25 }
 0x350   : > { %v15036_v38 = vadd.f32 %v4553_v61, %v4068_v17 }
 0x353   : > { %v4074_v42 = vpop.f32.mrb[36].mxu0  ;;  %v4183_v43 = vpop.f32.mrb[36].mxu1 }
 0x354   : > { %v4075_v58 = vpop.f32.mrb[37].mxu0  ;;  %v15038_v7 = vpop.f32.mrb[37].mxu1 }
 0x355   : > { %v4076_v40 = vpop.f32.mrb[38].mxu0  ;;  %v4186_v48 = vpop.f32.mrb[38].mxu1 }
 0x356   : > { %v15040_v35 = vpop.f32.mrb[39].mxu0  ;;  %v4554_v2 = vrot.slane %v4186_v48, 7  ;;  %v15042_v24 = vpop.f32.mrb[39].mxu1 }
 0x357   : > { %18407 = vst [vmem:[#allocation2_spill] sm:$0xff] %v15040_v35 }
 0x358   : > { %v15044_v59 = vadd.f32 %v4554_v2, %v4076_v40 }
 0x35a   : > { %18408 = vst [vmem:[#allocation3_spill] sm:$0xff] %v15044_v59 }
 0x35b   : > { %v4082_v4 = vpop.f32.mrb[40].mxu0  ;;  %v4192_v21 = vpop.f32.mrb[40].mxu1 }
 0x35c   : > { %v15046_v20 = vpop.f32.mrb[41].mxu0  ;;  %v4555_v19 = vrot.slane %v4192_v21, 7  ;;  %v15048_v36 = vpop.f32.mrb[41].mxu1 }
 0x35d   : > { %18409 = vst [vmem:[#allocation4_spill] sm:$0xff] %v15046_v20  ;;  %v4086_v37 = vpop.f32.mrb[42].mxu0  ;;  %v4196_v56 = vpop.f32.mrb[42].mxu1 }
 0x35e   : > { %v15050_v47 = vpop.f32.mrb[43].mxu0  ;;  %v4556_v28 = vrot.slane %v4196_v56, 7  ;;  %v15052_v18 = vpop.f32.mrb[43].mxu1  ;;  %v15054_v34 = vadd.f32 %v4555_v19, %v4082_v4 }
 0x35f   : > { %18410 = vst [vmem:[#allocation5_spill] sm:$0xff] %v15050_v47 }
 0x360   : > { %18411 = vst [vmem:[#allocation6_spill] sm:$0xff] %v15054_v34  ;;  %v15056_v27 = vadd.f32 %v4556_v28, %v4086_v37 }
 0x362   : > { %18412 = vst [vmem:[#allocation7_spill] sm:$0xff] %v15056_v27  ;;  %v12577_v27 = vld [vmem:[%s18301_s9] ss:$0 sm:$0xff] }
 0x363   : > { %v4092_v0 = vpop.f32.mrb[44].mxu0  ;;  %v4202_v10 = vpop.f32.mrb[44].mxu1  ;;  %v15170_v35 = vrot.slane %v12577_v27, %v14001_v8 }
 0x364   : > { %v15058_v50 = vpop.f32.mrb[45].mxu0  ;;  %v4557_v5 = vrot.slane %v4202_v10, 7  ;;  %v15060_v26 = vpop.f32.mrb[45].mxu1 }
 0x365   : > { %18413 = vst [vmem:[#allocation8_spill] sm:$0xff] %v15058_v50  ;;  %v4096_v55 = vpop.f32.mrb[46].mxu0  ;;  %v4206_v54 = vpop.f32.mrb[46].mxu1 }
 0x366   : > { %v4098_v12 = vpop.f32.mrb[47].mxu0  ;;  %v4558_v63 = vrot.slane %v4206_v54, 7  ;;  %v15062_v9 = vpop.f32.mrb[47].mxu1  ;;  %v15064_v49 = vadd.f32 %v4557_v5, %v4092_v0 }
 0x368   : > { %18414 = vst [vmem:[#allocation9_spill] sm:$0xff] %v15064_v49  ;;  %v4586_v25 = vadd.f32 %v4558_v63, %v4096_v55 }
 0x36b   : > { %v4102_v39 = vpop.f32.mrb[48].mxu0  ;;  %v4212_v23 = vpop.f32.mrb[48].mxu1 }
 0x36c   : > { %v4104_v17 = vpop.f32.mrb[49].mxu0  ;;  %v4559_v33 = vrot.slane %v4212_v23, 7  ;;  %v15066_v61 = vpop.f32.mrb[49].mxu1 }
 0x36d   : > { %v4106_v13 = vpop.f32.mrb[50].mxu0  ;;  %v4216_v42 = vpop.f32.mrb[50].mxu1 }
 0x36e   : > { %v4108_v43 = vpop.f32.mrb[51].mxu0  ;;  %v4560_v58 = vrot.slane %v4216_v42, 7  ;;  %v4218_v40 = vpop.f32.mrb[51].mxu1  ;;  %v4587_v48 = vadd.f32 %v4559_v33, %v4102_v39 }
 0x370   : > { %v4588_v2 = vadd.f32 %v4560_v58, %v4106_v13 }
 0x373   : > { %v4254_v4 = vpop.f32.mrb[52].mxu0  ;;  %v4421_v21 = vpop.f32.mrb[52].mxu1 }
 0x374   : > { %v4256_v19 = vpop.f32.mrb[53].mxu0  ;;  %v15068_v37 = vadd.f32 %v4586_v25, %v4421_v21  ;;  %v4423_v28 = vpop.f32.mrb[53].mxu1 }
 0x375   : > { %v4603_v56 = vrot.slane %v4256_v19, 7  ;;  %v4258_v0 = vpop.f32.mrb[54].mxu0  ;;  %v15070_v10 = vadd.f32 %v4423_v28, %v4098_v12  ;;  %v4425_v5 = vpop.f32.mrb[54].mxu1 }
 0x376   : > { %18415 = vst [vmem:[#allocation10_spill] sm:$0xff] %v15068_v37  ;;  %v4260_v55 = vpop.f32.mrb[55].mxu0  ;;  %v15073_v63 = vadd.f32 %v4587_v48, %v4425_v5  ;;  %v4427_v42 = vpop.f32.mrb[55].mxu1 }
 0x377   : > { %18416 = vst [vmem:[#allocation11_spill] sm:$0xff] %v15070_v10  ;;  %v4631_v54 = vadd.f32 %v4603_v56, %v14996_v16  ;;  %v4604_v23 = vrot.slane %v4260_v55, 7  ;;  %v15075_v39 = vadd.f32 %v4427_v42, %v4104_v17 }
 0x378   : > { %18417 = vst [vmem:[#allocation12_spill] sm:$0xff] %v15073_v63 }
 0x379   : > { %18418 = vst [vmem:[#allocation13_spill] sm:$0xff] %v15075_v39  ;;  %v4743_v33 = vrot.slane %v4631_v54, 1  ;;  %v4632_v13 = vadd.f32 %v4604_v23, %v15000_v45 }
 0x37b   : > { %v15078_v25 = vcombine.low %v4254_v4, %v4743_v33  ;;  %v15080_v58 = vcombine.high %v4254_v4, %v4743_v33  ;;  %v4744_v40 = vrot.slane %v4632_v13, 1  ;;  %v4264_v12 = vpop.f32.mrb[56].mxu0  ;;  %v4431_v21 = vpop.f32.mrb[56].mxu1 }
 0x37c   : > { %v4266_v19 = vpop.f32.mrb[57].mxu0  ;;  %v4433_v48 = vpop.f32.mrb[57].mxu1  ;;  %v15086_v5 = vadd.f32 %v4588_v2, %v4431_v21 }
 0x37d   : > { %18419 = vst [vmem:[#allocation14_spill] sm:$0xff] %v15080_v58  ;;  %v15082_v28 = vcombine.low %v4258_v0, %v4744_v40  ;;  %v15084_v16 = vcombine.high %v4258_v0, %v4744_v40  ;;  %v4268_v56 = vpop.f32.mrb[58].mxu0  ;;  %v4605_v17 = vrot.slane %v4266_v19, 7  ;;  %v15088_v55 = vadd.f32 %v4433_v48, %v4108_v43  ;;  %v4435_v45 = vpop.f32.mrb[58].mxu1 }
 0x37e   : > { %18421 = vst [vmem:[#allocation16_spill] sm:$0xff] %v15086_v5  ;;  %v4270_v54 = vpop.f32.mrb[59].mxu0  ;;  %v4436_v23 = vpop.f32.mrb[59].mxu1 }
 0x37f   : > { %18420 = vst [vmem:[#allocation15_spill] sm:$0xff] %v15084_v16  ;;  %18422 = vst [vmem:[#allocation17_spill] sm:$0xff] %v15088_v55  ;;  %v4633_v4 = vadd.f32 %v4605_v17, %v15006_v22  ;;  %v4606_v42 = vrot.slane %v4270_v54, 7  ;;  %v15101_v54 = vpop.permute.xlu0 %12998 }
 0x380   : > { %18425 = vst [vmem:[#allocation20_spill] sm:$0xff] %v15101_v54 }
 0x381   : > { %v4745_v33 = vrot.slane %v4633_v4, 1  ;;  %v4634_v13 = vadd.f32 %v4606_v42, %v15010_v44 }
 0x383   : > { %v4274_v39 = vpop.f32.mrb[60].mxu0  ;;  %v15092_v10 = vcombine.low %v4264_v12, %v4745_v33  ;;  %v15094_v0 = vcombine.high %v4264_v12, %v4745_v33  ;;  %v4746_v2 = vrot.slane %v4634_v13, 1 }
 0x384   : > { %v4276_v40 = vpop.f32.mrb[61].mxu0 }
 0x385   : > { %18423 = vst [vmem:[#allocation18_spill] sm:$0xff] %v15094_v0  ;;  %v4607_v21 = vrot.slane %v4276_v40, 7  ;;  %v4278_v19 = vpop.f32.mrb[62].mxu0  ;;  %v15096_v48 = vcombine.low %v4268_v56, %v4746_v2  ;;  %v15098_v45 = vcombine.high %v4268_v56, %v4746_v2  ;;  %v15108_v40 = vpop.permute.xlu0 %13008 }
 0x386   : > { %v4280_v43 = vpop.f32.mrb[63].mxu0  ;;  %18426 = vst [vmem:[#allocation21_spill] sm:$0xff] %v15108_v40 }
 0x387   : > { %18424 = vst [vmem:[#allocation19_spill] sm:$0xff] %v15098_v45  ;;  %v4635_v22 = vadd.f32 %v4607_v21, %v15018_v32  ;;  %v4608_v17 = vrot.slane %v4280_v43, 7 }
 0x389   : > { %v4747_v44 = vrot.slane %v4635_v22, 1  ;;  %v4636_v23 = vadd.f32 %v4608_v17, %v15022_v46  ;;  %v15115_v22 = vpop.permute.xlu0 %13018 }
 0x38a   : > { %18428 = vst [vmem:[#allocation23_spill] sm:$0xff] %v15115_v22 }
 0x38b   : > { %v15104_v4 = vcombine.low %v4274_v39, %v4747_v44  ;;  %v15106_v12 = vcombine.high %v4274_v39, %v4747_v44  ;;  %v4284_v42 = vpop.f32.mrb[64].mxu0  ;;  %v4748_v33 = vrot.slane %v4636_v23, 1 }
 0x38c   : > { %v4286_v13 = vpop.f32.mrb[65].mxu0 }
 0x38d   : > { %v4288_v55 = vpop.f32.mrb[66].mxu0  ;;  %v15110_v56 = vcombine.low %v4278_v19, %v4748_v33  ;;  %v15112_v2 = vcombine.high %v4278_v19, %v4748_v33  ;;  %v4609_v21 = vrot.slane %v4286_v13, 7  ;;  %v15121_v5 = vpop.permute.xlu0 %13028 }
 0x38e   : > { %v4289_v32 = vpop.f32.mrb[67].mxu0  ;;  %18429 = vst [vmem:[#allocation24_spill] sm:$0xff] %v15121_v5 }
 0x38f   : > { %18427 = vst [vmem:[#allocation22_spill] sm:$0xff] %v15112_v2  ;;  %v4637_v43 = vadd.f32 %v4609_v21, %v15030_v57 }
 0x391   : > { %v4749_v39 = vrot.slane %v4637_v43, 1  ;;  %v13435_v43 = vld [vmem:[%s18302_s10 + $0x4] ss:$36 sps:$4 sm:$0xff]  }
 0x392   : > { %8836 = vmatprep.subr.bf16.mxu1 %v13435_v43 }
 0x393   : > { %v4292_v46 = vpop.f32.mrb[68].mxu0  ;;  %v15117_v23 = vcombine.low %v4284_v42, %v4749_v39  ;;  %v15119_v37 = vcombine.high %v4284_v42, %v4749_v39 }
 0x394   : > { %v4294_v17 = vpop.f32.mrb[69].mxu0 }
 0x395   : > { %v4296_v44 = vpop.f32.mrb[70].mxu0  ;;  %v4610_v55 = vrot.slane %v4294_v17, 7 }
 0x396   : > { %v4298_v63 = vpop.f32.mrb[71].mxu0 }
 0x397   : > { %v4638_v19 = vadd.f32 %v4610_v55, %v15038_v7  ;;  %v4611_v33 = vrot.slane %v4298_v63, 7  ;;  %v13433_v7 = vld [vmem:[%s18302_s10] ss:$36 sps:$4 sm:$0xff]   ;;  %v15135_v63 = vpop.permute.xlu0 %13038  ;;  %v13438_v55 = vld [vmem:[%s18302_s10 + $0xc] ss:$36 sps:$4 sm:$0xff]  }
 0x398   : > { %18431 = vst [vmem:[#allocation26_spill] sm:$0xff] %v15135_v63  ;;  %8837 = vmatpush1.bf16.msra.mxu1 %v13433_v7  ;;  %9173 = vmatprep.subr.bf16.mxu0 %v13438_v55 }
 0x399   : > { %v4750_v32 = vrot.slane %v4638_v19, 1  ;;  %v4639_v57 = vadd.f32 %v4611_v33, %v15042_v24  ;;  %v13436_v33 = vld [vmem:[%s18302_s10 + $0x8] ss:$36 sps:$4 sm:$0xff]  }
 0x39a   : > { %9174 = vmatpush1.bf16.msra.mxu0 %v13436_v33 }
 0x39b   : > { %v4302_v13 = vpop.f32.mrb[72].mxu0  ;;  %v15128_v49 = vcombine.low %v4292_v46, %v4750_v32  ;;  %v15130_v42 = vcombine.high %v4292_v46, %v4750_v32  ;;  %v4751_v17 = vrot.slane %v4639_v57, 1  ;;  %v13441_v32 = vld [vmem:[%s18302_s10 + $0x4c] ss:$36 sps:$4 sm:$0xff]  }
 0x39c   : > { %v4304_v21 = vpop.f32.mrb[73].mxu0  ;;  %v13439_v57 = vld [vmem:[%s18302_s10 + $0x48] ss:$36 sps:$4 sm:$0xff]   ;;  %8838 = vmatprep.subr.bf16.mxu1 %v13441_v32 }
 0x39d   : > { %v4306_v50 = vpop.f32.mrb[74].mxu0  ;;  %18430 = vst [vmem:[#allocation25_spill] sm:$0xff] %v15130_v42  ;;  %v15137_v24 = vcombine.low %v4296_v44, %v4751_v17  ;;  %v15142_v19 = vcombine.high %v4296_v44, %v4751_v17  ;;  %v4612_v46 = vrot.slane %v4304_v21, 7  ;;  %v15154_v17 = vpop.permute.xlu0 %13048  ;;  %8839 = vmatpush1.bf16.msra.mxu1 %v13439_v57  ;;  %v6472_v42 = vcombine.high %v12577_v27, %v12577_v27 }
 0x39e   : > { %v4308_v39 = vpop.f32.mrb[75].mxu0  ;;  %18433 = vst [vmem:[#allocation28_spill] sm:$0xff] %v15154_v17 }
 0x39f   : > { %18432 = vst [vmem:[#allocation27_spill] sm:$0xff] %v15142_v19  ;;  %v4640_v43 = vadd.f32 %v4612_v46, %v15048_v36  ;;  %v4613_v36 = vrot.slane %v4308_v39, 7 }
 0x3a1   : > { %v4752_v21 = vrot.slane %v4640_v43, 1  ;;  %v15163_v46 = vpop.permute.xlu0 %13058  ;;  %v4641_v33 = vadd.f32 %v4613_v36, %v15052_v18 }
 0x3a2   : > { %18436 = vst [vmem:[#allocation31_spill] sm:$0xff] %v15163_v46 }
 0x3a3   : > { %v4312_v7 = vpop.f32.mrb[76].mxu0  ;;  %v15159_v60 = vcombine.low %v4302_v13, %v4752_v21  ;;  %v15161_v19 = vcombine.high %v4302_v13, %v4752_v21  ;;  %v4753_v21 = vrot.slane %v4641_v33, 1 }
 0x3a4   : > { %v4314_v44 = vpop.f32.mrb[77].mxu0 }
 0x3a5   : > { %v4316_v47 = vpop.f32.mrb[78].mxu0  ;;  %18434 = vst [vmem:[#allocation29_spill] sm:$0xff] %v15159_v60  ;;  %18435 = vst [vmem:[#allocation30_spill] sm:$0xff] %v15161_v19  ;;  %v4614_v32 = vrot.slane %v4314_v44, 7  ;;  %v15173_v60 = vrot.slane %v6472_v42, %v14001_v8  ;;  %v15175_v13 = vpop.permute.xlu0 %13068  ;;  %v4833_v44 = vrot.slane %v15078_v25, %v14008_v15  ;;  %v15188_v42 = vcombine.high %v15170_v35, %v15170_v35 }
 0x3a6   : > { %v4318_v55 = vpop.f32.mrb[79].mxu0  ;;  %18437 = vst [vmem:[#allocation32_spill] sm:$0xff] %v15175_v13 }
 0x3a7   : > { %v4642_v57 = vadd.f32 %v4614_v32, %v15060_v26  ;;  %v4615_v20 = vrot.slane %v4318_v55, 7  ;;  %v15180_v26 = vcombine.low %v4306_v50, %v4753_v21  ;;  %v15182_v55 = vcombine.high %v4306_v50, %v4753_v21 }
 0x3a8   : > { %v5444_v59 = vcombine.high %v4833_v44, %v4833_v44  ;;  %v15194_v25 = vcombine.high %v15173_v60, %v15173_v60  ;;  %v4847_v50 = vrot.slane %v15082_v28, %v14008_v15  ;;  %v4861_v28 = vrot.slane %v15092_v10, %v14008_v15 }
 0x3a9   : > { %v4754_v18 = vrot.slane %v4642_v57, 1  ;;  %v4643_v36 = vadd.f32 %v4615_v20, %v15062_v9  ;;  %18438 = vst [vmem:[#allocation33_spill] sm:$0xff] %v15180_v26  ;;  %18439 = vst [vmem:[#allocation34_spill] sm:$0xff] %v15182_v55 }
 0x3aa   : > { %v5503_v9 = vcombine.high %v4847_v50, %v4847_v50  ;;  %v5569_v46 = vrot.slane %v4861_v28, %v14001_v8 }
 0x3ab   : > { %v15166_v43 = vpop.f32.mrb[80].mxu0  ;;  %v15184_v27 = vcombine.low %v4312_v7, %v4754_v18  ;;  %v15190_v32 = vcombine.high %v4312_v7, %v4754_v18  ;;  %v15205_v7 = vpop.permute.xlu0 %13078  ;;  %v5451_v18 = vrot.slane %v4833_v44, %v14001_v8  ;;  %v5510_v44 = vrot.slane %v4847_v50, %v14001_v8 }
 0x3ac   : > { %v4324_v34 = vpop.f32.mrb[81].mxu0  ;;  %18444 = vst [vmem:[#allocation39_spill] sm:$0xff] %v15205_v7 }
 0x3ad   : > { %v4326_v39 = vpop.f32.mrb[82].mxu0  ;;  %18440 = vst [vmem:[#allocation35_spill] sm:$0xff] %v15184_v27  ;;  %18441 = vst [vmem:[#allocation36_spill] sm:$0xff] %v15190_v32  ;;  %v4616_v20 = vrot.slane %v4324_v34, 7  ;;  %v5459_v26 = vcombine.high %v5451_v18, %v5451_v18  ;;  %v6493_v34 = vadd.f32 %v15170_v35, %v5451_v18  ;;  %v5518_v50 = vcombine.high %v5510_v44, %v5510_v44 }
 0x3ae   : > { %v4327_v19 = vpop.f32.mrb[83].mxu0  ;;  %v4755_v39 = vrot.slane %v4643_v36, 1  ;;  %v5562_v36 = vcombine.high %v4861_v28, %v4861_v28 }
 0x3af   : > { %v15229_v27 = vpop.permute.xlu0 %13088  ;;  %v4644_v19 = vadd.f32 %v4616_v20, %v15066_v61  ;;  %v13442_v61 = vld [vmem:[%s18302_s10 + $0x50] ss:$36 sps:$4 sm:$0xff]   ;;  %v6494_v20 = vadd.f32 %v15188_v42, %v5459_v26  ;;  %v4889_v26 = vrot.slane %v15104_v4, %v14008_v15 }
 0x3b0   : > { %v15201_v33 = vcombine.low %v4316_v47, %v4755_v39  ;;  %v15203_v57 = vcombine.high %v4316_v47, %v4755_v39  ;;  %v4875_v39 = vrot.slane %v15096_v48, %v14008_v15  ;;  %18445 = vst [vmem:[#allocation40_spill] sm:$0xff] %v15229_v27  ;;  %v13444_v47 = vld [vmem:[%s18302_s10 + $0x54] ss:$36 sps:$4 sm:$0xff]   ;;  %v5576_v18 = vrot.slane %v5562_v36, %v14001_v8 }
 0x3b1   : > { %v4756_v27 = vrot.slane %v4644_v19, 1  ;;  %9175 = vmatprep.subr.bf16.mxu0 %v13444_v47  ;;  %v5680_v58 = vcombine.high %v4889_v26, %v4889_v26  ;;  %v5687_v45 = vrot.slane %v4889_v26, %v14001_v8 }
 0x3b2   : > { %18442 = vst [vmem:[#allocation37_spill] sm:$0xff] %v15201_v33  ;;  %18443 = vst [vmem:[#allocation38_spill] sm:$0xff] %v15203_v57  ;;  %v5458_v33 = vrot.slane %v5444_v59, %v14001_v8  ;;  %v5517_v59 = vrot.slane %v5503_v9, %v14001_v8  ;;  %v5621_v48 = vcombine.high %v4875_v39, %v4875_v39  ;;  %9176 = vmatpush1.bf16.msra.mxu0 %v13442_v61 }
 0x3b3   : > { %v4363_v21 = vpop.f32.mrb[84].mxu0  ;;  %v15259_v19 = vcombine.low %v15166_v43, %v4756_v27  ;;  %v15262_v47 = vcombine.high %v15166_v43, %v4756_v27  ;;  %v15276_v43 = vadd.f32 %v15170_v35, %v5510_v44  ;;  %v5577_v27 = vcombine.high %v5569_v46, %v5569_v46 }
 0x3b4   : > { %v4365_v32 = vpop.f32.mrb[85].mxu0  ;;  %v5460_v10 = vcombine.high %v5458_v33, %v5458_v33  ;;  %v15250_v63 = vadd.f32 %v15002_v31, %v4363_v21  ;;  %v13447_v31 = vld [vmem:[%s18302_s10 + $0x94] ss:$36 sps:$4 sm:$0xff]   ;;  %v5628_v21 = vrot.slane %v4875_v39, %v14001_v8  ;;  %v5635_v61 = vrot.slane %v5621_v48, %v14001_v8 }
 0x3b5   : > { %v4367_v57 = vpop.f32.mrb[86].mxu0  ;;  %v15253_v9 = vadd.f32 %v4365_v32, %v14998_v14  ;;  %18446 = vst [vmem:[#allocation41_spill] sm:$0xff] %v15259_v19  ;;  %18447 = vst [vmem:[#allocation42_spill] sm:$0xff] %v15262_v47  ;;  %v6495_v14 = vadd.f32 %v15173_v60, %v5458_v33  ;;  %v5519_v32 = vcombine.high %v5517_v59, %v5517_v59  ;;  %8840 = vmatprep.subr.bf16.mxu1 %v13447_v31 }
 0x3b6   : > { %v4369_v55 = vpop.f32.mrb[87].mxu0  ;;  %v6496_v28 = vadd.f32 %v15194_v25, %v5460_v10  ;;  %v15270_v4 = vadd.f32 %v15012_v53, %v4367_v57  ;;  %v13445_v10 = vld [vmem:[%s18302_s10 + $0x90] ss:$36 sps:$4 sm:$0xff]   ;;  %v6941_v47 = vcombine.low %v6493_v34, %v6494_v20  ;;  %v15280_v33 = vadd.f32 %v15188_v42, %v5518_v50 }
 0x3b7   : > { %v6509_v39 = vadd.f32 %v15173_v60, %v5517_v59  ;;  %v5578_v19 = vcombine.high %v5576_v18, %v5576_v18  ;;  %v15284_v53 = vadd.f32 %v4369_v55, %v15004_v62  ;;  %8841 = vmatpush1.bf16.msra.mxu1 %v13445_v10  ;;  %v15291_v34 = vadd.f32 %v15170_v35, %v5569_v46 }
 0x3b8   : > { %v6942_v48 = vcombine.low %v6495_v14, %v6496_v28  ;;  %v5636_v50 = vcombine.high %v5628_v21, %v5628_v21  ;;  %v6510_v20 = vadd.f32 %v15194_v25, %v5519_v32  ;;  %v15298_v55 = vadd.f32 %v15188_v42, %v5577_v27  ;;  %v15330_v27 = vpop.permute.xlu0 %13098 }
 0x3b9   : > { %v5637_v31 = vcombine.high %v5635_v61, %v5635_v61  ;;  %v4903_v10 = vrot.slane %v15110_v56, %v14008_v15  ;;  %v15303_v44 = vrot.slane %v6941_v47, %v14001_v8  ;;  %v6523_v46 = vadd.f32 %v15173_v60, %v5576_v18  ;;  %18448 = vst [vmem:[#allocation43_spill] sm:$0xff] %v15330_v27 }
 0x3ba   : > { %v15307_v14 = vadd.f32 %v15170_v35, %v5628_v21  ;;  %v5694_v56 = vrot.slane %v5680_v58, %v14001_v8  ;;  %v6956_v47 = vrot.slane %v6942_v48, %v14001_v8  ;;  %v6536_v21 = vadd.f32 %v15188_v42, %v5636_v50 }
 0x3bb   : > { %v4373_v7 = vpop.f32.mrb[88].mxu0  ;;  %v5739_v0 = vcombine.high %v4903_v10, %v4903_v10  ;;  %v7007_v58 = vcombine.low %v15276_v43, %v15280_v33  ;;  %v6538_v48 = vadd.f32 %v15194_v25, %v5637_v31 }
 0x3bc   : > { %v4375_v13 = vpop.f32.mrb[89].mxu0  ;;  %v15295_v59 = vadd.f32 %v15014_v30, %v4373_v7  ;;  %v6524_v30 = vadd.f32 %v15194_v25, %v5578_v19  ;;  %v7008_v19 = vcombine.low %v6509_v39, %v6510_v20  ;;  %v6957_v43 = vcombine.low %v15303_v44, %v6956_v47 }
 0x3bd   : > { %v4377_v16 = vpop.f32.mrb[90].mxu0  ;;  %v15311_v7 = vadd.f32 %v4375_v13, %v15008_v11  ;;  %v6537_v13 = vadd.f32 %v15173_v60, %v5635_v61  ;;  %v5695_v39 = vcombine.high %v5687_v45, %v5687_v45  ;;  %v4917_v20 = vrot.slane %v15117_v23, %v14008_v15 }
 0x3be   : > { %v4379_v36 = vpop.f32.mrb[91].mxu0  ;;  %v15318_v57 = vadd.f32 %v15024_v3, %v4377_v16  ;;  %v5746_v3 = vrot.slane %v4903_v10, %v14001_v8  ;;  %v7074_v16 = vcombine.low %v6523_v46, %v6524_v30  ;;  %v7022_v44 = vrot.slane %v7008_v19, %v14001_v8 }
 0x3bf   : > { %v15323_v11 = vadd.f32 %v4379_v36, %v15016_v51  ;;  %v13450_v51 = vld [vmem:[%s18302_s10 + $0x9c] ss:$36 sps:$4 sm:$0xff]   ;;  %v5696_v36 = vcombine.high %v5694_v56, %v5694_v56  ;;  %v5753_v31 = vrot.slane %v5739_v0, %v14001_v8  ;;  %v7140_v10 = vcombine.low %v6537_v13, %v6538_v48 }
 0x3c0   : > { %9177 = vmatprep.subr.bf16.mxu0 %v13450_v51  ;;  %v5754_v30 = vcombine.high %v5746_v3, %v5746_v3  ;;  %v6549_v0 = vadd.f32 %v15170_v35, %v5687_v45  ;;  %v5798_v48 = vcombine.high %v4917_v20, %v4917_v20  ;;  %v18449_v45 = vunpack.i.l.bf16 %v15101_v54 }
 0x3c1   : > { %v6552_v19 = vadd.f32 %v15194_v25, %v5696_v36  ;;  %v15388_v36 = vadd.f32 %v15170_v35, %v5746_v3  ;;  %v18451_v3 = vunpack.i.l.bf16 %v15108_v40  ;;  %v15486_v40 = vpop.permute.xlu1 %13003 }
 0x3c2   : > { %18479 = vst [vmem:[#allocation47_spill] sm:$0xff] %v15486_v40 }
 0x3c3   : > { %v4383_v62 = vpop.f32.mrb[92].mxu0 }
 0x3c4   : > { %v4385_v28 = vpop.f32.mrb[93].mxu0  ;;  %v15333_v50 = vadd.f32 %v15026_v6, %v4383_v62  ;;  %v13448_v6 = vld [vmem:[%s18302_s10 + $0x98] ss:$36 sps:$4 sm:$0xff]  }
 0x3c5   : > { %v4387_v32 = vpop.f32.mrb[94].mxu0  ;;  %v15336_v26 = vadd.f32 %v4385_v28, %v15020_v41  ;;  %v13453_v41 = vld [vmem:[%s18302_s10 + $0xdc] ss:$36 sps:$4 sm:$0xff]   ;;  %9178 = vmatpush1.bf16.msra.mxu0 %v13448_v6  ;;  %v6551_v6 = vadd.f32 %v15173_v60, %v5694_v56  ;;  %v4931_v56 = vrot.slane %v15128_v49, %v14008_v15  ;;  %v18468_v28 = vld [vmem:[#allocation7_spill] sm:$0xff] }
 0x3c6   : > { %v4389_v18 = vpop.f32.mrb[95].mxu0  ;;  %v15343_v61 = vadd.f32 %v15034_v29, %v4387_v32  ;;  %v7073_v29 = vcombine.low %v15291_v34, %v15298_v55  ;;  %8842 = vmatprep.subr.bf16.mxu1 %v13453_v41  ;;  %v7015_v34 = vrot.slane %v7007_v58, %v14001_v8  ;;  %v7088_v55 = vrot.slane %v7074_v16, %v14001_v8 }
 0x3c7   : > { %v15346_v33 = vadd.f32 %v4389_v18, %v15028_v1  ;;  %v13451_v1 = vld [vmem:[%s18302_s10 + $0xd8] ss:$36 sps:$4 sm:$0xff]   ;;  %v5805_v58 = vrot.slane %v4917_v20, %v14001_v8  ;;  %v15384_v41 = vsel %vm8145_vm5, %v6957_v43, %v18449_v45  ;;  %v15391_v20 = vadd.f32 %v15188_v42, %v5754_v30 }
 0x3c8   : > { %8843 = vmatpush1.bf16.msra.mxu1 %v13451_v1  ;;  %v7023_v51 = vcombine.low %v7015_v34, %v7022_v44  ;;  %v7081_v16 = vrot.slane %v7073_v29, %v14001_v8  ;;  %18450 = vst [vmem:[#allocation44_spill] sm:$0xff] %v15384_v41  ;;  %v6565_v29 = vadd.f32 %v15173_v60, %v5753_v31 }
 0x3c9   : > { %v5812_v1 = vrot.slane %v5798_v48, %v14001_v8  ;;  %v18454_v48 = vunpack.i.l.bf16 %v15115_v22  ;;  %v5857_v45 = vcombine.high %v4931_v56, %v4931_v56 }
 0x3ca   : > { %v7089_v44 = vcombine.low %v7081_v16, %v7088_v55  ;;  %v18453_v55 = vld [vmem:[#allocation3_spill] sm:$0xff] }
 0x3cb   : > { %v4393_v62 = vpop.f32.mrb[96].mxu0 }
 0x3cc   : > { %v15365_v46 = vadd.f32 %v15036_v38, %v4393_v62  ;;  %v4395_v23 = vpop.f32.mrb[97].mxu0  ;;  %v7139_v38 = vcombine.low %v15307_v14, %v6536_v21  ;;  %v7154_v14 = vrot.slane %v7140_v10, %v14001_v8  ;;  %v5755_v21 = vcombine.high %v5753_v31, %v5753_v31 }
 0x3cd   : > { %v15370_v32 = vadd.f32 %v4395_v23, %v15032_v52  ;;  %v4397_v47 = vpop.f32.mrb[98].mxu0  ;;  %v6550_v52 = vadd.f32 %v15188_v42, %v5695_v39  ;;  %v7206_v62 = vcombine.low %v6551_v6, %v6552_v19  ;;  %v5813_v10 = vcombine.high %v5805_v58, %v5805_v58  ;;  %v13456_v19 = vld [vmem:[%s18302_s10 + $0xe4] ss:$36 sps:$4 sm:$0xff]  }
 0x3ce   : > { %v4398_v13 = vpop.f32.mrb[99].mxu0  ;;  %v7147_v39 = vrot.slane %v7139_v38, %v14001_v8  ;;  %v15403_v23 = vsel %vm8145_vm5, %v7023_v51, %v18451_v3  ;;  %v4945_v31 = vrot.slane %v15137_v24, %v14008_v15  ;;  %v15419_v51 = vsel %vm8145_vm5, %v7089_v44, %v18454_v48  ;;  %v18456_v24 = vld [vmem:[#allocation2_spill] sm:$0xff]  ;;  %9179 = vmatprep.subr.bf16.mxu0 %v13456_v19 }
 0x3cf   : > { %18452 = vst [vmem:[#allocation45_spill] sm:$0xff] %v15403_v23  ;;  %v7205_v49 = vcombine.low %v6549_v0, %v6550_v52  ;;  %v15414_v13 = vadd.f32 %v15170_v35, %v5805_v58  ;;  %18455 = vst [vmem:[#allocation3_spill] sm:$0xff] %v15419_v51  ;;  %v6566_v16 = vadd.f32 %v15194_v25, %v5755_v21  ;;  %v13454_v6 = vld [vmem:[%s18302_s10 + $0xe0] ss:$36 sps:$4 sm:$0xff]   ;;  %v18477_v51 = vld [vmem:[#allocation9_spill] sm:$0xff] }
 0x3d0   : > { %v7155_v34 = vcombine.low %v7147_v39, %v7154_v14  ;;  %v5864_v14 = vrot.slane %v4931_v56, %v14001_v8  ;;  %v15430_v58 = vrot.slane %v7206_v62, %v14001_v8  ;;  %v18458_v39 = vld [vmem:[#allocation6_spill] sm:$0xff]  ;;  %v5814_v21 = vcombine.high %v5812_v1, %v5812_v1  ;;  %9180 = vmatpush1.bf16.msra.mxu0 %v13454_v6 }
 0x3d1   : > { %v18463_v62 = vunpack.i.l.bf16 %v15121_v5  ;;  %v7213_v19 = vrot.slane %v7205_v49, %v14001_v8  ;;  %v7271_v6 = vcombine.low %v15388_v36, %v15391_v20  ;;  %v5923_v43 = vrot.slane %v4945_v31, %v14001_v8 }
 0x3d3   : > { %v4401_v30 = vpop.f32.mrb[100].mxu0 }
 0x3d4   : > { %v15408_v47 = vadd.f32 %v18453_v55, %v4401_v30  ;;  %v4403_v38 = vpop.f32.mrb[101].mxu0  ;;  %v15436_v30 = vadd.f32 %v15188_v42, %v5813_v10  ;;  %v6579_v55 = vadd.f32 %v15173_v60, %v5812_v1  ;;  %v18466_v1 = vld [vmem:[#allocation29_spill] sm:$0xff] }
 0x3d5   : > { %v15423_v0 = vadd.f32 %v4403_v38, %v18456_v24  ;;  %v4405_v52 = vpop.f32.mrb[102].mxu0  ;;  %v18460_v38 = vld [vmem:[#allocation4_spill] sm:$0xff]  ;;  %v4959_v18 = vrot.slane %v18466_v1, %v14008_v15  ;;  %v5872_v24 = vcombine.high %v5864_v14, %v5864_v14 }
 0x3d6   : > { %v15433_v3 = vadd.f32 %v18458_v39, %v4405_v52  ;;  %v4407_v44 = vpop.f32.mrb[103].mxu0  ;;  %v15447_v52 = vsel %vm8145_vm5, %v7155_v34, %v18463_v62  ;;  %v5916_v39 = vcombine.high %v4945_v31, %v4945_v31  ;;  %v7221_v34 = vcombine.low %v7213_v19, %v15430_v58 }
 0x3d7   : > { %18457 = vst [vmem:[#allocation2_spill] sm:$0xff] %v15423_v0  ;;  %v15440_v48 = vadd.f32 %v4407_v44, %v18460_v38  ;;  %18464 = vst [vmem:[#allocation46_spill] sm:$0xff] %v15447_v52  ;;  %v7272_v44 = vcombine.low %v6565_v29, %v6566_v16  ;;  %v5871_v38 = vrot.slane %v5857_v45, %v14001_v8  ;;  %v18467_v52 = vmov 0   ;;  %v18472_v45 = vld [vmem:[#allocation5_spill] sm:$0xff] }
 0x3d8   : > { %18459 = vst [vmem:[#allocation6_spill] sm:$0xff] %v15433_v3  ;;  %v6580_v62 = vadd.f32 %v15194_v25, %v5814_v21  ;;  %v8232_v5 = vrot.slane %v18467_v52, 7  ;;  %v15462_v1 = vrot.slane %v5916_v39, %v14001_v8  ;;  %v18469_v29 = vmov 0 }
 0x3d9   : > { %18461 = vst [vmem:[#allocation4_spill] sm:$0xff] %v15440_v48  ;;  %v18470_v29 = vsel %vm15468_vm8, 4294967295, %v18469_v29  ;;  %v5975_v31 = vcombine.high %v4959_v18, %v4959_v18  ;;  %v7286_v16 = vrot.slane %v7272_v44, %v14001_v8  ;;  %v5931_v19 = vcombine.high %v5923_v43, %v5923_v43 }
 0x3da   : > { %18471 = vst [vmem:[#allocation29_spill] sm:$0xff] %v18470_v29  ;;  %v8464_v39 = vsel %vm15468_vm8, 0, %v8232_v5  ;;  %v7338_v5 = vcombine.low %v6579_v55, %v6580_v62 }
 0x3db   : > { %v4411_v49 = vpop.f32.mrb[104].mxu0  ;;  %v15490_v44 = vsel %vm15478_vm11, %v8464_v39, 0  ;;  %v15516_v62 = vrot.slane %v5975_v31, %v14001_v8  ;;  %v15529_v41 = vadd.f32 %v15188_v42, %v5931_v19 }
 0x3dc   : > { %v15465_v36 = vadd.f32 %v18468_v28, %v4411_v49  ;;  %v4413_v20 = vpop.f32.mrb[105].mxu0  ;;  %v18474_v28 = vmov 0  ;;  %v5982_v49 = vrot.slane %v4959_v18, %v14001_v8  ;;  %18480 = vst [vmem:[#allocation48_spill] sm:$0xff] %v15490_v44  ;;  %12614 = vmatmul.mubr.msk.bf16.vlgmr.msra.gmra.mrb[60].mxu1 %vm3462_vm3, %v15490_v44  ;;  %12646 = vmatmul.mubr.msk.bf16.vlgmr.msra.gmra.mrb[124].mxu0 %vm3462_vm3, %v15490_v44 }
 0x3dd   : > { %v15474_v58 = vadd.f32 %v4413_v20, %v18472_v45  ;;  %v4415_v21 = vpop.f32.mrb[106].mxu0  ;;  %v18475_v28 = vsel %vm15478_vm11, 4294967295, %v18474_v28  ;;  %v7279_v20 = vrot.slane %v7271_v6, %v14001_v8  ;;  %v18481_v45 = vld [vmem:[#allocation8_spill] sm:$0xff]  ;;  %v5873_v18 = vcombine.high %v5871_v38, %v5871_v38  ;;  %8874 = vmatprep.mubr.bf16.mxu1 %v18467_v52  ;;  %9211 = vmatprep.mubr.bf16.mxu0 %v18467_v52 }
 0x3de   : > { %18476 = vst [vmem:[#allocation5_spill] sm:$0xff] %v18475_v28  ;;  %v15484_v22 = vadd.f32 %v18477_v51, %v4415_v21  ;;  %v4417_v23 = vpop.f32.mrb[107].mxu0  ;;  %v15502_v51 = vadd.f32 %v15170_v35, %v5864_v14  ;;  %v7337_v21 = vcombine.low %v15414_v13, %v15436_v30  ;;  %v15513_v6 = vadd.f32 %v15173_v60, %v5871_v38  ;;  %v18483_v30 = vld [vmem:[#allocation26_spill] sm:$0xff] }
 0x3df   : > { %18473 = vst [vmem:[#allocation7_spill] sm:$0xff] %v15474_v58  ;;  %v15494_v29 = vadd.f32 %v4417_v23, %v18481_v45  ;;  %v15510_v23 = vadd.f32 %v15188_v42, %v5872_v24  ;;  %v7287_v14 = vcombine.low %v7279_v20, %v7286_v16  ;;  %v15521_v13 = vadd.f32 %v15170_v35, %v5923_v43 }
 0x3e0   : > { %18478 = vst [vmem:[#allocation9_spill] sm:$0xff] %v15484_v22  ;;  %v18484_v45 = vunpack.i.l.bf16 %v18483_v30  ;;  %v5990_v24 = vcombine.high %v5982_v49, %v5982_v49  ;;  %v15533_v38 = vadd.f32 %v15173_v60, %v15462_v1  ;;  %v7352_v20 = vrot.slane %v7338_v5, %v14001_v8  ;;  %v18489_v5 = vld [vmem:[#allocation33_spill] sm:$0xff] }
 0x3e1   : > { %18482 = vst [vmem:[#allocation8_spill] sm:$0xff] %v15494_v29  ;;  %v15539_v39 = vadd.f32 %v15170_v35, %v5982_v49  ;;  %v18487_v30 = vunpack.i.l.bf16 %v15154_v17  ;;  %v4973_v16 = vrot.slane %v18489_v5, %v14008_v15 }
 0x3e2   : > { %v15526_v55 = vsel %vm8145_vm5, %v7221_v34, %v18484_v45  ;;  %v7345_v34 = vrot.slane %v7337_v21, %v14001_v8  ;;  %v6594_v45 = vadd.f32 %v15194_v25, %v5873_v18  ;;  %v15553_v21 = vadd.f32 %v15188_v42, %v5990_v24 }
 0x3e3   : > { %18485 = vst [vmem:[#allocation49_spill] sm:$0xff] %v15526_v55  ;;  %v12849_v43 = vpop.f32.mrb[108].mxu0  ;;  %v15548_v40 = vsel %vm8145_vm5, %v7287_v14, %v18487_v30  ;;  %v15557_v18 = vadd.f32 %v15173_v60, %v15516_v62  ;;  %v18490_v14 = vld [vmem:[#allocation35_spill] sm:$0xff] }
 0x3e4   : > { %v4689_v44 = vrot.slane %v12849_v43, 7  ;;  %v4472_v19 = vpop.f32.mrb[109].mxu0  ;;  %18488 = vst [vmem:[#allocation50_spill] sm:$0xff] %v15548_v40  ;;  %v7353_v28 = vcombine.low %v7345_v34, %v7352_v20  ;;  %v4987_v30 = vrot.slane %v18490_v14, %v14008_v15  ;;  %v7404_v24 = vcombine.low %v15513_v6, %v6594_v45 }
 0x3e5   : > { %v4687_v49 = vrot.slane %v4472_v19, 7  ;;  %v12850_v52 = vpop.f32.mrb[110].mxu0  ;;  %v7403_v19 = vcombine.low %v15502_v51, %v15510_v23  ;;  %v6041_v34 = vrot.slane %v4973_v16, %v14001_v8 }
 0x3e6   : > { %v4717_v43 = vadd.f32 %v4689_v44, %v15295_v59  ;;  %v4690_v55 = vrot.slane %v12850_v52, 7  ;;  %v4475_v17 = vpop.f32.mrb[111].mxu0  ;;  %v6034_v52 = vcombine.high %v4973_v16, %v4973_v16  ;;  %v6093_v51 = vcombine.high %v4987_v30, %v4987_v30  ;;  %v18496_v59 = vld [vmem:[#allocation37_spill] sm:$0xff] }
 0x3e7   : > { %v4715_v5 = vadd.f32 %v4687_v49, %v15250_v63  ;;  %v4688_v40 = vrot.slane %v4475_v17, 7 }
 0x3e8   : > { %v5039_v54 = vrot.slane %v4717_v43, 1  ;;  %v4718_v10 = vadd.f32 %v4690_v55, %v15318_v57 }
 0x3e9   : > { %v5037_v44 = vrot.slane %v4715_v5, 1  ;;  %v4716_v20 = vadd.f32 %v4688_v40, %v15270_v4  ;;  %v18492_v5 = vld [vmem:[#allocation31_spill] sm:$0xff] }
 0x3ea   : > { %v5069_v63 = vcombine.low %v15311_v7, %v5039_v54  ;;  %v5070_v17 = vcombine.high %v15311_v7, %v5039_v54  ;;  %v5040_v49 = vrot.slane %v4718_v10, 1 }
 0x3eb   : > { %v5065_v23 = vcombine.low %v15253_v9, %v5037_v44  ;;  %v5066_v6 = vcombine.high %v15253_v9, %v5037_v44  ;;  %v5038_v57 = vrot.slane %v4716_v20, 1  ;;  %v15575_v55 = vpop.f32.mrb[112].mxu0  ;;  %v18493_v44 = vunpack.i.l.bf16 %v18492_v5 }
 0x3ec   : > { %v5155_v45 = vrot.slane %v5069_v63, %v14008_v15  ;;  %v5162_v43 = vrot.slane %v5070_v17, %v14008_v15  ;;  %v5071_v40 = vcombine.low %v15323_v11, %v5040_v49  ;;  %v15581_v4 = vcombine.high %v15323_v11, %v5040_v49  ;;  %v15583_v16 = vpop.f32.mrb[113].mxu0 }
 0x3ed   : > { %v5127_v54 = vrot.slane %v5065_v23, %v14008_v15  ;;  %v5134_v7 = vrot.slane %v5066_v6, %v14008_v15  ;;  %v15588_v9 = vcombine.low %v15284_v53, %v5038_v57  ;;  %v15591_v10 = vcombine.high %v15284_v53, %v5038_v57  ;;  %v12854_v14 = vpop.f32.mrb[114].mxu0 }
 0x3ee   : > { %v15596_v20 = vsel %vm8145_vm5, %v7353_v28, %v18493_v44  ;;  %v6100_v11 = vrot.slane %v4987_v30, %v14001_v8  ;;  %v5352_v63 = vrot.slane %v5155_v45, 2  ;;  %v15599_v17 = vrot.slane %v5162_v43, 2  ;;  %v15601_v49 = vpop.f32.mrb[115].mxu0  ;;  %v18497_v45 = vld [vmem:[#allocation18_spill] sm:$0xff] }
 0x3ef   : > { %18494 = vst [vmem:[#allocation33_spill] sm:$0xff] %v15596_v20  ;;  %v5001_v53 = vrot.slane %v18496_v59, %v14008_v15  ;;  %v5346_v57 = vrot.slane %v5127_v54, 2  ;;  %v5347_v14 = vrot.slane %v5134_v7, 2  ;;  %v15608_v5 = vrot.slane %v6034_v52, %v14001_v8  ;;  %v13457_v20 = vld [vmem:[%s18302_s10 + $0x10] ss:$36 sps:$4 sm:$0xff]   ;;  %v18501_v54 = vld [vmem:[#allocation14_spill] sm:$0xff] }
 0x3f0   : > { %v6049_v28 = vcombine.high %v6041_v34, %v6041_v34  ;;  %v15612_v30 = vsel %vm5345_vm12, %v5352_v63, %v15599_v17  ;;  %v18498_v43 = vrot.slane %v18497_v45, %v14008_v15  ;;  %v15621_v6 = vrot.slane %v6093_v51, %v14001_v8 }
 0x3f1   : > { %v15626_v52 = vrot.slane %v7403_v19, %v14001_v8  ;;  %v15629_v7 = vrot.slane %v7404_v24, %v14001_v8  ;;  %v15638_v51 = vadd.f32 %v15170_v35, %v6041_v34  ;;  %v6108_v45 = vcombine.high %v6100_v11, %v6100_v11 }
 0x3f2   : > { %v15618_v44 = vsel %vm5345_vm12, %v18498_v43, %v5352_v63  ;;  %v13459_v63 = vld [vmem:[%s18302_s10 + $0x14] ss:$36 sps:$4 sm:$0xff]   ;;  %v5348_v43 = vsel %vm5345_vm12, %v5346_v57, %v5347_v14  ;;  %v18502_v19 = vrot.slane %v18501_v54, %v14008_v15  ;;  %v15648_v59 = vadd.f32 %v15170_v35, %v6100_v11 }
 0x3f3   : > { %18499 = vst [vmem:[#allocation35_spill] sm:$0xff] %v15618_v44  ;;  %v6152_v23 = vcombine.high %v5001_v53, %v5001_v53  ;;  %v6159_v48 = vrot.slane %v5001_v53, %v14001_v8  ;;  %v5169_v29 = vrot.slane %v5071_v40, %v14008_v15  ;;  %v15652_v3 = vpop.f32.mrb[116].mxu0  ;;  %9510 = vmatprep.subr.bf16.mxu1 %v13459_v63 }
 0x3f4   : > { %v15645_v24 = vsel %vm5345_vm12, %v18502_v19, %v5346_v57  ;;  %v6050_v34 = vcombine.high %v15608_v5, %v15608_v5  ;;  %v15657_v22 = vadd.f32 %v15188_v42, %v6049_v28  ;;  %v5478_v54 = vcombine.high %v5348_v43, %v5348_v43  ;;  %v15661_v11 = vpop.f32.mrb[117].mxu0  ;;  %9511 = vmatpush1.bf16.msra.mxu1 %v13457_v20 }
 0x3f5   : > { %18503 = vst [vmem:[#allocation37_spill] sm:$0xff] %v15645_v24  ;;  %v5461_v57 = vcombine.high %v15645_v24, %v15645_v24  ;;  %v15665_v53 = vadd.f32 %v15173_v60, %v15608_v5  ;;  %v18504_v63 = vcombine.high %v15462_v1, %v15462_v1  ;;  %v15674_v19 = vrot.slane %v5348_v43, %v14001_v8  ;;  %v15676_v56 = vpop.f32.mrb[118].mxu0 }
 0x3f6   : > { %18506 = vst [vmem:[#allocation14_spill] sm:$0xff] %v15676_v56  ;;  %v15682_v20 = vrot.slane %v5478_v54, %v14001_v8  ;;  %v15685_v5 = vrot.slane %v5347_v14, %v14001_v8  ;;  %v5176_v40 = vrot.slane %v15581_v4, %v14008_v15  ;;  %v15689_v1 = vpop.f32.mrb[119].mxu0  ;;  %v15696_v43 = vadd.f32 %v15173_v60, %v15621_v6 }
 0x3f7   : > { %v6608_v28 = vadd.f32 %v15194_v25, %v18504_v63  ;;  %18505 = vst [vmem:[#allocation18_spill] sm:$0xff] %v15674_v19  ;;  %v15679_v31 = vrot.slane %v5461_v57, %v14001_v8  ;;  %18510 = vst [vmem:[#allocation54_spill] sm:$0xff] %v15689_v1  ;;  %v15692_v63 = vadd.f32 %v15188_v42, %v6108_v45  ;;  %v5355_v57 = vrot.slane %v5169_v29, 2 }
 0x3f8   : > { %18508 = vst [vmem:[#allocation52_spill] sm:$0xff] %v15682_v20  ;;  %18509 = vst [vmem:[#allocation53_spill] sm:$0xff] %v15685_v5  ;;  %v5141_v54 = vrot.slane %v15588_v9, %v14008_v15  ;;  %v15701_v56 = vrot.slane %v6152_v23, %v14001_v8  ;;  %v6167_v14 = vcombine.high %v6159_v48, %v6159_v48 }
 0x3f9   : > { %18507 = vst [vmem:[#allocation51_spill] sm:$0xff] %v15679_v31  ;;  %v5477_v4 = vcombine.high %v15679_v31, %v15679_v31  ;;  %v5494_v1 = vcombine.high %v15682_v20, %v15682_v20  ;;  %v7469_v45 = vcombine.low %v15521_v13, %v15529_v41  ;;  %v7470_v27 = vcombine.low %v15533_v38, %v6608_v28  ;;  %v18516_v28 = vld [vmem:[#allocation19_spill] sm:$0xff] }
 0x3fa   : > { %v15712_v29 = vadd.f32 %v15188_v42, %v15674_v19  ;;  %v5148_v9 = vrot.slane %v15591_v10, %v14008_v15  ;;  %v15724_v20 = vadd.f32 %v15188_v42, %v15685_v5  ;;  %v15726_v41 = vrot.slane %v5176_v40, 2 }
 0x3fb   : > { %v15717_v23 = vadd.f32 %v15170_v35, %v5477_v4  ;;  %v15720_v31 = vadd.f32 %v15170_v35, %v5494_v1  ;;  %v18515_v13 = vcombine.high %v15516_v62, %v15516_v62  ;;  %v5579_v10 = vcombine.high %v15618_v44, %v15618_v44  ;;  %v15742_v5 = vpop.f32.mrb[120].mxu0 }
 0x3fc   : > { %18511 = vst [vmem:[#allocation55_spill] sm:$0xff] %v15712_v29  ;;  %18514 = vst [vmem:[#allocation58_spill] sm:$0xff] %v15724_v20  ;;  %v18517_v4 = vrot.slane %v18516_v28, %v14008_v15  ;;  %v5349_v19 = vrot.slane %v5141_v54, 2  ;;  %v7535_v40 = vcombine.low %v15539_v39, %v15553_v21  ;;  %v5357_v24 = vsel %vm5345_vm12, %v5355_v57, %v15726_v41  ;;  %v15752_v2 = vpop.f32.mrb[121].mxu0  ;;  %v18525_v29 = vld [vmem:[#allocation15_spill] sm:$0xff] }
 0x3fd   : > { %18512 = vst [vmem:[#allocation56_spill] sm:$0xff] %v15717_v23  ;;  %18513 = vst [vmem:[#allocation57_spill] sm:$0xff] %v15720_v31  ;;  %v15732_v38 = vadd.f32 %v15194_v25, %v18515_v13  ;;  %v15757_v54 = vadd.f32 %v15170_v35, %v6159_v48  ;;  %v5596_v21 = vcombine.high %v15612_v30, %v15612_v30  ;;  %v12862_v62 = vpop.f32.mrb[122].mxu0  ;;  %v5350_v28 = vrot.slane %v5148_v9, 2 }
 0x3fe   : > { %v15740_v1 = vsel %vm5345_vm12, %v18517_v4, %v5355_v57  ;;  %18519 = vst [vmem:[#allocation59_spill] sm:$0xff] %v15742_v5  ;;  %18520 = vst [vmem:[#allocation60_spill] sm:$0xff] %v15752_v2  ;;  %v15763_v4 = vpop.permute.xlu1 %13013  ;;  %v15766_v13 = vadd.f32 %v15188_v42, %v6167_v14  ;;  %v15770_v57 = vadd.f32 %v15173_v60, %v15701_v56  ;;  %v15778_v39 = vpop.f32.mrb[123].mxu0 }
 0x3ff   : > { %18518 = vst [vmem:[#allocation19_spill] sm:$0xff] %v15740_v1  ;;  %18521 = vst [vmem:[#allocation61_spill] sm:$0xff] %v15757_v54  ;;  %v18526_v48 = vrot.slane %v18525_v29, %v14008_v15  ;;  %v15781_v2 = vrot.slane %v7469_v45, %v14001_v8  ;;  %v15784_v62 = vrot.slane %v7470_v27, %v14001_v8 }
 0x400   : > { %18522 = vst [vmem:[#allocation62_spill] sm:$0xff] %v15763_v4  ;;  %18523 = vst [vmem:[#allocation63_spill] sm:$0xff] %v15766_v13  ;;  %v7536_v14 = vcombine.low %v15557_v18, %v15732_v38  ;;  %v15789_v4 = vrot.slane %v5579_v10, %v14001_v8  ;;  %v15792_v9 = vrot.slane %v7535_v40, %v14001_v8  ;;  %v18530_v10 = vld [vmem:[#allocation41_spill] sm:$0xff] }
 0x401   : > { %18524 = vst [vmem:[#allocation64_spill] sm:$0xff] %v15770_v57  ;;  %v15776_v23 = vsel %vm5345_vm12, %v18526_v48, %v5349_v19  ;;  %18528 = vst [vmem:[#allocation65_spill] sm:$0xff] %v15778_v39  ;;  %v15795_v29 = vadd.f32 %v15194_v25, %v6050_v34  ;;  %v5603_v48 = vrot.slane %v15612_v30, %v14001_v8 }
 0x402   : > { %18527 = vst [vmem:[#allocation15_spill] sm:$0xff] %v15776_v23  ;;  %18529 = vst [vmem:[#allocation66_spill] sm:$0xff] %v15789_v4  ;;  %v5351_v45 = vsel %vm5345_vm12, %v5349_v19, %v5350_v28  ;;  %v5610_v39 = vrot.slane %v5596_v21, %v14001_v8  ;;  %v5520_v18 = vcombine.high %v15776_v23, %v15776_v23  ;;  %v13024_v20 = vpop.permute.xlu1 %13023 }
 0x403   : > { %v5537_v38 = vcombine.high %v5351_v45, %v5351_v45  ;;  %v15807_v40 = vrot.slane %v18530_v10, %v14008_v15  ;;  %v5619_v34 = vrot.slane %v15599_v17, %v14001_v8  ;;  %v5638_v30 = vcombine.high %v15740_v1, %v15740_v1 }
 0x404   : > { %v15814_v19 = vrot.slane %v5351_v45, %v14001_v8  ;;  %v15817_v27 = vrot.slane %v5520_v18, %v14001_v8  ;;  %v15823_v5 = vrot.slane %v5350_v28, %v14001_v8  ;;  %v5595_v10 = vcombine.high %v15789_v4, %v15789_v4 }
 0x405   : > { %v15820_v21 = vrot.slane %v5537_v38, %v14001_v8  ;;  %v5611_v31 = vcombine.high %v5603_v48, %v5603_v48  ;;  %v5655_v23 = vcombine.high %v5357_v24, %v5357_v24  ;;  %v13026_v45 = vunpack.i.h.bf16 %v13024_v20 }
 0x406   : > { %18531 = vst [vmem:[#allocation41_spill] sm:$0xff] %v15814_v19  ;;  %18532 = vst [vmem:[#allocation67_spill] sm:$0xff] %v15817_v27  ;;  %v5536_v18 = vcombine.high %v15817_v27, %v15817_v27  ;;  %v5612_v1 = vcombine.high %v5610_v39, %v5610_v39  ;;  %v13025_v57 = vunpack.i.l.bf16 %v13024_v20  ;;  %v5620_v28 = vcombine.high %v5619_v34, %v5619_v34 }
 0x407   : > { %18533 = vst [vmem:[#allocation68_spill] sm:$0xff] %v15820_v21  ;;  %18534 = vst [vmem:[#allocation69_spill] sm:$0xff] %v15823_v5  ;;  %v5553_v38 = vcombine.high %v15820_v21, %v15820_v21  ;;  %v6533_v54 = vadd.f32 %v15188_v42, %v5619_v34  ;;  %v15835_v4 = vrot.slane %v5638_v30, %v14001_v8 }
 0x408   : > { %v15839_v17 = vadd.f32 %v15188_v42, %v15814_v19  ;;  %v15842_v13 = vadd.f32 %v15170_v35, %v5536_v18  ;;  %v15849_v21 = vadd.f32 %v15188_v42, %v15823_v5  ;;  %v6528_v20 = vadd.f32 %v15170_v35, %v5595_v10 }
 0x409   : > { %v15845_v27 = vadd.f32 %v15170_v35, %v5553_v38  ;;  %v5662_v34 = vrot.slane %v5357_v24, %v14001_v8  ;;  %v5669_v30 = vrot.slane %v5655_v23, %v14001_v8  ;;  %v6529_v44 = vadd.f32 %v15188_v42, %v5603_v48 }
 0x40a   : > { %18535 = vst [vmem:[#allocation70_spill] sm:$0xff] %v15839_v17  ;;  %v6530_v19 = vadd.f32 %v15173_v60, %v5611_v31  ;;  %v6531_v0 = vadd.f32 %v15194_v25, %v5610_v39  ;;  %v6532_v5 = vadd.f32 %v15170_v35, %v5612_v1  ;;  %v6534_v10 = vadd.f32 %v15173_v60, %v5620_v28 }
 0x40b   : > { %v7106_v58 = vcombine.low %v6528_v20, %v6529_v44  ;;  %v4693_v24 = vrot.slane %v15575_v55, 7  ;;  %v4691_v23 = vrot.slane %v15583_v16, 7  ;;  %v15867_v31 = vrot.slane %v15726_v41, %v14001_v8 }
 0x40c   : > { %v7107_v48 = vcombine.low %v6530_v19, %v6531_v0  ;;  %v7123_v18 = vcombine.low %v6532_v5, %v6533_v54  ;;  %v5654_v38 = vcombine.high %v15835_v4, %v15835_v4  ;;  %v7137_v1 = vrot.slane %v6534_v10, %v14001_v8 }
 0x40d   : > { %v7114_v39 = vrot.slane %v7106_v58, %v14001_v8  ;;  %v4721_v28 = vadd.f32 %v4693_v24, %v15365_v46  ;;  %v4719_v44 = vadd.f32 %v4691_v23, %v15333_v50  ;;  %v5671_v20 = vcombine.high %v5669_v30, %v5669_v30 }
 0x40e   : > { %v7121_v55 = vrot.slane %v7107_v48, %v14001_v8  ;;  %v7130_v16 = vrot.slane %v7123_v18, %v14001_v8  ;;  %v6542_v41 = vadd.f32 %v15170_v35, %v5654_v38  ;;  %v15879_v0 = vrot.slane %v7536_v14, %v14001_v8 }
 0x40f   : > { %v5670_v5 = vcombine.high %v5662_v34, %v5662_v34  ;;  %v5043_v54 = vrot.slane %v4721_v28, 1  ;;  %v5041_v19 = vrot.slane %v4719_v44, 1  ;;  %v6543_v10 = vadd.f32 %v15188_v42, %v5662_v34 }
 0x410   : > { %v7122_v58 = vcombine.low %v7114_v39, %v7121_v55  ;;  %v7138_v17 = vcombine.low %v7130_v16, %v7137_v1  ;;  %v6546_v46 = vadd.f32 %v15170_v35, %v5671_v20  ;;  %v6547_v14 = vadd.f32 %v15188_v42, %v15867_v31 }
 0x411   : > { %v5077_v50 = vcombine.low %v15370_v32, %v5043_v54  ;;  %v5078_v24 = vcombine.high %v15370_v32, %v5043_v54  ;;  %v5073_v18 = vcombine.low %v15336_v26, %v5041_v19  ;;  %v5074_v38 = vcombine.high %v15336_v26, %v5041_v19  ;;  %v18538_v19 = vld [vmem:[#allocation32_spill] sm:$0xff] }
 0x412   : > { %v8157_v23 = vsel %vm8145_vm5, %v7138_v17, %v13026_v45  ;;  %v8156_v48 = vsel %vm8145_vm5, %v7122_v58, %v13025_v57  ;;  %v7172_v39 = vcombine.low %v6542_v41, %v6543_v10  ;;  %v7602_v44 = vcombine.low %v15665_v53, %v15795_v29 }
 0x413   : > { %v15891_v1 = vpack.c.bf16 %v8157_v23, %v8156_v48  ;;  %v5211_v34 = vrot.slane %v5077_v50, %v14008_v15  ;;  %v5218_v28 = vrot.slane %v5078_v24, %v14008_v15  ;;  %v5183_v32 = vrot.slane %v5073_v18, %v14008_v15  ;;  %v18543_v24 = vld [vmem:[#allocation42_spill] sm:$0xff]  ;;  %v13034_v48 = vpop.permute.xlu1 %13033 }
 0x414   : > { %v18537_v26 = vcombine.high %v15621_v6, %v15621_v6  ;;  %v5190_v57 = vrot.slane %v5074_v38, %v14008_v15  ;;  %v7189_v17 = vcombine.low %v6546_v46, %v6547_v14  ;;  %v6544_v20 = vadd.f32 %v15173_v60, %v5670_v5 }
 0x415   : > { %18536 = vst [vmem:[#allocation71_spill] sm:$0xff] %v15891_v1  ;;  %v5364_v45 = vrot.slane %v5211_v34, 2  ;;  %v15905_v16 = vrot.slane %v5218_v28, 2  ;;  %v6545_v41 = vadd.f32 %v15194_v25, %v5669_v30  ;;  %v6211_v54 = vcombine.high %v15807_v40, %v15807_v40 }
 0x416   : > { %v15902_v55 = vadd.f32 %v15194_v25, %v18537_v26  ;;  %v15913_v53 = vrot.slane %v15807_v40, %v14001_v8  ;;  %v5358_v6 = vrot.slane %v5183_v32, 2  ;;  %v5359_v29 = vrot.slane %v5190_v57, 2 }
 0x417   : > { %v18539_v58 = vunpack.i.l.bf16 %v18538_v19  ;;  %v18540_v10 = vcombine.low %v15626_v52, %v15629_v7  ;;  %v5679_v30 = vcombine.high %v15867_v31, %v15867_v31  ;;  %v15927_v5 = vsel %vm5345_vm12, %v5364_v45, %v15905_v16  ;;  %v18544_v52 = vld [vmem:[#allocation39_spill] sm:$0xff] }
 0x418   : > { %v18542_v40 = vrot.slane %v15119_v37, %v14008_v15  ;;  %v18545_v7 = vunpack.i.l.bf16 %v18544_v52  ;;  %v18546_v38 = vcombine.low %v15781_v2, %v15784_v62  ;;  %v7551_v14 = vcombine.low %v15792_v9, %v15879_v0 }
 0x419   : > { %v15921_v46 = vsel %vm8145_vm5, %v18540_v10, %v18539_v58  ;;  %v18548_v37 = vcombine.low %v15638_v51, %v15657_v22  ;;  %v15954_v34 = vrot.slane %v7602_v44, %v14001_v8  ;;  %v5360_v28 = vsel %vm5345_vm12, %v5358_v6, %v5359_v29  ;;  %v18552_v10 = vld [vmem:[#allocation40_spill] sm:$0xff] }
 0x41a   : > { %18541 = vst [vmem:[#allocation72_spill] sm:$0xff] %v15921_v46  ;;  %v15933_v50 = vsel %vm5345_vm12, %v18542_v40, %v5364_v45  ;;  %v15943_v31 = vsel %vm8145_vm5, %v18546_v38, %v18545_v7  ;;  %v18549_v2 = vrot.slane %v15106_v12, %v14008_v15  ;;  %v7173_v32 = vcombine.low %v6544_v20, %v6545_v41  ;;  %v13044_v38 = vpop.permute.xlu1 %13043 }
 0x41b   : > { %18547 = vst [vmem:[#allocation42_spill] sm:$0xff] %v15943_v31  ;;  %v15951_v23 = vrot.slane %v18548_v37, %v14001_v8  ;;  %v15964_v9 = vrot.slane %v6211_v54, %v14001_v8  ;;  %v7667_v51 = vcombine.low %v15648_v59, %v15692_v63  ;;  %v7668_v0 = vcombine.low %v15696_v43, %v15902_v55  ;;  %v18576_v55 = vld [vmem:[#allocation30_spill] sm:$0xff] }
 0x41c   : > { %v15961_v62 = vsel %vm5345_vm12, %v18549_v2, %v5358_v6  ;;  %v5714_v12 = vcombine.high %v5360_v28, %v5360_v28  ;;  %v6548_v26 = vadd.f32 %v15173_v60, %v5679_v30  ;;  %v7180_v57 = vrot.slane %v7172_v39, %v14001_v8  ;;  %v18591_v31 = vld [vmem:[#allocation14_spill] sm:$0xff] }
 0x41d   : > { %18550 = vst [vmem:[#allocation73_spill] sm:$0xff] %v15964_v9  ;;  %v5697_v44 = vcombine.high %v15961_v62, %v15961_v62  ;;  %v15978_v45 = vadd.f32 %v15170_v35, %v15913_v53  ;;  %v5721_v20 = vrot.slane %v5360_v28, %v14001_v8  ;;  %v5737_v41 = vrot.slane %v5359_v29, %v14001_v8 }
 0x41e   : > { %v13035_v59 = vunpack.i.l.bf16 %v13034_v48  ;;  %v5728_v54 = vrot.slane %v5714_v12, %v14001_v8  ;;  %v7187_v6 = vrot.slane %v7173_v32, %v14001_v8  ;;  %v7196_v58 = vrot.slane %v7189_v17, %v14001_v8 }
 0x41f   : > { %18551 = vst [vmem:[#allocation74_spill] sm:$0xff] %v15978_v45  ;;  %v15983_v63 = vrot.slane %v5697_v44, %v14001_v8  ;;  %v18553_v39 = vunpack.i.l.bf16 %v18552_v10  ;;  %v7617_v40 = vcombine.low %v15951_v23, %v15954_v34  ;;  %v15996_v29 = vrot.slane %v7667_v51, %v14001_v8 }
 0x420   : > { %v5729_v7 = vcombine.high %v5721_v20, %v5721_v20  ;;  %v5738_v37 = vcombine.high %v5737_v41, %v5737_v41  ;;  %v7188_v28 = vcombine.low %v7180_v57, %v7187_v6  ;;  %v7203_v2 = vrot.slane %v6548_v26, %v14001_v8 }
 0x421   : > { %v15991_v30 = vsel %vm8145_vm5, %v7551_v14, %v18553_v39  ;;  %18555 = vst [vmem:[#allocation76_spill] sm:$0xff] %v15996_v29  ;;  %v13036_v32 = vunpack.i.h.bf16 %v13034_v48  ;;  %v6561_v17 = vadd.f32 %v15188_v42, %v5737_v41  ;;  %v4692_v44 = vrot.slane %v15601_v49, 7 }
 0x422   : > { %18554 = vst [vmem:[#allocation75_spill] sm:$0xff] %v15991_v30  ;;  %v5713_v14 = vcombine.high %v15983_v63, %v15983_v63  ;;  %v5730_v12 = vcombine.high %v5728_v54, %v5728_v54  ;;  %v7204_v39 = vcombine.low %v7196_v58, %v7203_v2  ;;  %v8160_v18 = vsel %vm8145_vm5, %v7188_v28, %v13035_v59 }
 0x423   : > { %v6557_v51 = vadd.f32 %v15188_v42, %v5721_v20  ;;  %v6558_v22 = vadd.f32 %v15173_v60, %v5729_v7  ;;  %v4720_v57 = vadd.f32 %v4692_v44, %v15343_v61  ;;  %v6559_v48 = vadd.f32 %v15194_v25, %v5728_v54  ;;  %v16016_v61 = vpop.permute.xlu1 %13053 }
 0x424   : > { %v6556_v26 = vadd.f32 %v15170_v35, %v5713_v14  ;;  %v6560_v41 = vadd.f32 %v15170_v35, %v5730_v12  ;;  %v8161_v49 = vsel %vm8145_vm5, %v7204_v39, %v13036_v32  ;;  %v6562_v6 = vadd.f32 %v15173_v60, %v5738_v37 }
 0x425   : > { %v4696_v58 = vrot.slane %v15652_v3, 7  ;;  %v4694_v59 = vrot.slane %v15661_v11, 7  ;;  %v16014_v28 = vpack.c.bf16 %v8161_v49, %v8160_v18  ;;  %v5042_v20 = vrot.slane %v4720_v57, 1 }
 0x426   : > { %v7238_v7 = vcombine.low %v6556_v26, %v6557_v51  ;;  %v7239_v2 = vcombine.low %v6558_v22, %v6559_v48  ;;  %v7255_v44 = vcombine.low %v6560_v41, %v6561_v17  ;;  %v13046_v14 = vunpack.i.h.bf16 %v13044_v38  ;;  %v18559_v48 = vld [vmem:[#allocation7_spill] sm:$0xff] }
 0x427   : > { %18556 = vst [vmem:[#allocation77_spill] sm:$0xff] %v16014_v28  ;;  %v4724_v54 = vadd.f32 %v4696_v58, %v15465_v36  ;;  %v4722_v12 = vadd.f32 %v4694_v59, %v15408_v47  ;;  %v5075_v32 = vcombine.low %v15346_v33, %v5042_v20  ;;  %v5076_v37 = vcombine.high %v15346_v33, %v5042_v20  ;;  %v18560_v59 = vld [vmem:[#allocation2_spill] sm:$0xff] }
 0x428   : > { %v7269_v3 = vrot.slane %v6562_v6, %v14001_v8  ;;  %v13045_v11 = vunpack.i.l.bf16 %v13044_v38  ;;  %v7246_v18 = vrot.slane %v7238_v7, %v14001_v8  ;;  %v7253_v39 = vrot.slane %v7239_v2, %v14001_v8  ;;  %v16038_v7 = vpop.permute.xlu1 %13063  ;;  %v18561_v2 = vld [vmem:[#allocation35_spill] sm:$0xff] }
 0x429   : > { %v7262_v22 = vrot.slane %v7255_v44, %v14001_v8  ;;  %v5046_v51 = vrot.slane %v4724_v54, 1  ;;  %v18557_v17 = vcombine.high %v15701_v56, %v15701_v56  ;;  %v5197_v47 = vrot.slane %v5075_v32, %v14008_v15 }
 0x42a   : > { %v5204_v33 = vrot.slane %v5076_v37, %v14008_v15  ;;  %v5044_v57 = vrot.slane %v4722_v12, 1  ;;  %v7254_v26 = vcombine.low %v7246_v18, %v7253_v39  ;;  %v5586_v44 = vrot.slane %v18561_v2, %v14001_v8  ;;  %v18582_v2 = vld [vmem:[#allocation53_spill] sm:$0xff] }
 0x42b   : > { %v16030_v36 = vadd.f32 %v15194_v25, %v18557_v17  ;;  %v7270_v38 = vcombine.low %v7262_v22, %v7269_v3  ;;  %v5083_v41 = vcombine.low %v18559_v48, %v5046_v51  ;;  %v5084_v49 = vcombine.high %v18559_v48, %v5046_v51  ;;  %v18562_v3 = vld [vmem:[#allocation22_spill] sm:$0xff]  ;;  %v18588_v48 = vld [vmem:[#allocation52_spill] sm:$0xff] }
 0x42c   : > { %v5361_v6 = vrot.slane %v5197_v47, 2  ;;  %v5362_v58 = vrot.slane %v5204_v33, 2  ;;  %v5079_v20 = vcombine.low %v18560_v59, %v5044_v57  ;;  %v5080_v56 = vcombine.high %v18560_v59, %v5044_v57  ;;  %v18567_v57 = vld [vmem:[#allocation43_spill] sm:$0xff] }
 0x42d   : > { %18558 = vst [vmem:[#allocation78_spill] sm:$0xff] %v16030_v36  ;;  %v8165_v54 = vsel %vm8145_vm5, %v7270_v38, %v13046_v14  ;;  %v8164_v12 = vsel %vm8145_vm5, %v7254_v26, %v13045_v11  ;;  %v5253_v32 = vrot.slane %v5083_v41, %v14008_v15  ;;  %v18563_v18 = vrot.slane %v18562_v3, %v14008_v15  ;;  %v18566_v11 = vld [vmem:[#allocation37_spill] sm:$0xff] }
 0x42e   : > { %v5363_v37 = vsel %vm5345_vm12, %v5361_v6, %v5362_v58  ;;  %v16052_v22 = vpack.c.bf16 %v8165_v54, %v8164_v12  ;;  %v5260_v51 = vrot.slane %v5084_v49, %v14008_v15  ;;  %v16061_v14 = vrot.slane %v7668_v0, %v14001_v8 }
 0x42f   : > { %v16050_v39 = vsel %vm5345_vm12, %v18563_v18, %v5361_v6  ;;  %v5468_v47 = vrot.slane %v18566_v11, %v14001_v8  ;;  %v18568_v26 = vunpack.i.l.bf16 %v18567_v57  ;;  %v18573_v0 = vcombine.high %v15913_v53, %v15913_v53  ;;  %v16091_v18 = vpop.permute.xlu1 %13073 }
 0x430   : > { %18564 = vst [vmem:[#allocation7_spill] sm:$0xff] %v16052_v22  ;;  %18565 = vst [vmem:[#allocation2_spill] sm:$0xff] %v16061_v14  ;;  %v5756_v33 = vcombine.high %v16050_v39, %v16050_v39  ;;  %v5594_v59 = vcombine.high %v5586_v44, %v5586_v44  ;;  %v5373_v54 = vrot.slane %v5253_v32, 2  ;;  %v16088_v12 = vrot.slane %v5260_v51, 2 }
 0x431   : > { %v16073_v38 = vsel %vm8145_vm5, %v7617_v40, %v18568_v26  ;;  %v16083_v6 = vadd.f32 %v15188_v42, %v18573_v0  ;;  %v5773_v40 = vcombine.high %v5363_v37, %v5363_v37  ;;  %v5476_v11 = vcombine.high %v5468_v47, %v5468_v47  ;;  %v18579_v0 = vld [vmem:[#allocation66_spill] sm:$0xff] }
 0x432   : > { %18569 = vst [vmem:[#allocation35_spill] sm:$0xff] %v16073_v38  ;;  %v16094_v53 = vrot.slane %v5756_v33, %v14001_v8  ;;  %v5225_v26 = vrot.slane %v5079_v20, %v14008_v15  ;;  %v16100_v49 = vsel %vm5345_vm12, %v5373_v54, %v16088_v12  ;;  %v18577_v32 = vrot.slane %v18576_v55, %v14008_v15  ;;  %v18581_v55 = vld [vmem:[#allocation18_spill] sm:$0xff]  ;;  %v18587_v38 = vld [vmem:[#allocation51_spill] sm:$0xff] }
 0x433   : > { %18574 = vst [vmem:[#allocation22_spill] sm:$0xff] %v16083_v6  ;;  %v5232_v17 = vrot.slane %v5080_v56, %v14008_v15  ;;  %v16111_v33 = vadd.f32 %v15170_v35, %v5586_v44  ;;  %v16114_v20 = vadd.f32 %v15188_v42, %v5594_v59  ;;  %v16118_v3 = vadd.f32 %v15173_v60, %v18579_v0  ;;  %v18583_v0 = vld [vmem:[#allocation19_spill] sm:$0xff] }
 0x434   : > { %18575 = vst [vmem:[#allocation37_spill] sm:$0xff] %v16094_v53  ;;  %v16106_v51 = vsel %vm5345_vm12, %v18577_v32, %v5373_v54  ;;  %v5780_v23 = vrot.slane %v5363_v37, %v14001_v8  ;;  %v5493_v54 = vcombine.high %v18581_v55, %v18581_v55  ;;  %v5787_v32 = vrot.slane %v5773_v40, %v14001_v8 }
 0x435   : > { %18578 = vst [vmem:[#allocation30_spill] sm:$0xff] %v16106_v51  ;;  %18580 = vst [vmem:[#allocation66_spill] sm:$0xff] %v16118_v3  ;;  %v5796_v56 = vrot.slane %v5362_v58, %v14001_v8  ;;  %v5367_v34 = vrot.slane %v5225_v26, 2  ;;  %v5502_v44 = vcombine.high %v18582_v2, %v18582_v2  ;;  %v16128_v59 = vadd.f32 %v15170_v35, %v5468_v47  ;;  %v18584_v26 = vld [vmem:[#allocation25_spill] sm:$0xff] }
 0x436   : > { %v16131_v22 = vadd.f32 %v15188_v42, %v5476_v11  ;;  %v5772_v37 = vcombine.high %v16094_v53, %v16094_v53  ;;  %v16137_v55 = vrot.slane %v18583_v0, %v14001_v8  ;;  %v5815_v58 = vcombine.high %v15933_v50, %v15933_v50 }
 0x437   : > { %v16141_v40 = vrot.slane %v5232_v17, 2  ;;  %v18585_v2 = vrot.slane %v18584_v26, %v14008_v15  ;;  %v16153_v28 = vadd.f32 %v15173_v60, %v18587_v38  ;;  %v5832_v0 = vcombine.high %v15927_v5, %v15927_v5 }
 0x438   : > { %v5788_v45 = vcombine.high %v5780_v23, %v5780_v23  ;;  %v16158_v17 = vadd.f32 %v15173_v60, %v5493_v54  ;;  %v5797_v6 = vcombine.high %v5796_v56, %v5796_v56  ;;  %v16166_v11 = vadd.f32 %v15194_v25, %v18588_v48 }
 0x439   : > { %v16147_v47 = vsel %vm5345_vm12, %v18585_v2, %v5367_v34  ;;  %v16162_v26 = vsel %vm5345_vm12, %v5367_v34, %v16141_v40  ;;  %v5789_v2 = vcombine.high %v5787_v32, %v5787_v32  ;;  %v16169_v38 = vadd.f32 %v15173_v60, %v5502_v44  ;;  %v18590_v44 = vld [vmem:[#allocation15_spill] sm:$0xff] }
 0x43a   : > { %18586 = vst [vmem:[#allocation18_spill] sm:$0xff] %v16147_v47  ;;  %v5839_v41 = vrot.slane %v15927_v5, %v14001_v8  ;;  %v6570_v29 = vadd.f32 %v15170_v35, %v5772_v37  ;;  %v16179_v14 = vrot.slane %v5815_v58, %v14001_v8  ;;  %v16183_v48 = vrot.slane %v15905_v16, %v14001_v8 }
 0x43b   : > { %v16187_v30 = vrot.slane %v18590_v44, %v14001_v8  ;;  %v5846_v5 = vrot.slane %v5832_v0, %v14001_v8  ;;  %v6571_v37 = vadd.f32 %v15188_v42, %v5780_v23  ;;  %v6572_v54 = vadd.f32 %v15173_v60, %v5788_v45  ;;  %v18592_v44 = vld [vmem:[#allocation54_spill] sm:$0xff] }
 0x43c   : > { %18589 = vst [vmem:[#allocation53_spill] sm:$0xff] %v16179_v14  ;;  %v6575_v36 = vadd.f32 %v15188_v42, %v5796_v56  ;;  %v6573_v34 = vadd.f32 %v15194_v25, %v5787_v32  ;;  %v6574_v58 = vadd.f32 %v15170_v35, %v5789_v2  ;;  %v6576_v43 = vadd.f32 %v15173_v60, %v5797_v6  ;;  %v18593_v2 = vld [vmem:[#allocation9_spill] sm:$0xff]  ;;  %v18594_v6 = vld [vmem:[#allocation6_spill] sm:$0xff] }
 0x43d   : > { %v5847_v16 = vcombine.high %v5839_v41, %v5839_v41  ;;  %v7304_v10 = vcombine.low %v6570_v29, %v6571_v37  ;;  %v4697_v52 = vrot.slane %v18591_v31, 7  ;;  %v4695_v46 = vrot.slane %v18592_v44, 7 }
 0x43e   : > { %v16200_v0 = vadd.f32 %v15188_v42, %v16183_v48  ;;  %v7305_v23 = vcombine.low %v6572_v54, %v6573_v34  ;;  %v7321_v45 = vcombine.low %v6574_v58, %v6575_v36  ;;  %v5831_v56 = vcombine.high %v16179_v14, %v16179_v14 }
 0x43f   : > { %v7312_v32 = vrot.slane %v7304_v10, %v14001_v8  ;;  %v4725_v19 = vadd.f32 %v4697_v52, %v18593_v2  ;;  %v4723_v9 = vadd.f32 %v4695_v46, %v18594_v6  ;;  %v5848_v29 = vcombine.high %v5846_v5, %v5846_v5  ;;  %v18595_v2 = vld [vmem:[#allocation8_spill] sm:$0xff] }
 0x440   : > { %v7319_v31 = vrot.slane %v7305_v23, %v14001_v8  ;;  %v7328_v37 = vrot.slane %v7321_v45, %v14001_v8  ;;  %v7335_v44 = vrot.slane %v6576_v43, %v14001_v8  ;;  %v6584_v1 = vadd.f32 %v15170_v35, %v5831_v56  ;;  %v18596_v6 = vld [vmem:[#allocation4_spill] sm:$0xff] }
 0x441   : > { %v5047_v54 = vrot.slane %v4725_v19, 1  ;;  %v5045_v36 = vrot.slane %v4723_v9, 1  ;;  %v6586_v34 = vadd.f32 %v15173_v60, %v5847_v16  ;;  %v6587_v58 = vadd.f32 %v15194_v25, %v5846_v5 }
 0x442   : > { %v7320_v10 = vcombine.low %v7312_v32, %v7319_v31  ;;  %v7336_v53 = vcombine.low %v7328_v37, %v7335_v44  ;;  %v6585_v52 = vadd.f32 %v15188_v42, %v5839_v41  ;;  %v6588_v46 = vadd.f32 %v15170_v35, %v5848_v29 }
 0x443   : > { %v5085_v23 = vcombine.low %v18595_v2, %v5047_v54  ;;  %v5086_v45 = vcombine.high %v18595_v2, %v5047_v54  ;;  %v5081_v43 = vcombine.low %v18596_v6, %v5045_v36  ;;  %v5082_v56 = vcombine.high %v18596_v6, %v5045_v36  ;;  %v13460_v54 = vld [vmem:[%s18302_s10 + $0x58] ss:$36 sps:$4 sm:$0xff]  }
 0x444   : > { %v18597_v19 = vunpack.i.h.bf16 %v16016_v61  ;;  %v18598_v5 = vunpack.i.l.bf16 %v16016_v61  ;;  %v7370_v32 = vcombine.low %v6584_v1, %v6585_v52  ;;  %v7371_v41 = vcombine.low %v6586_v34, %v6587_v58  ;;  %v13462_v61 = vld [vmem:[%s18302_s10 + $0x5c] ss:$36 sps:$4 sm:$0xff]  }
 0x445   : > { %v5267_v29 = vrot.slane %v5085_v23, %v14008_v15  ;;  %v5274_v37 = vrot.slane %v5086_v45, %v14008_v15  ;;  %v5239_v44 = vrot.slane %v5081_v43, %v14008_v15  ;;  %v7387_v34 = vcombine.low %v6588_v46, %v16200_v0  ;;  %9512 = vmatprep.subr.bf16.mxu1 %v13462_v61  ;;  %v18601_v45 = vld [vmem:[#allocation69_spill] sm:$0xff] }
 0x446   : > { %v8169_v9 = vsel %vm8145_vm5, %v7336_v53, %v18597_v19  ;;  %v8168_v16 = vsel %vm8145_vm5, %v7320_v10, %v18598_v5  ;;  %v5246_v53 = vrot.slane %v5082_v56, %v14008_v15  ;;  %v7378_v1 = vrot.slane %v7370_v32, %v14001_v8  ;;  %v18600_v10 = vld [vmem:[#allocation41_spill] sm:$0xff]  ;;  %9513 = vmatpush1.bf16.msra.mxu1 %v13460_v54  ;;  %v18602_v5 = vld [vmem:[#allocation34_spill] sm:$0xff] }
 0x447   : > { %v16225_v31 = vpack.c.bf16 %v8169_v9, %v8168_v16  ;;  %v7385_v36 = vrot.slane %v7371_v41, %v14001_v8  ;;  %v5535_v58 = vcombine.high %v16187_v30, %v16187_v30  ;;  %v5552_v52 = vcombine.high %v18600_v10, %v18600_v10  ;;  %v18605_v41 = vld [vmem:[#allocation57_spill] sm:$0xff] }
 0x448   : > { %v5376_v2 = vrot.slane %v5267_v29, 2  ;;  %v16244_v23 = vrot.slane %v5274_v37, 2  ;;  %v5561_v6 = vcombine.high %v18601_v45, %v18601_v45  ;;  %v5370_v43 = vrot.slane %v5239_v44, 2  ;;  %v18606_v29 = vld [vmem:[#allocation58_spill] sm:$0xff] }
 0x449   : > { %18599 = vst [vmem:[#allocation19_spill] sm:$0xff] %v16225_v31  ;;  %v16248_v56 = vrot.slane %v5246_v53, 2  ;;  %v7386_v19 = vcombine.low %v7378_v1, %v7385_v36  ;;  %v5856_v46 = vcombine.high %v16183_v48, %v16183_v48  ;;  %v18603_v16 = vrot.slane %v18602_v5, %v14008_v15  ;;  %v18619_v31 = vld [vmem:[#allocation59_spill] sm:$0xff] }
 0x44a   : > { %v16256_v9 = vsel %vm5345_vm12, %v5376_v2, %v16244_v23  ;;  %v18607_v37 = vcombine.low %v18605_v41, %v18606_v29  ;;  %v5874_v48 = vcombine.high %v16147_v47, %v16147_v47  ;;  %v5891_v61 = vcombine.high %v16162_v26, %v16162_v26  ;;  %v18613_v29 = vld [vmem:[#allocation68_spill] sm:$0xff] }
 0x44b   : > { %v16262_v32 = vsel %vm5345_vm12, %v18603_v16, %v5376_v2  ;;  %v18608_v53 = vcombine.high %v16137_v55, %v16137_v55  ;;  %v5898_v36 = vrot.slane %v16162_v26, %v14001_v8  ;;  %v16286_v10 = vsel %vm5345_vm12, %v5370_v43, %v16248_v56  ;;  %v18610_v2 = vld [vmem:[#allocation27_spill] sm:$0xff] }
 0x44c   : > { %18604 = vst [vmem:[#allocation25_spill] sm:$0xff] %v16262_v32  ;;  %v16268_v44 = vrot.slane %v18607_v37, %v14001_v8  ;;  %v18611_v45 = vrot.slane %v18610_v2, %v14008_v15  ;;  %v16295_v16 = vadd.f32 %v15188_v42, %v5535_v58  ;;  %v16298_v41 = vadd.f32 %v15173_v60, %v5552_v52 }
 0x44d   : > { %v16280_v1 = vadd.f32 %v15188_v42, %v18608_v53  ;;  %v16302_v37 = vadd.f32 %v15194_v25, %v18613_v29  ;;  %v16305_v26 = vadd.f32 %v15173_v60, %v5561_v6  ;;  %v16309_v53 = vadd.f32 %v15170_v35, %v16137_v55  ;;  %v18617_v29 = vld [vmem:[#allocation67_spill] sm:$0xff] }
 0x44e   : > { %v16292_v5 = vsel %vm5345_vm12, %v18611_v45, %v5370_v43  ;;  %v16313_v43 = vrot.slane %v15933_v50, %v14001_v8  ;;  %v5914_v58 = vrot.slane %v16141_v40, %v14001_v8  ;;  %v6590_v52 = vadd.f32 %v15173_v60, %v5856_v46 }
 0x44f   : > { %18609 = vst [vmem:[#allocation51_spill] sm:$0xff] %v16280_v1  ;;  %18612 = vst [vmem:[#allocation52_spill] sm:$0xff] %v16292_v5  ;;  %v16320_v2 = vadd.f32 %v15173_v60, %v15835_v4  ;;  %v16324_v6 = vadd.f32 %v15170_v35, %v16187_v30  ;;  %v16327_v55 = vrot.slane %v5874_v48, %v14001_v8  ;;  %v18620_v30 = vld [vmem:[#allocation60_spill] sm:$0xff]  ;;  %v18621_v1 = vunpack.i.l.bf16 %v16038_v7 }
 0x450   : > { %18614 = vst [vmem:[#allocation15_spill] sm:$0xff] %v16309_v53  ;;  %v5905_v45 = vrot.slane %v5891_v61, %v14001_v8  ;;  %v16334_v40 = vadd.f32 %v15173_v60, %v18617_v29  ;;  %v5906_v46 = vcombine.high %v5898_v36, %v5898_v36  ;;  %v7394_v4 = vrot.slane %v7387_v34, %v14001_v8 }
 0x451   : > { %18615 = vst [vmem:[#allocation14_spill] sm:$0xff] %v16320_v2  ;;  %18616 = vst [vmem:[#allocation54_spill] sm:$0xff] %v16327_v55  ;;  %v18618_v48 = vcombine.low %v15845_v27, %v15849_v21  ;;  %v5915_v0 = vcombine.high %v5914_v58, %v5914_v58  ;;  %v6603_v34 = vadd.f32 %v15188_v42, %v5914_v58  ;;  %v4700_v2 = vrot.slane %v18619_v31, 7  ;;  %v18622_v58 = vld [vmem:[#allocation16_spill] sm:$0xff] }
 0x452   : > { %v7401_v54 = vrot.slane %v6590_v52, %v14001_v8  ;;  %v4698_v14 = vrot.slane %v18620_v30, 7  ;;  %v5890_v27 = vcombine.high %v16327_v55, %v16327_v55  ;;  %v5907_v21 = vcombine.high %v5905_v45, %v5905_v45  ;;  %v18623_v52 = vld [vmem:[#allocation10_spill] sm:$0xff] }
 0x453   : > { %v16345_v61 = vrot.slane %v18618_v48, %v14001_v8  ;;  %v8172_v50 = vsel %vm8145_vm5, %v7386_v19, %v18621_v1  ;;  %v6599_v29 = vadd.f32 %v15188_v42, %v5898_v36  ;;  %v6600_v53 = vadd.f32 %v15173_v60, %v5906_v46  ;;  %v18625_v1 = vld [vmem:[#allocation65_spill] sm:$0xff] }
 0x454   : > { %v7402_v48 = vcombine.low %v7394_v4, %v7401_v54  ;;  %v4728_v57 = vadd.f32 %v4700_v2, %v18622_v58  ;;  %v4726_v47 = vadd.f32 %v4698_v14, %v18623_v52  ;;  %v6598_v31 = vadd.f32 %v15170_v35, %v5890_v27 }
 0x455   : > { %v6601_v30 = vadd.f32 %v15194_v25, %v5905_v45  ;;  %v18624_v55 = vunpack.i.h.bf16 %v16038_v7  ;;  %v6602_v4 = vadd.f32 %v15170_v35, %v5907_v21  ;;  %v6604_v19 = vadd.f32 %v15173_v60, %v5915_v0  ;;  %v18628_v7 = vld [vmem:[#allocation12_spill] sm:$0xff]  ;;  %v18629_v21 = vld [vmem:[#allocation17_spill] sm:$0xff] }
 0x456   : > { %v4699_v36 = vrot.slane %v18625_v1, 7  ;;  %v5050_v46 = vrot.slane %v4728_v57, 1  ;;  %v5048_v2 = vrot.slane %v4726_v47, 1  ;;  %v7436_v58 = vcombine.low %v6598_v31, %v6599_v29  ;;  %v18630_v47 = vld [vmem:[#allocation11_spill] sm:$0xff] }
 0x457   : > { %v8173_v54 = vsel %vm8145_vm5, %v7402_v48, %v18624_v55  ;;  %v16376_v14 = vadd.f32 %v15170_v35, %v16313_v43  ;;  %v7437_v45 = vcombine.low %v6600_v53, %v6601_v30  ;;  %v7453_v27 = vcombine.low %v6602_v4, %v6603_v34 }
 0x458   : > { %v16372_v3 = vpack.c.bf16 %v8173_v54, %v8172_v50  ;;  %v4727_v52 = vadd.f32 %v4699_v36, %v18628_v7  ;;  %v5704_v55 = vrot.slane %v15961_v62, %v14001_v8  ;;  %v5933_v0 = vcombine.high %v16292_v5, %v16292_v5 }
 0x459   : > { %18627 = vst [vmem:[#allocation6_spill] sm:$0xff] %v16376_v14  ;;  %v5091_v50 = vcombine.low %v18629_v21, %v5050_v46  ;;  %v5092_v57 = vcombine.high %v18629_v21, %v5050_v46  ;;  %v5087_v29 = vcombine.low %v18630_v47, %v5048_v2  ;;  %v5088_v48 = vcombine.high %v18630_v47, %v5048_v2 }
 0x45a   : > { %18626 = vst [vmem:[#allocation9_spill] sm:$0xff] %v16372_v3  ;;  %v7444_v31 = vrot.slane %v7436_v58, %v14001_v8  ;;  %v7451_v53 = vrot.slane %v7437_v45, %v14001_v8  ;;  %v7460_v62 = vrot.slane %v7453_v27, %v14001_v8  ;;  %v7467_v54 = vrot.slane %v6604_v19, %v14001_v8  ;;  %v18631_v27 = vld [vmem:[#allocation13_spill] sm:$0xff] }
 0x45b   : > { %v5309_v34 = vrot.slane %v5091_v50, %v14008_v15  ;;  %v5316_v30 = vrot.slane %v5092_v57, %v14008_v15  ;;  %v5281_v4 = vrot.slane %v5087_v29, %v14008_v15  ;;  %v5288_v1 = vrot.slane %v5088_v48, %v14008_v15 }
 0x45c   : > { %v7452_v36 = vcombine.low %v7444_v31, %v7451_v53  ;;  %v5049_v46 = vrot.slane %v4727_v52, 1  ;;  %v5712_v7 = vcombine.high %v5704_v55, %v5704_v55  ;;  %v7468_v58 = vcombine.low %v7460_v62, %v7467_v54  ;;  %v18635_v62 = vld [vmem:[#allocation36_spill] sm:$0xff] }
 0x45d   : > { %v5385_v2 = vrot.slane %v5309_v34, 2  ;;  %v16395_v21 = vrot.slane %v5316_v30, 2  ;;  %v16399_v45 = vrot.slane %v16050_v39, %v14001_v8  ;;  %v5379_v50 = vrot.slane %v5281_v4, 2 }
 0x45e   : > { %v5380_v57 = vrot.slane %v5288_v1, 2  ;;  %v5089_v47 = vcombine.low %v18631_v27, %v5049_v46  ;;  %v5992_v19 = vcombine.high %v16106_v51, %v16106_v51  ;;  %v16406_v29 = vrot.slane %v16088_v12, %v14001_v8 }
 0x45f   : > { %v16410_v52 = vsel %vm5345_vm12, %v5385_v2, %v16395_v21  ;;  %v18632_v48 = vrot.slane %v18543_v24, %v14008_v15  ;;  %v6009_v31 = vcombine.high %v16100_v49, %v16100_v49  ;;  %v16421_v53 = vrot.slane %v5933_v0, %v14001_v8 }
 0x460   : > { %v5950_v12 = vcombine.high %v16286_v10, %v16286_v10  ;;  %v5957_v34 = vrot.slane %v16286_v10, %v14001_v8  ;;  %v5381_v30 = vsel %vm5345_vm12, %v5379_v50, %v5380_v57  ;;  %v18636_v24 = vrot.slane %v18635_v62, %v14008_v15 }
 0x461   : > { %v16416_v39 = vsel %vm5345_vm12, %v18632_v48, %v5385_v2  ;;  %18634 = vst [vmem:[#allocation4_spill] sm:$0xff] %v16421_v53  ;;  %v18638_v4 = vunpack.i.h.bf16 %v16091_v18  ;;  %v18639_v0 = vunpack.i.l.bf16 %v16091_v18  ;;  %v18640_v48 = vcombine.high %v16313_v43, %v16313_v43 }
 0x462   : > { %18633 = vst [vmem:[#allocation8_spill] sm:$0xff] %v16416_v39  ;;  %v16432_v54 = vsel %vm5345_vm12, %v18636_v24, %v5379_v50  ;;  %v16447_v3 = vadd.f32 %v15170_v35, %v5704_v55  ;;  %v16450_v50 = vadd.f32 %v15188_v42, %v5712_v7  ;;  %v16454_v62 = vrot.slane %v16100_v49, %v14001_v8 }
 0x463   : > { %18637 = vst [vmem:[#allocation41_spill] sm:$0xff] %v16432_v54  ;;  %v8177_v1 = vsel %vm8145_vm5, %v7468_v58, %v18638_v4  ;;  %v8176_v2 = vsel %vm8145_vm5, %v7452_v36, %v18639_v0  ;;  %v16444_v10 = vadd.f32 %v15188_v42, %v18640_v48  ;;  %v16458_v18 = vadd.f32 %v15173_v60, %v15983_v63 }
 0x464   : > { %18642 = vst [vmem:[#allocation34_spill] sm:$0xff] %v16447_v3  ;;  %18643 = vst [vmem:[#allocation57_spill] sm:$0xff] %v16450_v50  ;;  %v16464_v36 = vrot.slane %v16244_v23, %v14001_v8  ;;  %v5973_v55 = vrot.slane %v16248_v56, %v14001_v8  ;;  %v5964_v49 = vrot.slane %v5950_v12, %v14001_v8 }
 0x465   : > { %18641 = vst [vmem:[#allocation69_spill] sm:$0xff] %v16444_v10  ;;  %18644 = vst [vmem:[#allocation58_spill] sm:$0xff] %v16458_v18  ;;  %v16471_v58 = vpack.c.bf16 %v8177_v1, %v8176_v2  ;;  %v5949_v63 = vcombine.high %v16421_v53, %v16421_v53  ;;  %v16476_v24 = vrot.slane %v5992_v19, %v14001_v8 }
 0x466   : > { %v16479_v4 = vrot.slane %v6009_v31, %v14001_v8  ;;  %v16483_v23 = vadd.f32 %v15188_v42, %v16406_v29  ;;  %v5965_v56 = vcombine.high %v5957_v34, %v5957_v34  ;;  %v6024_v0 = vcombine.high %v16454_v62, %v16454_v62 }
 0x467   : > { %18645 = vst [vmem:[#allocation27_spill] sm:$0xff] %v16471_v58  ;;  %18646 = vst [vmem:[#allocation68_spill] sm:$0xff] %v16476_v24  ;;  %v6051_v12 = vcombine.high %v16262_v32, %v16262_v32  ;;  %v6068_v1 = vcombine.high %v16256_v9, %v16256_v9  ;;  %v16493_v19 = vrot.slane %v16256_v9, %v14001_v8 }
 0x468   : > { %v16499_v2 = vadd.f32 %v15188_v42, %v16464_v36  ;;  %v5974_v48 = vcombine.high %v5973_v55, %v5973_v55  ;;  %v5090_v43 = vcombine.high %v18631_v27, %v5049_v46  ;;  %v6617_v7 = vadd.f32 %v15188_v42, %v5973_v55 }
 0x469   : > { %v5295_v58 = vrot.slane %v5089_v47, %v14008_v15  ;;  %v5966_v53 = vcombine.high %v5964_v49, %v5964_v49  ;;  %v6612_v32 = vadd.f32 %v15170_v35, %v5949_v63  ;;  %v6228_v9 = vcombine.high %v16416_v39, %v16416_v39 }
 0x46a   : > { %v5302_v18 = vrot.slane %v5090_v43, %v14008_v15  ;;  %v6613_v31 = vadd.f32 %v15188_v42, %v5957_v34  ;;  %v6614_v5 = vadd.f32 %v15173_v60, %v5965_v56  ;;  %v6110_v14 = vcombine.high %v16432_v54, %v16432_v54  ;;  %v18647_v34 = vld [vmem:[#allocation38_spill] sm:$0xff] }
 0x46b   : > { %v5382_v46 = vrot.slane %v5295_v58, 2  ;;  %v6615_v27 = vadd.f32 %v15194_v25, %v5964_v49  ;;  %v6616_v47 = vadd.f32 %v15170_v35, %v5966_v53  ;;  %v6127_v55 = vcombine.high %v5381_v30, %v5381_v30 }
 0x46c   : > { %v16515_v63 = vrot.slane %v5381_v30, %v14001_v8  ;;  %v5383_v10 = vrot.slane %v5302_v18, 2  ;;  %v7502_v39 = vcombine.low %v6612_v32, %v6613_v31  ;;  %v16518_v43 = vrot.slane %v5380_v57, %v14001_v8  ;;  %v13084_v57 = vpop.permute.xlu1 %13083 }
 0x46d   : > { %v18648_v56 = vrot.slane %v18647_v34, %v14008_v15  ;;  %v7503_v58 = vcombine.low %v6614_v5, %v6615_v27  ;;  %v7519_v54 = vcombine.low %v6616_v47, %v6617_v7  ;;  %v16527_v49 = vrot.slane %v6051_v12, %v14001_v8 }
 0x46e   : > { %v6082_v53 = vrot.slane %v6068_v1, %v14001_v8  ;;  %v16531_v30 = vsel %vm5345_vm12, %v5382_v46, %v5383_v10  ;;  %v6618_v32 = vadd.f32 %v15173_v60, %v5974_v48  ;;  %v6083_v18 = vcombine.high %v16493_v19, %v16493_v19 }
 0x46f   : > { %v16524_v51 = vsel %vm5345_vm12, %v18648_v56, %v5382_v46  ;;  %v7510_v15 = vrot.slane %v7502_v39, %v14001_v8  ;;  %v7517_v31 = vrot.slane %v7503_v58, %v14001_v8  ;;  %v13085_v5 = vunpack.i.l.bf16 %v13084_v57 }
 0x470   : > { %18649 = vst [vmem:[#allocation67_spill] sm:$0xff] %v16524_v51  ;;  %v16539_v7 = vrot.slane %v6228_v9, %v14001_v8  ;;  %v16545_v1 = vrot.slane %v16395_v21, %v14001_v8  ;;  %v16548_v48 = vrot.slane %v6110_v14, %v14001_v8  ;;  %v16551_v46 = vrot.slane %v6127_v55, %v14001_v8 }
 0x471   : > { %v6142_v39 = vcombine.high %v16515_v63, %v16515_v63  ;;  %v7518_v27 = vcombine.low %v7510_v15, %v7517_v31  ;;  %v7526_v47 = vrot.slane %v7519_v54, %v14001_v8  ;;  %v7533_v34 = vrot.slane %v6618_v32, %v14001_v8 }
 0x472   : > { %v13086_v56 = vunpack.i.h.bf16 %v13084_v57  ;;  %v6008_v21 = vcombine.high %v16476_v24, %v16476_v24  ;;  %v16563_v14 = vadd.f32 %v15188_v42, %v16518_v43  ;;  %v6025_v58 = vcombine.high %v16479_v4, %v16479_v4 }
 0x473   : > { %v8180_v55 = vsel %vm8145_vm5, %v7518_v27, %v13085_v5  ;;  %v6628_v12 = vadd.f32 %v15173_v60, %v6024_v0  ;;  %v7534_v15 = vcombine.low %v7526_v47, %v7533_v34  ;;  %v6627_v32 = vadd.f32 %v15188_v42, %v16454_v62  ;;  %v13094_v47 = vpop.permute.xlu1 %13093 }
 0x474   : > { %v6626_v54 = vadd.f32 %v15170_v35, %v6008_v21  ;;  %v6629_v57 = vadd.f32 %v15194_v25, %v16479_v4  ;;  %v6169_v31 = vcombine.high %v16524_v51, %v16524_v51  ;;  %v16577_v9 = vrot.slane %v5383_v10, %v14001_v8 }
 0x475   : > { %v6630_v5 = vadd.f32 %v15170_v35, %v6025_v58  ;;  %v18650_v0 = vcombine.high %v16406_v29, %v16406_v29  ;;  %v8181_v34 = vsel %vm8145_vm5, %v7534_v15, %v13086_v56  ;;  %v6067_v4 = vcombine.high %v16527_v49, %v16527_v49 }
 0x476   : > { %v7568_v62 = vcombine.low %v6626_v54, %v6627_v32  ;;  %v7569_v21 = vcombine.low %v6628_v12, %v6629_v57  ;;  %v16587_v24 = vpack.c.bf16 %v8181_v34, %v8180_v55  ;;  %v13096_v51 = vunpack.i.h.bf16 %v13094_v47 }
 0x477   : > { %v6632_v27 = vadd.f32 %v15173_v60, %v18650_v0  ;;  %v7585_v10 = vcombine.low %v6630_v5, %v16483_v23  ;;  %v6084_v3 = vcombine.high %v6082_v53, %v6082_v53  ;;  %v13095_v50 = vunpack.i.l.bf16 %v13094_v47 }
 0x478   : > { %v7576_v58 = vrot.slane %v7568_v62, %v14001_v8  ;;  %v7583_v29 = vrot.slane %v7569_v21, %v14001_v8  ;;  %v6640_v0 = vadd.f32 %v15170_v35, %v6067_v4  ;;  %v6641_v15 = vadd.f32 %v15188_v42, %v16493_v19  ;;  %v13104_v62 = vpop.permute.xlu1 %13103 }
 0x479   : > { %v7592_v56 = vrot.slane %v7585_v10, %v14001_v8  ;;  %v7599_v12 = vrot.slane %v6632_v27, %v14001_v8  ;;  %v6642_v55 = vadd.f32 %v15173_v60, %v6083_v18  ;;  %v6643_v23 = vadd.f32 %v15194_v25, %v6082_v53 }
 0x47a   : > { %v7584_v54 = vcombine.low %v7576_v58, %v7583_v29  ;;  %v6644_v32 = vadd.f32 %v15170_v35, %v6084_v3  ;;  %v18651_v57 = vcombine.high %v16464_v36, %v16464_v36  ;;  %v6186_v47 = vcombine.high %v16531_v30, %v16531_v30 }
 0x47b   : > { %v6193_v27 = vrot.slane %v16531_v30, %v14001_v8  ;;  %v7600_v34 = vcombine.low %v7592_v56, %v7599_v12  ;;  %v7634_v19 = vcombine.low %v6640_v0, %v6641_v15  ;;  %v7635_v21 = vcombine.low %v6642_v55, %v6643_v23 }
 0x47c   : > { %v6646_v5 = vadd.f32 %v15173_v60, %v18651_v57  ;;  %v8184_v18 = vsel %vm8145_vm5, %v7584_v54, %v13095_v50  ;;  %v7651_v53 = vcombine.low %v6644_v32, %v16499_v2  ;;  %v13106_v3 = vunpack.i.h.bf16 %v13104_v62 }
 0x47d   : > { %v8185_v4 = vsel %vm8145_vm5, %v7600_v34, %v13096_v51  ;;  %v7642_v36 = vrot.slane %v7634_v19, %v14001_v8  ;;  %v18652_v58 = vcombine.low %v16128_v59, %v16131_v22  ;;  %v7649_v0 = vrot.slane %v7635_v21, %v14001_v8 }
 0x47e   : > { %v7665_v10 = vrot.slane %v6646_v5, %v14001_v8  ;;  %v16617_v29 = vpack.c.bf16 %v8185_v4, %v8184_v18  ;;  %v7658_v50 = vrot.slane %v7651_v53, %v14001_v8  ;;  %v13105_v56 = vunpack.i.l.bf16 %v13104_v62  ;;  %v18654_v62 = vld [vmem:[#allocation20_spill] sm:$0xff] }
 0x47f   : > { %v6965_v30 = vrot.slane %v18652_v58, %v14001_v8  ;;  %v6972_v2 = vrot.slane %v16153_v28, %v14001_v8  ;;  %v6126_v51 = vcombine.high %v16548_v48, %v16548_v48  ;;  %v6143_v12 = vcombine.high %v16551_v46, %v16551_v46 }
 0x480   : > { %v6656_v15 = vadd.f32 %v15173_v60, %v6142_v39  ;;  %v16629_v22 = vrot.slane %v6169_v31, %v14001_v8  ;;  %v7650_v59 = vcombine.low %v7642_v36, %v7649_v0  ;;  %v7666_v55 = vcombine.low %v7658_v50, %v7665_v10  ;;  %v13114_v50 = vpop.permute.xlu1 %13113 }
 0x481   : > { %v6655_v54 = vadd.f32 %v15188_v42, %v16515_v63  ;;  %v6973_v23 = vcombine.low %v6965_v30, %v6972_v2  ;;  %v6654_v32 = vadd.f32 %v15170_v35, %v6126_v51  ;;  %v6657_v28 = vadd.f32 %v15194_v25, %v16551_v46 }
 0x482   : > { %v6658_v57 = vadd.f32 %v15170_v35, %v6143_v12  ;;  %v6200_v5 = vrot.slane %v6186_v47, %v14001_v8  ;;  %v8189_v39 = vsel %vm8145_vm5, %v7666_v55, %v13106_v3  ;;  %v8188_v31 = vsel %vm8145_vm5, %v7650_v59, %v13105_v56  ;;  %v18656_v3 = vld [vmem:[#allocation44_spill] sm:$0xff] }
 0x483   : > { %v18653_v34 = vcombine.high %v16518_v43, %v16518_v43  ;;  %v16644_v63 = vpack.c.bf16 %v8189_v39, %v8188_v31  ;;  %v18655_v18 = vunpack.i.h.bf16 %v18654_v62  ;;  %v7700_v46 = vcombine.low %v6654_v32, %v6655_v54  ;;  %v13465_v54 = vld [vmem:[%s18302_s10 + $0xa4] ss:$36 sps:$4 sm:$0xff]   ;;  %v13466_v39 = vld [vmem:[%s18302_s10 + $0x18] ss:$36 sps:$4 sm:$0xff]  }
 0x484   : > { %v7701_v53 = vcombine.low %v6656_v15, %v6657_v28  ;;  %v6201_v4 = vcombine.high %v6193_v27, %v6193_v27  ;;  %v6210_v47 = vcombine.high %v16577_v9, %v16577_v9  ;;  %v7717_v10 = vcombine.low %v6658_v57, %v16563_v14  ;;  %v13468_v31 = vld [vmem:[%s18302_s10 + $0x1c] ss:$36 sps:$4 sm:$0xff]   ;;  %9514 = vmatprep.subr.bf16.mxu1 %v13465_v54 }
 0x485   : > { %v6660_v19 = vadd.f32 %v15173_v60, %v18653_v34  ;;  %v8147_v21 = vsel %vm8145_vm5, %v6973_v23, %v18655_v18  ;;  %v6673_v43 = vadd.f32 %v15188_v42, %v16577_v9  ;;  %v7708_v58 = vrot.slane %v7700_v46, %v14001_v8  ;;  %v13463_v9 = vld [vmem:[%s18302_s10 + $0xa0] ss:$36 sps:$4 sm:$0xff]   ;;  %9847 = vmatprep.subr.bf16.mxu0 %v13468_v31 }
 0x486   : > { %v8202_v36 = vpack.c.bf16 %v8147_v21, %v18656_v3  ;;  %v7715_v30 = vrot.slane %v7701_v53, %v14001_v8  ;;  %v7724_v2 = vrot.slane %v7717_v10, %v14001_v8  ;;  %v13116_v51 = vunpack.i.h.bf16 %v13114_v50  ;;  %9515 = vmatpush1.bf16.msra.mxu1 %v13463_v9  ;;  %9848 = vmatpush1.bf16.msra.mxu0 %v13466_v39 }
 0x487   : > { %v7731_v0 = vrot.slane %v6660_v19, %v14001_v8  ;;  %v13115_v12 = vunpack.i.l.bf16 %v13114_v50  ;;  %v6185_v14 = vcombine.high %v16629_v22, %v16629_v22  ;;  %v6202_v55 = vcombine.high %v6200_v5, %v6200_v5 }
 0x488   : > { %v8237_v56 = vshrl.u32 %v8202_v36, 16  ;;  %v8240_v15 = vshll.u32 %v8202_v36, 16  ;;  %v7716_v59 = vcombine.low %v7708_v58, %v7715_v30  ;;  %v6669_v28 = vadd.f32 %v15188_v42, %v6193_v27  ;;  %v18657_v27 = vld [vmem:[#allocation62_spill] sm:$0xff] }
 0x489   : > { %v7732_v32 = vcombine.low %v7724_v2, %v7731_v0  ;;  %v6670_v57 = vadd.f32 %v15173_v60, %v6201_v4  ;;  %v6668_v19 = vadd.f32 %v15170_v35, %v6185_v14  ;;  %v6671_v62 = vadd.f32 %v15194_v25, %v6200_v5  ;;  %v18660_v2 = vld [vmem:[#allocation55_spill] sm:$0xff] }
 0x48a   : > { %v8239_v23 = vrot.slane %v8237_v56, 7  ;;  %v8192_v34 = vsel %vm8145_vm5, %v7716_v59, %v13115_v12  ;;  %v6672_v18 = vadd.f32 %v15170_v35, %v6202_v55  ;;  %v13016_v21 = vunpack.i.h.bf16 %v18657_v27  ;;  %v13124_v56 = vpop.permute.xlu1 %13123 }
 0x48b   : > { %v8193_v53 = vsel %vm8145_vm5, %v7732_v32, %v13116_v51  ;;  %v6674_v4 = vadd.f32 %v15173_v60, %v6210_v47  ;;  %v7766_v36 = vcombine.low %v6668_v19, %v6669_v28  ;;  %v7767_v10 = vcombine.low %v6670_v57, %v6671_v62  ;;  %v18659_v47 = vld [vmem:[#allocation56_spill] sm:$0xff] }
 0x48c   : > { %v8242_v46 = vor.u32 %v8240_v15, %v8239_v23  ;;  %v16682_v3 = vpack.c.bf16 %v8193_v53, %v8192_v34  ;;  %v7783_v58 = vcombine.low %v6672_v18, %v6673_v43  ;;  %v6252_v5 = vrot.slane %v16410_v52, %v14001_v8 }
 0x48d   : > { %v6269_v30 = vcombine.high %v16545_v1, %v16545_v1  ;;  %v18661_v51 = vcombine.low %v18659_v47, %v18660_v2  ;;  %v7774_v43 = vrot.slane %v7766_v36, %v14001_v8  ;;  %v7797_v14 = vrot.slane %v6674_v4, %v14001_v8  ;;  %v18668_v4 = vld [vmem:[#allocation47_spill] sm:$0xff] }
 0x48e   : > { %v8465_v50 = vsel %vm15468_vm8, 0, %v8242_v46  ;;  %v13126_v55 = vunpack.i.h.bf16 %v13124_v56  ;;  %v7781_v9 = vrot.slane %v7767_v10, %v14001_v8  ;;  %v7790_v54 = vrot.slane %v7783_v58, %v14001_v8 }
 0x48f   : > { %v6982_v12 = vrot.slane %v18661_v51, %v14001_v8  ;;  %v16696_v59 = vsel %vm15478_vm11, %v8465_v50, 0  ;;  %v13125_v23 = vunpack.i.l.bf16 %v13124_v56  ;;  %v18664_v32 = vcombine.low %v16158_v17, %v16166_v11  ;;  %v13134_v51 = vpop.permute.xlu1 %13133 }
 0x490   : > { %18663 = vst [vmem:[#allocation59_spill] sm:$0xff] %v16696_v59  ;;  %12615 = vmatmul.mubr.msk.bf16.gmra.mrb[64].mxu1 %vm3462_vm3, %v16696_v59  ;;  %12647 = vmatmul.mubr.msk.bf16.gmra.mrb[128].mxu0 %vm3462_vm3, %v16696_v59  ;;  %v13015_v57 = vunpack.i.l.bf16 %v18657_v27  ;;  %v18665_v39 = vmov 0   ;;  %v18666_v31 = vrot.slane %v16169_v38, %v14001_v8  ;;  %v6244_v19 = vcombine.high %v16539_v7, %v16539_v7 }
 0x491   : > { %v6989_v28 = vrot.slane %v18664_v32, %v14001_v8  ;;  %8880 = vmatprep.mubr.bf16.mxu1 %v18665_v39  ;;  %9219 = vmatprep.mubr.bf16.mxu0 %v18665_v39  ;;  %v18667_v62 = vcombine.high %v16410_v52, %v16410_v52  ;;  %v7782_v17 = vcombine.low %v7774_v43, %v7781_v9  ;;  %v18669_v36 = vunpack.i.h.bf16 %v18668_v4 }
 0x492   : > { %v7006_v34 = vcombine.low %v16268_v44, %v18666_v31  ;;  %v7798_v18 = vcombine.low %v7790_v54, %v7797_v14  ;;  %v6260_v53 = vcombine.high %v6252_v5, %v6252_v5  ;;  %v6682_v38 = vadd.f32 %v15170_v35, %v6244_v19 }
 0x493   : > { %v6259_v11 = vrot.slane %v18667_v62, %v14001_v8  ;;  %v6990_v46 = vcombine.low %v6982_v12, %v6989_v28  ;;  %v6683_v44 = vadd.f32 %v15188_v42, %v6252_v5  ;;  %v8196_v56 = vsel %vm8145_vm5, %v7782_v17, %v13125_v23 }
 0x494   : > { %v8149_v10 = vsel %vm8145_vm5, %v7006_v34, %v18669_v36  ;;  %v8197_v50 = vsel %vm8145_vm5, %v7798_v18, %v13126_v55  ;;  %v18670_v52 = vunpack.i.l.bf16 %v18668_v4  ;;  %v6684_v2 = vadd.f32 %v15173_v60, %v6260_v53 }
 0x495   : > { %v6261_v58 = vcombine.high %v6259_v11, %v6259_v11  ;;  %v16734_v12 = vpack.c.bf16 %v8197_v50, %v8196_v56  ;;  %v6685_v14 = vadd.f32 %v15194_v25, %v6259_v11  ;;  %v18671_v5 = vcombine.high %v16399_v45, %v16399_v45 }
 0x496   : > { %v8148_v47 = vsel %vm8145_vm5, %v6990_v46, %v18670_v52  ;;  %v6687_v54 = vadd.f32 %v15188_v42, %v16545_v1  ;;  %v6688_v23 = vadd.f32 %v15173_v60, %v6269_v30  ;;  %v7832_v32 = vcombine.low %v6682_v38, %v6683_v44  ;;  %v18673_v30 = vld [vmem:[#allocation70_spill] sm:$0xff] }
 0x497   : > { %v8203_v43 = vpack.c.bf16 %v8149_v10, %v8148_v47  ;;  %v6686_v9 = vadd.f32 %v15170_v35, %v6261_v58  ;;  %v16742_v55 = vadd.f32 %v15188_v42, %v18671_v5  ;;  %v13136_v31 = vunpack.i.h.bf16 %v13134_v51  ;;  %v18678_v47 = vld [vmem:[#allocation66_spill] sm:$0xff] }
 0x498   : > { %v13135_v34 = vunpack.i.l.bf16 %v13134_v51  ;;  %v18672_v19 = vcombine.low %v16324_v6, %v16295_v16  ;;  %v7833_v17 = vcombine.low %v6684_v2, %v6685_v14  ;;  %v7840_v18 = vrot.slane %v7832_v32, %v14001_v8  ;;  %v18679_v51 = vld [vmem:[#allocation18_spill] sm:$0xff] }
 0x499   : > { %v8244_v28 = vshrl.u32 %v8203_v43, 16  ;;  %v8247_v11 = vshll.u32 %v8203_v43, 16  ;;  %v7849_v46 = vcombine.low %v6686_v9, %v6687_v54  ;;  %v7863_v4 = vrot.slane %v6688_v23, %v14001_v8 }
 0x49a   : > { %v7031_v62 = vrot.slane %v18672_v19, %v14001_v8  ;;  %v7038_v1 = vrot.slane %v16334_v40, %v14001_v8  ;;  %v18674_v36 = vcombine.low %v15842_v13, %v18673_v30  ;;  %v7847_v58 = vrot.slane %v7833_v17, %v14001_v8 }
 0x49b   : > { %v8246_v53 = vrot.slane %v8244_v28, 7  ;;  %v7856_v16 = vrot.slane %v7849_v46, %v14001_v8  ;;  %v18675_v6 = vcombine.low %v16298_v41, %v16302_v37  ;;  %v18676_v44 = vrot.slane %v16305_v26, %v14001_v8  ;;  %v18683_v28 = vld [vmem:[#allocation45_spill] sm:$0xff] }
 0x49c   : > { %v7048_v10 = vrot.slane %v18674_v36, %v14001_v8  ;;  %v7039_v56 = vcombine.low %v7031_v62, %v7038_v1  ;;  %v18677_v13 = vcombine.low %v16111_v33, %v16114_v20  ;;  %v7104_v2 = vrot.slane %v18678_v47, %v14001_v8  ;;  %v18684_v62 = vld [vmem:[#allocation43_spill] sm:$0xff]  ;;  %v18687_v46 = vld [vmem:[#allocation57_spill] sm:$0xff] }
 0x49d   : > { %v7055_v38 = vrot.slane %v18675_v6, %v14001_v8  ;;  %v7072_v50 = vcombine.low %v16345_v61, %v18676_v44  ;;  %v8249_v40 = vor.u32 %v8247_v11, %v8246_v53  ;;  %v5881_v43 = vrot.slane %v18679_v51, %v14001_v8  ;;  %v18680_v61 = vld [vmem:[#allocation21_spill] sm:$0xff]  ;;  %v18688_v53 = vld [vmem:[#allocation34_spill] sm:$0xff]  ;;  %v18689_v36 = vld [vmem:[#allocation3_spill] sm:$0xff] }
 0x49e   : > { %v7097_v52 = vrot.slane %v18677_v13, %v14001_v8  ;;  %v7848_v41 = vcombine.low %v7840_v18, %v7847_v58  ;;  %v7864_v37 = vcombine.low %v7856_v16, %v7863_v4  ;;  %v18681_v9 = vunpack.i.h.bf16 %v18680_v61  ;;  %v18685_v18 = vld [vmem:[#allocation23_spill] sm:$0xff]  ;;  %v18696_v51 = vld [vmem:[#allocation6_spill] sm:$0xff] }
 0x49f   : > { %v7056_v14 = vcombine.low %v7048_v10, %v7055_v38  ;;  %v8466_v26 = vsel %vm15468_vm8, 0, %v8249_v40  ;;  %v8153_v33 = vsel %vm8145_vm5, %v7072_v50, %v13016_v21  ;;  %v13101_v11 = vunpack.i.h.bf16 %v18684_v62  ;;  %v18691_v6 = vld [vmem:[#allocation15_spill] sm:$0xff]  ;;  %v18694_v40 = vld [vmem:[#allocation53_spill] sm:$0xff] }
 0x4a0   : > { %v8151_v5 = vsel %vm8145_vm5, %v7039_v56, %v18681_v9  ;;  %v7105_v20 = vcombine.low %v7097_v52, %v7104_v2  ;;  %v16787_v54 = vsel %vm15478_vm11, %v8466_v26, 0  ;;  %v8201_v23 = vsel %vm8145_vm5, %v7864_v37, %v13136_v31  ;;  %v18692_v38 = vld [vmem:[#allocation51_spill] sm:$0xff]  ;;  %v18695_v2 = vld [vmem:[#allocation69_spill] sm:$0xff]  ;;  %v18698_v26 = vld [vmem:[#allocation14_spill] sm:$0xff] }
 0x4a1   : > { %18682 = vst [vmem:[#allocation60_spill] sm:$0xff] %v16787_v54  ;;  %v8200_v32 = vsel %vm8145_vm5, %v7848_v41, %v13135_v34  ;;  %v8204_v19 = vpack.c.bf16 %v8151_v5, %v18683_v28  ;;  %12616 = vmatmul.mubr.msk.bf16.gmra.mrb[68].mxu1 %vm3462_vm3, %v16787_v54  ;;  %12648 = vmatmul.mubr.msk.bf16.gmra.mrb[132].mxu0 %vm3462_vm3, %v16787_v54  ;;  %v18686_v31 = vunpack.i.h.bf16 %v18685_v18  ;;  %v18697_v37 = vld [vmem:[#allocation37_spill] sm:$0xff]  ;;  %v18699_v9 = vld [vmem:[#allocation52_spill] sm:$0xff] }
 0x4a2   : > { %v16797_v21 = vpack.c.bf16 %v8201_v23, %v8200_v32  ;;  %v8152_v17 = vsel %vm8145_vm5, %v7056_v14, %v13015_v57  ;;  %v7222_v4 = vcombine.low %v18688_v53, %v18687_v46  ;;  %8890 = vmatprep.mubr.bf16.mxu1 %v18665_v39  ;;  %9229 = vmatprep.mubr.bf16.mxu0 %v18665_v39  ;;  %v18690_v57 = vld [vmem:[#allocation30_spill] sm:$0xff]  ;;  %v18701_v53 = vld [vmem:[#allocation25_spill] sm:$0xff] }
 0x4a3   : > { %v8155_v34 = vsel %vm8145_vm5, %v7105_v20, %v18686_v31  ;;  %v8251_v1 = vshrl.u32 %v8204_v19, 16  ;;  %v8205_v30 = vpack.c.bf16 %v8153_v33, %v8152_v17  ;;  %v6567_v27 = vadd.f32 %v15170_v35, %v16399_v45  ;;  %v18700_v17 = vld [vmem:[#allocation58_spill] sm:$0xff] }
 0x4a4   : > { %v16810_v10 = vpack.c.bf16 %v8155_v34, %v18689_v36  ;;  %v5999_v58 = vrot.slane %v18690_v57, %v14001_v8  ;;  %v5889_v16 = vcombine.high %v5881_v43, %v5881_v43  ;;  %v18693_v44 = vcombine.low %v18691_v6, %v18692_v38  ;;  %v18703_v36 = vld [vmem:[#allocation24_spill] sm:$0xff]  ;;  %v18705_v6 = vld [vmem:[#allocation46_spill] sm:$0xff] }
 0x4a5   : > { %v6583_v56 = vadd.f32 %v15173_v60, %v18694_v40  ;;  %v8253_v13 = vrot.slane %v8251_v1, 7  ;;  %v8254_v52 = vshll.u32 %v8204_v19, 16  ;;  %v8258_v47 = vshrl.u32 %v8205_v30, 16 }
 0x4a6   : > { %v7163_v50 = vrot.slane %v18693_v44, %v14001_v8  ;;  %v7354_v41 = vcombine.low %v18696_v51, %v18695_v2  ;;  %v6569_v45 = vadd.f32 %v15173_v60, %v18697_v37  ;;  %v7288_v14 = vcombine.low %v6567_v27, %v16742_v55  ;;  %v18706_v44 = vld [vmem:[#allocation71_spill] sm:$0xff]  ;;  %v18709_v37 = vld [vmem:[#allocation41_spill] sm:$0xff] }
 0x4a7   : > { %v7170_v61 = vrot.slane %v18698_v26, %v14001_v8  ;;  %v5940_v5 = vrot.slane %v18699_v9, %v14001_v8  ;;  %v8256_v33 = vor.u32 %v8254_v52, %v8253_v13  ;;  %v8260_v20 = vrot.slane %v8258_v47, 7  ;;  %v18707_v13 = vld [vmem:[#allocation26_spill] sm:$0xff] }
 0x4a8   : > { %v7229_v23 = vrot.slane %v7222_v4, %v14001_v8  ;;  %v6007_v32 = vcombine.high %v5999_v58, %v5999_v58  ;;  %v6596_v28 = vadd.f32 %v15188_v42, %v5889_v16  ;;  %v7236_v18 = vrot.slane %v18700_v17, %v14001_v8 }
 0x4a9   : > { %v7171_v19 = vcombine.low %v7163_v50, %v7170_v61  ;;  %v16836_v31 = vadd.f32 %v15170_v35, %v5999_v58  ;;  %v6595_v55 = vadd.f32 %v15170_v35, %v5881_v43  ;;  %v8467_v34 = vsel %vm15468_vm8, 0, %v8256_v33  ;;  %v18710_v61 = vld [vmem:[#allocation49_spill] sm:$0xff] }
 0x4aa   : > { %v8261_v46 = vshll.u32 %v8205_v30, 16  ;;  %v6058_v1 = vrot.slane %v18701_v53, %v14001_v8  ;;  %v16845_v4 = vsel %vm15478_vm11, %v8467_v34, 0  ;;  %v18704_v27 = vunpack.i.h.bf16 %v18703_v36 }
 0x4ab   : > { %18702 = vst [vmem:[#allocation16_spill] sm:$0xff] %v16845_v4  ;;  %v7237_v16 = vcombine.low %v7229_v23, %v7236_v18  ;;  %v5948_v58 = vcombine.high %v5940_v5, %v5940_v5  ;;  %12617 = vmatmul.mubr.msk.bf16.gmra.mrb[72].mxu1 %vm3462_vm3, %v16845_v4  ;;  %12649 = vmatmul.mubr.msk.bf16.gmra.mrb[136].mxu0 %vm3462_vm3, %v16845_v4  ;;  %v8265_v30 = vshrl.u32 %v16810_v10, 16  ;;  %v8272_v50 = vshrl.u32 %v18706_v44, 16 }
 0x4ac   : > { %v8159_v57 = vsel %vm8145_vm5, %v7171_v19, %v18704_v27  ;;  %v8263_v43 = vor.u32 %v8261_v46, %v8260_v20  ;;  %v7420_v40 = vcombine.low %v6595_v55, %v6596_v28  ;;  %8900 = vmatprep.mubr.bf16.mxu1 %v18665_v39  ;;  %9239 = vmatprep.mubr.bf16.mxu0 %v18665_v39  ;;  %v18708_v52 = vunpack.i.h.bf16 %v18707_v13  ;;  %v18711_v20 = vld [vmem:[#allocation54_spill] sm:$0xff]  ;;  %v18712_v46 = vld [vmem:[#allocation4_spill] sm:$0xff] }
 0x4ad   : > { %v16856_v38 = vpack.c.bf16 %v8159_v57, %v18705_v6  ;;  %v7295_v2 = vrot.slane %v7288_v14, %v14001_v8  ;;  %v6624_v51 = vadd.f32 %v15188_v42, %v6007_v32  ;;  %v6117_v26 = vrot.slane %v18709_v37, %v14001_v8  ;;  %v18716_v6 = vld [vmem:[#allocation50_spill] sm:$0xff] }
 0x4ae   : > { %v8163_v47 = vsel %vm8145_vm5, %v7237_v16, %v18708_v52  ;;  %v7302_v33 = vrot.slane %v6569_v45, %v14001_v8  ;;  %v6597_v23 = vadd.f32 %v15173_v60, %v18711_v20  ;;  %v6066_v28 = vcombine.high %v6058_v1, %v6058_v1  ;;  %v18714_v16 = vld [vmem:[#allocation28_spill] sm:$0xff] }
 0x4af   : > { %v16869_v9 = vpack.c.bf16 %v8163_v47, %v18710_v61  ;;  %v7361_v19 = vrot.slane %v7354_v41, %v14001_v8  ;;  %v7368_v17 = vrot.slane %v6583_v56, %v14001_v8  ;;  %v6610_v14 = vadd.f32 %v15188_v42, %v5948_v58  ;;  %v18713_v41 = vld [vmem:[#allocation67_spill] sm:$0xff] }
 0x4b0   : > { %v8468_v32 = vsel %vm15468_vm8, 0, %v8263_v43  ;;  %v8267_v18 = vrot.slane %v8265_v30, 7  ;;  %v7303_v55 = vcombine.low %v7295_v2, %v7302_v33  ;;  %v6609_v34 = vadd.f32 %v15170_v35, %v5940_v5  ;;  %v16889_v30 = vpop.permute.xlu0 %13108  ;;  %v18719_v33 = vld [vmem:[#allocation33_spill] sm:$0xff] }
 0x4b1   : > { %v6611_v45 = vadd.f32 %v15173_v60, %v18712_v46  ;;  %v7369_v53 = vcombine.low %v7361_v19, %v7368_v17  ;;  %v7427_v36 = vrot.slane %v7420_v40, %v14001_v8  ;;  %v6125_v27 = vcombine.high %v6117_v26, %v6117_v26  ;;  %v18717_v40 = vld [vmem:[#allocation31_spill] sm:$0xff]  ;;  %v18720_v17 = vld [vmem:[#allocation68_spill] sm:$0xff] }
 0x4b2   : > { %v6176_v57 = vrot.slane %v18713_v41, %v14001_v8  ;;  %v8268_v56 = vshll.u32 %v16810_v10, 16  ;;  %v18715_v58 = vunpack.i.h.bf16 %v18714_v16  ;;  %v16893_v5 = vsel %vm15478_vm11, %v8468_v32, 0  ;;  %v18722_v41 = vld [vmem:[#allocation8_spill] sm:$0xff] }
 0x4b3   : > { %v18718_v52 = vunpack.i.h.bf16 %v18717_v40  ;;  %v7434_v2 = vrot.slane %v6597_v23, %v14001_v8  ;;  %v13111_v10 = vunpack.i.h.bf16 %v16889_v30  ;;  %v7486_v37 = vcombine.low %v6609_v34, %v6610_v14  ;;  %12618 = vmatmul.mubr.msk.bf16.gmra.mrb[76].mxu1 %vm3462_vm3, %v16893_v5  ;;  %12650 = vmatmul.mubr.msk.bf16.gmra.mrb[140].mxu0 %vm3462_vm3, %v16893_v5 }
 0x4b4   : > { %v8167_v43 = vsel %vm8145_vm5, %v7303_v55, %v18715_v58  ;;  %v8270_v61 = vor.u32 %v8268_v56, %v8267_v18  ;;  %v13110_v19 = vunpack.i.l.bf16 %v16889_v30  ;;  %v6625_v32 = vadd.f32 %v15173_v60, %v18720_v17  ;;  %8910 = vmatprep.mubr.bf16.mxu1 %v18665_v39  ;;  %9249 = vmatprep.mubr.bf16.mxu0 %v18665_v39  ;;  %v18721_v55 = vld [vmem:[#allocation73_spill] sm:$0xff] }
 0x4b5   : > { %v16896_v13 = vpack.c.bf16 %v8167_v43, %v18716_v6  ;;  %v8171_v47 = vsel %vm8145_vm5, %v7369_v53, %v18718_v52  ;;  %v7552_v23 = vcombine.low %v16836_v31, %v6624_v51  ;;  %v7435_v14 = vcombine.low %v7427_v36, %v7434_v2  ;;  %v18723_v51 = vld [vmem:[#allocation32_spill] sm:$0xff] }
 0x4b6   : > { %v16908_v20 = vpack.c.bf16 %v8171_v47, %v18719_v33  ;;  %v16918_v34 = vadd.f32 %v15173_v60, %v18721_v55  ;;  %v8274_v18 = vrot.slane %v8272_v50, 7  ;;  %v6637_v46 = vadd.f32 %v15170_v35, %v6058_v1  ;;  %v18725_v6 = vld [vmem:[#allocation72_spill] sm:$0xff] }
 0x4b7   : > { %v6638_v53 = vadd.f32 %v15188_v42, %v6066_v28  ;;  %v6235_v56 = vrot.slane %v18722_v41, %v14001_v8  ;;  %v6652_v16 = vadd.f32 %v15188_v42, %v6125_v27  ;;  %v6184_v31 = vcombine.high %v6176_v57, %v6176_v57  ;;  %v9207_v41 = vpop.f32.mrb[124].mxu0 }
 0x4b8   : > { %v18724_v58 = vunpack.i.h.bf16 %v18723_v51  ;;  %v8469_v36 = vsel %vm15468_vm8, 0, %v8270_v61  ;;  %v7493_v1 = vrot.slane %v7486_v37, %v14001_v8  ;;  %v7500_v50 = vrot.slane %v6611_v45, %v14001_v8  ;;  %v16944_v61 = vpop.permute.xlu0 %13118 }
 0x4b9   : > { %v18726_v28 = vcombine.high %v18721_v55, %v18721_v55  ;;  %v8275_v52 = vshll.u32 %v18706_v44, 16  ;;  %v7559_v47 = vrot.slane %v7552_v23, %v14001_v8  ;;  %v7566_v2 = vrot.slane %v6625_v32, %v14001_v8  ;;  %v8870_v23 = vpop.f32.mrb[60].mxu1 }
 0x4ba   : > { %v8175_v43 = vsel %vm8145_vm5, %v7435_v14, %v18724_v58  ;;  %v6639_v33 = vadd.f32 %v15173_v60, %v16527_v49  ;;  %v7618_v37 = vcombine.low %v6637_v46, %v6638_v53  ;;  %v6651_v45 = vadd.f32 %v15170_v35, %v6117_v26  ;;  %v18727_v46 = vld [vmem:[#allocation39_spill] sm:$0xff]  ;;  %v8871_v51 = vpop.f32.mrb[61].mxu1  ;;  %v9208_v58 = vpop.f32.mrb[125].mxu0 }
 0x4bb   : > { %v16931_v40 = vpack.c.bf16 %v8175_v43, %v18725_v6  ;;  %v16939_v27 = vadd.f32 %v15194_v25, %v18726_v28  ;;  %v7501_v17 = vcombine.low %v7493_v1, %v7500_v50  ;;  %v6243_v14 = vcombine.high %v6235_v56, %v6235_v56  ;;  %v8872_v28 = vpop.f32.mrb[62].mxu1  ;;  %v18735_v23 = vld [vmem:[#allocation75_spill] sm:$0xff]  ;;  %v18736_v51 = vld [vmem:[#allocation2_spill] sm:$0xff]  ;;  %v18737_v58 = vld [vmem:[#allocation76_spill] sm:$0xff] }
 0x4bc   : > { %v6666_v55 = vadd.f32 %v15188_v42, %v6184_v31  ;;  %v16952_v25 = vsel %vm15478_vm11, %v8469_v36, 0  ;;  %v7567_v44 = vcombine.low %v7559_v47, %v7566_v2  ;;  %v7684_v32 = vcombine.low %v6651_v45, %v6652_v16  ;;  %v18729_v16 = vld [vmem:[#allocation42_spill] sm:$0xff]  ;;  %v18732_v47 = vld [vmem:[#allocation64_spill] sm:$0xff]  ;;  %v18738_v28 = vld [vmem:[#allocation61_spill] sm:$0xff] }
 0x4bd   : > { %12619 = vmatmul.mubr.msk.bf16.gmra.mrb[80].mxu1 %vm3462_vm3, %v16952_v25  ;;  %12651 = vmatmul.mubr.msk.bf16.gmra.mrb[144].mxu0 %vm3462_vm3, %v16952_v25  ;;  %v8277_v49 = vor.u32 %v8275_v52, %v8274_v18  ;;  %v8279_v26 = vshrl.u32 %v16856_v38, 16  ;;  %v18728_v53 = vunpack.i.h.bf16 %v18727_v46  ;;  %v13121_v43 = vunpack.i.h.bf16 %v16944_v61  ;;  %v18730_v18 = vld [vmem:[#allocation40_spill] sm:$0xff]  ;;  %v9209_v52 = vpop.f32.mrb[126].mxu0  ;;  %v18733_v2 = vld [vmem:[#allocation78_spill] sm:$0xff] }
 0x4be   : > { %v6665_v36 = vadd.f32 %v15170_v35, %v6176_v57  ;;  %8920 = vmatprep.mubr.bf16.mxu1 %v18665_v39  ;;  %9259 = vmatprep.mubr.bf16.mxu0 %v18665_v39  ;;  %v18731_v1 = vunpack.i.h.bf16 %v18730_v18  ;;  %v18734_v45 = vcombine.low %v18732_v47, %v18733_v2  ;;  %v6653_v57 = vadd.f32 %v15173_v60, %v16548_v48  ;;  %v18739_v52 = vld [vmem:[#allocation63_spill] sm:$0xff] }
 0x4bf   : > { %v8179_v31 = vsel %vm8145_vm5, %v7501_v17, %v18728_v53  ;;  %v7625_v46 = vrot.slane %v7618_v37, %v14001_v8  ;;  %v8873_v53 = vpop.f32.mrb[63].mxu1  ;;  %v18740_v47 = vcombine.low %v18738_v28, %v18739_v52  ;;  %v8470_v37 = vsel %vm15468_vm8, 0, %v8277_v49 }
 0x4c0   : > { %v16967_v6 = vpack.c.bf16 %v8179_v31, %v18729_v16  ;;  %v8183_v50 = vsel %vm8145_vm5, %v7567_v44, %v18731_v1  ;;  %v7748_v17 = vrot.slane %v18734_v45, %v14001_v8  ;;  %v9210_v31 = vpop.f32.mrb[127].mxu0  ;;  %v7683_v44 = vcombine.low %v18737_v58, %v18736_v51 }
 0x4c1   : > { %v16979_v41 = vpack.c.bf16 %v8183_v50, %v18735_v23  ;;  %v6680_v16 = vadd.f32 %v15188_v42, %v6243_v14  ;;  %v7750_v18 = vcombine.low %v6665_v36, %v6666_v55  ;;  %v7632_v1 = vrot.slane %v6639_v33, %v14001_v8  ;;  %v18741_v36 = vld [vmem:[#allocation22_spill] sm:$0xff] }
 0x4c2   : > { %v7741_v48 = vrot.slane %v18740_v47, %v14001_v8  ;;  %v7800_v50 = vcombine.low %v16918_v34, %v16939_v27  ;;  %v8281_v2 = vrot.slane %v8279_v26, 7  ;;  %v6679_v45 = vadd.f32 %v15170_v35, %v6235_v56  ;;  %v18742_v23 = vld [vmem:[#allocation74_spill] sm:$0xff]  ;;  %v13129_v27 = vpop.permute.xlu0 %13128  ;;  %v18743_v56 = vld [vmem:[#allocation77_spill] sm:$0xff]  ;;  %v18744_v26 = vld [vmem:[#allocation35_spill] sm:$0xff] }
 0x4c3   : > { %v6667_v42 = vadd.f32 %v15173_v60, %v16629_v22  ;;  %v7633_v14 = vcombine.low %v7625_v46, %v7632_v1  ;;  %v7691_v33 = vrot.slane %v7684_v32, %v14001_v8  ;;  %v7799_v53 = vcombine.low %v18742_v23, %v18741_v36  ;;  %v13472_v36 = vld [vmem:[%s18302_s10 + $0x60] ss:$36 sps:$4 sm:$0xff]  }
 0x4c4   : > { %v7749_v55 = vcombine.low %v7741_v48, %v7748_v17  ;;  %v8282_v31 = vshll.u32 %v16856_v38, 16  ;;  %v7698_v34 = vrot.slane %v6653_v57, %v14001_v8  ;;  %v7816_v51 = vcombine.low %v6679_v45, %v6680_v16  ;;  %v13474_v23 = vld [vmem:[%s18302_s10 + $0x64] ss:$36 sps:$4 sm:$0xff]  }
 0x4c5   : > { %v17004_v49 = vsel %vm15478_vm11, %v8470_v37, 0  ;;  %v8187_v35 = vsel %vm8145_vm5, %v7633_v14, %v13101_v11  ;;  %v7757_v22 = vrot.slane %v7750_v18, %v14001_v8  ;;  %v8286_v32 = vshrl.u32 %v18743_v56, 16  ;;  %v13469_v14 = vld [vmem:[%s18302_s10 + $0xe8] ss:$36 sps:$4 sm:$0xff]   ;;  %9849 = vmatprep.subr.bf16.mxu0 %v13474_v23  ;;  %v18748_v23 = vld [vmem:[#allocation48_spill] sm:$0xff] }
 0x4c6   : > { %12620 = vmatmul.mubr.msk.bf16.gmra.mrb[84].mxu1 %vm3462_vm3, %v17004_v49  ;;  %12652 = vmatmul.mubr.msk.bf16.gmra.mrb[148].mxu0 %vm3462_vm3, %v17004_v49  ;;  %v8284_v38 = vor.u32 %v8282_v31, %v8281_v2  ;;  %v17016_v17 = vpack.c.bf16 %v8187_v35, %v18744_v26  ;;  %v7699_v57 = vcombine.low %v7691_v33, %v7698_v34  ;;  %v13120_v46 = vunpack.i.l.bf16 %v16944_v61  ;;  %v13471_v33 = vld [vmem:[%s18302_s10 + $0xec] ss:$36 sps:$4 sm:$0xff]  }
 0x4c7   : > { %v7814_v62 = vrot.slane %v7800_v50, %v14001_v8  ;;  %v6681_v11 = vadd.f32 %v15173_v60, %v16539_v7  ;;  %8930 = vmatprep.mubr.bf16.mxu1 %v18665_v39  ;;  %9269 = vmatprep.mubr.bf16.mxu0 %v18665_v39  ;;  %v7764_v58 = vrot.slane %v6667_v42, %v14001_v8  ;;  %v13131_v16 = vunpack.i.h.bf16 %v13129_v27  ;;  %v18745_v35 = vld [vmem:[#allocation7_spill] sm:$0xff] }
 0x4c8   : > { %v13130_v18 = vunpack.i.l.bf16 %v13129_v27  ;;  %v8190_v1 = vsel %vm8145_vm5, %v7683_v44, %v13110_v19  ;;  %v7807_v28 = vrot.slane %v7799_v53, %v14001_v8  ;;  %v8191_v61 = vsel %vm8145_vm5, %v7699_v57, %v13111_v10  ;;  %9516 = vmatprep.subr.bf16.mxu1 %v13471_v33  ;;  %9850 = vmatpush1.bf16.msra.mxu0 %v13472_v36 }
 0x4c9   : > { %v7765_v52 = vcombine.low %v7757_v22, %v7764_v58  ;;  %v8288_v60 = vrot.slane %v8286_v32, 7  ;;  %v8471_v7 = vsel %vm15468_vm8, 0, %v8284_v38  ;;  %v17034_v47 = vpack.c.bf16 %v8191_v61, %v8190_v1  ;;  %9517 = vmatpush1.bf16.msra.mxu1 %v13469_v14 }
 0x4ca   : > { %v7823_v48 = vrot.slane %v7816_v51, %v14001_v8  ;;  %v8194_v50 = vsel %vm8145_vm5, %v7749_v55, %v13120_v46  ;;  %v7815_v37 = vcombine.low %v7807_v28, %v7814_v62  ;;  %v7830_v44 = vrot.slane %v6681_v11, %v14001_v8 }
 0x4cb   : > { %v8195_v19 = vsel %vm8145_vm5, %v7765_v52, %v13121_v43  ;;  %v8289_v30 = vshll.u32 %v18743_v56, 16  ;;  %v17045_v10 = vsel %vm15478_vm11, %v8471_v7, 0  ;;  %v8293_v43 = vshrl.u32 %v16869_v9, 16 }
 0x4cc   : > { %v17041_v2 = vpack.c.bf16 %v8195_v19, %v8194_v50  ;;  %v7831_v45 = vcombine.low %v7823_v48, %v7830_v44  ;;  %v8198_v8 = vsel %vm8145_vm5, %v7815_v37, %v13130_v18  ;;  %v8296_v27 = vshll.u32 %v16869_v9, 16  ;;  %v18746_v18 = vld [vmem:[#allocation19_spill] sm:$0xff] }
 0x4cd   : > { %v8291_v42 = vor.u32 %v8289_v30, %v8288_v60  ;;  %v8295_v34 = vrot.slane %v8293_v43, 7  ;;  %v8300_v22 = vshrl.u32 %v18745_v35, 16  ;;  %v8303_v38 = vshll.u32 %v18745_v35, 16  ;;  %v18747_v30 = vld [vmem:[#allocation9_spill] sm:$0xff] }
 0x4ce   : > { %12621 = vmatmul.mubr.msk.bf16.gmra.mrb[88].mxu1 %vm3462_vm3, %v17045_v10  ;;  %12653 = vmatmul.mubr.msk.bf16.gmra.mrb[152].mxu0 %vm3462_vm3, %v17045_v10  ;;  %v8199_v55 = vsel %vm8145_vm5, %v7831_v45, %v13131_v16  ;;  %v8307_v46 = vshrl.u32 %v16896_v13, 16  ;;  %v8310_v58 = vshll.u32 %v16896_v13, 16  ;;  %v8314_v1 = vshrl.u32 %v18746_v18, 16 }
 0x4cf   : > { %8940 = vmatprep.mubr.bf16.mxu1 %v18665_v39  ;;  %9279 = vmatprep.mubr.bf16.mxu0 %v18665_v39  ;;  %v17068_v53 = vpack.c.bf16 %v8199_v55, %v8198_v8  ;;  %v8472_v31 = vsel %vm15468_vm8, 0, %v8291_v42  ;;  %v8298_v56 = vor.u32 %v8296_v27, %v8295_v34  ;;  %v8302_v32 = vrot.slane %v8300_v22, 7  ;;  %v13475_v34 = vld [vmem:[%s18302_s10 + $0xa8] ss:$36 sps:$4 sm:$0xff]  }
 0x4d0   : > { %v17075_v51 = vsel %vm15478_vm11, %v8472_v31, 0  ;;  %v8309_v11 = vrot.slane %v8307_v46, 7  ;;  %v8316_v61 = vrot.slane %v8314_v1, 7  ;;  %v8317_v52 = vshll.u32 %v18746_v18, 16  ;;  %v13477_v27 = vld [vmem:[%s18302_s10 + $0xac] ss:$36 sps:$4 sm:$0xff]  }
 0x4d1   : > { %v8473_v9 = vsel %vm15468_vm8, 0, %v8298_v56  ;;  %v8305_v57 = vor.u32 %v8303_v38, %v8302_v32  ;;  %v8321_v48 = vshrl.u32 %v16908_v20, 16  ;;  %v8324_v19 = vshll.u32 %v16908_v20, 16  ;;  %9851 = vmatprep.subr.bf16.mxu0 %v13477_v27  ;;  %v13478_v56 = vld [vmem:[%s18302_s10 + $0xf0] ss:$36 sps:$4 sm:$0xff]  }
 0x4d2   : > { %v17089_v26 = vsel %vm15478_vm11, %v8473_v9, 0  ;;  %v8312_v28 = vor.u32 %v8310_v58, %v8309_v11  ;;  %v8319_v7 = vor.u32 %v8317_v52, %v8316_v61  ;;  %v8328_v45 = vshrl.u32 %v18747_v30, 16  ;;  %9852 = vmatpush1.bf16.msra.mxu0 %v13475_v34  ;;  %v13480_v32 = vld [vmem:[%s18302_s10 + $0xf4] ss:$36 sps:$4 sm:$0xff]   ;;  %v18749_v9 = vld [vmem:[#allocation27_spill] sm:$0xff] }
 0x4d3   : > { %v8474_v62 = vsel %vm15468_vm8, 0, %v8305_v57  ;;  %v8323_v37 = vrot.slane %v8321_v48, 7  ;;  %v8331_v8 = vshll.u32 %v18747_v30, 16  ;;  %v8335_v31 = vshrl.u32 %v16931_v40, 16  ;;  %9853 = vmatprep.subr.bf16.mxu0 %v13480_v32 }
 0x4d4   : > { %v17103_v16 = vsel %vm15478_vm11, %v8474_v62, 0  ;;  %v8475_v13 = vsel %vm15468_vm8, 0, %v8312_v28  ;;  %v8476_v50 = vsel %vm15468_vm8, 0, %v8319_v7  ;;  %v8330_v43 = vrot.slane %v8328_v45, 7 }
 0x4d5   : > { %v17117_v60 = vsel %vm15478_vm11, %v8475_v13, 0  ;;  %v17131_v44 = vsel %vm15478_vm11, %v8476_v50, 0  ;;  %v8326_v42 = vor.u32 %v8324_v19, %v8323_v37  ;;  %v8337_v35 = vrot.slane %v8335_v31, 7 }
 0x4d6   : > { %12622 = vmatmul.mubr.msk.bf16.gmra.mrb[92].mxu1 %vm3462_vm3, %v17075_v51  ;;  %12654 = vmatmul.mubr.msk.bf16.gmra.mrb[156].mxu0 %vm3462_vm3, %v17075_v51  ;;  %v8333_v33 = vor.u32 %v8331_v8, %v8330_v43  ;;  %v8338_v22 = vshll.u32 %v16931_v40, 16  ;;  %v8342_v38 = vshrl.u32 %v18749_v9, 16  ;;  %v17195_v40 = vld [vmem:[%s18302_s10 + $0x20] ss:$36 sps:$4 sm:$0xff]   ;;  %v8345_v11 = vshll.u32 %v18749_v9, 16 }
 0x4d7   : > { %8950 = vmatprep.mubr.bf16.mxu1 %v18665_v39  ;;  %9289 = vmatprep.mubr.bf16.mxu0 %v18665_v39  ;;  %v8477_v20 = vsel %vm15468_vm8, 0, %v8326_v42  ;;  %v8349_v1 = vshrl.u32 %v16967_v6, 16  ;;  %v8352_v13 = vshll.u32 %v16967_v6, 16  ;;  %v8356_v7 = vshrl.u32 %v16587_v24, 16 }
 0x4d8   : > { %v17145_v14 = vsel %vm15478_vm11, %v8477_v20, 0  ;;  %v8478_v55 = vsel %vm15468_vm8, 0, %v8333_v33  ;;  %v8340_v57 = vor.u32 %v8338_v22, %v8337_v35  ;;  %9854 = vmatpush1.bf16.msra.mxu0 %v13478_v56  ;;  %v8344_v46 = vrot.slane %v8342_v38, 7  ;;  %12863 = vmatprep.subr.bf16.mxu1 %v17195_v40 }
 0x4d9   : > { %v17157_v36 = vsel %vm15478_vm11, %v8478_v55, 0  ;;  %v8351_v61 = vrot.slane %v8349_v1, 7  ;;  %v8358_v50 = vrot.slane %v8356_v7, 7  ;;  %v8359_v37 = vshll.u32 %v16587_v24, 16 }
 0x4da   : > { %v8479_v62 = vsel %vm15468_vm8, 0, %v8340_v57  ;;  %v8347_v18 = vor.u32 %v8345_v11, %v8344_v46  ;;  %v8363_v45 = vshrl.u32 %v16979_v41, 16  ;;  %v8366_v43 = vshll.u32 %v16979_v41, 16 }
 0x4db   : > { %v17203_v58 = vsel %vm15478_vm11, %v8479_v62, 0  ;;  %v8354_v48 = vor.u32 %v8352_v13, %v8351_v61  ;;  %v8361_v30 = vor.u32 %v8359_v37, %v8358_v50  ;;  %v8370_v8 = vshrl.u32 %v16617_v29, 16 }
 0x4dc   : > { %v8480_v28 = vsel %vm15468_vm8, 0, %v8347_v18  ;;  %v8365_v42 = vrot.slane %v8363_v45, 7  ;;  %v8373_v31 = vshll.u32 %v16617_v29, 16  ;;  %v8377_v35 = vshrl.u32 %v17016_v17, 16 }
 0x4dd   : > { %v17217_v52 = vsel %vm15478_vm11, %v8480_v28, 0  ;;  %v8481_v6 = vsel %vm15468_vm8, 0, %v8354_v48  ;;  %v8482_v24 = vsel %vm15468_vm8, 0, %v8361_v30  ;;  %v8372_v55 = vrot.slane %v8370_v8, 7 }
 0x4de   : > { %12623 = vmatmul.mubr.msk.bf16.gmra.mrb[96].mxu1 %vm3462_vm3, %v17089_v26  ;;  %12655 = vmatmul.mubr.msk.bf16.gmra.mrb[160].mxu0 %vm3462_vm3, %v17089_v26  ;;  %v17231_v19 = vsel %vm15478_vm11, %v8481_v6, 0  ;;  %v17245_v20 = vsel %vm15478_vm11, %v8482_v24, 0  ;;  %v8368_v33 = vor.u32 %v8366_v43, %v8365_v42  ;;  %v8379_v22 = vrot.slane %v8377_v35, 7 }
 0x4df   : > { %8960 = vmatprep.mubr.bf16.mxu1 %v18665_v39  ;;  %9299 = vmatprep.mubr.bf16.mxu0 %v18665_v39  ;;  %v8375_v27 = vor.u32 %v8373_v31, %v8372_v55  ;;  %v8380_v56 = vshll.u32 %v17016_v17, 16  ;;  %v8384_v9 = vshrl.u32 %v16644_v63, 16  ;;  %v8387_v46 = vshll.u32 %v16644_v63, 16 }
 0x4e0   : > { %v8483_v41 = vsel %vm15468_vm8, 0, %v8368_v33  ;;  %v8391_v18 = vshrl.u32 %v17034_v47, 16  ;;  %v8394_v28 = vshll.u32 %v17034_v47, 16  ;;  %v8398_v13 = vshrl.u32 %v16682_v3, 16 }
 0x4e1   : > { %v17259_v34 = vsel %vm15478_vm11, %v8483_v41, 0  ;;  %v8484_v29 = vsel %vm15468_vm8, 0, %v8375_v27  ;;  %v8382_v38 = vor.u32 %v8380_v56, %v8379_v22  ;;  %v8386_v57 = vrot.slane %v8384_v9, 7 }
 0x4e2   : > { %v17273_v32 = vsel %vm15478_vm11, %v8484_v29, 0  ;;  %v8393_v1 = vrot.slane %v8391_v18, 7  ;;  %v8400_v48 = vrot.slane %v8398_v13, 7  ;;  %v8401_v50 = vshll.u32 %v16682_v3, 16 }
 0x4e3   : > { %v8485_v17 = vsel %vm15468_vm8, 0, %v8382_v38  ;;  %v8389_v11 = vor.u32 %v8387_v46, %v8386_v57  ;;  %v8405_v30 = vshrl.u32 %v17041_v2, 16  ;;  %v8408_v24 = vshll.u32 %v17041_v2, 16 }
 0x4e4   : > { %v17287_v62 = vsel %vm15478_vm11, %v8485_v17, 0  ;;  %v8396_v7 = vor.u32 %v8394_v28, %v8393_v1  ;;  %v8403_v37 = vor.u32 %v8401_v50, %v8400_v48  ;;  %v8412_v43 = vshrl.u32 %v16734_v12, 16 }
 0x4e5   : > { %v8486_v63 = vsel %vm15468_vm8, 0, %v8389_v11  ;;  %v8407_v45 = vrot.slane %v8405_v30, 7  ;;  %v8415_v22 = vshll.u32 %v16734_v12, 16  ;;  %v8419_v17 = vshrl.u32 %v17068_v53, 16 }
 0x4e6   : > { %12624 = vmatmul.mubr.msk.bf16.gmra.mrb[100].mxu1 %vm3462_vm3, %v17103_v16  ;;  %12656 = vmatmul.mubr.msk.bf16.gmra.mrb[164].mxu0 %vm3462_vm3, %v17103_v16  ;;  %v17301_v61 = vsel %vm15478_vm11, %v8486_v63, 0  ;;  %v8487_v47 = vsel %vm15468_vm8, 0, %v8396_v7  ;;  %v8488_v3 = vsel %vm15468_vm8, 0, %v8403_v37  ;;  %v8414_v2 = vrot.slane %v8412_v43, 7 }
 0x4e7   : > { %8970 = vmatprep.mubr.bf16.mxu1 %v18665_v39  ;;  %9309 = vmatprep.mubr.bf16.mxu0 %v18665_v39  ;;  %v17315_v6 = vsel %vm15478_vm11, %v8487_v47, 0  ;;  %v17329_v42 = vsel %vm15478_vm11, %v8488_v3, 0  ;;  %v8410_v8 = vor.u32 %v8408_v24, %v8407_v45  ;;  %v8421_v46 = vrot.slane %v8419_v17, 7 }
 0x4e8   : > { %v8417_v57 = vor.u32 %v8415_v22, %v8414_v2  ;;  %v8422_v11 = vshll.u32 %v17068_v53, 16  ;;  %v8426_v63 = vshrl.u32 %v16797_v21, 16 }
 0x4e9   : > { %v8489_v41 = vsel %vm15468_vm8, 0, %v8410_v8  ;;  %v8429_v8 = vshll.u32 %v16797_v21, 16 }
 0x4ea   : > { %v17343_v38 = vsel %vm15478_vm11, %v8489_v41, 0  ;;  %v8490_v12 = vsel %vm15468_vm8, 0, %v8417_v57  ;;  %v8424_v1 = vor.u32 %v8422_v11, %v8421_v46  ;;  %v8428_v48 = vrot.slane %v8426_v63, 7 }
 0x4eb   : > { %18750 = vst [vmem:[#allocation10_spill] sm:$0xff] %v17343_v38  ;;  %v17357_v18 = vsel %vm15478_vm11, %v8490_v12, 0 }
 0x4ec   : > { %18751 = vst [vmem:[#allocation65_spill] sm:$0xff] %v17357_v18  ;;  %v8491_v30 = vsel %vm15468_vm8, 0, %v8424_v1 }
 0x4ed   : > { %v17372_v41 = vsel %vm15478_vm11, %v8491_v30, 0 }
 0x4ee   : > { %12625 = vmatmul.mubr.msk.bf16.gmra.mrb[104].mxu1 %vm3462_vm3, %v17117_v60  ;;  %12657 = vmatmul.mubr.msk.bf16.gmra.mrb[168].mxu0 %vm3462_vm3, %v17117_v60 }
 0x4ef   : > { %8980 = vmatprep.mubr.bf16.mxu1 %v18665_v39  ;;  %9319 = vmatprep.mubr.bf16.mxu0 %v18665_v39 }
 0x4f6   : > { %12626 = vmatmul.mubr.msk.bf16.gmra.mrb[108].mxu1 %vm3462_vm3, %v17131_v44  ;;  %12658 = vmatmul.mubr.msk.bf16.gmra.mrb[172].mxu0 %vm3462_vm3, %v17131_v44 }
 0x4f7   : > { %8990 = vmatprep.mubr.bf16.mxu1 %v18665_v39  ;;  %9329 = vmatprep.mubr.bf16.mxu0 %v18665_v39 }
 0x4fe   : > { %12627 = vmatmul.mubr.msk.bf16.gmra.mrb[112].mxu1 %vm3462_vm3, %v17145_v14  ;;  %12659 = vmatmul.mubr.msk.bf16.gmra.mrb[176].mxu0 %vm3462_vm3, %v17145_v14 }
 0x4ff   : > { %9000 = vmatprep.mubr.bf16.mxu1 %v18665_v39  ;;  %9339 = vmatprep.mubr.bf16.mxu0 %v18665_v39 }
 0x506   : > { %12628 = vmatmul.mubr.msk.bf16.gmra.mrb[116].mxu1 %vm3462_vm3, %v17157_v36  ;;  %12660 = vmatmul.mubr.msk.bf16.gmra.mrb[180].mxu0 %vm3462_vm3, %v17157_v36 }
 0x507   : > { %9010 = vmatprep.mubr.bf16.mxu1 %v18665_v39  ;;  %9349 = vmatprep.mubr.bf16.mxu0 %v18665_v39 }
 0x50e   : > { %12629 = vmatmul.mubr.msk.bf16.gmra.mrb[120].mxu1 %vm3462_vm3, %v18748_v23  ;;  %12661 = vmatmul.mubr.msk.bf16.gmra.mrb[184].mxu0 %vm3462_vm3, %v18748_v23 }
 0x50f   : > { %9020 = vmatprep.mubr.bf16.mxu1 %v18665_v39  ;;  %9357 = vmatprep.mubr.bf16.mxu0 %v18665_v39 }
 0x516   : > { %12630 = vmatmul.mubr.msk.bf16.gmra.mrb[124].mxu1 %vm3462_vm3, %v18748_v23  ;;  %12662 = vmatmul.mubr.msk.bf16.gmra.mrb[188].mxu0 %vm3462_vm3, %v18748_v23 }
 0x517   : > { %9026 = vmatprep.mubr.bf16.mxu1 %v18665_v39  ;;  %9363 = vmatprep.mubr.bf16.mxu0 %v18665_v39 }
 0x51e   : > { %12631 = vmatmul.mubr.msk.bf16.gmra.mrb[128].mxu1 %vm3462_vm3, %v17203_v58  ;;  %12663 = vmatmul.mubr.msk.bf16.gmra.mrb[192].mxu0 %vm3462_vm3, %v17203_v58 }
 0x51f   : > { %9032 = vmatprep.mubr.bf16.mxu1 %v18665_v39  ;;  %9371 = vmatprep.mubr.bf16.mxu0 %v18665_v39 }
 0x526   : > { %12632 = vmatmul.mubr.msk.bf16.gmra.mrb[132].mxu1 %vm3462_vm3, %v17217_v52  ;;  %12664 = vmatmul.mubr.msk.bf16.gmra.mrb[196].mxu0 %vm3462_vm3, %v17217_v52 }
 0x527   : > { %9042 = vmatprep.mubr.bf16.mxu1 %v18665_v39  ;;  %9381 = vmatprep.mubr.bf16.mxu0 %v18665_v39 }
 0x52e   : > { %12633 = vmatmul.mubr.msk.bf16.gmra.mrb[136].mxu1 %vm3462_vm3, %v17231_v19  ;;  %12665 = vmatmul.mubr.msk.bf16.gmra.mrb[200].mxu0 %vm3462_vm3, %v17231_v19 }
 0x52f   : > { %9052 = vmatprep.mubr.bf16.mxu1 %v18665_v39  ;;  %9391 = vmatprep.mubr.bf16.mxu0 %v18665_v39 }
 0x536   : > { %12634 = vmatmul.mubr.msk.bf16.gmra.mrb[140].mxu1 %vm3462_vm3, %v17245_v20  ;;  %12666 = vmatmul.mubr.msk.bf16.gmra.mrb[204].mxu0 %vm3462_vm3, %v17245_v20 }
 0x537   : > { %9062 = vmatprep.mubr.bf16.mxu1 %v18665_v39  ;;  %9401 = vmatprep.mubr.bf16.mxu0 %v18665_v39 }
 0x53e   : > { %12635 = vmatmul.mubr.msk.bf16.gmra.mrb[144].mxu1 %vm3462_vm3, %v17259_v34  ;;  %12667 = vmatmul.mubr.msk.bf16.gmra.mrb[208].mxu0 %vm3462_vm3, %v17259_v34 }
 0x53f   : > { %9072 = vmatprep.mubr.bf16.mxu1 %v18665_v39  ;;  %9411 = vmatprep.mubr.bf16.mxu0 %v18665_v39 }
 0x546   : > { %12636 = vmatmul.mubr.msk.bf16.gmra.mrb[148].mxu1 %vm3462_vm3, %v17273_v32  ;;  %12668 = vmatmul.mubr.msk.bf16.gmra.mrb[212].mxu0 %vm3462_vm3, %v17273_v32 }
 0x547   : > { %9082 = vmatprep.mubr.bf16.mxu1 %v18665_v39  ;;  %9421 = vmatprep.mubr.bf16.mxu0 %v18665_v39 }
 0x54e   : > { %12637 = vmatmul.mubr.msk.bf16.gmra.mrb[152].mxu1 %vm3462_vm3, %v17287_v62  ;;  %12669 = vmatmul.mubr.msk.bf16.gmra.mrb[216].mxu0 %vm3462_vm3, %v17287_v62 }
 0x54f   : > { %9092 = vmatprep.mubr.bf16.mxu1 %v18665_v39  ;;  %9431 = vmatprep.mubr.bf16.mxu0 %v18665_v39 }
 0x556   : > { %12638 = vmatmul.mubr.msk.bf16.gmra.mrb[156].mxu1 %vm3462_vm3, %v17301_v61  ;;  %12670 = vmatmul.mubr.msk.bf16.gmra.mrb[220].mxu0 %vm3462_vm3, %v17301_v61 }
 0x557   : > { %9102 = vmatprep.mubr.bf16.mxu1 %v18665_v39  ;;  %9441 = vmatprep.mubr.bf16.mxu0 %v18665_v39 }
 0x55e   : > { %12639 = vmatmul.mubr.msk.bf16.gmra.mrb[160].mxu1 %vm3462_vm3, %v17315_v6  ;;  %12671 = vmatmul.mubr.msk.bf16.gmra.mrb[224].mxu0 %vm3462_vm3, %v17315_v6 }
 0x55f   : > { %9112 = vmatprep.mubr.bf16.mxu1 %v18665_v39  ;;  %9451 = vmatprep.mubr.bf16.mxu0 %v18665_v39 }
 0x563   : > { %v8876_v33 = vpop.f32.mrb[64].mxu1  ;;  %v9213_v55 = vpop.f32.mrb[128].mxu0 }
 0x564   : > { %v8877_v31 = vpop.f32.mrb[65].mxu1  ;;  %v9214_v27 = vpop.f32.mrb[129].mxu0 }
 0x565   : > { %v8878_v35 = vpop.f32.mrb[66].mxu1  ;;  %v9216_v29 = vpop.f32.mrb[130].mxu0 }
 0x566   : > { %12640 = vmatmul.mubr.msk.bf16.gmra.mrb[164].mxu1 %vm3462_vm3, %v17329_v42  ;;  %12672 = vmatmul.mubr.msk.bf16.gmra.mrb[228].mxu0 %vm3462_vm3, %v17329_v42  ;;  %v8879_v56 = vpop.f32.mrb[67].mxu1  ;;  %v9217_v9 = vpop.f32.mrb[131].mxu0  ;;  %v8431_v35 = vor.u32 %v8429_v8, %v8428_v48 }
 0x567   : > { %9122 = vmatprep.mubr.bf16.mxu1 %v18665_v39  ;;  %9461 = vmatprep.mubr.bf16.mxu0 %v18665_v39 }
 0x568   : > { %v8492_v11 = vsel %vm15468_vm8, 0, %v8431_v35 }
 0x569   : > { %v17389_v30 = vsel %vm15478_vm11, %v8492_v11, 0 }
 0x56e   : > { %12641 = vmatmul.mubr.msk.bf16.gmra.mrb[168].mxu1 %vm3462_vm3, %v17343_v38  ;;  %12673 = vmatmul.mubr.msk.bf16.gmra.mrb[232].mxu0 %vm3462_vm3, %v17343_v38 }
 0x56f   : > { %9132 = vmatprep.mubr.bf16.mxu1 %v18665_v39  ;;  %9471 = vmatprep.mubr.bf16.mxu0 %v18665_v39 }
 0x574   : > { %v8882_v28 = vpop.f32.mrb[68].mxu1  ;;  %v9221_v13 = vpop.f32.mrb[132].mxu0 }
 0x575   : > { %v8884_v53 = vpop.f32.mrb[69].mxu1  ;;  %v9223_v7 = vpop.f32.mrb[133].mxu0  ;;  %v10774_v3 = vrot.slane %v9221_v13, 6 }
 0x576   : > { %12642 = vmatmul.mubr.msk.bf16.gmra.mrb[172].mxu1 %vm3462_vm3, %v17357_v18  ;;  %12674 = vmatmul.mubr.msk.bf16.gmra.mrb[236].mxu0 %vm3462_vm3, %v17357_v18  ;;  %v10522_v47 = vrot.slane %v8884_v53, 7  ;;  %v8886_v50 = vpop.f32.mrb[70].mxu1  ;;  %v9225_v37 = vpop.f32.mrb[134].mxu0 }
 0x577   : > { %9142 = vmatprep.mubr.bf16.mxu1 %v18665_v39  ;;  %9481 = vmatprep.mubr.bf16.mxu0 %v18665_v39  ;;  %v10775_v45 = vrot.slane %v9225_v37, 6  ;;  %v8888_v24 = vpop.f32.mrb[71].mxu1  ;;  %v9227_v43 = vpop.f32.mrb[135].mxu0 }
 0x578   : > { %v10662_v33 = vadd.f32 %v10522_v47, %v8882_v28  ;;  %v10523_v55 = vrot.slane %v8888_v24, 7 }
 0x579   : > { %v10776_v2 = vsel %vm1370_vm0, %v10774_v3, %v10775_v45 }
 0x57a   : > { %v10524_v31 = vsel %vm8461_vm6, %v10522_v47, %v10523_v55  ;;  %v10914_v29 = vadd.f32 %v10774_v3, %v10662_v33 }
 0x57b   : > { %v10663_v22 = vadd.f32 %v10524_v31, %v8886_v50 }
 0x57c   : > { %v17381_v21 = vadd.f32 %v10914_v29, %v9214_v27 }
 0x57d   : > { %v10915_v17 = vadd.f32 %v10776_v2, %v10663_v22 }
 0x57e   : > { %12643 = vmatmul.mubr.msk.bf16.gmra.mrb[176].mxu1 %vm3462_vm3, %v17372_v41  ;;  %12675 = vmatmul.mubr.msk.bf16.gmra.mrb[240].mxu0 %vm3462_vm3, %v17372_v41  ;;  %v8892_v56 = vpop.f32.mrb[72].mxu1  ;;  %v9231_v57 = vpop.f32.mrb[136].mxu0 }
 0x57f   : > { %9152 = vmatprep.mubr.bf16.mxu1 %v18665_v39  ;;  %9491 = vmatprep.mubr.bf16.mxu0 %v18665_v39  ;;  %v8894_v12 = vpop.f32.mrb[73].mxu1  ;;  %v9233_v46 = vpop.f32.mrb[137].mxu0  ;;  %v17385_v13 = vadd.f32 %v10915_v17, %v9217_v9  ;;  %v10777_v53 = vrot.slane %v9231_v57, 6 }
 0x580   : > { %v10525_v63 = vrot.slane %v8894_v12, 7  ;;  %v8896_v1 = vpop.f32.mrb[74].mxu1  ;;  %v9235_v28 = vpop.f32.mrb[138].mxu0 }
 0x581   : > { %v10778_v48 = vrot.slane %v9235_v28, 6  ;;  %v8898_v47 = vpop.f32.mrb[75].mxu1  ;;  %v9237_v50 = vpop.f32.mrb[139].mxu0 }
 0x582   : > { %v10664_v37 = vadd.f32 %v10525_v63, %v8892_v56  ;;  %v10526_v27 = vrot.slane %v8898_v47, 7 }
 0x583   : > { %v10779_v3 = vsel %vm1370_vm0, %v10777_v53, %v10778_v48 }
 0x584   : > { %v10527_v0 = vsel %vm8461_vm6, %v10525_v63, %v10526_v27  ;;  %v10916_v9 = vadd.f32 %v10777_v53, %v10664_v37 }
 0x585   : > { %v10665_v45 = vadd.f32 %v10527_v0, %v8896_v1 }
 0x586   : > { %12644 = vmatmul.mubr.msk.bf16.gmra.mrb[180].mxu1 %vm3462_vm3, %v17389_v30  ;;  %12676 = vmatmul.mubr.msk.bf16.gmra.mrb[244].mxu0 %vm3462_vm3, %v17389_v30  ;;  %v8902_v24 = vpop.f32.mrb[76].mxu1  ;;  %v9241_v15 = vpop.f32.mrb[140].mxu0  ;;  %v17399_v8 = vadd.f32 %v10916_v9, %v9223_v7 }
 0x587   : > { %9162 = vmatprep.mubr.bf16.mxu1 %v18665_v39  ;;  %9501 = vmatprep.mubr.bf16.mxu0 %v18665_v39  ;;  %v8904_v33 = vpop.f32.mrb[77].mxu1  ;;  %v9243_v55 = vpop.f32.mrb[141].mxu0  ;;  %v10917_v2 = vadd.f32 %v10779_v3, %v10665_v45  ;;  %v10780_v22 = vrot.slane %v9241_v15, 6 }
 0x588   : > { %v10528_v31 = vrot.slane %v8904_v33, 7  ;;  %v8906_v35 = vpop.f32.mrb[78].mxu1  ;;  %v9245_v29 = vpop.f32.mrb[142].mxu0 }
 0x589   : > { %v10781_v56 = vrot.slane %v9245_v29, 6  ;;  %v8908_v57 = vpop.f32.mrb[79].mxu1  ;;  %v9247_v17 = vpop.f32.mrb[143].mxu0  ;;  %v17401_v12 = vadd.f32 %v10917_v2, %v9227_v43 }
 0x58a   : > { %v10666_v11 = vadd.f32 %v10528_v31, %v8902_v24  ;;  %v10529_v63 = vrot.slane %v8908_v57, 7 }
 0x58b   : > { %v10782_v1 = vsel %vm1370_vm0, %v10780_v22, %v10781_v56 }
 0x58c   : > { %v10530_v7 = vsel %vm8461_vm6, %v10528_v31, %v10529_v63  ;;  %v10918_v28 = vadd.f32 %v10780_v22, %v10666_v11  ;;  %v13482_v31 = vld [vmem:[%s18302_s10 + $0x68] ss:$36 sps:$4 sm:$0xff]  }
 0x58d   : > { %v10667_v53 = vadd.f32 %v10530_v7, %v8906_v35 }
 0x58e   : > { %12645 = vmatmul.mubr.msk.bf16.gmra.mrb[184].mxu1 %vm3462_vm3, %v18748_v23  ;;  %12677 = vmatmul.mubr.msk.bf16.gmra.mrb[248].mxu0 %vm3462_vm3, %v18748_v23  ;;  %v17411_v47 = vadd.f32 %v10918_v28, %v9233_v46 }
 0x58f   : > { %9542 = vmatprep.mubr.bf16.mxu1 %v18665_v39  ;;  %9879 = vmatprep.mubr.bf16.mxu0 %v18665_v39  ;;  %v10919_v3 = vadd.f32 %v10782_v1, %v10667_v53  ;;  %v13483_v53 = vld [vmem:[%s18302_s10 + $0xb0] ss:$36 sps:$4 sm:$0xff]  }
 0x590   : > { %v8912_v43 = vpop.f32.mrb[80].mxu1  ;;  %v9251_v48 = vpop.f32.mrb[144].mxu0 }
 0x591   : > { %v8914_v37 = vpop.f32.mrb[81].mxu1  ;;  %v9253_v27 = vpop.f32.mrb[145].mxu0  ;;  %v10783_v24 = vrot.slane %v9251_v48, 6  ;;  %v17416_v29 = vadd.f32 %v10919_v3, %v9237_v50 }
 0x592   : > { %v10531_v0 = vrot.slane %v8914_v37, 7  ;;  %v8916_v9 = vpop.f32.mrb[82].mxu1  ;;  %v9255_v45 = vpop.f32.mrb[146].mxu0 }
 0x593   : > { %v10784_v15 = vrot.slane %v9255_v45, 6  ;;  %v8918_v33 = vpop.f32.mrb[83].mxu1  ;;  %v9257_v2 = vpop.f32.mrb[147].mxu0 }
 0x594   : > { %v10668_v35 = vadd.f32 %v10531_v0, %v8912_v43  ;;  %v10532_v22 = vrot.slane %v8918_v33, 7 }
 0x595   : > { %v10785_v46 = vsel %vm1370_vm0, %v10783_v24, %v10784_v15 }
 0x596   : > { %12678 = vmatmul.mubr.msk.bf16.vlgmr.msra.gmra.mrb[188].mxu1 %vm3462_vm3, %v18748_v23  ;;  %12710 = vmatmul.mubr.msk.bf16.vlgmr.msra.gmra.mrb[252].mxu0 %vm3462_vm3, %v18748_v23  ;;  %v10533_v56 = vsel %vm8461_vm6, %v10531_v0, %v10532_v22  ;;  %v10920_v57 = vadd.f32 %v10783_v24, %v10668_v35 }
 0x597   : > { %12864 = vmatpush3.bf16.msra.mxu1 %v17195_v40  ;;  %9548 = vmatprep.mubr.bf16.mxu1 %v18665_v39  ;;  %v10669_v11 = vadd.f32 %v10533_v56, %v8916_v9 }
 0x598   : > { %9889 = vmatprep.mubr.bf16.mxu0 %v18665_v39  ;;  %12865 = vmatprep.subr.bf16.mxu1 %v13482_v31  ;;  %v17427_v1 = vadd.f32 %v10920_v57, %v9243_v55 }
 0x599   : > { %v8922_v50 = vpop.f32.mrb[84].mxu1  ;;  %v9261_v63 = vpop.f32.mrb[148].mxu0  ;;  %v10921_v43 = vadd.f32 %v10785_v46, %v10669_v11 }
 0x59a   : > { %v8924_v7 = vpop.f32.mrb[85].mxu1  ;;  %v9263_v28 = vpop.f32.mrb[149].mxu0  ;;  %v10786_v3 = vrot.slane %v9261_v63, 6 }
 0x59b   : > { %v10534_v48 = vrot.slane %v8924_v7, 7  ;;  %v8926_v40 = vpop.f32.mrb[86].mxu1  ;;  %v9265_v37 = vpop.f32.mrb[150].mxu0  ;;  %12866 = vmatpush3.bf16.msra.mxu1 %v13482_v31  ;;  %v17432_v24 = vadd.f32 %v10921_v43, %v9247_v17 }
 0x59c   : > { %v10787_v0 = vrot.slane %v9265_v37, 6  ;;  %v8928_v9 = vpop.f32.mrb[87].mxu1  ;;  %v9267_v45 = vpop.f32.mrb[151].mxu0  ;;  %12867 = vmatprep.subr.bf16.mxu1 %v13483_v53 }
 0x59d   : > { %v10670_v55 = vadd.f32 %v10534_v48, %v8922_v50  ;;  %v10535_v15 = vrot.slane %v8928_v9, 7 }
 0x59e   : > { %v10788_v33 = vsel %vm1370_vm0, %v10786_v3, %v10787_v0  ;;  %12679 = vmatmul.mubr.msk.bf16.gmra.mrb[192].mxu1 %vm3462_vm3, %v16696_v59  ;;  %12711 = vmatmul.mubr.msk.bf16.gmra.mrb[0].mxu0 %vm3462_vm3, %v16696_v59 }
 0x59f   : > { %v10536_v35 = vsel %vm8461_vm6, %v10534_v48, %v10535_v15  ;;  %9558 = vmatprep.mubr.bf16.mxu1 %v18665_v39  ;;  %9899 = vmatprep.mubr.bf16.mxu0 %v18665_v39  ;;  %v10922_v31 = vadd.f32 %v10786_v3, %v10670_v55 }
 0x5a0   : > { %v10671_v22 = vadd.f32 %v10536_v35, %v8926_v40  ;;  %12868 = vmatpush3.bf16.msra.mxu1 %v13483_v53 }
 0x5a1   : > { %v8932_v17 = vpop.f32.mrb[88].mxu1  ;;  %v9271_v46 = vpop.f32.mrb[152].mxu0  ;;  %v17442_v56 = vadd.f32 %v10922_v31, %v9253_v27 }
 0x5a2   : > { %v8934_v57 = vpop.f32.mrb[89].mxu1  ;;  %v9273_v11 = vpop.f32.mrb[153].mxu0  ;;  %v10923_v50 = vadd.f32 %v10788_v33, %v10671_v22  ;;  %v10789_v37 = vrot.slane %v9271_v46, 6 }
 0x5a3   : > { %v10537_v63 = vrot.slane %v8934_v57, 7  ;;  %v8936_v7 = vpop.f32.mrb[90].mxu1  ;;  %v9275_v43 = vpop.f32.mrb[154].mxu0 }
 0x5a4   : > { %v10790_v0 = vrot.slane %v9275_v43, 6  ;;  %v8938_v48 = vpop.f32.mrb[91].mxu1  ;;  %v9277_v9 = vpop.f32.mrb[155].mxu0  ;;  %v17444_v15 = vadd.f32 %v10923_v50, %v9257_v2 }
 0x5a5   : > { %v10672_v59 = vadd.f32 %v10537_v63, %v8932_v17  ;;  %v10538_v3 = vrot.slane %v8938_v48, 7 }
 0x5a6   : > { %18752 = vst [vmem:[#allocation12_spill] sm:$0xff] %v17444_v15  ;;  %v10791_v53 = vsel %vm1370_vm0, %v10789_v37, %v10790_v0  ;;  %12680 = vmatmul.mubr.msk.bf16.gmra.mrb[196].mxu1 %vm3462_vm3, %v16787_v54  ;;  %12712 = vmatmul.mubr.msk.bf16.gmra.mrb[4].mxu0 %vm3462_vm3, %v16787_v54 }
 0x5a7   : > { %v10539_v27 = vsel %vm8461_vm6, %v10537_v63, %v10538_v3  ;;  %9568 = vmatprep.mubr.bf16.mxu1 %v18665_v39  ;;  %9909 = vmatprep.mubr.bf16.mxu0 %v18665_v39  ;;  %v10924_v40 = vadd.f32 %v10789_v37, %v10672_v59 }
 0x5a8   : > { %v10673_v55 = vadd.f32 %v10539_v27, %v8936_v7 }
 0x5a9   : > { %v8942_v2 = vpop.f32.mrb[92].mxu1  ;;  %v9281_v33 = vpop.f32.mrb[156].mxu0  ;;  %v17454_v35 = vadd.f32 %v10924_v40, %v9263_v28 }
 0x5aa   : > { %v8944_v31 = vpop.f32.mrb[93].mxu1  ;;  %v9283_v22 = vpop.f32.mrb[157].mxu0  ;;  %v10925_v17 = vadd.f32 %v10791_v53, %v10673_v55  ;;  %v10792_v43 = vrot.slane %v9281_v33, 6 }
 0x5ab   : > { %v10540_v46 = vrot.slane %v8944_v31, 7  ;;  %v8946_v57 = vpop.f32.mrb[94].mxu1  ;;  %v9285_v50 = vpop.f32.mrb[158].mxu0 }
 0x5ac   : > { %v10793_v0 = vrot.slane %v9285_v50, 6  ;;  %v8948_v48 = vpop.f32.mrb[95].mxu1  ;;  %v9287_v63 = vpop.f32.mrb[159].mxu0  ;;  %v17456_v3 = vadd.f32 %v10925_v17, %v9267_v45 }
 0x5ad   : > { %v10674_v54 = vadd.f32 %v10540_v46, %v8942_v2  ;;  %v10541_v15 = vrot.slane %v8948_v48, 7 }
 0x5ae   : > { %18753 = vst [vmem:[#allocation17_spill] sm:$0xff] %v17456_v3  ;;  %v10794_v59 = vsel %vm1370_vm0, %v10792_v43, %v10793_v0  ;;  %12681 = vmatmul.mubr.msk.bf16.gmra.mrb[200].mxu1 %vm3462_vm3, %v16845_v4  ;;  %12713 = vmatmul.mubr.msk.bf16.gmra.mrb[8].mxu0 %vm3462_vm3, %v16845_v4 }
 0x5af   : > { %v10542_v28 = vsel %vm8461_vm6, %v10540_v46, %v10541_v15  ;;  %9578 = vmatprep.mubr.bf16.mxu1 %v18665_v39  ;;  %9919 = vmatprep.mubr.bf16.mxu0 %v18665_v39  ;;  %v10926_v7 = vadd.f32 %v10792_v43, %v10674_v54 }
 0x5b0   : > { %v10675_v37 = vadd.f32 %v10542_v28, %v8946_v57 }
 0x5b1   : > { %v8952_v45 = vpop.f32.mrb[96].mxu1  ;;  %v9291_v53 = vpop.f32.mrb[160].mxu0  ;;  %v17466_v27 = vadd.f32 %v10926_v7, %v9273_v11 }
 0x5b2   : > { %v8954_v40 = vpop.f32.mrb[97].mxu1  ;;  %v9293_v55 = vpop.f32.mrb[161].mxu0  ;;  %v10927_v2 = vadd.f32 %v10794_v59, %v10675_v37  ;;  %v10795_v50 = vrot.slane %v9291_v53, 6 }
 0x5b3   : > { %18754 = vst [vmem:[#allocation11_spill] sm:$0xff] %v17466_v27  ;;  %v10543_v33 = vrot.slane %v8954_v40, 7  ;;  %v8956_v31 = vpop.f32.mrb[98].mxu1  ;;  %v9295_v17 = vpop.f32.mrb[162].mxu0 }
 0x5b4   : > { %v10796_v0 = vrot.slane %v9295_v17, 6  ;;  %v8958_v48 = vpop.f32.mrb[99].mxu1  ;;  %v9297_v15 = vpop.f32.mrb[163].mxu0  ;;  %v17468_v46 = vadd.f32 %v10927_v2, %v9277_v9 }
 0x5b5   : > { %v10676_v3 = vadd.f32 %v10543_v33, %v8952_v45  ;;  %v10544_v4 = vrot.slane %v8958_v48, 7 }
 0x5b6   : > { %18755 = vst [vmem:[#allocation13_spill] sm:$0xff] %v17468_v46  ;;  %v10797_v54 = vsel %vm1370_vm0, %v10795_v50, %v10796_v0  ;;  %12682 = vmatmul.mubr.msk.bf16.gmra.mrb[204].mxu1 %vm3462_vm3, %v16893_v5  ;;  %12714 = vmatmul.mubr.msk.bf16.gmra.mrb[12].mxu0 %vm3462_vm3, %v16893_v5 }
 0x5b7   : > { %v10545_v11 = vsel %vm8461_vm6, %v10543_v33, %v10544_v4  ;;  %9588 = vmatprep.mubr.bf16.mxu1 %v18665_v39  ;;  %9929 = vmatprep.mubr.bf16.mxu0 %v18665_v39  ;;  %v10928_v57 = vadd.f32 %v10795_v50, %v10676_v3 }
 0x5b8   : > { %v10677_v43 = vadd.f32 %v10545_v11, %v8956_v31 }
 0x5b9   : > { %v8962_v9 = vpop.f32.mrb[100].mxu1  ;;  %v9301_v59 = vpop.f32.mrb[164].mxu0  ;;  %v17478_v28 = vadd.f32 %v10928_v57, %v9283_v22 }
 0x5ba   : > { %v8964_v7 = vpop.f32.mrb[101].mxu1  ;;  %v9303_v37 = vpop.f32.mrb[165].mxu0  ;;  %v10929_v45 = vadd.f32 %v10797_v54, %v10677_v43  ;;  %v10798_v17 = vrot.slane %v9301_v59, 6 }
 0x5bb   : > { %18756 = vst [vmem:[#allocation36_spill] sm:$0xff] %v17478_v28  ;;  %v10546_v53 = vrot.slane %v8964_v7, 7  ;;  %v8966_v40 = vpop.f32.mrb[102].mxu1  ;;  %v9305_v2 = vpop.f32.mrb[166].mxu0 }
 0x5bc   : > { %v10799_v0 = vrot.slane %v9305_v2, 6  ;;  %v8968_v48 = vpop.f32.mrb[103].mxu1  ;;  %v9307_v4 = vpop.f32.mrb[167].mxu0  ;;  %v17480_v33 = vadd.f32 %v10929_v45, %v9287_v63 }
 0x5bd   : > { %v10678_v46 = vadd.f32 %v10546_v53, %v8962_v9  ;;  %v10547_v27 = vrot.slane %v8968_v48, 7 }
 0x5be   : > { %18757 = vst [vmem:[#allocation38_spill] sm:$0xff] %v17480_v33  ;;  %v10800_v3 = vsel %vm1370_vm0, %v10798_v17, %v10799_v0  ;;  %12683 = vmatmul.mubr.msk.bf16.gmra.mrb[208].mxu1 %vm3462_vm3, %v16952_v25  ;;  %12715 = vmatmul.mubr.msk.bf16.gmra.mrb[16].mxu0 %vm3462_vm3, %v16952_v25 }
 0x5bf   : > { %v10548_v22 = vsel %vm8461_vm6, %v10546_v53, %v10547_v27  ;;  %9598 = vmatprep.mubr.bf16.mxu1 %v18665_v39  ;;  %9939 = vmatprep.mubr.bf16.mxu0 %v18665_v39  ;;  %v10930_v31 = vadd.f32 %v10798_v17, %v10678_v46 }
 0x5c0   : > { %v10679_v50 = vadd.f32 %v10548_v22, %v8966_v40 }
 0x5c1   : > { %v8972_v63 = vpop.f32.mrb[104].mxu1  ;;  %v9311_v54 = vpop.f32.mrb[168].mxu0  ;;  %v17490_v11 = vadd.f32 %v10930_v31, %v9293_v55 }
 0x5c2   : > { %v8974_v57 = vpop.f32.mrb[105].mxu1  ;;  %v9313_v43 = vpop.f32.mrb[169].mxu0  ;;  %v10931_v9 = vadd.f32 %v10800_v3, %v10679_v50  ;;  %v10801_v2 = vrot.slane %v9311_v54, 6 }
 0x5c3   : > { %18758 = vst [vmem:[#allocation20_spill] sm:$0xff] %v17490_v11  ;;  %v10549_v59 = vrot.slane %v8974_v57, 7  ;;  %v8976_v7 = vpop.f32.mrb[106].mxu1  ;;  %v9315_v45 = vpop.f32.mrb[170].mxu0 }
 0x5c4   : > { %v10802_v0 = vrot.slane %v9315_v45, 6  ;;  %v8978_v48 = vpop.f32.mrb[107].mxu1  ;;  %v9317_v27 = vpop.f32.mrb[171].mxu0  ;;  %v17492_v53 = vadd.f32 %v10931_v9, %v9297_v15 }
 0x5c5   : > { %v10680_v33 = vadd.f32 %v10549_v59, %v8972_v63  ;;  %v10550_v28 = vrot.slane %v8978_v48, 7 }
 0x5c6   : > { %18759 = vst [vmem:[#allocation44_spill] sm:$0xff] %v17492_v53  ;;  %v10803_v46 = vsel %vm1370_vm0, %v10801_v2, %v10802_v0  ;;  %12684 = vmatmul.mubr.msk.bf16.gmra.mrb[212].mxu1 %vm3462_vm3, %v17004_v49  ;;  %12716 = vmatmul.mubr.msk.bf16.gmra.mrb[20].mxu0 %vm3462_vm3, %v17004_v49 }
 0x5c7   : > { %v10551_v55 = vsel %vm8461_vm6, %v10549_v59, %v10550_v28  ;;  %9608 = vmatprep.mubr.bf16.mxu1 %v18665_v39  ;;  %9949 = vmatprep.mubr.bf16.mxu0 %v18665_v39  ;;  %v10932_v40 = vadd.f32 %v10801_v2, %v10680_v33 }
 0x5c8   : > { %v10681_v17 = vadd.f32 %v10551_v55, %v8976_v7 }
 0x5c9   : > { %v8982_v15 = vpop.f32.mrb[108].mxu1  ;;  %v9321_v3 = vpop.f32.mrb[172].mxu0  ;;  %v17502_v22 = vadd.f32 %v10932_v40, %v9303_v37 }
 0x5ca   : > { %v8984_v31 = vpop.f32.mrb[109].mxu1  ;;  %v9323_v50 = vpop.f32.mrb[173].mxu0  ;;  %v10933_v63 = vadd.f32 %v10803_v46, %v10681_v17  ;;  %v10804_v45 = vrot.slane %v9321_v3, 6 }
 0x5cb   : > { %18760 = vst [vmem:[#allocation62_spill] sm:$0xff] %v17502_v22  ;;  %v10552_v54 = vrot.slane %v8984_v31, 7  ;;  %v8986_v57 = vpop.f32.mrb[110].mxu1  ;;  %v9325_v9 = vpop.f32.mrb[174].mxu0 }
 0x5cc   : > { %v10805_v0 = vrot.slane %v9325_v9, 6  ;;  %v8988_v48 = vpop.f32.mrb[111].mxu1  ;;  %v9327_v28 = vpop.f32.mrb[175].mxu0  ;;  %v17504_v59 = vadd.f32 %v10933_v63, %v9307_v4 }
 0x5cd   : > { %v10682_v53 = vadd.f32 %v10552_v54, %v8982_v15  ;;  %v10553_v11 = vrot.slane %v8988_v48, 7 }
 0x5ce   : > { %18761 = vst [vmem:[#allocation29_spill] sm:$0xff] %v17504_v59  ;;  %v10806_v33 = vsel %vm1370_vm0, %v10804_v45, %v10805_v0  ;;  %12685 = vmatmul.mubr.msk.bf16.gmra.mrb[216].mxu1 %vm3462_vm3, %v17045_v10  ;;  %12717 = vmatmul.mubr.msk.bf16.gmra.mrb[24].mxu0 %vm3462_vm3, %v17045_v10 }
 0x5cf   : > { %v10554_v37 = vsel %vm8461_vm6, %v10552_v54, %v10553_v11  ;;  %9618 = vmatprep.mubr.bf16.mxu1 %v18665_v39  ;;  %9959 = vmatprep.mubr.bf16.mxu0 %v18665_v39  ;;  %v10934_v7 = vadd.f32 %v10804_v45, %v10682_v53 }
 0x5d0   : > { %v10683_v2 = vadd.f32 %v10554_v37, %v8986_v57 }
 0x5d1   : > { %v8992_v4 = vpop.f32.mrb[112].mxu1  ;;  %v9331_v46 = vpop.f32.mrb[176].mxu0  ;;  %v17514_v55 = vadd.f32 %v10934_v7, %v9313_v43 }
 0x5d2   : > { %v8994_v40 = vpop.f32.mrb[113].mxu1  ;;  %v9333_v17 = vpop.f32.mrb[177].mxu0  ;;  %v10935_v15 = vadd.f32 %v10806_v33, %v10683_v2  ;;  %v10807_v9 = vrot.slane %v9331_v46, 6 }
 0x5d3   : > { %18762 = vst [vmem:[#allocation56_spill] sm:$0xff] %v17514_v55  ;;  %v10555_v3 = vrot.slane %v8994_v40, 7  ;;  %v8996_v31 = vpop.f32.mrb[114].mxu1  ;;  %v9335_v63 = vpop.f32.mrb[178].mxu0 }
 0x5d4   : > { %v10808_v0 = vrot.slane %v9335_v63, 6  ;;  %v8998_v48 = vpop.f32.mrb[115].mxu1  ;;  %v9337_v11 = vpop.f32.mrb[179].mxu0  ;;  %v17516_v54 = vadd.f32 %v10935_v15, %v9317_v27 }
 0x5d5   : > { %v10684_v59 = vadd.f32 %v10555_v3, %v8992_v4  ;;  %v10556_v22 = vrot.slane %v8998_v48, 7  ;;  %v13484_v4 = vld [vmem:[%s18302_s10 + $0xf8] ss:$36 sps:$4 sm:$0xff]  }
 0x5d6   : > { %18763 = vst [vmem:[#allocation55_spill] sm:$0xff] %v17516_v54  ;;  %v10809_v53 = vsel %vm1370_vm0, %v10807_v9, %v10808_v0  ;;  %12686 = vmatmul.mubr.msk.bf16.gmra.mrb[220].mxu1 %vm3462_vm3, %v17075_v51  ;;  %12718 = vmatmul.mubr.msk.bf16.gmra.mrb[28].mxu0 %vm3462_vm3, %v17075_v51 }
 0x5d7   : > { %v10557_v43 = vsel %vm8461_vm6, %v10555_v3, %v10556_v22  ;;  %9628 = vmatprep.mubr.bf16.mxu1 %v18665_v39  ;;  %9969 = vmatprep.mubr.bf16.mxu0 %v18665_v39  ;;  %v10936_v57 = vadd.f32 %v10807_v9, %v10684_v59 }
 0x5d8   : > { %v10685_v45 = vadd.f32 %v10557_v43, %v8996_v31  ;;  %12869 = vmatprep.subr.bf16.mxu1 %v13484_v4 }
 0x5d9   : > { %v9002_v27 = vpop.f32.mrb[116].mxu1  ;;  %v9341_v33 = vpop.f32.mrb[180].mxu0  ;;  %v17526_v37 = vadd.f32 %v10936_v57, %v9323_v50  ;;  %12870 = vmatpush3.bf16.msra.mxu1 %v13484_v4 }
 0x5da   : > { %v9004_v7 = vpop.f32.mrb[117].mxu1  ;;  %v9343_v2 = vpop.f32.mrb[181].mxu0  ;;  %v10937_v46 = vadd.f32 %v10809_v53, %v10685_v45  ;;  %v10810_v3 = vrot.slane %v9341_v33, 6 }
 0x5db   : > { %18764 = vst [vmem:[#allocation5_spill] sm:$0xff] %v17526_v37  ;;  %v10558_v40 = vrot.slane %v9004_v7, 7  ;;  %v9006_v15 = vpop.f32.mrb[118].mxu1  ;;  %v9345_v22 = vpop.f32.mrb[182].mxu0 }
 0x5dc   : > { %v10811_v63 = vrot.slane %v9345_v22, 6  ;;  %v9008_v0 = vpop.f32.mrb[119].mxu1  ;;  %v9347_v48 = vpop.f32.mrb[183].mxu0  ;;  %v17531_v59 = vadd.f32 %v10937_v46, %v9327_v28 }
 0x5dd   : > { %v10686_v31 = vadd.f32 %v10558_v40, %v9002_v27  ;;  %v10559_v50 = vrot.slane %v9008_v0, 7 }
 0x5de   : > { %18765 = vst [vmem:[#allocation47_spill] sm:$0xff] %v17531_v59  ;;  %v10812_v9 = vsel %vm1370_vm0, %v10810_v3, %v10811_v63  ;;  %12687 = vmatmul.mubr.msk.bf16.gmra.mrb[224].mxu1 %vm3462_vm3, %v17089_v26  ;;  %12719 = vmatmul.mubr.msk.bf16.gmra.mrb[32].mxu0 %vm3462_vm3, %v17089_v26 }
 0x5df   : > { %v10560_v53 = vsel %vm8461_vm6, %v10558_v40, %v10559_v50  ;;  %9638 = vmatprep.mubr.bf16.mxu1 %v18665_v39  ;;  %9979 = vmatprep.mubr.bf16.mxu0 %v18665_v39  ;;  %v10938_v43 = vadd.f32 %v10810_v3, %v10686_v31 }
 0x5e0   : > { %v10687_v28 = vadd.f32 %v10560_v53, %v9006_v15 }
 0x5e1   : > { %v9012_v57 = vpop.f32.mrb[120].mxu1  ;;  %v9351_v45 = vpop.f32.mrb[184].mxu0  ;;  %v17541_v27 = vadd.f32 %v10938_v43, %v9333_v17 }
 0x5e2   : > { %v9014_v33 = vpop.f32.mrb[121].mxu1  ;;  %v9353_v7 = vpop.f32.mrb[185].mxu0  ;;  %v10939_v4 = vadd.f32 %v10812_v9, %v10687_v28  ;;  %v10813_v63 = vrot.slane %v9351_v45, 6 }
 0x5e3   : > { %v10561_v46 = vrot.slane %v9014_v33, 7  ;;  %v9016_v22 = vpop.f32.mrb[122].mxu1  ;;  %v9354_v0 = vpop.f32.mrb[186].mxu0 }
 0x5e4   : > { %v9018_v59 = vpop.f32.mrb[123].mxu1  ;;  %v10814_v37 = vrot.slane %v9354_v0, 6  ;;  %v9356_v40 = vpop.f32.mrb[187].mxu0  ;;  %v17543_v50 = vadd.f32 %v10939_v4, %v9337_v11 }
 0x5e5   : > { %v10562_v54 = vrot.slane %v9018_v59, 7  ;;  %v10688_v55 = vadd.f32 %v10561_v46, %v9012_v57 }
 0x5e6   : > { %v10815_v15 = vsel %vm1370_vm0, %v10813_v63, %v10814_v37  ;;  %12688 = vmatmul.mubr.msk.bf16.gmra.mrb[228].mxu1 %vm3462_vm3, %v17103_v16  ;;  %12720 = vmatmul.mubr.msk.bf16.gmra.mrb[36].mxu0 %vm3462_vm3, %v17103_v16 }
 0x5e7   : > { %v10563_v17 = vsel %vm8461_vm6, %v10561_v46, %v10562_v54  ;;  %v10940_v3 = vadd.f32 %v10813_v63, %v10688_v55  ;;  %9648 = vmatprep.mubr.bf16.mxu1 %v18665_v39  ;;  %9989 = vmatprep.mubr.bf16.mxu0 %v18665_v39 }
 0x5e8   : > { %v10689_v31 = vadd.f32 %v10563_v17, %v9016_v22 }
 0x5e9   : > { %v9022_v11 = vpop.f32.mrb[124].mxu1  ;;  %v9359_v9 = vpop.f32.mrb[188].mxu0  ;;  %v17553_v59 = vadd.f32 %v10940_v3, %v9343_v2 }
 0x5ea   : > { %v10941_v53 = vadd.f32 %v10815_v15, %v10689_v31  ;;  %v9023_v37 = vpop.f32.mrb[125].mxu1  ;;  %v9360_v43 = vpop.f32.mrb[189].mxu0 }
 0x5eb   : > { %18766 = vst [vmem:[#allocation70_spill] sm:$0xff] %v17553_v59  ;;  %v9024_v28 = vpop.f32.mrb[126].mxu1  ;;  %v9361_v57 = vpop.f32.mrb[190].mxu0 }
 0x5ec   : > { %v9025_v45 = vpop.f32.mrb[127].mxu1  ;;  %v9362_v33 = vpop.f32.mrb[191].mxu0  ;;  %v17555_v7 = vadd.f32 %v10941_v53, %v9347_v48 }
 0x5ee   : > { %18767 = vst [vmem:[#allocation66_spill] sm:$0xff] %v17555_v7  ;;  %12689 = vmatmul.mubr.msk.bf16.gmra.mrb[232].mxu1 %vm3462_vm3, %v17117_v60  ;;  %12721 = vmatmul.mubr.msk.bf16.gmra.mrb[40].mxu0 %vm3462_vm3, %v17117_v60 }
 0x5ef   : > { %9658 = vmatprep.mubr.bf16.mxu1 %v18665_v39  ;;  %9999 = vmatprep.mubr.bf16.mxu0 %v18665_v39 }
 0x5f1   : > { %v9028_v55 = vpop.f32.mrb[128].mxu1  ;;  %v9365_v54 = vpop.f32.mrb[192].mxu0 }
 0x5f2   : > { %v9029_v2 = vpop.f32.mrb[129].mxu1  ;;  %v9366_v4 = vpop.f32.mrb[193].mxu0 }
 0x5f3   : > { %v9030_v46 = vpop.f32.mrb[130].mxu1  ;;  %v9368_v22 = vpop.f32.mrb[194].mxu0 }
 0x5f4   : > { %v9031_v63 = vpop.f32.mrb[131].mxu1  ;;  %v9369_v0 = vpop.f32.mrb[195].mxu0 }
 0x5f6   : > { %12690 = vmatmul.mubr.msk.bf16.gmra.mrb[236].mxu1 %vm3462_vm3, %v17131_v44  ;;  %12722 = vmatmul.mubr.msk.bf16.gmra.mrb[44].mxu0 %vm3462_vm3, %v17131_v44 }
 0x5f7   : > { %9668 = vmatprep.mubr.bf16.mxu1 %v18665_v39  ;;  %10009 = vmatprep.mubr.bf16.mxu0 %v18665_v39 }
 0x5f9   : > { %v9034_v48 = vpop.f32.mrb[132].mxu1  ;;  %v9373_v40 = vpop.f32.mrb[196].mxu0 }
 0x5fa   : > { %v9036_v15 = vpop.f32.mrb[133].mxu1  ;;  %v9375_v17 = vpop.f32.mrb[197].mxu0  ;;  %v10816_v9 = vrot.slane %v9373_v40, 6 }
 0x5fb   : > { %v10564_v3 = vrot.slane %v9036_v15, 7  ;;  %v9038_v31 = vpop.f32.mrb[134].mxu1  ;;  %v9377_v11 = vpop.f32.mrb[198].mxu0 }
 0x5fc   : > { %v10817_v53 = vrot.slane %v9377_v11, 6  ;;  %v9040_v37 = vpop.f32.mrb[135].mxu1  ;;  %v9379_v43 = vpop.f32.mrb[199].mxu0 }
 0x5fd   : > { %v10690_v28 = vadd.f32 %v10564_v3, %v9034_v48  ;;  %v10565_v57 = vrot.slane %v9040_v37, 7 }
 0x5fe   : > { %v10818_v45 = vsel %vm1370_vm0, %v10816_v9, %v10817_v53  ;;  %12691 = vmatmul.mubr.msk.bf16.gmra.mrb[240].mxu1 %vm3462_vm3, %v17145_v14  ;;  %12723 = vmatmul.mubr.msk.bf16.gmra.mrb[48].mxu0 %vm3462_vm3, %v17145_v14 }
 0x5ff   : > { %v10942_v33 = vadd.f32 %v10816_v9, %v10690_v28  ;;  %v10566_v55 = vsel %vm8461_vm6, %v10564_v3, %v10565_v57  ;;  %9678 = vmatprep.mubr.bf16.mxu1 %v18665_v39  ;;  %10019 = vmatprep.mubr.bf16.mxu0 %v18665_v39 }
 0x600   : > { %v10691_v54 = vadd.f32 %v10566_v55, %v9038_v31 }
 0x601   : > { %v9044_v2 = vpop.f32.mrb[136].mxu1  ;;  %v9383_v46 = vpop.f32.mrb[200].mxu0  ;;  %v17577_v22 = vadd.f32 %v10942_v33, %v9366_v4 }
 0x602   : > { %v10943_v63 = vadd.f32 %v10818_v45, %v10691_v54  ;;  %v9046_v48 = vpop.f32.mrb[137].mxu1  ;;  %v9385_v40 = vpop.f32.mrb[201].mxu0  ;;  %v10819_v37 = vrot.slane %v9383_v46, 6 }
 0x603   : > { %18768 = vst [vmem:[#allocation18_spill] sm:$0xff] %v17577_v22  ;;  %v10567_v15 = vrot.slane %v9046_v48, 7  ;;  %v9048_v11 = vpop.f32.mrb[138].mxu1  ;;  %v9387_v53 = vpop.f32.mrb[202].mxu0 }
 0x604   : > { %v10820_v7 = vrot.slane %v9387_v53, 6  ;;  %v9050_v9 = vpop.f32.mrb[139].mxu1  ;;  %v9389_v28 = vpop.f32.mrb[203].mxu0  ;;  %v17579_v3 = vadd.f32 %v10943_v63, %v9369_v0 }
 0x605   : > { %v10692_v57 = vadd.f32 %v10567_v15, %v9044_v2  ;;  %v10568_v59 = vrot.slane %v9050_v9, 7 }
 0x606   : > { %18769 = vst [vmem:[#allocation21_spill] sm:$0xff] %v17579_v3  ;;  %v10821_v31 = vsel %vm1370_vm0, %v10819_v37, %v10820_v7  ;;  %12692 = vmatmul.mubr.msk.bf16.gmra.mrb[244].mxu1 %vm3462_vm3, %v17157_v36  ;;  %12724 = vmatmul.mubr.msk.bf16.gmra.mrb[52].mxu0 %vm3462_vm3, %v17157_v36 }
 0x607   : > { %v10944_v4 = vadd.f32 %v10819_v37, %v10692_v57  ;;  %v10569_v45 = vsel %vm8461_vm6, %v10567_v15, %v10568_v59  ;;  %9688 = vmatprep.mubr.bf16.mxu1 %v18665_v39  ;;  %10025 = vmatprep.mubr.bf16.mxu0 %v18665_v39 }
 0x608   : > { %v10693_v33 = vadd.f32 %v10569_v45, %v9048_v11 }
 0x609   : > { %v9054_v0 = vpop.f32.mrb[140].mxu1  ;;  %v9393_v55 = vpop.f32.mrb[204].mxu0  ;;  %v17589_v54 = vadd.f32 %v10944_v4, %v9375_v17 }
 0x60a   : > { %v10945_v2 = vadd.f32 %v10821_v31, %v10693_v33  ;;  %v9056_v7 = vpop.f32.mrb[141].mxu1  ;;  %v9395_v46 = vpop.f32.mrb[205].mxu0  ;;  %v10822_v9 = vrot.slane %v9393_v55, 6 }
 0x60b   : > { %18770 = vst [vmem:[#allocation45_spill] sm:$0xff] %v17589_v54  ;;  %v10570_v63 = vrot.slane %v9056_v7, 7  ;;  %v9058_v48 = vpop.f32.mrb[142].mxu1  ;;  %v9397_v53 = vpop.f32.mrb[206].mxu0 }
 0x60c   : > { %v10823_v3 = vrot.slane %v9397_v53, 6  ;;  %v9060_v37 = vpop.f32.mrb[143].mxu1  ;;  %v9399_v57 = vpop.f32.mrb[207].mxu0  ;;  %v17591_v59 = vadd.f32 %v10945_v2, %v9379_v43 }
 0x60d   : > { %v10694_v15 = vadd.f32 %v10570_v63, %v9054_v0  ;;  %v10571_v22 = vrot.slane %v9060_v37, 7 }
 0x60e   : > { %18771 = vst [vmem:[#allocation43_spill] sm:$0xff] %v17591_v59  ;;  %v10824_v11 = vsel %vm1370_vm0, %v10822_v9, %v10823_v3  ;;  %12693 = vmatmul.mubr.msk.bf16.gmra.mrb[248].mxu1 %vm3462_vm3, %v18748_v23  ;;  %12725 = vmatmul.mubr.msk.bf16.gmra.mrb[56].mxu0 %vm3462_vm3, %v18748_v23 }
 0x60f   : > { %v10946_v17 = vadd.f32 %v10822_v9, %v10694_v15  ;;  %v10572_v31 = vsel %vm8461_vm6, %v10570_v63, %v10571_v22  ;;  %9694 = vmatprep.mubr.bf16.mxu1 %v18665_v39  ;;  %10031 = vmatprep.mubr.bf16.mxu0 %v18665_v39 }
 0x610   : > { %v10695_v4 = vadd.f32 %v10572_v31, %v9058_v48 }
 0x611   : > { %v9064_v43 = vpop.f32.mrb[144].mxu1  ;;  %v9403_v45 = vpop.f32.mrb[208].mxu0  ;;  %v17601_v33 = vadd.f32 %v10946_v17, %v9385_v40 }
 0x612   : > { %v10947_v0 = vadd.f32 %v10824_v11, %v10695_v4  ;;  %v9066_v3 = vpop.f32.mrb[145].mxu1  ;;  %v9405_v55 = vpop.f32.mrb[209].mxu0  ;;  %v10825_v37 = vrot.slane %v9403_v45, 6 }
 0x613   : > { %18772 = vst [vmem:[#allocation23_spill] sm:$0xff] %v17601_v33  ;;  %v10573_v2 = vrot.slane %v9066_v3, 7  ;;  %v9068_v7 = vpop.f32.mrb[146].mxu1  ;;  %v9407_v53 = vpop.f32.mrb[210].mxu0 }
 0x614   : > { %v10826_v59 = vrot.slane %v9407_v53, 6  ;;  %v9070_v9 = vpop.f32.mrb[147].mxu1  ;;  %v9409_v15 = vpop.f32.mrb[211].mxu0  ;;  %v17603_v22 = vadd.f32 %v10947_v0, %v9389_v28 }
 0x615   : > { %v10696_v63 = vadd.f32 %v10573_v2, %v9064_v43  ;;  %v10574_v54 = vrot.slane %v9070_v9, 7 }
 0x616   : > { %18773 = vst [vmem:[#allocation57_spill] sm:$0xff] %v17603_v22  ;;  %v10827_v48 = vsel %vm1370_vm0, %v10825_v37, %v10826_v59  ;;  %12694 = vmatmul.mubr.msk.bf16.gmra.mrb[252].mxu1 %vm3462_vm3, %v18748_v23  ;;  %12726 = vmatmul.mubr.msk.bf16.gmra.mrb[60].mxu0 %vm3462_vm3, %v18748_v23 }
 0x617   : > { %v10948_v40 = vadd.f32 %v10825_v37, %v10696_v63  ;;  %v10575_v11 = vsel %vm8461_vm6, %v10573_v2, %v10574_v54  ;;  %9700 = vmatprep.mubr.bf16.mxu1 %v18665_v39  ;;  %10041 = vmatprep.mubr.bf16.mxu0 %v18665_v39 }
 0x618   : > { %v10697_v17 = vadd.f32 %v10575_v11, %v9068_v7 }
 0x619   : > { %v9074_v28 = vpop.f32.mrb[148].mxu1  ;;  %v9413_v31 = vpop.f32.mrb[212].mxu0  ;;  %v17613_v4 = vadd.f32 %v10948_v40, %v9395_v46 }
 0x61a   : > { %v10949_v43 = vadd.f32 %v10827_v48, %v10697_v17  ;;  %v9076_v59 = vpop.f32.mrb[149].mxu1  ;;  %v9415_v45 = vpop.f32.mrb[213].mxu0  ;;  %v10828_v9 = vrot.slane %v9413_v31, 6 }
 0x61b   : > { %18774 = vst [vmem:[#allocation34_spill] sm:$0xff] %v17613_v4  ;;  %v10576_v0 = vrot.slane %v9076_v59, 7  ;;  %v9078_v3 = vpop.f32.mrb[150].mxu1  ;;  %v9417_v53 = vpop.f32.mrb[214].mxu0 }
 0x61c   : > { %v10829_v22 = vrot.slane %v9417_v53, 6  ;;  %v9080_v37 = vpop.f32.mrb[151].mxu1  ;;  %v9419_v63 = vpop.f32.mrb[215].mxu0  ;;  %v17615_v54 = vadd.f32 %v10949_v43, %v9399_v57 }
 0x61d   : > { %v10698_v2 = vadd.f32 %v10576_v0, %v9074_v28  ;;  %v10577_v33 = vrot.slane %v9080_v37, 7 }
 0x61e   : > { %18775 = vst [vmem:[#allocation3_spill] sm:$0xff] %v17615_v54  ;;  %v10830_v7 = vsel %vm1370_vm0, %v10828_v9, %v10829_v22  ;;  %12695 = vmatmul.mubr.msk.bf16.gmra.mrb[0].mxu1 %vm3462_vm3, %v17203_v58  ;;  %12727 = vmatmul.mubr.msk.bf16.gmra.mrb[64].mxu0 %vm3462_vm3, %v17203_v58 }
 0x61f   : > { %v10950_v46 = vadd.f32 %v10828_v9, %v10698_v2  ;;  %v10578_v48 = vsel %vm8461_vm6, %v10576_v0, %v10577_v33  ;;  %9710 = vmatprep.mubr.bf16.mxu1 %v18665_v39  ;;  %10051 = vmatprep.mubr.bf16.mxu0 %v18665_v39 }
 0x620   : > { %v10699_v40 = vadd.f32 %v10578_v48, %v9078_v3 }
 0x621   : > { %v9084_v57 = vpop.f32.mrb[152].mxu1  ;;  %v9423_v11 = vpop.f32.mrb[216].mxu0  ;;  %v17625_v17 = vadd.f32 %v10950_v46, %v9405_v55 }
 0x622   : > { %v10951_v28 = vadd.f32 %v10830_v7, %v10699_v40  ;;  %v9086_v22 = vpop.f32.mrb[153].mxu1  ;;  %v9425_v31 = vpop.f32.mrb[217].mxu0  ;;  %v10831_v37 = vrot.slane %v9423_v11, 6 }
 0x623   : > { %18776 = vst [vmem:[#allocation30_spill] sm:$0xff] %v17625_v17  ;;  %v10579_v43 = vrot.slane %v9086_v22, 7  ;;  %v9088_v59 = vpop.f32.mrb[154].mxu1  ;;  %v9427_v53 = vpop.f32.mrb[218].mxu0 }
 0x624   : > { %v10832_v54 = vrot.slane %v9427_v53, 6  ;;  %v9090_v9 = vpop.f32.mrb[155].mxu1  ;;  %v9429_v2 = vpop.f32.mrb[219].mxu0  ;;  %v17627_v33 = vadd.f32 %v10951_v28, %v9409_v15 }
 0x625   : > { %v10700_v0 = vadd.f32 %v10579_v43, %v9084_v57  ;;  %v10580_v4 = vrot.slane %v9090_v9, 7 }
 0x626   : > { %18777 = vst [vmem:[#allocation15_spill] sm:$0xff] %v17627_v33  ;;  %v10833_v3 = vsel %vm1370_vm0, %v10831_v37, %v10832_v54  ;;  %12696 = vmatmul.mubr.msk.bf16.gmra.mrb[4].mxu1 %vm3462_vm3, %v17217_v52  ;;  %12728 = vmatmul.mubr.msk.bf16.gmra.mrb[68].mxu0 %vm3462_vm3, %v17217_v52 }
 0x627   : > { %v10952_v55 = vadd.f32 %v10831_v37, %v10700_v0  ;;  %v10581_v7 = vsel %vm8461_vm6, %v10579_v43, %v10580_v4  ;;  %9720 = vmatprep.mubr.bf16.mxu1 %v18665_v39  ;;  %10061 = vmatprep.mubr.bf16.mxu0 %v18665_v39 }
 0x628   : > { %v10701_v46 = vadd.f32 %v10581_v7, %v9088_v59 }
 0x629   : > { %v9094_v15 = vpop.f32.mrb[156].mxu1  ;;  %v9433_v48 = vpop.f32.mrb[220].mxu0  ;;  %v17637_v40 = vadd.f32 %v10952_v55, %v9415_v45 }
 0x62a   : > { %v10953_v57 = vadd.f32 %v10833_v3, %v10701_v46  ;;  %v9096_v54 = vpop.f32.mrb[157].mxu1  ;;  %v9435_v11 = vpop.f32.mrb[221].mxu0  ;;  %v10834_v9 = vrot.slane %v9433_v48, 6 }
 0x62b   : > { %18778 = vst [vmem:[#allocation51_spill] sm:$0xff] %v17637_v40  ;;  %v10582_v28 = vrot.slane %v9096_v54, 7  ;;  %v9098_v22 = vpop.f32.mrb[158].mxu1  ;;  %v9437_v53 = vpop.f32.mrb[222].mxu0 }
 0x62c   : > { %v10835_v33 = vrot.slane %v9437_v53, 6  ;;  %v9100_v37 = vpop.f32.mrb[159].mxu1  ;;  %v9439_v0 = vpop.f32.mrb[223].mxu0  ;;  %v17639_v4 = vadd.f32 %v10953_v57, %v9419_v63 }
 0x62d   : > { %v10702_v43 = vadd.f32 %v10582_v28, %v9094_v15  ;;  %v10583_v17 = vrot.slane %v9100_v37, 7 }
 0x62e   : > { %18779 = vst [vmem:[#allocation53_spill] sm:$0xff] %v17639_v4  ;;  %v10836_v59 = vsel %vm1370_vm0, %v10834_v9, %v10835_v33  ;;  %12697 = vmatmul.mubr.msk.bf16.gmra.mrb[8].mxu1 %vm3462_vm3, %v17231_v19  ;;  %12729 = vmatmul.mubr.msk.bf16.gmra.mrb[72].mxu0 %vm3462_vm3, %v17231_v19 }
 0x62f   : > { %v10954_v45 = vadd.f32 %v10834_v9, %v10702_v43  ;;  %v10584_v3 = vsel %vm8461_vm6, %v10582_v28, %v10583_v17  ;;  %9730 = vmatprep.mubr.bf16.mxu1 %v18665_v39  ;;  %10071 = vmatprep.mubr.bf16.mxu0 %v18665_v39 }
 0x630   : > { %v10703_v55 = vadd.f32 %v10584_v3, %v9098_v22 }
 0x631   : > { %v9104_v63 = vpop.f32.mrb[160].mxu1  ;;  %v9443_v7 = vpop.f32.mrb[224].mxu0  ;;  %v17649_v46 = vadd.f32 %v10954_v45, %v9425_v31 }
 0x632   : > { %v10955_v15 = vadd.f32 %v10836_v59, %v10703_v55  ;;  %v9106_v33 = vpop.f32.mrb[161].mxu1  ;;  %v9445_v48 = vpop.f32.mrb[225].mxu0  ;;  %v10837_v37 = vrot.slane %v9443_v7, 6 }
 0x633   : > { %18780 = vst [vmem:[#allocation69_spill] sm:$0xff] %v17649_v46  ;;  %v10585_v57 = vrot.slane %v9106_v33, 7  ;;  %v9108_v54 = vpop.f32.mrb[162].mxu1  ;;  %v9447_v53 = vpop.f32.mrb[226].mxu0 }
 0x634   : > { %v10838_v4 = vrot.slane %v9447_v53, 6  ;;  %v9110_v9 = vpop.f32.mrb[163].mxu1  ;;  %v9449_v43 = vpop.f32.mrb[227].mxu0  ;;  %v17651_v17 = vadd.f32 %v10955_v15, %v9429_v2 }
 0x635   : > { %v10704_v28 = vadd.f32 %v10585_v57, %v9104_v63  ;;  %v10586_v40 = vrot.slane %v9110_v9, 7 }
 0x636   : > { %18781 = vst [vmem:[#allocation6_spill] sm:$0xff] %v17651_v17  ;;  %v10839_v22 = vsel %vm1370_vm0, %v10837_v37, %v10838_v4  ;;  %12698 = vmatmul.mubr.msk.bf16.gmra.mrb[12].mxu1 %vm3462_vm3, %v17245_v20  ;;  %12730 = vmatmul.mubr.msk.bf16.gmra.mrb[76].mxu0 %vm3462_vm3, %v17245_v20 }
 0x637   : > { %v10956_v31 = vadd.f32 %v10837_v37, %v10704_v28  ;;  %v10587_v59 = vsel %vm8461_vm6, %v10585_v57, %v10586_v40  ;;  %9740 = vmatprep.mubr.bf16.mxu1 %v18665_v39  ;;  %10081 = vmatprep.mubr.bf16.mxu0 %v18665_v39 }
 0x638   : > { %v10705_v45 = vadd.f32 %v10587_v59, %v9108_v54 }
 0x639   : > { %v9114_v2 = vpop.f32.mrb[164].mxu1  ;;  %v9453_v3 = vpop.f32.mrb[228].mxu0  ;;  %v17661_v55 = vadd.f32 %v10956_v31, %v9435_v11 }
 0x63a   : > { %v10957_v63 = vadd.f32 %v10839_v22, %v10705_v45  ;;  %v9116_v4 = vpop.f32.mrb[165].mxu1  ;;  %v9455_v7 = vpop.f32.mrb[229].mxu0  ;;  %v10840_v9 = vrot.slane %v9453_v3, 6 }
 0x63b   : > { %18782 = vst [vmem:[#allocation37_spill] sm:$0xff] %v17661_v55  ;;  %v10588_v15 = vrot.slane %v9116_v4, 7  ;;  %v9118_v33 = vpop.f32.mrb[166].mxu1  ;;  %v9457_v53 = vpop.f32.mrb[230].mxu0 }
 0x63c   : > { %v10841_v17 = vrot.slane %v9457_v53, 6  ;;  %v9120_v37 = vpop.f32.mrb[167].mxu1  ;;  %v9459_v28 = vpop.f32.mrb[231].mxu0  ;;  %v17663_v40 = vadd.f32 %v10957_v63, %v9439_v0 }
 0x63d   : > { %v10706_v57 = vadd.f32 %v10588_v15, %v9114_v2  ;;  %v10589_v46 = vrot.slane %v9120_v37, 7 }
 0x63e   : > { %18783 = vst [vmem:[#allocation14_spill] sm:$0xff] %v17663_v40  ;;  %v10842_v54 = vsel %vm1370_vm0, %v10840_v9, %v10841_v17  ;;  %12699 = vmatmul.mubr.msk.bf16.gmra.mrb[16].mxu1 %vm3462_vm3, %v17259_v34  ;;  %12731 = vmatmul.mubr.msk.bf16.gmra.mrb[80].mxu0 %vm3462_vm3, %v17259_v34 }
 0x63f   : > { %v10958_v11 = vadd.f32 %v10840_v9, %v10706_v57  ;;  %v10590_v22 = vsel %vm8461_vm6, %v10588_v15, %v10589_v46  ;;  %9750 = vmatprep.mubr.bf16.mxu1 %v18665_v39  ;;  %10091 = vmatprep.mubr.bf16.mxu0 %v18665_v39 }
 0x640   : > { %v10707_v31 = vadd.f32 %v10590_v22, %v9118_v33 }
 0x641   : > { %v9124_v0 = vpop.f32.mrb[168].mxu1  ;;  %v9463_v59 = vpop.f32.mrb[232].mxu0  ;;  %v17673_v45 = vadd.f32 %v10958_v11, %v9445_v48 }
 0x642   : > { %v10959_v2 = vadd.f32 %v10842_v54, %v10707_v31  ;;  %v9126_v17 = vpop.f32.mrb[169].mxu1  ;;  %v9465_v3 = vpop.f32.mrb[233].mxu0  ;;  %v10843_v37 = vrot.slane %v9463_v59, 6 }
 0x643   : > { %18784 = vst [vmem:[#allocation52_spill] sm:$0xff] %v17673_v45  ;;  %v10591_v63 = vrot.slane %v9126_v17, 7  ;;  %v9128_v4 = vpop.f32.mrb[170].mxu1  ;;  %v9467_v53 = vpop.f32.mrb[234].mxu0 }
 0x644   : > { %v10844_v40 = vrot.slane %v9467_v53, 6  ;;  %v9130_v9 = vpop.f32.mrb[171].mxu1  ;;  %v9469_v57 = vpop.f32.mrb[235].mxu0  ;;  %v17675_v46 = vadd.f32 %v10959_v2, %v9449_v43 }
 0x645   : > { %v10708_v15 = vadd.f32 %v10591_v63, %v9124_v0  ;;  %v10592_v55 = vrot.slane %v9130_v9, 7 }
 0x646   : > { %18785 = vst [vmem:[#allocation58_spill] sm:$0xff] %v17675_v46  ;;  %v10845_v33 = vsel %vm1370_vm0, %v10843_v37, %v10844_v40  ;;  %12700 = vmatmul.mubr.msk.bf16.gmra.mrb[20].mxu1 %vm3462_vm3, %v17273_v32  ;;  %12732 = vmatmul.mubr.msk.bf16.gmra.mrb[84].mxu0 %vm3462_vm3, %v17273_v32 }
 0x647   : > { %v10960_v48 = vadd.f32 %v10843_v37, %v10708_v15  ;;  %v10593_v54 = vsel %vm8461_vm6, %v10591_v63, %v10592_v55  ;;  %9760 = vmatprep.mubr.bf16.mxu1 %v18665_v39  ;;  %10101 = vmatprep.mubr.bf16.mxu0 %v18665_v39 }
 0x648   : > { %v10709_v11 = vadd.f32 %v10593_v54, %v9128_v4 }
 0x649   : > { %v9134_v43 = vpop.f32.mrb[172].mxu1  ;;  %v9473_v22 = vpop.f32.mrb[236].mxu0  ;;  %v17685_v31 = vadd.f32 %v10960_v48, %v9455_v7 }
 0x64a   : > { %v10961_v0 = vadd.f32 %v10845_v33, %v10709_v11  ;;  %v9136_v40 = vpop.f32.mrb[173].mxu1  ;;  %v9475_v59 = vpop.f32.mrb[237].mxu0  ;;  %v10846_v9 = vrot.slane %v9473_v22, 6 }
 0x64b   : > { %18786 = vst [vmem:[#allocation25_spill] sm:$0xff] %v17685_v31  ;;  %v10594_v2 = vrot.slane %v9136_v40, 7  ;;  %v9138_v17 = vpop.f32.mrb[174].mxu1  ;;  %v9477_v53 = vpop.f32.mrb[238].mxu0 }
 0x64c   : > { %v10847_v46 = vrot.slane %v9477_v53, 6  ;;  %v9140_v37 = vpop.f32.mrb[175].mxu1  ;;  %v9479_v15 = vpop.f32.mrb[239].mxu0  ;;  %v17687_v55 = vadd.f32 %v10961_v0, %v9459_v28 }
 0x64d   : > { %v10710_v63 = vadd.f32 %v10594_v2, %v9134_v43  ;;  %v10595_v45 = vrot.slane %v9140_v37, 7 }
 0x64e   : > { %18787 = vst [vmem:[#allocation24_spill] sm:$0xff] %v17687_v55  ;;  %v10848_v4 = vsel %vm1370_vm0, %v10846_v9, %v10847_v46  ;;  %12701 = vmatmul.mubr.msk.bf16.gmra.mrb[24].mxu1 %vm3462_vm3, %v17287_v62  ;;  %12733 = vmatmul.mubr.msk.bf16.gmra.mrb[88].mxu0 %vm3462_vm3, %v17287_v62 }
 0x64f   : > { %v10962_v7 = vadd.f32 %v10846_v9, %v10710_v63  ;;  %v10596_v33 = vsel %vm8461_vm6, %v10594_v2, %v10595_v45  ;;  %9770 = vmatprep.mubr.bf16.mxu1 %v18665_v39  ;;  %10111 = vmatprep.mubr.bf16.mxu0 %v18665_v39 }
 0x650   : > { %v10711_v48 = vadd.f32 %v10596_v33, %v9138_v17 }
 0x651   : > { %v9144_v28 = vpop.f32.mrb[176].mxu1  ;;  %v9483_v54 = vpop.f32.mrb[240].mxu0  ;;  %v17697_v11 = vadd.f32 %v10962_v7, %v9465_v3 }
 0x652   : > { %v10963_v43 = vadd.f32 %v10848_v4, %v10711_v48  ;;  %v9146_v46 = vpop.f32.mrb[177].mxu1  ;;  %v9485_v22 = vpop.f32.mrb[241].mxu0  ;;  %v10849_v37 = vrot.slane %v9483_v54, 6 }
 0x653   : > { %18788 = vst [vmem:[#allocation46_spill] sm:$0xff] %v17697_v11  ;;  %v10597_v0 = vrot.slane %v9146_v46, 7  ;;  %v9148_v40 = vpop.f32.mrb[178].mxu1  ;;  %v9487_v53 = vpop.f32.mrb[242].mxu0 }
 0x654   : > { %v10850_v55 = vrot.slane %v9487_v53, 6  ;;  %v9150_v9 = vpop.f32.mrb[179].mxu1  ;;  %v9489_v63 = vpop.f32.mrb[243].mxu0  ;;  %v17699_v45 = vadd.f32 %v10963_v43, %v9469_v57 }
 0x655   : > { %v10712_v2 = vadd.f32 %v10597_v0, %v9144_v28  ;;  %v10598_v31 = vrot.slane %v9150_v9, 7 }
 0x656   : > { %18789 = vst [vmem:[#allocation71_spill] sm:$0xff] %v17699_v45  ;;  %v10851_v17 = vsel %vm1370_vm0, %v10849_v37, %v10850_v55  ;;  %12702 = vmatmul.mubr.msk.bf16.gmra.mrb[28].mxu1 %vm3462_vm3, %v17301_v61  ;;  %12734 = vmatmul.mubr.msk.bf16.gmra.mrb[92].mxu0 %vm3462_vm3, %v17301_v61 }
 0x657   : > { %v10964_v3 = vadd.f32 %v10849_v37, %v10712_v2  ;;  %v10599_v4 = vsel %vm8461_vm6, %v10597_v0, %v10598_v31  ;;  %9780 = vmatprep.mubr.bf16.mxu1 %v18665_v39  ;;  %10121 = vmatprep.mubr.bf16.mxu0 %v18665_v39 }
 0x658   : > { %v10713_v7 = vadd.f32 %v10599_v4, %v9148_v40 }
 0x659   : > { %v9154_v57 = vpop.f32.mrb[180].mxu1  ;;  %v9493_v33 = vpop.f32.mrb[244].mxu0  ;;  %v17709_v48 = vadd.f32 %v10964_v3, %v9475_v59 }
 0x65a   : > { %v10965_v28 = vadd.f32 %v10851_v17, %v10713_v7  ;;  %v9156_v55 = vpop.f32.mrb[181].mxu1  ;;  %v9495_v54 = vpop.f32.mrb[245].mxu0  ;;  %v10852_v9 = vrot.slane %v9493_v33, 6 }
 0x65b   : > { %18790 = vst [vmem:[#allocation26_spill] sm:$0xff] %v17709_v48  ;;  %v10600_v43 = vrot.slane %v9156_v55, 7  ;;  %v9158_v46 = vpop.f32.mrb[182].mxu1  ;;  %v9497_v53 = vpop.f32.mrb[246].mxu0 }
 0x65c   : > { %v10853_v45 = vrot.slane %v9497_v53, 6  ;;  %v9160_v37 = vpop.f32.mrb[183].mxu1  ;;  %v9499_v2 = vpop.f32.mrb[247].mxu0  ;;  %v17711_v31 = vadd.f32 %v10965_v28, %v9479_v15 }
 0x65d   : > { %v10714_v0 = vadd.f32 %v10600_v43, %v9154_v57  ;;  %v10601_v11 = vrot.slane %v9160_v37, 7 }
 0x65e   : > { %18791 = vst [vmem:[#allocation41_spill] sm:$0xff] %v17711_v31  ;;  %v10854_v40 = vsel %vm1370_vm0, %v10852_v9, %v10853_v45  ;;  %12703 = vmatmul.mubr.msk.bf16.gmra.mrb[32].mxu1 %vm3462_vm3, %v17315_v6  ;;  %12735 = vmatmul.mubr.msk.bf16.gmra.mrb[96].mxu0 %vm3462_vm3, %v17315_v6 }
 0x65f   : > { %v10966_v59 = vadd.f32 %v10852_v9, %v10714_v0  ;;  %v10602_v17 = vsel %vm8461_vm6, %v10600_v43, %v10601_v11  ;;  %9790 = vmatprep.mubr.bf16.mxu1 %v18665_v39  ;;  %10131 = vmatprep.mubr.bf16.mxu0 %v18665_v39 }
 0x660   : > { %v10715_v3 = vadd.f32 %v10602_v17, %v9158_v46 }
 0x661   : > { %v9164_v15 = vpop.f32.mrb[184].mxu1  ;;  %v9503_v4 = vpop.f32.mrb[248].mxu0  ;;  %v17721_v7 = vadd.f32 %v10966_v59, %v9485_v22 }
 0x662   : > { %v10967_v57 = vadd.f32 %v10854_v40, %v10715_v3  ;;  %v9166_v45 = vpop.f32.mrb[185].mxu1  ;;  %v9505_v33 = vpop.f32.mrb[249].mxu0  ;;  %v10855_v53 = vrot.slane %v9503_v4, 6 }
 0x663   : > { %18792 = vst [vmem:[#allocation49_spill] sm:$0xff] %v17721_v7  ;;  %v10603_v28 = vrot.slane %v9166_v45, 7  ;;  %v9168_v55 = vpop.f32.mrb[186].mxu1  ;;  %v9506_v37 = vpop.f32.mrb[250].mxu0 }
 0x664   : > { %v9170_v31 = vpop.f32.mrb[187].mxu1  ;;  %v10856_v9 = vrot.slane %v9506_v37, 6  ;;  %v9508_v0 = vpop.f32.mrb[251].mxu0  ;;  %v17723_v11 = vadd.f32 %v10967_v57, %v9489_v63 }
 0x665   : > { %v10716_v43 = vadd.f32 %v10603_v28, %v9164_v15  ;;  %v10604_v48 = vrot.slane %v9170_v31, 7 }
 0x666   : > { %18793 = vst [vmem:[#allocation54_spill] sm:$0xff] %v17723_v11  ;;  %v10857_v46 = vsel %vm1370_vm0, %v10855_v53, %v10856_v9  ;;  %12704 = vmatmul.mubr.msk.bf16.gmra.mrb[36].mxu1 %vm3462_vm3, %v17329_v42  ;;  %12736 = vmatmul.mubr.msk.bf16.gmra.mrb[100].mxu0 %vm3462_vm3, %v17329_v42 }
 0x667   : > { %v10605_v22 = vsel %vm8461_vm6, %v10603_v28, %v10604_v48  ;;  %v10968_v40 = vadd.f32 %v10855_v53, %v10716_v43  ;;  %9800 = vmatprep.mubr.bf16.mxu1 %v18665_v39  ;;  %10141 = vmatprep.mubr.bf16.mxu0 %v18665_v39 }
 0x668   : > { %v10717_v59 = vadd.f32 %v10605_v22, %v9168_v55 }
 0x669   : > { %v9544_v63 = vpop.f32.mrb[188].mxu1  ;;  %v9881_v17 = vpop.f32.mrb[252].mxu0  ;;  %v17733_v3 = vadd.f32 %v10968_v40, %v9495_v54 }
 0x66a   : > { %v10969_v31 = vadd.f32 %v10857_v46, %v10717_v59  ;;  %v9545_v15 = vpop.f32.mrb[189].mxu1  ;;  %v9883_v4 = vpop.f32.mrb[253].mxu0 }
 0x66b   : > { %18794 = vst [vmem:[#allocation4_spill] sm:$0xff] %v17733_v3  ;;  %v9546_v57 = vpop.f32.mrb[190].mxu1  ;;  %v9885_v45 = vpop.f32.mrb[254].mxu0  ;;  %v11642_v48 = vrot.slane %v9883_v4, 7 }
 0x66c   : > { %v9547_v33 = vpop.f32.mrb[191].mxu1  ;;  %v9887_v37 = vpop.f32.mrb[255].mxu0  ;;  %v17735_v9 = vadd.f32 %v10969_v31, %v9499_v2 }
 0x66d   : > { %v11643_v28 = vrot.slane %v9887_v37, 7 }
 0x66e   : > { %18795 = vst [vmem:[#allocation67_spill] sm:$0xff] %v17735_v9  ;;  %12705 = vmatmul.mubr.msk.bf16.gmra.mrb[40].mxu1 %vm3462_vm3, %v17343_v38  ;;  %12737 = vmatmul.mubr.msk.bf16.gmra.mrb[104].mxu0 %vm3462_vm3, %v17343_v38 }
 0x66f   : > { %v11644_v54 = vsel %vm8461_vm6, %v11642_v48, %v11643_v28  ;;  %9810 = vmatprep.mubr.bf16.mxu1 %v18665_v39  ;;  %10151 = vmatprep.mubr.bf16.mxu0 %v18665_v39 }
 0x671   : > { %v9550_v55 = vpop.f32.mrb[192].mxu1  ;;  %v9891_v53 = vpop.f32.mrb[0].mxu0 }
 0x672   : > { %v11082_v0 = vrot.slane %v9550_v55, 7  ;;  %v9552_v43 = vpop.f32.mrb[193].mxu1  ;;  %v9893_v2 = vpop.f32.mrb[1].mxu0 }
 0x673   : > { %v11334_v46 = vrot.slane %v9552_v43, 6  ;;  %v9554_v22 = vpop.f32.mrb[194].mxu1  ;;  %v9895_v40 = vpop.f32.mrb[2].mxu0  ;;  %v11645_v4 = vrot.slane %v9893_v2, 7 }
 0x674   : > { %v11222_v59 = vadd.f32 %v11082_v0, %v17381_v21  ;;  %v11083_v63 = vrot.slane %v9554_v22, 7  ;;  %v9556_v31 = vpop.f32.mrb[195].mxu1  ;;  %v9897_v15 = vpop.f32.mrb[3].mxu0 }
 0x675   : > { %v11335_v57 = vrot.slane %v9556_v31, 6  ;;  %v11646_v33 = vrot.slane %v9897_v15, 7 }
 0x676   : > { %v11474_v37 = vadd.f32 %v11334_v46, %v11222_v59  ;;  %v11084_v28 = vsel %vm8461_vm6, %v11082_v0, %v11083_v63  ;;  %12706 = vmatmul.mubr.msk.bf16.gmra.mrb[44].mxu1 %vm3462_vm3, %v17357_v18  ;;  %12738 = vmatmul.mubr.msk.bf16.gmra.mrb[108].mxu0 %vm3462_vm3, %v17357_v18 }
 0x677   : > { %v11223_v55 = vadd.f32 %v11084_v28, %v17385_v13  ;;  %v11336_v43 = vsel %vm1370_vm0, %v11334_v46, %v11335_v57  ;;  %v11647_v21 = vsel %vm8461_vm6, %v11645_v4, %v11646_v33  ;;  %9820 = vmatprep.mubr.bf16.mxu1 %v18665_v39  ;;  %10161 = vmatprep.mubr.bf16.mxu0 %v18665_v39 }
 0x678   : > { %v11530_v2 = vadd.f32 %v11474_v37, %v9881_v17 }
 0x679   : > { %v11475_v22 = vadd.f32 %v11336_v43, %v11223_v55  ;;  %v9560_v59 = vpop.f32.mrb[196].mxu1  ;;  %v9901_v0 = vpop.f32.mrb[4].mxu0 }
 0x67a   : > { %v11085_v63 = vrot.slane %v9560_v59, 7  ;;  %v9562_v31 = vpop.f32.mrb[197].mxu1  ;;  %v9903_v15 = vpop.f32.mrb[5].mxu0  ;;  %v17755_v9 = vadd.f32 %v11642_v48, %v11530_v2 }
 0x67b   : > { %v11531_v3 = vadd.f32 %v11475_v22, %v9885_v45  ;;  %v11337_v11 = vrot.slane %v9562_v31, 6  ;;  %v9564_v13 = vpop.f32.mrb[198].mxu1  ;;  %v9905_v28 = vpop.f32.mrb[6].mxu0  ;;  %v11648_v18 = vrot.slane %v9903_v15, 7 }
 0x67c   : > { %v11224_v46 = vadd.f32 %v11085_v63, %v17399_v8  ;;  %v11086_v57 = vrot.slane %v9564_v13, 7  ;;  %v9566_v33 = vpop.f32.mrb[199].mxu1  ;;  %v9907_v7 = vpop.f32.mrb[7].mxu0 }
 0x67d   : > { %v11338_v38 = vrot.slane %v9566_v33, 6  ;;  %v11649_v17 = vrot.slane %v9907_v7, 7  ;;  %v17758_v37 = vadd.f32 %v11644_v54, %v11531_v3 }
 0x67e   : > { %v11476_v55 = vadd.f32 %v11337_v11, %v11224_v46  ;;  %v11087_v43 = vsel %vm8461_vm6, %v11085_v63, %v11086_v57  ;;  %12707 = vmatmul.mubr.msk.bf16.gmra.mrb[48].mxu1 %vm3462_vm3, %v17372_v41  ;;  %12739 = vmatmul.mubr.msk.bf16.gmra.mrb[112].mxu0 %vm3462_vm3, %v17372_v41 }
 0x67f   : > { %v11225_v45 = vadd.f32 %v11087_v43, %v17401_v12  ;;  %v11339_v8 = vsel %vm1370_vm0, %v11337_v11, %v11338_v38  ;;  %v11650_v48 = vsel %vm8461_vm6, %v11648_v18, %v11649_v17  ;;  %9830 = vmatprep.mubr.bf16.mxu1 %v18665_v39  ;;  %10171 = vmatprep.mubr.bf16.mxu0 %v18665_v39 }
 0x680   : > { %v11532_v7 = vadd.f32 %v11476_v55, %v9891_v53 }
 0x681   : > { %v11477_v3 = vadd.f32 %v11339_v8, %v11225_v45  ;;  %v9570_v54 = vpop.f32.mrb[200].mxu1  ;;  %v9911_v2 = vpop.f32.mrb[8].mxu0 }
 0x682   : > { %v11088_v22 = vrot.slane %v9570_v54, 7  ;;  %v9572_v59 = vpop.f32.mrb[201].mxu1  ;;  %v9913_v63 = vpop.f32.mrb[9].mxu0  ;;  %v17770_v31 = vadd.f32 %v11645_v4, %v11532_v7 }
 0x683   : > { %v11533_v15 = vadd.f32 %v11477_v3, %v9895_v40  ;;  %v11340_v13 = vrot.slane %v9572_v59, 6  ;;  %v9574_v12 = vpop.f32.mrb[202].mxu1  ;;  %v9915_v46 = vpop.f32.mrb[10].mxu0  ;;  %v11651_v17 = vrot.slane %v9913_v63, 7 }
 0x684   : > { %v11226_v38 = vadd.f32 %v11088_v22, %v17411_v47  ;;  %v11089_v11 = vrot.slane %v9574_v12, 7  ;;  %v9576_v57 = vpop.f32.mrb[203].mxu1  ;;  %v9917_v33 = vpop.f32.mrb[11].mxu0 }
 0x685   : > { %v11341_v43 = vrot.slane %v9576_v57, 6  ;;  %v11652_v53 = vrot.slane %v9917_v33, 7  ;;  %v17773_v55 = vadd.f32 %v11647_v21, %v11533_v15 }
 0x686   : > { %v11478_v45 = vadd.f32 %v11340_v13, %v11226_v38  ;;  %v11090_v8 = vsel %vm8461_vm6, %v11088_v22, %v11089_v11  ;;  %12708 = vmatmul.mubr.msk.bf16.gmra.mrb[52].mxu1 %vm3462_vm3, %v17389_v30  ;;  %12740 = vmatmul.mubr.msk.bf16.gmra.mrb[116].mxu0 %vm3462_vm3, %v17389_v30 }
 0x687   : > { %v11227_v40 = vadd.f32 %v11090_v8, %v17416_v29  ;;  %v11342_v47 = vsel %vm1370_vm0, %v11340_v13, %v11341_v43  ;;  %v11653_v4 = vsel %vm8461_vm6, %v11651_v17, %v11652_v53  ;;  %9840 = vmatprep.mubr.bf16.mxu1 %v18665_v39  ;;  %10177 = vmatprep.mubr.bf16.mxu0 %v18665_v39 }
 0x688   : > { %v11534_v21 = vadd.f32 %v11478_v45, %v9901_v0 }
 0x689   : > { %v11479_v7 = vadd.f32 %v11342_v47, %v11227_v40  ;;  %v9580_v3 = vpop.f32.mrb[204].mxu1  ;;  %v9921_v54 = vpop.f32.mrb[12].mxu0 }
 0x68a   : > { %v11091_v22 = vrot.slane %v9580_v3, 7  ;;  %v9582_v59 = vpop.f32.mrb[205].mxu1  ;;  %v9923_v63 = vpop.f32.mrb[13].mxu0  ;;  %v17785_v15 = vadd.f32 %v11648_v18, %v11534_v21 }
 0x68b   : > { %v11535_v12 = vadd.f32 %v11479_v7, %v9905_v28  ;;  %v11343_v38 = vrot.slane %v9582_v59, 6  ;;  %v9584_v29 = vpop.f32.mrb[206].mxu1  ;;  %v9925_v11 = vpop.f32.mrb[14].mxu0  ;;  %v11654_v53 = vrot.slane %v9923_v63, 7 }
 0x68c   : > { %v11228_v13 = vadd.f32 %v11091_v22, %v17427_v1  ;;  %v11092_v57 = vrot.slane %v9584_v29, 7  ;;  %v9586_v33 = vpop.f32.mrb[207].mxu1  ;;  %v9927_v43 = vpop.f32.mrb[15].mxu0 }
 0x68d   : > { %v11344_v39 = vrot.slane %v9586_v33, 6  ;;  %v11655_v0 = vrot.slane %v9927_v43, 7  ;;  %v17788_v45 = vadd.f32 %v11650_v48, %v11535_v12 }
 0x68e   : > { %v11480_v8 = vadd.f32 %v11343_v38, %v11228_v13  ;;  %v11093_v40 = vsel %vm8461_vm6, %v11091_v22, %v11092_v57  ;;  %12709 = vmatmul.mubr.msk.bf16.gmra.mrb[56].mxu1 %vm3462_vm3, %v18748_v23  ;;  %12741 = vmatmul.mubr.msk.bf16.gmra.mrb[120].mxu0 %vm3462_vm3, %v18748_v23 }
 0x68f   : > { %v11229_v18 = vadd.f32 %v11093_v40, %v17432_v24  ;;  %v11345_v1 = vsel %vm1370_vm0, %v11343_v38, %v11344_v39  ;;  %v11656_v28 = vsel %vm8461_vm6, %v11654_v53, %v11655_v0  ;;  %12871 = vmatprep.mubr.msk.bf16.mxu1 %vm3462_vm3, %v18748_v23 }
 0x690   : > { %v11536_v48 = vadd.f32 %v11480_v8, %v9911_v2 }
 0x691   : > { %v11481_v47 = vadd.f32 %v11345_v1, %v11229_v18  ;;  %v9590_v21 = vpop.f32.mrb[208].mxu1  ;;  %v9931_v7 = vpop.f32.mrb[16].mxu0  ;;  %v18796_v1 = vld [vmem:[#allocation59_spill] sm:$0xff] }
 0x692   : > { %v11094_v3 = vrot.slane %v9590_v21, 7  ;;  %v9592_v22 = vpop.f32.mrb[209].mxu1  ;;  %v9933_v59 = vpop.f32.mrb[17].mxu0  ;;  %v17800_v63 = vadd.f32 %v11651_v17, %v11536_v48 }
 0x693   : > { %v11537_v12 = vadd.f32 %v11481_v47, %v9915_v46  ;;  %v11346_v29 = vrot.slane %v9592_v22, 6  ;;  %v9594_v13 = vpop.f32.mrb[210].mxu1  ;;  %v9935_v24 = vpop.f32.mrb[18].mxu0  ;;  %v11657_v39 = vrot.slane %v9933_v59, 7  ;;  %v18797_v46 = vld [vmem:[#allocation12_spill] sm:$0xff] }
 0x694   : > { %v11230_v38 = vadd.f32 %v11094_v3, %v17442_v56  ;;  %v11095_v57 = vrot.slane %v9594_v13, 7  ;;  %v9596_v33 = vpop.f32.mrb[211].mxu1  ;;  %v9937_v43 = vpop.f32.mrb[19].mxu0  ;;  %v18798_v47 = vld [vmem:[#allocation60_spill] sm:$0xff] }
 0x695   : > { %v11347_v0 = vrot.slane %v9596_v33, 6  ;;  %v11658_v2 = vrot.slane %v9937_v43, 7  ;;  %v17803_v8 = vadd.f32 %v11653_v4, %v11537_v12 }
 0x696   : > { %v11482_v40 = vadd.f32 %v11346_v29, %v11230_v38  ;;  %v11096_v18 = vsel %vm8461_vm6, %v11094_v3, %v11095_v57  ;;  %12872 = vmatmul.mubr.msk.bf16.vlgmr.msra.gmra.mrb[60].mxu1 %vm3462_vm3, %v18796_v1 }
 0x697   : > { %v11231_v17 = vadd.f32 %v11096_v18, %v18797_v46  ;;  %v11348_v48 = vsel %vm1370_vm0, %v11346_v29, %v11347_v0  ;;  %v11659_v56 = vsel %vm8461_vm6, %v11657_v39, %v11658_v2  ;;  %12875 = vmatprep.mubr.msk.bf16.mxu1 %vm3462_vm3, %v18798_v47 }
 0x698   : > { %v11538_v21 = vadd.f32 %v11482_v40, %v9921_v54 }
 0x699   : > { %v11483_v22 = vadd.f32 %v11348_v48, %v11231_v17  ;;  %v9600_v59 = vpop.f32.mrb[212].mxu1  ;;  %v9941_v4 = vpop.f32.mrb[20].mxu0 }
 0x69a   : > { %v11097_v12 = vrot.slane %v9600_v59, 7  ;;  %v9602_v13 = vpop.f32.mrb[213].mxu1  ;;  %v9943_v38 = vpop.f32.mrb[21].mxu0  ;;  %v17813_v3 = vadd.f32 %v11654_v53, %v11538_v21  ;;  %v18800_v59 = vld [vmem:[#allocation16_spill] sm:$0xff] }
 0x69b   : > { %v11539_v57 = vadd.f32 %v11483_v22, %v9925_v11  ;;  %v11349_v33 = vrot.slane %v9602_v13, 6  ;;  %v9604_v43 = vpop.f32.mrb[214].mxu1  ;;  %v9945_v18 = vpop.f32.mrb[22].mxu0  ;;  %v11660_v46 = vrot.slane %v9943_v38, 7  ;;  %v18801_v11 = vld [vmem:[#allocation17_spill] sm:$0xff] }
 0x69c   : > { %v11232_v29 = vadd.f32 %v11097_v12, %v17454_v35  ;;  %v11098_v0 = vrot.slane %v9604_v43, 7  ;;  %v9606_v2 = vpop.f32.mrb[215].mxu1  ;;  %v9947_v1 = vpop.f32.mrb[23].mxu0 }
 0x69d   : > { %v11350_v47 = vrot.slane %v9606_v2, 6  ;;  %v11661_v54 = vrot.slane %v9947_v1, 7  ;;  %v17816_v40 = vadd.f32 %v11656_v28, %v11539_v57 }
 0x69e   : > { %v11484_v17 = vadd.f32 %v11349_v33, %v11232_v29  ;;  %v11099_v48 = vsel %vm8461_vm6, %v11097_v12, %v11098_v0  ;;  %12876 = vmatmul.mubr.msk.bf16.gmra.mrb[64].mxu1 %vm3462_vm3, %v18800_v59  ;;  %v18802_v59 = vld [vmem:[#allocation11_spill] sm:$0xff] }
 0x69f   : > { %18799 = vst [vmem:[#allocation28_spill] sm:$0xff] %v17816_v40  ;;  %v11233_v53 = vadd.f32 %v11099_v48, %v18801_v11  ;;  %v11351_v21 = vsel %vm1370_vm0, %v11349_v33, %v11350_v47  ;;  %v11662_v35 = vsel %vm8461_vm6, %v11660_v46, %v11661_v54  ;;  %12879 = vmatprep.mubr.msk.bf16.mxu1 %vm3462_vm3, %v16893_v5 }
 0x6a0   : > { %v11540_v22 = vadd.f32 %v11484_v17, %v9931_v7 }
 0x6a1   : > { %v11485_v13 = vadd.f32 %v11351_v21, %v11233_v53  ;;  %v9610_v38 = vpop.f32.mrb[216].mxu1  ;;  %v9951_v28 = vpop.f32.mrb[24].mxu0 }
 0x6a2   : > { %v11100_v57 = vrot.slane %v9610_v38, 7  ;;  %v9612_v43 = vpop.f32.mrb[217].mxu1  ;;  %v9953_v29 = vpop.f32.mrb[25].mxu0  ;;  %v17826_v12 = vadd.f32 %v11657_v39, %v11540_v22 }
 0x6a3   : > { %v11541_v0 = vadd.f32 %v11485_v13, %v9935_v24  ;;  %v11352_v2 = vrot.slane %v9612_v43, 6  ;;  %v9614_v1 = vpop.f32.mrb[218].mxu1  ;;  %v9955_v48 = vpop.f32.mrb[26].mxu0  ;;  %v11663_v40 = vrot.slane %v9953_v29, 7  ;;  %v18803_v24 = vld [vmem:[#allocation13_spill] sm:$0xff] }
 0x6a4   : > { %v11234_v33 = vadd.f32 %v11100_v57, %v18802_v59  ;;  %v11101_v47 = vrot.slane %v9614_v1, 7  ;;  %v9616_v54 = vpop.f32.mrb[219].mxu1  ;;  %v9957_v11 = vpop.f32.mrb[27].mxu0 }
 0x6a5   : > { %v11353_v5 = vrot.slane %v9616_v54, 6  ;;  %v11664_v7 = vrot.slane %v9957_v11, 7  ;;  %v17829_v17 = vadd.f32 %v11659_v56, %v11541_v0  ;;  %v18804_v11 = vld [vmem:[#allocation36_spill] sm:$0xff] }
 0x6a6   : > { %v11486_v53 = vadd.f32 %v11352_v2, %v11234_v33  ;;  %v11102_v21 = vsel %vm8461_vm6, %v11100_v57, %v11101_v47  ;;  %12880 = vmatmul.mubr.msk.bf16.gmra.mrb[68].mxu1 %vm3462_vm3, %v16952_v25 }
 0x6a7   : > { %v11235_v39 = vadd.f32 %v11102_v21, %v18803_v24  ;;  %v11354_v22 = vsel %vm1370_vm0, %v11352_v2, %v11353_v5  ;;  %v11665_v13 = vsel %vm8461_vm6, %v11663_v40, %v11664_v7  ;;  %12883 = vmatprep.mubr.msk.bf16.mxu1 %vm3462_vm3, %v17004_v49 }
 0x6a8   : > { %v11542_v38 = vadd.f32 %v11486_v53, %v9941_v4 }
 0x6a9   : > { %v11487_v43 = vadd.f32 %v11354_v22, %v11235_v39  ;;  %v9620_v29 = vpop.f32.mrb[220].mxu1  ;;  %v9961_v56 = vpop.f32.mrb[28].mxu0 }
 0x6aa   : > { %v11103_v0 = vrot.slane %v9620_v29, 7  ;;  %v9622_v1 = vpop.f32.mrb[221].mxu1  ;;  %v9963_v59 = vpop.f32.mrb[29].mxu0  ;;  %v17839_v57 = vadd.f32 %v11660_v46, %v11542_v38 }
 0x6ab   : > { %v11543_v33 = vadd.f32 %v11487_v43, %v9945_v18  ;;  %v11355_v25 = vrot.slane %v9622_v1, 6  ;;  %v9624_v47 = vpop.f32.mrb[222].mxu1  ;;  %v9965_v54 = vpop.f32.mrb[30].mxu0  ;;  %v11666_v24 = vrot.slane %v9963_v59, 7  ;;  %v18805_v18 = vld [vmem:[#allocation38_spill] sm:$0xff] }
 0x6ac   : > { %v11236_v2 = vadd.f32 %v11103_v0, %v18804_v11  ;;  %v11104_v5 = vrot.slane %v9624_v47, 7  ;;  %v9626_v7 = vpop.f32.mrb[223].mxu1  ;;  %v9967_v21 = vpop.f32.mrb[31].mxu0 }
 0x6ad   : > { %v11356_v49 = vrot.slane %v9626_v7, 6  ;;  %v11667_v4 = vrot.slane %v9967_v21, 7  ;;  %v17842_v53 = vadd.f32 %v11662_v35, %v11543_v33  ;;  %v18806_v21 = vld [vmem:[#allocation20_spill] sm:$0xff] }
 0x6ae   : > { %v11488_v39 = vadd.f32 %v11355_v25, %v11236_v2  ;;  %v11105_v22 = vsel %vm8461_vm6, %v11103_v0, %v11104_v5  ;;  %12884 = vmatmul.mubr.msk.bf16.gmra.mrb[72].mxu1 %vm3462_vm3, %v17045_v10 }
 0x6af   : > { %v11237_v46 = vadd.f32 %v11105_v22, %v18805_v18  ;;  %v11357_v38 = vsel %vm1370_vm0, %v11355_v25, %v11356_v49  ;;  %v11668_v43 = vsel %vm8461_vm6, %v11666_v24, %v11667_v4  ;;  %12887 = vmatprep.mubr.msk.bf16.mxu1 %vm3462_vm3, %v17075_v51 }
 0x6b0   : > { %v11544_v29 = vadd.f32 %v11488_v39, %v9951_v28 }
 0x6b1   : > { %v11489_v1 = vadd.f32 %v11357_v38, %v11237_v46  ;;  %v9630_v59 = vpop.f32.mrb[224].mxu1  ;;  %v9971_v35 = vpop.f32.mrb[32].mxu0 }
 0x6b2   : > { %v11106_v33 = vrot.slane %v9630_v59, 7  ;;  %v9632_v47 = vpop.f32.mrb[225].mxu1  ;;  %v9973_v11 = vpop.f32.mrb[33].mxu0  ;;  %v17852_v0 = vadd.f32 %v11663_v40, %v11544_v29  ;;  %v18807_v40 = vld [vmem:[#allocation44_spill] sm:$0xff] }
 0x6b3   : > { %v11545_v2 = vadd.f32 %v11489_v1, %v9955_v48  ;;  %v11358_v10 = vrot.slane %v9632_v47, 6  ;;  %v9634_v5 = vpop.f32.mrb[226].mxu1  ;;  %v9975_v7 = vpop.f32.mrb[34].mxu0  ;;  %v11669_v18 = vrot.slane %v9973_v11, 7 }
 0x6b4   : > { %v11238_v25 = vadd.f32 %v11106_v33, %v18806_v21  ;;  %v11107_v49 = vrot.slane %v9634_v5, 7  ;;  %v9636_v4 = vpop.f32.mrb[227].mxu1  ;;  %v9977_v22 = vpop.f32.mrb[35].mxu0 }
 0x6b5   : > { %v11359_v51 = vrot.slane %v9636_v4, 6  ;;  %v11670_v28 = vrot.slane %v9977_v22, 7  ;;  %v17855_v39 = vadd.f32 %v11665_v13, %v11545_v2  ;;  %v18808_v22 = vld [vmem:[#allocation62_spill] sm:$0xff] }
 0x6b6   : > { %v11490_v46 = vadd.f32 %v11358_v10, %v11238_v25  ;;  %v11108_v38 = vsel %vm8461_vm6, %v11106_v33, %v11107_v49  ;;  %12888 = vmatmul.mubr.msk.bf16.gmra.mrb[76].mxu1 %vm3462_vm3, %v17089_v26 }
 0x6b7   : > { %v11239_v48 = vadd.f32 %v11108_v38, %v18807_v40  ;;  %v11360_v29 = vsel %vm1370_vm0, %v11358_v10, %v11359_v51  ;;  %v11671_v1 = vsel %vm8461_vm6, %v11669_v18, %v11670_v28  ;;  %12891 = vmatprep.mubr.msk.bf16.mxu1 %vm3462_vm3, %v17103_v16 }
 0x6b8   : > { %v11546_v59 = vadd.f32 %v11490_v46, %v9961_v56 }
 0x6b9   : > { %v11491_v47 = vadd.f32 %v11360_v29, %v11239_v48  ;;  %v9640_v11 = vpop.f32.mrb[228].mxu1  ;;  %v9981_v13 = vpop.f32.mrb[36].mxu0 }
 0x6ba   : > { %v11109_v2 = vrot.slane %v9640_v11, 7  ;;  %v9642_v5 = vpop.f32.mrb[229].mxu1  ;;  %v9983_v21 = vpop.f32.mrb[37].mxu0  ;;  %v17865_v33 = vadd.f32 %v11666_v24, %v11546_v59 }
 0x6bb   : > { %v11547_v25 = vadd.f32 %v11491_v47, %v9965_v54  ;;  %v11361_v26 = vrot.slane %v9642_v5, 6  ;;  %v9644_v49 = vpop.f32.mrb[230].mxu1  ;;  %v9985_v4 = vpop.f32.mrb[38].mxu0  ;;  %v11672_v40 = vrot.slane %v9983_v21, 7  ;;  %v18809_v54 = vld [vmem:[#allocation29_spill] sm:$0xff] }
 0x6bc   : > { %v11240_v10 = vadd.f32 %v11109_v2, %v18808_v22  ;;  %v11110_v51 = vrot.slane %v9644_v49, 7  ;;  %v9646_v28 = vpop.f32.mrb[231].mxu1  ;;  %v9987_v38 = vpop.f32.mrb[39].mxu0 }
 0x6bd   : > { %v11362_v16 = vrot.slane %v9646_v28, 6  ;;  %v11673_v56 = vrot.slane %v9987_v38, 7  ;;  %v17868_v46 = vadd.f32 %v11668_v43, %v11547_v25  ;;  %v18810_v38 = vld [vmem:[#allocation56_spill] sm:$0xff] }
 0x6be   : > { %v11492_v48 = vadd.f32 %v11361_v26, %v11240_v10  ;;  %v11111_v29 = vsel %vm8461_vm6, %v11109_v2, %v11110_v51  ;;  %12892 = vmatmul.mubr.msk.bf16.gmra.mrb[80].mxu1 %vm3462_vm3, %v17117_v60 }
 0x6bf   : > { %v11241_v24 = vadd.f32 %v11111_v29, %v18809_v54  ;;  %v11363_v59 = vsel %vm1370_vm0, %v11361_v26, %v11362_v16  ;;  %v11674_v47 = vsel %vm8461_vm6, %v11672_v40, %v11673_v56  ;;  %12895 = vmatprep.mubr.msk.bf16.mxu1 %vm3462_vm3, %v17131_v44 }
 0x6c0   : > { %v11548_v11 = vadd.f32 %v11492_v48, %v9971_v35 }
 0x6c1   : > { %v11493_v5 = vadd.f32 %v11363_v59, %v11241_v24  ;;  %v9650_v21 = vpop.f32.mrb[232].mxu1  ;;  %v9991_v43 = vpop.f32.mrb[40].mxu0 }
 0x6c2   : > { %v11112_v25 = vrot.slane %v9650_v21, 7  ;;  %v9652_v49 = vpop.f32.mrb[233].mxu1  ;;  %v9993_v22 = vpop.f32.mrb[41].mxu0  ;;  %v17878_v2 = vadd.f32 %v11669_v18, %v11548_v11 }
 0x6c3   : > { %v11549_v10 = vadd.f32 %v11493_v5, %v9975_v7  ;;  %v11364_v60 = vrot.slane %v9652_v49, 6  ;;  %v9654_v51 = vpop.f32.mrb[234].mxu1  ;;  %v9995_v28 = vpop.f32.mrb[42].mxu0  ;;  %v11675_v54 = vrot.slane %v9993_v22, 7  ;;  %v18811_v7 = vld [vmem:[#allocation55_spill] sm:$0xff] }
 0x6c4   : > { %v11242_v26 = vadd.f32 %v11112_v25, %v18810_v38  ;;  %v11113_v16 = vrot.slane %v9654_v51, 7  ;;  %v9656_v56 = vpop.f32.mrb[235].mxu1  ;;  %v9997_v29 = vpop.f32.mrb[43].mxu0 }
 0x6c5   : > { %v11365_v44 = vrot.slane %v9656_v56, 6  ;;  %v11676_v35 = vrot.slane %v9997_v29, 7  ;;  %v17881_v48 = vadd.f32 %v11671_v1, %v11549_v10  ;;  %v18812_v29 = vld [vmem:[#allocation5_spill] sm:$0xff] }
 0x6c6   : > { %v11494_v24 = vadd.f32 %v11364_v60, %v11242_v26  ;;  %v11114_v59 = vsel %vm8461_vm6, %v11112_v25, %v11113_v16  ;;  %12896 = vmatmul.mubr.msk.bf16.gmra.mrb[84].mxu1 %vm3462_vm3, %v17145_v14 }
 0x6c7   : > { %v11243_v18 = vadd.f32 %v11114_v59, %v18811_v7  ;;  %v11366_v11 = vsel %vm1370_vm0, %v11364_v60, %v11365_v44  ;;  %v11677_v5 = vsel %vm8461_vm6, %v11675_v54, %v11676_v35  ;;  %12899 = vmatprep.mubr.msk.bf16.mxu1 %vm3462_vm3, %v17157_v36 }
 0x6c8   : > { %v11550_v21 = vadd.f32 %v11494_v24, %v9981_v13 }
 0x6c9   : > { %v11495_v49 = vadd.f32 %v11366_v11, %v11243_v18  ;;  %v9660_v22 = vpop.f32.mrb[236].mxu1  ;;  %v10001_v1 = vpop.f32.mrb[44].mxu0 }
 0x6ca   : > { %v11115_v10 = vrot.slane %v9660_v22, 7  ;;  %v9662_v51 = vpop.f32.mrb[237].mxu1  ;;  %v10003_v38 = vpop.f32.mrb[45].mxu0  ;;  %v17891_v25 = vadd.f32 %v11672_v40, %v11550_v21 }
 0x6cb   : > { %v11551_v26 = vadd.f32 %v11495_v49, %v9985_v4  ;;  %v11367_v14 = vrot.slane %v9662_v51, 6  ;;  %v9664_v16 = vpop.f32.mrb[238].mxu1  ;;  %v10005_v56 = vpop.f32.mrb[46].mxu0  ;;  %v11678_v7 = vrot.slane %v10003_v38, 7  ;;  %v18814_v4 = vld [vmem:[#allocation47_spill] sm:$0xff] }
 0x6cc   : > { %v11244_v60 = vadd.f32 %v11115_v10, %v18812_v29  ;;  %v11116_v44 = vrot.slane %v9664_v16, 7  ;;  %v9666_v35 = vpop.f32.mrb[239].mxu1  ;;  %v10007_v59 = vpop.f32.mrb[47].mxu0 }
 0x6cd   : > { %v11368_v36 = vrot.slane %v9666_v35, 6  ;;  %v11679_v13 = vrot.slane %v10007_v59, 7  ;;  %v17894_v24 = vadd.f32 %v11674_v47, %v11551_v26 }
 0x6ce   : > { %v11496_v18 = vadd.f32 %v11367_v14, %v11244_v60  ;;  %v11117_v11 = vsel %vm8461_vm6, %v11115_v10, %v11116_v44  ;;  %12900 = vmatmul.mubr.msk.bf16.gmra.mrb[88].mxu1 %vm3462_vm3, %v18748_v23 }
 0x6cf   : > { %18813 = vst [vmem:[#allocation50_spill] sm:$0xff] %v17894_v24  ;;  %v11245_v40 = vadd.f32 %v11117_v11, %v18814_v4  ;;  %v11369_v21 = vsel %vm1370_vm0, %v11367_v14, %v11368_v36  ;;  %v11680_v49 = vsel %vm8461_vm6, %v11678_v7, %v11679_v13  ;;  %12903 = vmatprep.mubr.msk.bf16.mxu1 %vm3462_vm3, %v18748_v23 }
 0x6d0   : > { %v11552_v22 = vadd.f32 %v11496_v18, %v9991_v43 }
 0x6d1   : > { %v11497_v51 = vadd.f32 %v11369_v21, %v11245_v40  ;;  %v9670_v38 = vpop.f32.mrb[240].mxu1  ;;  %v10011_v47 = vpop.f32.mrb[48].mxu0 }
 0x6d2   : > { %v11118_v26 = vrot.slane %v9670_v38, 7  ;;  %v9672_v16 = vpop.f32.mrb[241].mxu1  ;;  %v10013_v29 = vpop.f32.mrb[49].mxu0  ;;  %v17904_v10 = vadd.f32 %v11675_v54, %v11552_v22 }
 0x6d3   : > { %v11553_v60 = vadd.f32 %v11497_v51, %v9995_v28  ;;  %v11370_v44 = vrot.slane %v9672_v16, 6  ;;  %v9674_v35 = vpop.f32.mrb[242].mxu1  ;;  %v10015_v59 = vpop.f32.mrb[50].mxu0  ;;  %v11681_v4 = vrot.slane %v10013_v29, 7 }
 0x6d4   : > { %v11246_v14 = vadd.f32 %v11118_v26, %v17541_v27  ;;  %v11119_v36 = vrot.slane %v9674_v35, 7  ;;  %v9676_v13 = vpop.f32.mrb[243].mxu1  ;;  %v10017_v11 = vpop.f32.mrb[51].mxu0 }
 0x6d5   : > { %v11371_v24 = vrot.slane %v9676_v13, 6  ;;  %v11682_v43 = vrot.slane %v10017_v11, 7  ;;  %v17907_v18 = vadd.f32 %v11677_v5, %v11553_v60 }
 0x6d6   : > { %v11498_v40 = vadd.f32 %v11370_v44, %v11246_v14  ;;  %v11120_v21 = vsel %vm8461_vm6, %v11118_v26, %v11119_v36  ;;  %12904 = vmatmul.mubr.msk.bf16.gmra.mrb[92].mxu1 %vm3462_vm3, %v17203_v58  ;;  %v18815_v36 = vld [vmem:[#allocation70_spill] sm:$0xff] }
 0x6d7   : > { %v11247_v28 = vadd.f32 %v11120_v21, %v17543_v50  ;;  %v11372_v54 = vsel %vm1370_vm0, %v11370_v44, %v11371_v24  ;;  %v11683_v27 = vsel %vm8461_vm6, %v11681_v4, %v11682_v43  ;;  %12907 = vmatprep.mubr.msk.bf16.mxu1 %vm3462_vm3, %v17217_v52 }
 0x6d8   : > { %v11554_v22 = vadd.f32 %v11498_v40, %v10001_v1 }
 0x6d9   : > { %v11499_v51 = vadd.f32 %v11372_v54, %v11247_v28  ;;  %v9680_v38 = vpop.f32.mrb[244].mxu1  ;;  %v10021_v5 = vpop.f32.mrb[52].mxu0 }
 0x6da   : > { %v11121_v16 = vrot.slane %v9680_v38, 7  ;;  %v9682_v29 = vpop.f32.mrb[245].mxu1  ;;  %v10022_v60 = vpop.f32.mrb[53].mxu0  ;;  %v17917_v26 = vadd.f32 %v11678_v7, %v11554_v22  ;;  %v18816_v7 = vld [vmem:[#allocation66_spill] sm:$0xff] }
 0x6db   : > { %v11555_v35 = vadd.f32 %v11499_v51, %v10005_v56  ;;  %v11373_v58 = vrot.slane %v9682_v29, 6  ;;  %v9684_v14 = vpop.f32.mrb[246].mxu1  ;;  %v10023_v50 = vpop.f32.mrb[54].mxu0 }
 0x6dc   : > { %v11248_v24 = vadd.f32 %v11121_v16, %v18815_v36  ;;  %v11122_v44 = vrot.slane %v9684_v14, 7  ;;  %v9686_v13 = vpop.f32.mrb[247].mxu1  ;;  %v10024_v11 = vpop.f32.mrb[55].mxu0 }
 0x6dd   : > { %v11374_v43 = vrot.slane %v9686_v13, 6  ;;  %v17920_v52 = vadd.f32 %v11680_v49, %v11555_v35 }
 0x6de   : > { %v11500_v1 = vadd.f32 %v11373_v58, %v11248_v24  ;;  %v11123_v40 = vsel %vm8461_vm6, %v11121_v16, %v11122_v44  ;;  %12908 = vmatmul.mubr.msk.bf16.gmra.mrb[96].mxu1 %vm3462_vm3, %v17231_v19 }
 0x6df   : > { %v11249_v21 = vadd.f32 %v11123_v40, %v18816_v7  ;;  %v11375_v56 = vsel %vm1370_vm0, %v11373_v58, %v11374_v43  ;;  %12911 = vmatprep.mubr.msk.bf16.mxu1 %vm3462_vm3, %v17245_v20 }
 0x6e0   : > { %v11556_v28 = vadd.f32 %v11500_v1, %v10011_v47 }
 0x6e1   : > { %v11501_v54 = vadd.f32 %v11375_v56, %v11249_v21  ;;  %v9690_v22 = vpop.f32.mrb[248].mxu1  ;;  %v10027_v51 = vpop.f32.mrb[56].mxu0  ;;  %v18817_v56 = vld [vmem:[#allocation18_spill] sm:$0xff] }
 0x6e2   : > { %v9691_v38 = vpop.f32.mrb[249].mxu1  ;;  %v10028_v49 = vpop.f32.mrb[57].mxu0  ;;  %v17929_v5 = vadd.f32 %v11681_v4, %v11556_v28 }
 0x6e3   : > { %v11557_v29 = vadd.f32 %v11501_v54, %v10015_v59  ;;  %v9692_v16 = vpop.f32.mrb[250].mxu1  ;;  %v10029_v60 = vpop.f32.mrb[58].mxu0 }
 0x6e4   : > { %v9693_v35 = vpop.f32.mrb[251].mxu1  ;;  %v10030_v19 = vpop.f32.mrb[59].mxu0  ;;  %v18818_v16 = vld [vmem:[#allocation21_spill] sm:$0xff] }
 0x6e5   : > { %v17931_v14 = vadd.f32 %v11683_v27, %v11557_v29 }
 0x6e6   : > { %12912 = vmatmul.mubr.msk.bf16.gmra.mrb[100].mxu1 %vm3462_vm3, %v17259_v34 }
 0x6e7   : > { %12915 = vmatprep.mubr.msk.bf16.mxu1 %vm3462_vm3, %v17273_v32 }
 0x6e9   : > { %v9696_v20 = vpop.f32.mrb[252].mxu1  ;;  %v10033_v47 = vpop.f32.mrb[60].mxu0 }
 0x6ea   : > { %v9697_v58 = vpop.f32.mrb[253].mxu1  ;;  %v10035_v50 = vpop.f32.mrb[61].mxu0 }
 0x6eb   : > { %v9698_v36 = vpop.f32.mrb[254].mxu1  ;;  %v10037_v4 = vpop.f32.mrb[62].mxu0  ;;  %v11684_v44 = vrot.slane %v10035_v50, 7 }
 0x6ec   : > { %v9699_v24 = vpop.f32.mrb[255].mxu1  ;;  %v10039_v59 = vpop.f32.mrb[63].mxu0 }
 0x6ed   : > { %v11685_v13 = vrot.slane %v10039_v59, 7 }
 0x6ee   : > { %12916 = vmatmul.mubr.msk.bf16.gmra.mrb[104].mxu1 %vm3462_vm3, %v17287_v62 }
 0x6ef   : > { %12919 = vmatprep.mubr.msk.bf16.mxu1 %vm3462_vm3, %v17301_v61  ;;  %v11686_v34 = vsel %vm8461_vm6, %v11684_v44, %v11685_v13 }
 0x6f1   : > { %v9702_v27 = vpop.f32.mrb[0].mxu1  ;;  %v10043_v32 = vpop.f32.mrb[64].mxu0 }
 0x6f2   : > { %v11124_v11 = vrot.slane %v9702_v27, 7  ;;  %v9704_v43 = vpop.f32.mrb[1].mxu1  ;;  %v10045_v1 = vpop.f32.mrb[65].mxu0 }
 0x6f3   : > { %v11376_v40 = vrot.slane %v9704_v43, 6  ;;  %v9706_v7 = vpop.f32.mrb[2].mxu1  ;;  %v10047_v21 = vpop.f32.mrb[66].mxu0  ;;  %v11687_v38 = vrot.slane %v10045_v1, 7 }
 0x6f4   : > { %v11250_v28 = vadd.f32 %v11124_v11, %v18817_v56  ;;  %v11125_v54 = vrot.slane %v9706_v7, 7  ;;  %v9708_v22 = vpop.f32.mrb[3].mxu1  ;;  %v10049_v51 = vpop.f32.mrb[67].mxu0  ;;  %v18819_v7 = vld [vmem:[#allocation45_spill] sm:$0xff] }
 0x6f5   : > { %v11377_v62 = vrot.slane %v9708_v22, 6  ;;  %v11688_v49 = vrot.slane %v10049_v51, 7 }
 0x6f6   : > { %v11502_v29 = vadd.f32 %v11376_v40, %v11250_v28  ;;  %v11126_v61 = vsel %vm8461_vm6, %v11124_v11, %v11125_v54  ;;  %12920 = vmatmul.mubr.msk.bf16.gmra.mrb[108].mxu1 %vm3462_vm3, %v17315_v6 }
 0x6f7   : > { %v11251_v60 = vadd.f32 %v11126_v61, %v18818_v16  ;;  %v11378_v35 = vsel %vm1370_vm0, %v11376_v40, %v11377_v62  ;;  %v11689_v19 = vsel %vm8461_vm6, %v11687_v38, %v11688_v49  ;;  %12923 = vmatprep.mubr.msk.bf16.mxu1 %vm3462_vm3, %v17329_v42 }
 0x6f8   : > { %v11558_v20 = vadd.f32 %v11502_v29, %v10033_v47  ;;  %v18820_v29 = vld [vmem:[#allocation10_spill] sm:$0xff] }
 0x6f9   : > { %v11503_v58 = vadd.f32 %v11378_v35, %v11251_v60  ;;  %v9712_v50 = vpop.f32.mrb[4].mxu1  ;;  %v10053_v36 = vpop.f32.mrb[68].mxu0  ;;  %v18822_v60 = vld [vmem:[#allocation65_spill] sm:$0xff] }
 0x6fa   : > { %v11127_v24 = vrot.slane %v9712_v50, 7  ;;  %v9714_v59 = vpop.f32.mrb[5].mxu1  ;;  %v10055_v13 = vpop.f32.mrb[69].mxu0  ;;  %v17951_v27 = vadd.f32 %v11684_v44, %v11558_v20 }
 0x6fb   : > { %v11559_v11 = vadd.f32 %v11503_v58, %v10037_v4  ;;  %v11379_v6 = vrot.slane %v9714_v59, 6  ;;  %v9716_v43 = vpop.f32.mrb[6].mxu1  ;;  %v10057_v1 = vpop.f32.mrb[70].mxu0  ;;  %v11690_v22 = vrot.slane %v10055_v13, 7  ;;  %v18821_v4 = vld [vmem:[#allocation43_spill] sm:$0xff] }
 0x6fc   : > { %v11252_v40 = vadd.f32 %v11127_v24, %v18819_v7  ;;  %v11128_v56 = vrot.slane %v9716_v43, 7  ;;  %v9718_v28 = vpop.f32.mrb[7].mxu1  ;;  %v10059_v54 = vpop.f32.mrb[71].mxu0 }
 0x6fd   : > { %v11380_v42 = vrot.slane %v9718_v28, 6  ;;  %v11691_v47 = vrot.slane %v10059_v54, 7  ;;  %v17954_v51 = vadd.f32 %v11686_v34, %v11559_v11 }
 0x6fe   : > { %v11504_v62 = vadd.f32 %v11379_v6, %v11252_v40  ;;  %v11129_v49 = vsel %vm8461_vm6, %v11127_v24, %v11128_v56  ;;  %12924 = vmatmul.mubr.msk.bf16.gmra.mrb[112].mxu1 %vm3462_vm3, %v18820_v29  ;;  %v18823_v56 = vld [vmem:[#allocation23_spill] sm:$0xff] }
 0x6ff   : > { %v11253_v44 = vadd.f32 %v11129_v49, %v18821_v4  ;;  %v11381_v61 = vsel %vm1370_vm0, %v11379_v6, %v11380_v42  ;;  %v11692_v16 = vsel %vm8461_vm6, %v11690_v22, %v11691_v47  ;;  %12927 = vmatprep.mubr.msk.bf16.mxu1 %vm3462_vm3, %v18822_v60 }
 0x700   : > { %v11560_v35 = vadd.f32 %v11504_v62, %v10043_v32 }
 0x701   : > { %v11505_v20 = vadd.f32 %v11381_v61, %v11253_v44  ;;  %v9722_v58 = vpop.f32.mrb[8].mxu1  ;;  %v10063_v34 = vpop.f32.mrb[72].mxu0 }
 0x702   : > { %v11130_v50 = vrot.slane %v9722_v58, 7  ;;  %v9724_v59 = vpop.f32.mrb[9].mxu1  ;;  %v10065_v13 = vpop.f32.mrb[73].mxu0  ;;  %v17964_v24 = vadd.f32 %v11687_v38, %v11560_v35 }
 0x703   : > { %v11561_v11 = vadd.f32 %v11505_v20, %v10047_v21  ;;  %v11382_v43 = vrot.slane %v9724_v59, 6  ;;  %v9726_v7 = vpop.f32.mrb[10].mxu1  ;;  %v10067_v40 = vpop.f32.mrb[74].mxu0  ;;  %v11693_v47 = vrot.slane %v10065_v13, 7  ;;  %v18824_v21 = vld [vmem:[#allocation57_spill] sm:$0xff] }
 0x704   : > { %v11254_v6 = vadd.f32 %v11130_v50, %v18823_v56  ;;  %v11131_v28 = vrot.slane %v9726_v7, 7  ;;  %v9728_v54 = vpop.f32.mrb[11].mxu1  ;;  %v10069_v42 = vpop.f32.mrb[75].mxu0 }
 0x705   : > { %v11383_v49 = vrot.slane %v9728_v54, 6  ;;  %v11694_v32 = vrot.slane %v10069_v42, 7  ;;  %v17967_v62 = vadd.f32 %v11689_v19, %v11561_v11 }
 0x706   : > { %v11506_v29 = vadd.f32 %v11382_v43, %v11254_v6  ;;  %v11132_v4 = vsel %vm8461_vm6, %v11130_v50, %v11131_v28  ;;  %12928 = vmatmul.mubr.msk.bf16.gmra.mrb[116].mxu1 %vm3462_vm3, %v17372_v41  ;;  %v18825_v6 = vld [vmem:[#allocation34_spill] sm:$0xff] }
 0x707   : > { %v11255_v38 = vadd.f32 %v11132_v4, %v18824_v21  ;;  %v11384_v44 = vsel %vm1370_vm0, %v11382_v43, %v11383_v49  ;;  %v11695_v61 = vsel %vm8461_vm6, %v11693_v47, %v11694_v32  ;;  %12931 = vmatprep.mubr.msk.bf16.mxu1 %vm3462_vm3, %v17389_v30 }
 0x708   : > { %v11562_v60 = vadd.f32 %v11506_v29, %v10053_v36 }
 0x709   : > { %v11507_v35 = vadd.f32 %v11384_v44, %v11255_v38  ;;  %v9732_v20 = vpop.f32.mrb[12].mxu1  ;;  %v10073_v19 = vpop.f32.mrb[76].mxu0 }
 0x70a   : > { %v11133_v58 = vrot.slane %v9732_v20, 7  ;;  %v9734_v59 = vpop.f32.mrb[13].mxu1  ;;  %v10075_v13 = vpop.f32.mrb[77].mxu0  ;;  %v17977_v50 = vadd.f32 %v11690_v22, %v11562_v60 }
 0x70b   : > { %v11563_v11 = vadd.f32 %v11507_v35, %v10057_v1  ;;  %v11385_v41 = vrot.slane %v9734_v59, 6  ;;  %v9736_v7 = vpop.f32.mrb[14].mxu1  ;;  %v10077_v56 = vpop.f32.mrb[78].mxu0  ;;  %v11696_v49 = vrot.slane %v10075_v13, 7  ;;  %v18827_v1 = vld [vmem:[#allocation3_spill] sm:$0xff] }
 0x70c   : > { %v11256_v43 = vadd.f32 %v11133_v58, %v18825_v6  ;;  %v11134_v28 = vrot.slane %v9736_v7, 7  ;;  %v9738_v54 = vpop.f32.mrb[15].mxu1  ;;  %v10079_v42 = vpop.f32.mrb[79].mxu0 }
 0x70d   : > { %v11386_v30 = vrot.slane %v9738_v54, 6  ;;  %v11697_v36 = vrot.slane %v10079_v42, 7  ;;  %v17980_v32 = vadd.f32 %v11692_v16, %v11563_v11 }
 0x70e   : > { %v11508_v29 = vadd.f32 %v11385_v41, %v11256_v43  ;;  %v11135_v4 = vsel %vm8461_vm6, %v11133_v58, %v11134_v28  ;;  %12932 = vmatmul.mubr.msk.bf16.gmra.mrb[120].mxu1 %vm3462_vm3, %v18748_v23  ;;  %v18828_v23 = vld [vmem:[#allocation30_spill] sm:$0xff] }
 0x70f   : > { %18826 = vst [vmem:[#allocation31_spill] sm:$0xff] %v17980_v32  ;;  %v11257_v22 = vadd.f32 %v11135_v4, %v18827_v1  ;;  %v11387_v21 = vsel %vm1370_vm0, %v11385_v41, %v11386_v30  ;;  %v11698_v38 = vsel %vm8461_vm6, %v11696_v49, %v11697_v36 }
 0x710   : > { %v11564_v44 = vadd.f32 %v11508_v29, %v10063_v34 }
 0x711   : > { %v11509_v60 = vadd.f32 %v11387_v21, %v11257_v22  ;;  %v9742_v35 = vpop.f32.mrb[16].mxu1  ;;  %v10083_v20 = vpop.f32.mrb[80].mxu0  ;;  %v18829_v22 = vld [vmem:[#allocation15_spill] sm:$0xff] }
 0x712   : > { %v11136_v59 = vrot.slane %v9742_v35, 7  ;;  %v9744_v13 = vpop.f32.mrb[17].mxu1  ;;  %v10085_v16 = vpop.f32.mrb[81].mxu0  ;;  %v17988_v11 = vadd.f32 %v11693_v47, %v11564_v44 }
 0x713   : > { %v11565_v7 = vadd.f32 %v11509_v60, %v10067_v40  ;;  %v11388_v58 = vrot.slane %v9744_v13, 6  ;;  %v9746_v6 = vpop.f32.mrb[18].mxu1  ;;  %v10087_v43 = vpop.f32.mrb[82].mxu0  ;;  %v11699_v30 = vrot.slane %v10085_v16, 7 }
 0x714   : > { %v11258_v28 = vadd.f32 %v11136_v59, %v18828_v23  ;;  %v11137_v54 = vrot.slane %v9746_v6, 7  ;;  %v9748_v42 = vpop.f32.mrb[19].mxu1  ;;  %v10089_v41 = vpop.f32.mrb[83].mxu0 }
 0x715   : > { %v11389_v36 = vrot.slane %v9748_v42, 6  ;;  %v11700_v34 = vrot.slane %v10089_v41, 7  ;;  %v17991_v29 = vadd.f32 %v11695_v61, %v11565_v7 }
 0x716   : > { %v11510_v4 = vadd.f32 %v11388_v58, %v11258_v28  ;;  %v11138_v1 = vsel %vm8461_vm6, %v11136_v59, %v11137_v54  ;;  %v18831_v59 = vld [vmem:[#allocation51_spill] sm:$0xff] }
 0x717   : > { %v11259_v47 = vadd.f32 %v11138_v1, %v18829_v22  ;;  %v11390_v40 = vsel %vm1370_vm0, %v11388_v58, %v11389_v36  ;;  %v11701_v21 = vsel %vm8461_vm6, %v11699_v30, %v11700_v34 }
 0x718   : > { %v11566_v44 = vadd.f32 %v11510_v4, %v10073_v19 }
 0x719   : > { %v11511_v60 = vadd.f32 %v11390_v40, %v11259_v47  ;;  %v9752_v35 = vpop.f32.mrb[20].mxu1  ;;  %v10093_v13 = vpop.f32.mrb[84].mxu0 }
 0x71a   : > { %v11139_v6 = vrot.slane %v9752_v35, 7  ;;  %v9754_v23 = vpop.f32.mrb[21].mxu1  ;;  %v10095_v16 = vpop.f32.mrb[85].mxu0  ;;  %v17997_v42 = vadd.f32 %v11696_v49, %v11566_v44  ;;  %v18833_v35 = vld [vmem:[#allocation53_spill] sm:$0xff] }
 0x71b   : > { %v11567_v61 = vadd.f32 %v11511_v60, %v10077_v56  ;;  %v11391_v7 = vrot.slane %v9754_v23, 6  ;;  %v9756_v28 = vpop.f32.mrb[22].mxu1  ;;  %v10097_v41 = vpop.f32.mrb[86].mxu0  ;;  %v11702_v36 = vrot.slane %v10095_v16, 7 }
 0x71c   : > { %18830 = vst [vmem:[#allocation33_spill] sm:$0xff] %v17997_v42  ;;  %v11260_v54 = vadd.f32 %v11139_v6, %v18831_v59  ;;  %v11140_v1 = vrot.slane %v9756_v28, 7  ;;  %v9758_v22 = vpop.f32.mrb[23].mxu1  ;;  %v10099_v58 = vpop.f32.mrb[87].mxu0 }
 0x71d   : > { %v11392_v34 = vrot.slane %v9758_v22, 6  ;;  %v11703_v19 = vrot.slane %v10099_v58, 7  ;;  %v18000_v4 = vadd.f32 %v11698_v38, %v11567_v61 }
 0x71e   : > { %v11512_v47 = vadd.f32 %v11391_v7, %v11260_v54  ;;  %v11141_v40 = vsel %vm8461_vm6, %v11139_v6, %v11140_v1  ;;  %v18835_v6 = vld [vmem:[#allocation69_spill] sm:$0xff] }
 0x71f   : > { %18832 = vst [vmem:[#allocation68_spill] sm:$0xff] %v18000_v4  ;;  %v11261_v49 = vadd.f32 %v11141_v40, %v18833_v35  ;;  %v11393_v56 = vsel %vm1370_vm0, %v11391_v7, %v11392_v34  ;;  %v11704_v44 = vsel %vm8461_vm6, %v11702_v36, %v11703_v19 }
 0x720   : > { %v11568_v60 = vadd.f32 %v11512_v47, %v10083_v20 }
 0x721   : > { %v11513_v23 = vadd.f32 %v11393_v56, %v11261_v49  ;;  %v9762_v59 = vpop.f32.mrb[24].mxu1  ;;  %v10103_v28 = vpop.f32.mrb[88].mxu0 }
 0x722   : > { %v11142_v42 = vrot.slane %v9762_v59, 7  ;;  %v9764_v32 = vpop.f32.mrb[25].mxu1  ;;  %v10105_v16 = vpop.f32.mrb[89].mxu0  ;;  %v18006_v22 = vadd.f32 %v11699_v30, %v11568_v60  ;;  %v18837_v59 = vld [vmem:[#allocation6_spill] sm:$0xff] }
 0x723   : > { %v11569_v38 = vadd.f32 %v11513_v23, %v10087_v43  ;;  %v11394_v61 = vrot.slane %v9764_v32, 6  ;;  %v9766_v54 = vpop.f32.mrb[26].mxu1  ;;  %v10107_v58 = vpop.f32.mrb[90].mxu0  ;;  %v11705_v34 = vrot.slane %v10105_v16, 7 }
 0x724   : > { %18834 = vst [vmem:[#allocation73_spill] sm:$0xff] %v18006_v22  ;;  %v11262_v1 = vadd.f32 %v11142_v42, %v18835_v6  ;;  %v11143_v40 = vrot.slane %v9766_v54, 7  ;;  %v9768_v35 = vpop.f32.mrb[27].mxu1  ;;  %v10109_v7 = vpop.f32.mrb[91].mxu0 }
 0x725   : > { %v11395_v19 = vrot.slane %v9768_v35, 6  ;;  %v11706_v20 = vrot.slane %v10109_v7, 7  ;;  %v18009_v47 = vadd.f32 %v11701_v21, %v11569_v38 }
 0x726   : > { %v11514_v49 = vadd.f32 %v11394_v61, %v11262_v1  ;;  %v11144_v56 = vsel %vm8461_vm6, %v11142_v42, %v11143_v40  ;;  %v18839_v42 = vld [vmem:[#allocation37_spill] sm:$0xff] }
 0x727   : > { %18836 = vst [vmem:[#allocation8_spill] sm:$0xff] %v18009_v47  ;;  %v11263_v30 = vadd.f32 %v11144_v56, %v18837_v59  ;;  %v11396_v43 = vsel %vm1370_vm0, %v11394_v61, %v11395_v19  ;;  %v11707_v32 = vsel %vm8461_vm6, %v11705_v34, %v11706_v20 }
 0x728   : > { %v11570_v60 = vadd.f32 %v11514_v49, %v10093_v13 }
 0x729   : > { %v11515_v23 = vadd.f32 %v11396_v43, %v11263_v30  ;;  %v9772_v6 = vpop.f32.mrb[28].mxu1  ;;  %v10113_v54 = vpop.f32.mrb[92].mxu0 }
 0x72a   : > { %v11145_v4 = vrot.slane %v9772_v6, 7  ;;  %v9774_v22 = vpop.f32.mrb[29].mxu1  ;;  %v10115_v16 = vpop.f32.mrb[93].mxu0  ;;  %v18015_v35 = vadd.f32 %v11702_v36, %v11570_v60  ;;  %v18841_v6 = vld [vmem:[#allocation14_spill] sm:$0xff] }
 0x72b   : > { %v11571_v21 = vadd.f32 %v11515_v23, %v10097_v41  ;;  %v11397_v38 = vrot.slane %v9774_v22, 6  ;;  %v9776_v1 = vpop.f32.mrb[30].mxu1  ;;  %v10117_v7 = vpop.f32.mrb[94].mxu0  ;;  %v11708_v19 = vrot.slane %v10115_v16, 7 }
 0x72c   : > { %18838 = vst [vmem:[#allocation32_spill] sm:$0xff] %v18015_v35  ;;  %v11264_v40 = vadd.f32 %v11145_v4, %v18839_v42  ;;  %v11146_v56 = vrot.slane %v9776_v1, 7  ;;  %v9778_v59 = vpop.f32.mrb[31].mxu1  ;;  %v10119_v61 = vpop.f32.mrb[95].mxu0 }
 0x72d   : > { %v11398_v20 = vrot.slane %v9778_v59, 6  ;;  %v11709_v13 = vrot.slane %v10119_v61, 7  ;;  %v18018_v49 = vadd.f32 %v11704_v44, %v11571_v21 }
 0x72e   : > { %v11516_v30 = vadd.f32 %v11397_v38, %v11264_v40  ;;  %v11147_v43 = vsel %vm8461_vm6, %v11145_v4, %v11146_v56  ;;  %v18843_v4 = vld [vmem:[#allocation52_spill] sm:$0xff] }
 0x72f   : > { %18840 = vst [vmem:[#allocation72_spill] sm:$0xff] %v18018_v49  ;;  %v11265_v36 = vadd.f32 %v11147_v43, %v18841_v6  ;;  %v11399_v41 = vsel %vm1370_vm0, %v11397_v38, %v11398_v20  ;;  %v11710_v22 = vsel %vm8461_vm6, %v11708_v19, %v11709_v13 }
 0x730   : > { %v11572_v60 = vadd.f32 %v11516_v30, %v10103_v28 }
 0x731   : > { %v11517_v23 = vadd.f32 %v11399_v41, %v11265_v36  ;;  %v9782_v42 = vpop.f32.mrb[32].mxu1  ;;  %v10123_v1 = vpop.f32.mrb[96].mxu0 }
 0x732   : > { %v11148_v35 = vrot.slane %v9782_v42, 7  ;;  %v9784_v47 = vpop.f32.mrb[33].mxu1  ;;  %v10125_v16 = vpop.f32.mrb[97].mxu0  ;;  %v18024_v59 = vadd.f32 %v11705_v34, %v11572_v60  ;;  %v18845_v42 = vld [vmem:[#allocation58_spill] sm:$0xff] }
 0x733   : > { %v11573_v44 = vadd.f32 %v11517_v23, %v10107_v58  ;;  %v11400_v21 = vrot.slane %v9784_v47, 6  ;;  %v9786_v40 = vpop.f32.mrb[34].mxu1  ;;  %v10127_v61 = vpop.f32.mrb[98].mxu0  ;;  %v11711_v20 = vrot.slane %v10125_v16, 7 }
 0x734   : > { %18842 = vst [vmem:[#allocation39_spill] sm:$0xff] %v18024_v59  ;;  %v11266_v56 = vadd.f32 %v11148_v35, %v18843_v4  ;;  %v11149_v43 = vrot.slane %v9786_v40, 7  ;;  %v9788_v6 = vpop.f32.mrb[35].mxu1  ;;  %v10129_v38 = vpop.f32.mrb[99].mxu0 }
 0x735   : > { %v11401_v13 = vrot.slane %v9788_v6, 6  ;;  %v11712_v28 = vrot.slane %v10129_v38, 7  ;;  %v18027_v30 = vadd.f32 %v11707_v32, %v11573_v44 }
 0x736   : > { %v11518_v36 = vadd.f32 %v11400_v21, %v11266_v56  ;;  %v11150_v41 = vsel %vm8461_vm6, %v11148_v35, %v11149_v43  ;;  %v18847_v35 = vld [vmem:[#allocation25_spill] sm:$0xff] }
 0x737   : > { %18844 = vst [vmem:[#allocation42_spill] sm:$0xff] %v18027_v30  ;;  %v11267_v34 = vadd.f32 %v11150_v41, %v18845_v42  ;;  %v11402_v58 = vsel %vm1370_vm0, %v11400_v21, %v11401_v13  ;;  %v11713_v47 = vsel %vm8461_vm6, %v11711_v20, %v11712_v28 }
 0x738   : > { %v11574_v60 = vadd.f32 %v11518_v36, %v10113_v54 }
 0x739   : > { %v11519_v23 = vadd.f32 %v11402_v58, %v11267_v34  ;;  %v9792_v4 = vpop.f32.mrb[36].mxu1  ;;  %v10133_v40 = vpop.f32.mrb[100].mxu0 }
 0x73a   : > { %v11151_v49 = vrot.slane %v9792_v4, 7  ;;  %v9794_v59 = vpop.f32.mrb[37].mxu1  ;;  %v10135_v16 = vpop.f32.mrb[101].mxu0  ;;  %v18033_v6 = vadd.f32 %v11708_v19, %v11574_v60  ;;  %v18849_v4 = vld [vmem:[#allocation24_spill] sm:$0xff] }
 0x73b   : > { %v11575_v32 = vadd.f32 %v11519_v23, %v10117_v7  ;;  %v11403_v44 = vrot.slane %v9794_v59, 6  ;;  %v9796_v56 = vpop.f32.mrb[38].mxu1  ;;  %v10137_v38 = vpop.f32.mrb[102].mxu0  ;;  %v11714_v13 = vrot.slane %v10135_v16, 7 }
 0x73c   : > { %18846 = vst [vmem:[#allocation40_spill] sm:$0xff] %v18033_v6  ;;  %v11268_v43 = vadd.f32 %v11151_v49, %v18847_v35  ;;  %v11152_v41 = vrot.slane %v9796_v56, 7  ;;  %v9798_v42 = vpop.f32.mrb[39].mxu1  ;;  %v10139_v21 = vpop.f32.mrb[103].mxu0 }
 0x73d   : > { %v11404_v28 = vrot.slane %v9798_v42, 6  ;;  %v11715_v54 = vrot.slane %v10139_v21, 7  ;;  %v18036_v36 = vadd.f32 %v11710_v22, %v11575_v32 }
 0x73e   : > { %v11520_v34 = vadd.f32 %v11403_v44, %v11268_v43  ;;  %v11153_v58 = vsel %vm8461_vm6, %v11151_v49, %v11152_v41  ;;  %v18851_v49 = vld [vmem:[#allocation46_spill] sm:$0xff] }
 0x73f   : > { %18848 = vst [vmem:[#allocation64_spill] sm:$0xff] %v18036_v36  ;;  %v11269_v19 = vadd.f32 %v11153_v58, %v18849_v4  ;;  %v11405_v7 = vsel %vm1370_vm0, %v11403_v44, %v11404_v28  ;;  %v11716_v59 = vsel %vm8461_vm6, %v11714_v13, %v11715_v54 }
 0x740   : > { %v11576_v60 = vadd.f32 %v11520_v34, %v10123_v1 }
 0x741   : > { %v11521_v23 = vadd.f32 %v11405_v7, %v11269_v19  ;;  %v9802_v35 = vpop.f32.mrb[40].mxu1  ;;  %v10143_v56 = vpop.f32.mrb[104].mxu0 }
 0x742   : > { %v11154_v6 = vrot.slane %v9802_v35, 7  ;;  %v9804_v30 = vpop.f32.mrb[41].mxu1  ;;  %v10145_v16 = vpop.f32.mrb[105].mxu0  ;;  %v18042_v42 = vadd.f32 %v11711_v20, %v11576_v60  ;;  %v18853_v35 = vld [vmem:[#allocation71_spill] sm:$0xff] }
 0x743   : > { %v11577_v22 = vadd.f32 %v11521_v23, %v10127_v61  ;;  %v11406_v32 = vrot.slane %v9804_v30, 6  ;;  %v9806_v43 = vpop.f32.mrb[42].mxu1  ;;  %v10147_v21 = vpop.f32.mrb[106].mxu0  ;;  %v11717_v28 = vrot.slane %v10145_v16, 7 }
 0x744   : > { %18850 = vst [vmem:[#allocation78_spill] sm:$0xff] %v18042_v42  ;;  %v11270_v41 = vadd.f32 %v11154_v6, %v18851_v49  ;;  %v11155_v58 = vrot.slane %v9806_v43, 7  ;;  %v9808_v4 = vpop.f32.mrb[43].mxu1  ;;  %v10149_v44 = vpop.f32.mrb[107].mxu0 }
 0x745   : > { %v11407_v54 = vrot.slane %v9808_v4, 6  ;;  %v11718_v1 = vrot.slane %v10149_v44, 7  ;;  %v18045_v34 = vadd.f32 %v11713_v47, %v11577_v22 }
 0x746   : > { %v11522_v19 = vadd.f32 %v11406_v32, %v11270_v41  ;;  %v11156_v7 = vsel %vm8461_vm6, %v11154_v6, %v11155_v58  ;;  %v18855_v6 = vld [vmem:[#allocation26_spill] sm:$0xff] }
 0x747   : > { %18852 = vst [vmem:[#allocation75_spill] sm:$0xff] %v18045_v34  ;;  %v11271_v20 = vadd.f32 %v11156_v7, %v18853_v35  ;;  %v11408_v61 = vsel %vm1370_vm0, %v11406_v32, %v11407_v54  ;;  %v11719_v30 = vsel %vm8461_vm6, %v11717_v28, %v11718_v1 }
 0x748   : > { %v11578_v60 = vadd.f32 %v11522_v19, %v10133_v40 }
 0x749   : > { %v11523_v23 = vadd.f32 %v11408_v61, %v11271_v20  ;;  %v9812_v49 = vpop.f32.mrb[44].mxu1  ;;  %v10153_v43 = vpop.f32.mrb[108].mxu0 }
 0x74a   : > { %v11157_v36 = vrot.slane %v9812_v49, 7  ;;  %v9814_v42 = vpop.f32.mrb[45].mxu1  ;;  %v10155_v16 = vpop.f32.mrb[109].mxu0  ;;  %v18051_v4 = vadd.f32 %v11714_v13, %v11578_v60  ;;  %v18857_v49 = vld [vmem:[#allocation41_spill] sm:$0xff] }
 0x74b   : > { %v11579_v47 = vadd.f32 %v11523_v23, %v10137_v38  ;;  %v11409_v22 = vrot.slane %v9814_v42, 6  ;;  %v9816_v41 = vpop.f32.mrb[46].mxu1  ;;  %v10157_v44 = vpop.f32.mrb[110].mxu0  ;;  %v11720_v54 = vrot.slane %v10155_v16, 7 }
 0x74c   : > { %18854 = vst [vmem:[#allocation2_spill] sm:$0xff] %v18051_v4  ;;  %v11272_v58 = vadd.f32 %v11157_v36, %v18855_v6  ;;  %v11158_v7 = vrot.slane %v9816_v41, 7  ;;  %v9818_v35 = vpop.f32.mrb[47].mxu1  ;;  %v10159_v32 = vpop.f32.mrb[111].mxu0 }
 0x74d   : > { %v11410_v1 = vrot.slane %v9818_v35, 6  ;;  %v11721_v40 = vrot.slane %v10159_v32, 7  ;;  %v18054_v19 = vadd.f32 %v11716_v59, %v11579_v47 }
 0x74e   : > { %v11524_v20 = vadd.f32 %v11409_v22, %v11272_v58  ;;  %v11159_v61 = vsel %vm8461_vm6, %v11157_v36, %v11158_v7  ;;  %v18859_v36 = vld [vmem:[#allocation49_spill] sm:$0xff] }
 0x74f   : > { %18856 = vst [vmem:[#allocation76_spill] sm:$0xff] %v18054_v19  ;;  %v11273_v13 = vadd.f32 %v11159_v61, %v18857_v49  ;;  %v11411_v38 = vsel %vm1370_vm0, %v11409_v22, %v11410_v1  ;;  %v11722_v42 = vsel %vm8461_vm6, %v11720_v54, %v11721_v40 }
 0x750   : > { %v11580_v60 = vadd.f32 %v11524_v20, %v10143_v56 }
 0x751   : > { %v11525_v23 = vadd.f32 %v11411_v38, %v11273_v13  ;;  %v9822_v6 = vpop.f32.mrb[48].mxu1  ;;  %v10163_v41 = vpop.f32.mrb[112].mxu0 }
 0x752   : > { %v11160_v4 = vrot.slane %v9822_v6, 7  ;;  %v9824_v34 = vpop.f32.mrb[49].mxu1  ;;  %v10165_v16 = vpop.f32.mrb[113].mxu0  ;;  %v18060_v35 = vadd.f32 %v11717_v28, %v11580_v60  ;;  %v18860_v6 = vld [vmem:[#allocation54_spill] sm:$0xff] }
 0x753   : > { %v11581_v59 = vadd.f32 %v11525_v23, %v10147_v21  ;;  %v11412_v47 = vrot.slane %v9824_v34, 6  ;;  %v9826_v58 = vpop.f32.mrb[50].mxu1  ;;  %v10167_v32 = vpop.f32.mrb[114].mxu0  ;;  %v11723_v1 = vrot.slane %v10165_v16, 7 }
 0x754   : > { %18858 = vst [vmem:[#allocation61_spill] sm:$0xff] %v18060_v35  ;;  %v11274_v7 = vadd.f32 %v11160_v4, %v18859_v36  ;;  %v11161_v61 = vrot.slane %v9826_v58, 7  ;;  %v9828_v49 = vpop.f32.mrb[51].mxu1  ;;  %v10169_v22 = vpop.f32.mrb[115].mxu0 }
 0x755   : > { %v11413_v40 = vrot.slane %v9828_v49, 6  ;;  %v11724_v56 = vrot.slane %v10169_v22, 7  ;;  %v18063_v20 = vadd.f32 %v11719_v30, %v11581_v59 }
 0x756   : > { %v11526_v13 = vadd.f32 %v11412_v47, %v11274_v7  ;;  %v11162_v38 = vsel %vm8461_vm6, %v11160_v4, %v11161_v61  ;;  %v18861_v4 = vld [vmem:[#allocation4_spill] sm:$0xff] }
 0x757   : > { %v11275_v28 = vadd.f32 %v11162_v38, %v18860_v6  ;;  %v11414_v21 = vsel %vm1370_vm0, %v11412_v47, %v11413_v40  ;;  %v11725_v34 = vsel %vm8461_vm6, %v11723_v1, %v11724_v56 }
 0x758   : > { %v11582_v60 = vadd.f32 %v11526_v13, %v10153_v43 }
 0x759   : > { %v11527_v23 = vadd.f32 %v11414_v21, %v11275_v28  ;;  %v9832_v36 = vpop.f32.mrb[52].mxu1  ;;  %v10173_v58 = vpop.f32.mrb[116].mxu0  ;;  %v18862_v28 = vld [vmem:[#allocation67_spill] sm:$0xff] }
 0x75a   : > { %v11163_v19 = vrot.slane %v9832_v36, 7  ;;  %v9834_v35 = vpop.f32.mrb[53].mxu1  ;;  %v10174_v16 = vpop.f32.mrb[117].mxu0  ;;  %v18069_v49 = vadd.f32 %v11720_v54, %v11582_v60 }
 0x75b   : > { %v11583_v30 = vadd.f32 %v11527_v23, %v10157_v44  ;;  %v11415_v59 = vrot.slane %v9834_v35, 6  ;;  %v9836_v7 = vpop.f32.mrb[54].mxu1  ;;  %v10175_v22 = vpop.f32.mrb[118].mxu0 }
 0x75c   : > { %v11276_v61 = vadd.f32 %v11163_v19, %v18861_v4  ;;  %v11164_v38 = vrot.slane %v9836_v7, 7  ;;  %v9838_v6 = vpop.f32.mrb[55].mxu1  ;;  %v10176_v47 = vpop.f32.mrb[119].mxu0 }
 0x75d   : > { %v11416_v40 = vrot.slane %v9838_v6, 6  ;;  %v18072_v56 = vadd.f32 %v11722_v42, %v11583_v30 }
 0x75e   : > { %v11528_v43 = vadd.f32 %v11415_v59, %v11276_v61  ;;  %v11165_v13 = vsel %vm8461_vm6, %v11163_v19, %v11164_v38 }
 0x75f   : > { %v11277_v21 = vadd.f32 %v11165_v13, %v18862_v28  ;;  %v11417_v54 = vsel %vm1370_vm0, %v11415_v59, %v11416_v40 }
 0x760   : > { %v11584_v60 = vadd.f32 %v11528_v43, %v10163_v41  ;;  %v18084_v41 = vld [vmem:[%s18303_s11] ss:$0 sm:$0xff] }
 0x761   : > { %v11529_v44 = vadd.f32 %v11417_v54, %v11277_v21  ;;  %v9842_v35 = vpop.f32.mrb[56].mxu1  ;;  %v10179_v23 = vpop.f32.mrb[120].mxu0 }
 0x762   : > { %v9843_v36 = vpop.f32.mrb[57].mxu1  ;;  %v18077_v58 = vadd.f32 %v11723_v1, %v11584_v60  ;;  %v10180_v16 = vpop.f32.mrb[121].mxu0 }
 0x763   : > { %v11585_v7 = vadd.f32 %v11529_v44, %v10167_v32  ;;  %v9844_v22 = vpop.f32.mrb[58].mxu1  ;;  %v10181_v42 = vpop.f32.mrb[122].mxu0 }
 0x764   : > { %v9845_v30 = vpop.f32.mrb[59].mxu1  ;;  %v10182_v4 = vpop.f32.mrb[123].mxu0 }
 0x765   : > { %v18079_v61 = vadd.f32 %v11725_v34, %v11585_v7 }
 0x769   : > { %v12873_v19 = vpop.f32.mrb[60].mxu1 }
 0x76a   : > { %v11897_v38 = vrot.slane %v12873_v19, 6  ;;  %v10218_v6 = vpop.f32.mrb[61].mxu1 }
 0x76b   : > { %v11894_v59 = vrot.slane %v10218_v6, 6  ;;  %v12874_v1 = vpop.f32.mrb[62].mxu1 }
 0x76c   : > { %v12036_v47 = vadd.f32 %v11897_v38, %v17770_v31  ;;  %v11898_v40 = vrot.slane %v12874_v1, 6  ;;  %v10221_v32 = vpop.f32.mrb[63].mxu1 }
 0x76d   : > { %v12034_v34 = vadd.f32 %v11894_v59, %v17755_v9  ;;  %v11895_v43 = vrot.slane %v10221_v32, 6 }
 0x76e   : > { %v12099_v13 = vadd.f32 %v18084_v41, %v12036_v47  ;;  %v11899_v28 = vsel %vm1370_vm0, %v11897_v38, %v11898_v40 }
 0x76f   : > { %v12097_v31 = vadd.f32 %v18084_v41, %v12034_v34  ;;  %v12037_v21 = vadd.f32 %v11899_v28, %v17773_v55  ;;  %v11896_v54 = vsel %vm1370_vm0, %v11894_v59, %v11895_v43 }
 0x770   : > { %12155 = vst [vmem:[%s18092_s15 + $0xe] sm:$0xfc] %v12099_v13  ;;  %v12035_v60 = vadd.f32 %v11896_v54, %v17758_v37 }
 0x771   : > { %12153 = vst [vmem:[%s18092_s15 - $0x2] sm:$0xfc] %v12097_v31  ;;  %v12100_v44 = vadd.f32 %v18084_v41, %v12037_v21  ;;  %v12877_v35 = vpop.f32.mrb[64].mxu1 }
 0x772   : > { %v12098_v9 = vadd.f32 %v18084_v41, %v12035_v60  ;;  %v11903_v23 = vrot.slane %v12877_v35, 6  ;;  %v10234_v36 = vpop.f32.mrb[65].mxu1 }
 0x773   : > { %12156 = vst [vmem:[%s18092_s15 + $0x16] sm:$0xff] %v12100_v44  ;;  %v11900_v16 = vrot.slane %v10234_v36, 6  ;;  %v12878_v7 = vpop.f32.mrb[66].mxu1 }
 0x774   : > { %12154 = vst [vmem:[%s18092_s15 + $0x6] sm:$0xff] %v12098_v9  ;;  %v12040_v55 = vadd.f32 %v11903_v23, %v17800_v63  ;;  %v11904_v22 = vrot.slane %v12878_v7, 6  ;;  %v10237_v42 = vpop.f32.mrb[67].mxu1  ;;  %v18863_v9 = vld [vmem:[#allocation28_spill] sm:$0xff] }
 0x775   : > { %v12038_v37 = vadd.f32 %v11900_v16, %v17785_v15  ;;  %v11901_v30 = vrot.slane %v10237_v42, 6 }
 0x776   : > { %v12103_v4 = vadd.f32 %v18084_v41, %v12040_v55  ;;  %v11905_v19 = vsel %vm1370_vm0, %v11903_v23, %v11904_v22 }
 0x777   : > { %v12101_v38 = vadd.f32 %v18084_v41, %v12038_v37  ;;  %v12041_v6 = vadd.f32 %v11905_v19, %v17803_v8  ;;  %v11902_v59 = vsel %vm1370_vm0, %v11900_v16, %v11901_v30 }
 0x778   : > { %12159 = vst [vmem:[%s18092_s15 + $0x2e] sm:$0xfc] %v12103_v4  ;;  %v12039_v63 = vadd.f32 %v11902_v59, %v17788_v45 }
 0x779   : > { %12157 = vst [vmem:[%s18092_s15 + $0x1e] sm:$0xfc] %v12101_v38  ;;  %v12104_v1 = vadd.f32 %v18084_v41, %v12041_v6  ;;  %v12881_v47 = vpop.f32.mrb[68].mxu1 }
 0x77a   : > { %v12102_v15 = vadd.f32 %v18084_v41, %v12039_v63  ;;  %v11909_v40 = vrot.slane %v12881_v47, 6  ;;  %v10250_v32 = vpop.f32.mrb[69].mxu1 }
 0x77b   : > { %12160 = vst [vmem:[%s18092_s15 + $0x36] sm:$0xff] %v12104_v1  ;;  %v11906_v34 = vrot.slane %v10250_v32, 6  ;;  %v12882_v43 = vpop.f32.mrb[70].mxu1 }
 0x77c   : > { %12158 = vst [vmem:[%s18092_s15 + $0x26] sm:$0xff] %v12102_v15  ;;  %v12044_v8 = vadd.f32 %v11909_v40, %v17826_v12  ;;  %v11910_v13 = vrot.slane %v12882_v43, 6  ;;  %v10253_v28 = vpop.f32.mrb[71].mxu1 }
 0x77d   : > { %v12042_v45 = vadd.f32 %v11906_v34, %v17813_v3  ;;  %v11907_v31 = vrot.slane %v10253_v28, 6 }
 0x77e   : > { %v12107_v21 = vadd.f32 %v18084_v41, %v12044_v8  ;;  %v11911_v54 = vsel %vm1370_vm0, %v11909_v40, %v11910_v13 }
 0x77f   : > { %v12105_v60 = vadd.f32 %v18084_v41, %v12042_v45  ;;  %v12045_v44 = vadd.f32 %v11911_v54, %v17829_v17  ;;  %v11908_v35 = vsel %vm1370_vm0, %v11906_v34, %v11907_v31 }
 0x780   : > { %12163 = vst [vmem:[%s18092_s15 + $0x4e] sm:$0xfc] %v12107_v21  ;;  %v12043_v12 = vadd.f32 %v11908_v35, %v18863_v9 }
 0x781   : > { %12161 = vst [vmem:[%s18092_s15 + $0x3e] sm:$0xfc] %v12105_v60  ;;  %v12108_v23 = vadd.f32 %v18084_v41, %v12045_v44  ;;  %v12885_v36 = vpop.f32.mrb[72].mxu1 }
 0x782   : > { %v12106_v3 = vadd.f32 %v18084_v41, %v12043_v12  ;;  %v11915_v16 = vrot.slane %v12885_v36, 6  ;;  %v10266_v7 = vpop.f32.mrb[73].mxu1 }
 0x783   : > { %12164 = vst [vmem:[%s18092_s15 + $0x56] sm:$0xff] %v12108_v23  ;;  %v11912_v55 = vrot.slane %v10266_v7, 6  ;;  %v12886_v22 = vpop.f32.mrb[74].mxu1 }
 0x784   : > { %12162 = vst [vmem:[%s18092_s15 + $0x46] sm:$0xff] %v12106_v3  ;;  %v12048_v17 = vadd.f32 %v11915_v16, %v17852_v0  ;;  %v11916_v42 = vrot.slane %v12886_v22, 6  ;;  %v10269_v37 = vpop.f32.mrb[75].mxu1 }
 0x785   : > { %v12046_v30 = vadd.f32 %v11912_v55, %v17839_v57  ;;  %v11913_v4 = vrot.slane %v10269_v37, 6  ;;  %v18864_v37 = vld [vmem:[#allocation50_spill] sm:$0xff] }
 0x786   : > { %v12111_v19 = vadd.f32 %v18084_v41, %v12048_v17  ;;  %v11917_v38 = vsel %vm1370_vm0, %v11915_v16, %v11916_v42 }
 0x787   : > { %v12109_v6 = vadd.f32 %v18084_v41, %v12046_v30  ;;  %v12049_v59 = vadd.f32 %v11917_v38, %v17855_v39  ;;  %v11914_v63 = vsel %vm1370_vm0, %v11912_v55, %v11913_v4 }
 0x788   : > { %12167 = vst [vmem:[%s18092_s15 + $0x6e] sm:$0xfc] %v12111_v19  ;;  %v12047_v0 = vadd.f32 %v11914_v63, %v17842_v53 }
 0x789   : > { %12165 = vst [vmem:[%s18092_s15 + $0x5e] sm:$0xfc] %v12109_v6  ;;  %v12112_v1 = vadd.f32 %v18084_v41, %v12049_v59  ;;  %v12889_v47 = vpop.f32.mrb[76].mxu1 }
 0x78a   : > { %v12110_v57 = vadd.f32 %v18084_v41, %v12047_v0  ;;  %v11921_v15 = vrot.slane %v12889_v47, 6  ;;  %v10282_v40 = vpop.f32.mrb[77].mxu1 }
 0x78b   : > { %12168 = vst [vmem:[%s18092_s15 + $0x76] sm:$0xff] %v12112_v1  ;;  %v11918_v32 = vrot.slane %v10282_v40, 6  ;;  %v12890_v34 = vpop.f32.mrb[78].mxu1 }
 0x78c   : > { %12166 = vst [vmem:[%s18092_s15 + $0x66] sm:$0xff] %v12110_v57  ;;  %v12052_v39 = vadd.f32 %v11921_v15, %v17878_v2  ;;  %v11922_v43 = vrot.slane %v12890_v34, 6  ;;  %v10285_v8 = vpop.f32.mrb[79].mxu1 }
 0x78d   : > { %v12050_v53 = vadd.f32 %v11918_v32, %v17865_v33  ;;  %v11919_v13 = vrot.slane %v10285_v8, 6 }
 0x78e   : > { %v12115_v28 = vadd.f32 %v18084_v41, %v12052_v39  ;;  %v11923_v45 = vsel %vm1370_vm0, %v11921_v15, %v11922_v43 }
 0x78f   : > { %v12113_v31 = vadd.f32 %v18084_v41, %v12050_v53  ;;  %v12053_v21 = vadd.f32 %v11923_v45, %v17881_v48  ;;  %v11920_v54 = vsel %vm1370_vm0, %v11918_v32, %v11919_v13 }
 0x790   : > { %12171 = vst [vmem:[%s18092_s15 + $0x8e] sm:$0xfc] %v12115_v28  ;;  %v12051_v2 = vadd.f32 %v11920_v54, %v17868_v46 }
 0x791   : > { %12169 = vst [vmem:[%s18092_s15 + $0x7e] sm:$0xfc] %v12113_v31  ;;  %v12116_v60 = vadd.f32 %v18084_v41, %v12053_v21  ;;  %v12893_v44 = vpop.f32.mrb[80].mxu1 }
 0x792   : > { %v12114_v33 = vadd.f32 %v18084_v41, %v12051_v2  ;;  %v11927_v35 = vrot.slane %v12893_v44, 6  ;;  %v10298_v9 = vpop.f32.mrb[81].mxu1 }
 0x793   : > { %12172 = vst [vmem:[%s18092_s15 + $0x96] sm:$0xff] %v12116_v60  ;;  %v11924_v12 = vrot.slane %v10298_v9, 6  ;;  %v12894_v23 = vpop.f32.mrb[82].mxu1 }
 0x794   : > { %12170 = vst [vmem:[%s18092_s15 + $0x86] sm:$0xff] %v12114_v33  ;;  %v12056_v48 = vadd.f32 %v11927_v35, %v17904_v10  ;;  %v11928_v36 = vrot.slane %v12894_v23, 6  ;;  %v10301_v3 = vpop.f32.mrb[83].mxu1 }
 0x795   : > { %v12054_v46 = vadd.f32 %v11924_v12, %v17891_v25  ;;  %v11925_v16 = vrot.slane %v10301_v3, 6 }
 0x796   : > { %v12119_v7 = vadd.f32 %v18084_v41, %v12056_v48  ;;  %v11929_v55 = vsel %vm1370_vm0, %v11927_v35, %v11928_v36 }
 0x797   : > { %v12117_v22 = vadd.f32 %v18084_v41, %v12054_v46  ;;  %v12057_v17 = vadd.f32 %v11929_v55, %v17907_v18  ;;  %v11926_v42 = vsel %vm1370_vm0, %v11924_v12, %v11925_v16 }
 0x798   : > { %12175 = vst [vmem:[%s18092_s15 + $0xae] sm:$0xfc] %v12119_v7  ;;  %v12055_v10 = vadd.f32 %v11926_v42, %v18864_v37 }
 0x799   : > { %12173 = vst [vmem:[%s18092_s15 + $0x9e] sm:$0xfc] %v12117_v22  ;;  %v12120_v30 = vadd.f32 %v18084_v41, %v12057_v17  ;;  %v12897_v4 = vpop.f32.mrb[84].mxu1 }
 0x79a   : > { %v12118_v25 = vadd.f32 %v18084_v41, %v12055_v10  ;;  %v11933_v19 = vrot.slane %v12897_v4, 6  ;;  %v10314_v38 = vpop.f32.mrb[85].mxu1 }
 0x79b   : > { %12176 = vst [vmem:[%s18092_s15 + $0xb6] sm:$0xff] %v12120_v30  ;;  %v11930_v6 = vrot.slane %v10314_v38, 6  ;;  %v12898_v59 = vpop.f32.mrb[86].mxu1 }
 0x79c   : > { %12174 = vst [vmem:[%s18092_s15 + $0xa6] sm:$0xff] %v12118_v25  ;;  %v12060_v18 = vadd.f32 %v11933_v19, %v17929_v5  ;;  %v11934_v63 = vrot.slane %v12898_v59, 6  ;;  %v10317_v0 = vpop.f32.mrb[87].mxu1  ;;  %v18865_v25 = vld [vmem:[#allocation31_spill] sm:$0xff] }
 0x79d   : > { %v12058_v1 = vadd.f32 %v11930_v6, %v17917_v26  ;;  %v11931_v47 = vrot.slane %v10317_v0, 6 }
 0x79e   : > { %v12123_v57 = vadd.f32 %v18084_v41, %v12060_v18  ;;  %v11935_v15 = vsel %vm1370_vm0, %v11933_v19, %v11934_v63 }
 0x79f   : > { %v12121_v40 = vadd.f32 %v18084_v41, %v12058_v1  ;;  %v12061_v32 = vadd.f32 %v11935_v15, %v17931_v14  ;;  %v11932_v34 = vsel %vm1370_vm0, %v11930_v6, %v11931_v47 }
 0x7a0   : > { %12179 = vst [vmem:[%s18092_s15 + $0xce] sm:$0xfc] %v12123_v57  ;;  %v12059_v5 = vadd.f32 %v11932_v34, %v17920_v52  ;;  %v18867_v57 = vld [vmem:[#allocation33_spill] sm:$0xff] }
 0x7a1   : > { %12177 = vst [vmem:[%s18092_s15 + $0xbe] sm:$0xfc] %v12121_v40  ;;  %v12124_v39 = vadd.f32 %v18084_v41, %v12061_v32  ;;  %v12901_v43 = vpop.f32.mrb[88].mxu1 }
 0x7a2   : > { %v12122_v26 = vadd.f32 %v18084_v41, %v12059_v5  ;;  %v10330_v8 = vpop.f32.mrb[89].mxu1 }
 0x7a3   : > { %12180 = vst [vmem:[%s18092_s15 + $0xd6] sm:$0xff] %v12124_v39  ;;  %v12902_v53 = vpop.f32.mrb[90].mxu1  ;;  %v18868_v39 = vld [vmem:[#allocation8_spill] sm:$0xff] }
 0x7a4   : > { %12178 = vst [vmem:[%s18092_s15 + $0xc6] sm:$0xff] %v12122_v26  ;;  %v10332_v13 = vpop.f32.mrb[91].mxu1  ;;  %v18869_v8 = vld [vmem:[#allocation68_spill] sm:$0xff] }
 0x7a9   : > { %v12905_v28 = vpop.f32.mrb[92].mxu1 }
 0x7aa   : > { %v11939_v45 = vrot.slane %v12905_v28, 6  ;;  %v10342_v14 = vpop.f32.mrb[93].mxu1 }
 0x7ab   : > { %v11936_v31 = vrot.slane %v10342_v14, 6  ;;  %v12906_v21 = vpop.f32.mrb[94].mxu1 }
 0x7ac   : > { %v12064_v52 = vadd.f32 %v11939_v45, %v17964_v24  ;;  %v11940_v54 = vrot.slane %v12906_v21, 6  ;;  %v10345_v2 = vpop.f32.mrb[95].mxu1 }
 0x7ad   : > { %v12062_v60 = vadd.f32 %v11936_v31, %v17951_v27  ;;  %v11937_v44 = vrot.slane %v10345_v2, 6 }
 0x7ae   : > { %v12127_v33 = vadd.f32 %v18084_v41, %v12064_v52  ;;  %v11941_v35 = vsel %vm1370_vm0, %v11939_v45, %v11940_v54  ;;  %v18870_v54 = vld [vmem:[#allocation39_spill] sm:$0xff] }
 0x7af   : > { %v12125_v9 = vadd.f32 %v18084_v41, %v12062_v60  ;;  %v12065_v12 = vadd.f32 %v11941_v35, %v17967_v62  ;;  %v11938_v23 = vsel %vm1370_vm0, %v11936_v31, %v11937_v44 }
 0x7b0   : > { %12183 = vst [vmem:[%s18092_s15 + $0xee] sm:$0xfc] %v12127_v33  ;;  %v12063_v24 = vadd.f32 %v11938_v23, %v17954_v51  ;;  %v18871_v33 = vld [vmem:[#allocation32_spill] sm:$0xff] }
 0x7b1   : > { %12181 = vst [vmem:[%s18092_s15 + $0xde] sm:$0xfc] %v12125_v9  ;;  %v12128_v48 = vadd.f32 %v18084_v41, %v12065_v12  ;;  %v12909_v36 = vpop.f32.mrb[96].mxu1 }
 0x7b2   : > { %v12126_v27 = vadd.f32 %v18084_v41, %v12063_v24  ;;  %v11945_v3 = vrot.slane %v12909_v36, 6  ;;  %v10358_v46 = vpop.f32.mrb[97].mxu1 }
 0x7b3   : > { %12184 = vst [vmem:[%s18092_s15 + $0xf6] sm:$0xff] %v12128_v48  ;;  %v11942_v16 = vrot.slane %v10358_v46, 6  ;;  %v12910_v7 = vpop.f32.mrb[98].mxu1  ;;  %v18872_v48 = vld [vmem:[#allocation42_spill] sm:$0xff] }
 0x7b4   : > { %12182 = vst [vmem:[%s18092_s15 + $0xe6] sm:$0xff] %v12126_v27  ;;  %v12068_v62 = vadd.f32 %v11945_v3, %v17988_v11  ;;  %v11946_v55 = vrot.slane %v12910_v7, 6  ;;  %v10361_v22 = vpop.f32.mrb[99].mxu1 }
 0x7b5   : > { %v12066_v51 = vadd.f32 %v11942_v16, %v17977_v50  ;;  %v11943_v17 = vrot.slane %v10361_v22, 6 }
 0x7b6   : > { %v12131_v42 = vadd.f32 %v18084_v41, %v12068_v62  ;;  %v11947_v37 = vsel %vm1370_vm0, %v11945_v3, %v11946_v55  ;;  %v18873_v3 = vld [vmem:[#allocation72_spill] sm:$0xff] }
 0x7b7   : > { %v12129_v10 = vadd.f32 %v18084_v41, %v12066_v51  ;;  %v12069_v30 = vadd.f32 %v11947_v37, %v17991_v29  ;;  %v11944_v4 = vsel %vm1370_vm0, %v11942_v16, %v11943_v17  ;;  %v18866_v29 = vld [vmem:[#allocation73_spill] sm:$0xff] }
 0x7b8   : > { %12187 = vst [vmem:[%s18092_s15 + $0x10e] sm:$0xfc] %v12131_v42  ;;  %v12067_v11 = vadd.f32 %v11944_v4, %v18865_v25  ;;  %v18874_v42 = vld [vmem:[#allocation78_spill] sm:$0xff]  ;;  %v18875_v4 = vld [vmem:[#allocation40_spill] sm:$0xff] }
 0x7b9   : > { %12185 = vst [vmem:[%s18092_s15 + $0xfe] sm:$0xfc] %v12129_v10  ;;  %v12132_v19 = vadd.f32 %v18084_v41, %v12069_v30  ;;  %v12913_v38 = vpop.f32.mrb[100].mxu1 }
 0x7ba   : > { %v12130_v50 = vadd.f32 %v18084_v41, %v12067_v11  ;;  %v11951_v6 = vrot.slane %v12913_v38, 6  ;;  %v10374_v59 = vpop.f32.mrb[101].mxu1 }
 0x7bb   : > { %12188 = vst [vmem:[%s18092_s15 + $0x116] sm:$0xff] %v12132_v19  ;;  %v11948_v18 = vrot.slane %v10374_v59, 6  ;;  %v12914_v63 = vpop.f32.mrb[102].mxu1 }
 0x7bc   : > { %12186 = vst [vmem:[%s18092_s15 + $0x106] sm:$0xff] %v12130_v50  ;;  %v12072_v0 = vadd.f32 %v11951_v6, %v18866_v29  ;;  %v11952_v1 = vrot.slane %v12914_v63, 6  ;;  %v10377_v47 = vpop.f32.mrb[103].mxu1  ;;  %v18877_v63 = vld [vmem:[#allocation64_spill] sm:$0xff] }
 0x7bd   : > { %v12070_v15 = vadd.f32 %v11948_v18, %v18867_v57  ;;  %v11949_v40 = vrot.slane %v10377_v47, 6 }
 0x7be   : > { %v12135_v32 = vadd.f32 %v18084_v41, %v12072_v0  ;;  %v11953_v34 = vsel %vm1370_vm0, %v11951_v6, %v11952_v1  ;;  %v18876_v6 = vld [vmem:[#allocation75_spill] sm:$0xff] }
 0x7bf   : > { %v12133_v5 = vadd.f32 %v18084_v41, %v12070_v15  ;;  %v12073_v43 = vadd.f32 %v11953_v34, %v18868_v39  ;;  %v11950_v26 = vsel %vm1370_vm0, %v11948_v18, %v11949_v40  ;;  %v18878_v34 = vld [vmem:[#allocation61_spill] sm:$0xff] }
 0x7c0   : > { %12191 = vst [vmem:[%s18092_s15 + $0x12e] sm:$0xfc] %v12135_v32  ;;  %v12071_v53 = vadd.f32 %v11950_v26, %v18869_v8  ;;  %v18879_v26 = vld [vmem:[#allocation2_spill] sm:$0xff] }
 0x7c1   : > { %12189 = vst [vmem:[%s18092_s15 + $0x11e] sm:$0xfc] %v12133_v5  ;;  %v12136_v13 = vadd.f32 %v18084_v41, %v12073_v43  ;;  %v12917_v28 = vpop.f32.mrb[104].mxu1 }
 0x7c2   : > { %v12134_v45 = vadd.f32 %v18084_v41, %v12071_v53  ;;  %v11957_v14 = vrot.slane %v12917_v28, 6  ;;  %v10390_v31 = vpop.f32.mrb[105].mxu1 }
 0x7c3   : > { %12192 = vst [vmem:[%s18092_s15 + $0x136] sm:$0xff] %v12136_v13  ;;  %v11954_v21 = vrot.slane %v10390_v31, 6  ;;  %v12918_v52 = vpop.f32.mrb[106].mxu1 }
 0x7c4   : > { %12190 = vst [vmem:[%s18092_s15 + $0x126] sm:$0xff] %v12134_v45  ;;  %v12076_v2 = vadd.f32 %v11957_v14, %v18870_v54  ;;  %v11958_v60 = vrot.slane %v12918_v52, 6  ;;  %v10393_v44 = vpop.f32.mrb[107].mxu1 }
 0x7c5   : > { %v12074_v35 = vadd.f32 %v11954_v21, %v18871_v33  ;;  %v11955_v9 = vrot.slane %v10393_v44, 6 }
 0x7c6   : > { %v12139_v12 = vadd.f32 %v18084_v41, %v12076_v2  ;;  %v11959_v23 = vsel %vm1370_vm0, %v11957_v14, %v11958_v60 }
 0x7c7   : > { %v12137_v24 = vadd.f32 %v18084_v41, %v12074_v35  ;;  %v12077_v36 = vadd.f32 %v11959_v23, %v18872_v48  ;;  %v11956_v27 = vsel %vm1370_vm0, %v11954_v21, %v11955_v9  ;;  %v18880_v21 = vld [vmem:[#allocation76_spill] sm:$0xff] }
 0x7c8   : > { %12195 = vst [vmem:[%s18092_s15 + $0x14e] sm:$0xfc] %v12139_v12  ;;  %v12075_v46 = vadd.f32 %v11956_v27, %v18873_v3 }
 0x7c9   : > { %12193 = vst [vmem:[%s18092_s15 + $0x13e] sm:$0xfc] %v12137_v24  ;;  %v12140_v16 = vadd.f32 %v18084_v41, %v12077_v36  ;;  %v12921_v7 = vpop.f32.mrb[108].mxu1 }
 0x7ca   : > { %v12138_v62 = vadd.f32 %v18084_v41, %v12075_v46  ;;  %v11963_v55 = vrot.slane %v12921_v7, 6  ;;  %v10406_v22 = vpop.f32.mrb[109].mxu1 }
 0x7cb   : > { %12196 = vst [vmem:[%s18092_s15 + $0x156] sm:$0xff] %v12140_v16  ;;  %v11960_v51 = vrot.slane %v10406_v22, 6  ;;  %v12922_v17 = vpop.f32.mrb[110].mxu1 }
 0x7cc   : > { %12194 = vst [vmem:[%s18092_s15 + $0x146] sm:$0xff] %v12138_v62  ;;  %v12080_v37 = vadd.f32 %v11963_v55, %v18874_v42  ;;  %v11964_v10 = vrot.slane %v12922_v17, 6  ;;  %v10409_v30 = vpop.f32.mrb[111].mxu1 }
 0x7cd   : > { %v12078_v25 = vadd.f32 %v11960_v51, %v18875_v4  ;;  %v11961_v11 = vrot.slane %v10409_v30, 6 }
 0x7ce   : > { %v12143_v19 = vadd.f32 %v18084_v41, %v12080_v37  ;;  %v11965_v38 = vsel %vm1370_vm0, %v11963_v55, %v11964_v10 }
 0x7cf   : > { %v12141_v50 = vadd.f32 %v18084_v41, %v12078_v25  ;;  %v12081_v59 = vadd.f32 %v11965_v38, %v18876_v6  ;;  %v11962_v18 = vsel %vm1370_vm0, %v11960_v51, %v11961_v11 }
 0x7d0   : > { %12199 = vst [vmem:[%s18092_s15 + $0x16e] sm:$0xfc] %v12143_v19  ;;  %v12079_v29 = vadd.f32 %v11962_v18, %v18877_v63 }
 0x7d1   : > { %12197 = vst [vmem:[%s18092_s15 + $0x15e] sm:$0xfc] %v12141_v50  ;;  %v12144_v0 = vadd.f32 %v18084_v41, %v12081_v59  ;;  %v12925_v1 = vpop.f32.mrb[112].mxu1 }
 0x7d2   : > { %v12142_v47 = vadd.f32 %v18084_v41, %v12079_v29  ;;  %v11969_v57 = vrot.slane %v12925_v1, 6  ;;  %v10422_v15 = vpop.f32.mrb[113].mxu1 }
 0x7d3   : > { %12200 = vst [vmem:[%s18092_s15 + $0x176] sm:$0xff] %v12144_v0  ;;  %v11966_v40 = vrot.slane %v10422_v15, 6  ;;  %v12926_v32 = vpop.f32.mrb[114].mxu1 }
 0x7d4   : > { %12198 = vst [vmem:[%s18092_s15 + $0x166] sm:$0xff] %v12142_v47  ;;  %v12084_v5 = vadd.f32 %v11969_v57, %v18878_v34  ;;  %v11970_v39 = vrot.slane %v12926_v32, 6  ;;  %v10425_v43 = vpop.f32.mrb[115].mxu1 }
 0x7d5   : > { %v12082_v8 = vadd.f32 %v11966_v40, %v18879_v26  ;;  %v11967_v53 = vrot.slane %v10425_v43, 6 }
 0x7d6   : > { %v12147_v13 = vadd.f32 %v18084_v41, %v12084_v5  ;;  %v11971_v28 = vsel %vm1370_vm0, %v11969_v57, %v11970_v39 }
 0x7d7   : > { %v12145_v45 = vadd.f32 %v18084_v41, %v12082_v8  ;;  %v12085_v14 = vadd.f32 %v11971_v28, %v18063_v20  ;;  %v11968_v31 = vsel %vm1370_vm0, %v11966_v40, %v11967_v53 }
 0x7d8   : > { %12203 = vst [vmem:[%s18092_s15 + $0x18e] sm:$0xfc] %v12147_v13  ;;  %v12083_v52 = vadd.f32 %v11968_v31, %v18880_v21 }
 0x7d9   : > { %12201 = vst [vmem:[%s18092_s15 + $0x17e] sm:$0xfc] %v12145_v45  ;;  %v12148_v54 = vadd.f32 %v18084_v41, %v12085_v14  ;;  %v12929_v2 = vpop.f32.mrb[116].mxu1 }
 0x7da   : > { %v12146_v60 = vadd.f32 %v18084_v41, %v12083_v52  ;;  %v11975_v44 = vrot.slane %v12929_v2, 6  ;;  %v10438_v33 = vpop.f32.mrb[117].mxu1 }
 0x7db   : > { %12204 = vst [vmem:[%s18092_s15 + $0x196] sm:$0xff] %v12148_v54  ;;  %v11972_v35 = vrot.slane %v10438_v33, 6  ;;  %v12930_v9 = vpop.f32.mrb[118].mxu1 }
 0x7dc   : > { %12202 = vst [vmem:[%s18092_s15 + $0x186] sm:$0xff] %v12146_v60  ;;  %v12088_v20 = vadd.f32 %v11975_v44, %v18077_v58  ;;  %v11976_v12 = vrot.slane %v12930_v9, 6  ;;  %v10441_v23 = vpop.f32.mrb[119].mxu1 }
 0x7dd   : > { %v12086_v24 = vadd.f32 %v11972_v35, %v18069_v49  ;;  %v11973_v48 = vrot.slane %v10441_v23, 6 }
 0x7de   : > { %v12151_v36 = vadd.f32 %v18084_v41, %v12088_v20  ;;  %v11977_v27 = vsel %vm1370_vm0, %v11975_v44, %v11976_v12 }
 0x7df   : > { %v12149_v3 = vadd.f32 %v18084_v41, %v12086_v24  ;;  %v12089_v46 = vadd.f32 %v11977_v27, %v18079_v61  ;;  %v11974_v16 = vsel %vm1370_vm0, %v11972_v35, %v11973_v48 }
 0x7e0   : > { %12207 = vst [vmem:[%s18092_s15 + $0x1ae] sm:$0xfc] %v12151_v36  ;;  %v12087_v58 = vadd.f32 %v11974_v16, %v18072_v56 }
 0x7e1   : > { %12205 = vst [vmem:[%s18092_s15 + $0x19e] sm:$0xfc] %v12149_v3  ;;  %v12152_v7 = vadd.f32 %v18084_v41, %v12089_v46  ;;  %v12933_v62 = vpop.f32.mrb[120].mxu1 }
 0x7e2   : > { %v12150_v49 = vadd.f32 %v18084_v41, %v12087_v58  ;;  %v10454_v55 = vpop.f32.mrb[121].mxu1 }
 0x7e3   : > { %12208 = vst [vmem:[%s18092_s15 + $0x1b6] sm:$0xff] %v12152_v7  ;;  %v12934_v22 = vpop.f32.mrb[122].mxu1 }
 0x7e4   : > { %12206 = vst [vmem:[%s18092_s15 + $0x1a6] sm:$0xff] %v12150_v49  ;;  %v10456_v51 = vpop.f32.mrb[123].mxu1 }
 0x7e5 PF: > { %s22_s21 = sadd.s32 1, %s13491_s21  }
 0x7e6   : > { %p19_p4 = scmp.ge.s32.totalorder %s22_s21, 4  }
 0x7e8   :  { %21 = sbr.rel (!%p19_p4) target bundleno = 1 (0x1), region = 107 }

</bundles_post_ra>
